<compile_context>
chip_gen: v7x
topology: tpu7x:2x2x1
jax: 0.10.0
libtpu: 0.0.40
codegen_flags: <defaults>
</compile_context>

<pallas_src>
import math
from functools import partial

import numpy as np
import jax
import jax.numpy as jnp
from jax.experimental import pallas as pl
from jax.experimental.pallas import tpu as pltpu

# ----------------------------- configuration ------------------------------ #
BATCH = 2
IMG = 32                     # input spatial size
WIDTH = 2                    # Mul_conv base width  -> embed in_channels = WIDTH*16
HIDDEN = 32                  # configs.hidden_size
NUM_HEADS = 4
MLP_DIM = 64
NUM_LAYERS = 2               # configs.trans_encoder_nums
N_PROMPT = 4                 # prompt tokens produced by PromptDecoder when t_f is None
N_CLASSES = 2
HEAD_CH = HIDDEN             # Decoder_pre output channels (== hidden so t_f gates directly)
DEC_CH = (16, 8, 4)          # decoder block output channels
GRID_HW = IMG // 16          # spatial size after /16 hybrid backbone
N_PATCH = GRID_HW * GRID_HW

_PARALLEL = pltpu.CompilerParams(dimension_semantics=("parallel",))


# ------------------------------ small helpers ------------------------------ #
def _apply_act(x, act):
    if act == "relu":
        return jnp.maximum(x, 0.0)
    if act == "gelu":
        return jax.nn.gelu(x)
    if act == "sigmoid":
        return jax.nn.sigmoid(x)
    return x


def _layernorm(x, g, b, eps=1e-6):
    mu = jnp.mean(x, axis=-1, keepdims=True)
    var = jnp.mean(jnp.square(x - mu), axis=-1, keepdims=True)
    return (x - mu) * jax.lax.rsqrt(var + eps) * g + b


def _dot(a, b):
    return jnp.dot(a, b, preferred_element_type=jnp.float32)


def _dot_nt(a, b):  # a @ b.T without an explicit transpose
    return jax.lax.dot_general(a, b, (((1,), (1,)), ((), ())),
                               preferred_element_type=jnp.float32)


def _resident_spec(a):
    nd = a.ndim
    return pl.BlockSpec(a.shape, lambda b, nd=nd: (0,) * nd)


# --------------------------- fused conv2d kernel ---------------------------- #
def _conv_kernel(x_ref, w_ref, b_ref, *rest, taps, phases, oh, act, has_gate):
    if has_gate:
        g_ref, o_ref = rest
    else:
        (o_ref,) = rest
    # whole (padded, phase-split) input row-plane is resident in VMEM per batch item
    ph = [x_ref[p] for p in range(phases)]
    acc = None
    for i in range(taps):                                  # KH row taps, unrolled
        band = ph[i % phases][i // phases:i // phases + oh, :]   # (OH, WP*C)
        c = _dot(band, w_ref[i])                           # banded weight (WP*C, OW*O)
        acc = c if acc is None else acc + c
    acc = acc + b_ref[...]
    acc = _apply_act(acc, act)
    if has_gate:
        acc = acc * g_ref[...]                             # per-(batch, channel) gate
    o_ref[...] = acc


def conv2d_pallas(x, w, b, *, stride=1, padding=1, act="none", gate=None):
    """KxK conv as ONE fused Pallas kernel per layer.

    x: NHWC (B,H,W,C);  w: (KH,KW,Cin,Cout);  b: (Cout,);  gate: (B,1,Cout) or None.
    The KW in-row taps and the W-stride are folded into a banded weight so the kernel
    only does KH dense GEMMs over a (OH, WP*C) row band -> lane-dense (OH, OW*O) out.
    """
    B, H, W, C = x.shape
    KH, KW, _, O = w.shape
    OH = (H + 2 * padding - KH) // stride + 1
    OW = (W + 2 * padding - KW) // stride + 1
    HP, WP = H + 2 * padding, W + 2 * padding

    xp = jnp.pad(x, ((0, 0), (padding, padding), (padding, padding), (0, 0)))
    xp = xp.reshape(B, HP, WP * C)
    if stride == 1:
        nphase, hph = 1, HP
        xph = xp[:, None]                                   # (B,1,HP,WP*C)
    else:
        assert HP % stride == 0
        nphase, hph = stride, HP // stride
        xph = jnp.stack([xp[:, a::stride] for a in range(stride)], axis=1)

    # banded weight: Wexp_i[v*C+c, w*O+o] = W[i,j,c,o] iff v == stride*w + j
    sel = np.zeros((KW, WP, OW), np.float32)
    for j in range(KW):
        for wo in range(OW):
            sel[j, stride * wo + j, wo] = 1.0
    wexp = jnp.einsum("ijco,jvw->ivcwo", w, jnp.asarray(sel)).reshape(KH, WP * C, OW * O)
    bias = jnp.tile(b, OW).reshape(1, OW * O)

    inputs = [xph, wexp, bias]
    in_specs = [
        pl.BlockSpec((None, nphase, hph, WP * C), lambda bb: (bb, 0, 0, 0)),
        pl.BlockSpec((KH, WP * C, OW * O), lambda bb: (0, 0, 0)),
        pl.BlockSpec((1, OW * O), lambda bb: (0, 0)),
    ]
    has_gate = gate is not None
    if has_gate:
        gate_t = jnp.tile(gate.reshape(B, O), (1, OW)).reshape(B, 1, OW * O)
        inputs.append(gate_t)
        in_specs.append(pl.BlockSpec((None, 1, OW * O), lambda bb: (bb, 0, 0)))

    out = pl.pallas_call(
        partial(_conv_kernel, taps=KH, phases=nphase, oh=OH, act=act, has_gate=has_gate),
        out_shape=jax.ShapeDtypeStruct((B, OH, OW * O), jnp.float32),
        grid=(B,),
        in_specs=in_specs,
        out_specs=pl.BlockSpec((None, OH, OW * O), lambda bb: (bb, 0, 0)),
        compiler_params=_PARALLEL,
    )(*inputs)
    return out.reshape(B, OH, OW, O)


def upsample2x(x):
    # TODO(synk): original Decoder may use bilinear upsampling; nearest used here.
    return jnp.repeat(jnp.repeat(x, 2, axis=1), 2, axis=2)


# --------- one fused kernel: embed + encoder stack + norm + prompt + gate ---------- #
def _transformer_kernel(tok_ref, t_ref,
                        pw, pb, pe,
                        ln1g, ln1b, wq, bq, wk, bk, wv, bv, wo, bo,
                        ln2g, ln2b, w1, bm1, w2, bm2,
                        elng, elnb,
                        qw, qb, kw, kb, vw, vb, ow, ob, xw, xb,
                        xo_ref, g_ref,
                        *, nlayers, nh, scale_h, scale_pd, n_prompt):
    # --- patch embedding GEMM + bias + positional embedding (fused) ---
    x = _dot(tok_ref[...], pw[...]) + pb[...] + pe[...]           # (N, H)

    # --- encoder blocks, statically unrolled; all weights resident in VMEM ---
    for l in range(nlayers):
        xn = _layernorm(x, ln1g[l], ln1b[l])
        attn = jnp.zeros_like(x)
        for h in range(nh):
            q = _dot(xn, wq[l, h]) + bq[l, h]
            k = _dot(xn, wk[l, h]) + bk[l, h]
            v = _dot(xn, wv[l, h]) + bv[l, h]
            s = _dot_nt(q, k) * scale_h
            m = jnp.max(s, axis=-1, keepdims=True)
            e = jnp.exp(s - m)
            probs = e / jnp.sum(e, axis=-1, keepdims=True)
            attn = attn + _dot(_dot(probs, v), wo[l, h])
        x1 = x + attn + bo[l]
        xn2 = _layernorm(x1, ln2g[l], ln2b[l])
        y = jax.nn.gelu(_dot(xn2, w1[l]) + bm1[l])
        y = _dot(y, w2[l]) + bm2[l]
        x = x1 + y

    # --- encoder_norm (fused) ---
    xn = _layernorm(x, elng[...], elnb[...])

    # --- PromptDecoder: prompts cross-attend to encoder tokens ---
    # TODO(synk): PromptDecoder source was not provided; implemented as single-head
    # cross-attention + a linear fusion on x (standard prompt-decoder form).
    t = t_ref[...]
    q = _dot(t, qw[...]) + qb[...]
    k = _dot(xn, kw[...]) + kb[...]
    v = _dot(xn, vw[...]) + vb[...]
    s = _dot_nt(q, k) * scale_pd
    m = jnp.max(s, axis=-1, keepdims=True)
    e = jnp.exp(s - m)
    probs = e / jnp.sum(e, axis=-1, keepdims=True)
    t_out = t + _dot(_dot(probs, v), ow[...]) + ob[...]

    # gate[c] = mean over prompts of sigmoid(t_out[:, c])  (== sigmoid + AdaptiveAvgPool)
    avg = jnp.full((1, n_prompt), 1.0 / n_prompt, jnp.float32)
    g_ref[...] = _dot(avg, jax.nn.sigmoid(t_out))

    # x fusion + trailing ReLU (fused)
    x_out = xn + _dot(xn, xw[...]) + xb[...]
    xo_ref[...] = jnp.maximum(x_out, 0.0)


def _split_w_in(w, nh):   # (H,H) -> (nh, H, dh)  (input-side projections)
    H = w.shape[0]
    return w.reshape(H, nh, H // nh).transpose(1, 0, 2)


def _split_b(b, nh):      # (H,)  -> (nh, 1, dh)
    return b.reshape(nh, 1, b.shape[0] // nh)


def _split_w_out(w, nh):  # (H,H) -> (nh, dh, H)  (output projection rows)
    H = w.shape[0]
    return w.reshape(nh, H // nh, H)


def transformer_fused(tok, t_f, p):
    """Embeddings + all encoder blocks + encoder_norm + PromptDecoder + gate + ReLU."""
    B, N, C = tok.shape
    H = HIDDEN
    nh = NUM_HEADS
    dh = H // nh
    blocks = p["blocks"]
    L = len(blocks)

    def stk(key, fn):
        return jnp.stack([fn(b[key]) for b in blocks])      # constant-folded under jit

    if t_f is None:
        t_in = jnp.broadcast_to(p["prompt"][None], (B, N_PROMPT, H))
    else:
        t_in = t_f
    Np = t_in.shape[1]

    args = [
        tok, t_in,
        p["patch_w"].reshape(C, H), p["patch_b"].reshape(1, H), p["pos_emb"].reshape(N, H),
        stk("ln1_g", lambda a: a.reshape(1, H)), stk("ln1_b", lambda a: a.reshape(1, H)),
        stk("wq", lambda a: _split_w_in(a, nh)), stk("bq", lambda a: _split_b(a, nh)),
        stk("wk", lambda a: _split_w_in(a, nh)), stk("bk", lambda a: _split_b(a, nh)),
        stk("wv", lambda a: _split_w_in(a, nh)), stk("bv", lambda a: _split_b(a, nh)),
        stk("wo", lambda a: _split_w_out(a, nh)), stk("bo", lambda a: a.reshape(1, H)),
        stk("ln2_g", lambda a: a.reshape(1, H)), stk("ln2_b", lambda a: a.reshape(1, H)),
        stk("fc1_w", lambda a: a), stk("fc1_b", lambda a: a.reshape(1, MLP_DIM)),
        stk("fc2_w", lambda a: a), stk("fc2_b", lambda a: a.reshape(1, H)),
        p["enc_ln_g"].reshape(1, H), p["enc_ln_b"].reshape(1, H),
        p["pd_wq"], p["pd_bq"].reshape(1, H),
        p["pd_wk"], p["pd_bk"].reshape(1, H),
        p["pd_wv"], p["pd_bv"].reshape(1, H),
        p["pd_wo"], p["pd_bo"].reshape(1, H),
        p["pd_wx"], p["pd_bx"].reshape(1, H),
    ]
    in_specs = [
        pl.BlockSpec((None, N, C), lambda b: (b, 0, 0)),
        pl.BlockSpec((None, Np, H), lambda b: (b, 0, 0)),
    ] + [_resident_spec(a) for a in args[2:]]

    x_relu, gate = pl.pallas_call(
        partial(_transformer_kernel, nlayers=L, nh=nh,
                scale_h=1.0 / math.sqrt(dh), scale_pd=1.0 / math.sqrt(H), n_prompt=Np),
        out_shape=(jax.ShapeDtypeStruct((B, N, H), jnp.float32),
                   jax.ShapeDtypeStruct((B, 1, H), jnp.float32)),
        grid=(B,),
        in_specs=in_specs,
        out_specs=(pl.BlockSpec((None, N, H), lambda b: (b, 0, 0)),
                   pl.BlockSpec((None, 1, H), lambda b: (b, 0, 0))),
        compiler_params=_PARALLEL,
    )(*args)
    return x_relu, gate


# --------------------------------- modules --------------------------------- #
def mul_conv(x, p):
    """Hybrid CNN stem: /16 downsample + skip features (TransUNet-style)."""
    f1 = conv2d_pallas(x, p["conv1_w"], p["conv1_b"], stride=2, act="relu")   # /2 , width
    f2 = conv2d_pallas(f1, p["conv2_w"], p["conv2_b"], stride=2, act="relu")  # /4 , 4w
    f3 = conv2d_pallas(f2, p["conv3_w"], p["conv3_b"], stride=2, act="relu")  # /8 , 8w
    x4 = conv2d_pallas(f3, p["conv4_w"], p["conv4_b"], stride=2, act="relu")  # /16, 16w
    return x4, [f3, f2, f1]


def decoder_pre(tokens, gate, p):
    """3x3 conv on reshaped tokens with fused ReLU and per-channel prompt gate."""
    B, N, H = tokens.shape
    hw = int(math.isqrt(N))
    x = tokens.reshape(B, hw, hw, H)                        # NHWC
    # TODO(synk): Decoder applies the pooled prompt gate; fused here into the
    # decoder_pre conv epilogue (numerically: for_decoder gated before Decoder).
    return conv2d_pallas(x, p["pre_w"], p["pre_b"], act="relu", gate=gate)


def decoder(x, features, p):
    for i, skip in enumerate(features):
        x = upsample2x(x)
        x = jnp.concatenate([x, skip], axis=-1)
        x = conv2d_pallas(x, p[f"dec{i}_w1"], p[f"dec{i}_b1"], act="relu")
        x = conv2d_pallas(x, p[f"dec{i}_w2"], p[f"dec{i}_b2"], act="relu")
    return x


def seg_head(x, p):
    x = upsample2x(x)
    return conv2d_pallas(x, p["seg_w"], p["seg_b"], act="none")


# ------------------------------ full forward ------------------------------- #
def dm_net_forward(x_nchw, p, t_f=None):
    x = jnp.transpose(x_nchw, (0, 2, 3, 1))                 # NCHW -> NHWC
    x, features = mul_conv(x, p)
    B, h, w, C = x.shape
    tok = x.reshape(B, h * w, C)
    # ONE kernel: embed + encoder blocks + encoder_norm + prompt decoder + gate + ReLU
    x_relu, gate = transformer_fused(tok, t_f, p)
    for_dec = decoder_pre(x_relu, gate, p)                  # gate fused into conv epilogue
    dec = decoder(for_dec, features, p)
    out = seg_head(dec, p)
    return jnp.transpose(out, (0, 3, 1, 2))                 # back to NCHW


# ------------------------------ parameter init ----------------------------- #
def init_params(key):
    keys = iter(jax.random.split(key, 256))

    def nrm(shape, scale=0.02):
        return scale * jax.random.normal(next(keys), shape, jnp.float32)

    def zeros(n):
        return jnp.zeros((n,), jnp.float32)

    w = WIDTH
    p = {}
    # Mul_conv
    p["conv1_w"], p["conv1_b"] = nrm((3, 3, 3, w)), zeros(w)
    p["conv2_w"], p["conv2_b"] = nrm((3, 3, w, 4 * w)), zeros(4 * w)
    p["conv3_w"], p["conv3_b"] = nrm((3, 3, 4 * w, 8 * w)), zeros(8 * w)
    p["conv4_w"], p["conv4_b"] = nrm((3, 3, 8 * w, 16 * w)), zeros(16 * w)
    # Embeddings
    p["patch_w"], p["patch_b"] = nrm((1, 1, 16 * w, HIDDEN)), zeros(HIDDEN)
    p["pos_emb"] = nrm((1, N_PATCH, HIDDEN))
    # Transformer encoder blocks
    p["blocks"] = []
    for _ in range(NUM_LAYERS):
        blk = {
            "ln1_g": jnp.ones((HIDDEN,), jnp.float32), "ln1_b": zeros(HIDDEN),
            "wq": nrm((HIDDEN, HIDDEN)), "bq": zeros(HIDDEN),
            "wk": nrm((HIDDEN, HIDDEN)), "bk": zeros(HIDDEN),
            "wv": nrm((HIDDEN, HIDDEN)), "bv": zeros(HIDDEN),
            "wo": nrm((HIDDEN, HIDDEN)), "bo": zeros(HIDDEN),
            "ln2_g": jnp.ones((HIDDEN,), jnp.float32), "ln2_b": zeros(HIDDEN),
            "fc1_w": nrm((HIDDEN, MLP_DIM)), "fc1_b": zeros(MLP_DIM),
            "fc2_w": nrm((MLP_DIM, HIDDEN)), "fc2_b": zeros(HIDDEN),
        }
        p["blocks"].append(blk)
    p["enc_ln_g"], p["enc_ln_b"] = jnp.ones((HIDDEN,), jnp.float32), zeros(HIDDEN)
    # PromptDecoder
    p["prompt"] = nrm((N_PROMPT, HIDDEN))
    for name in ("pd_wq", "pd_wk", "pd_wv", "pd_wo", "pd_wx"):
        p[name] = nrm((HIDDEN, HIDDEN))
        p[name.replace("w", "b")] = zeros(HIDDEN)
    # Decoder_pre
    p["pre_w"], p["pre_b"] = nrm((3, 3, HIDDEN, HEAD_CH)), zeros(HEAD_CH)
    # Decoder blocks (with skip concat)
    skip_chs = (8 * w, 4 * w, w)
    in_ch = HEAD_CH
    for i, (sc, oc) in enumerate(zip(skip_chs, DEC_CH)):
        p[f"dec{i}_w1"], p[f"dec{i}_b1"] = nrm((3, 3, in_ch + sc, oc)), zeros(oc)
        p[f"dec{i}_w2"], p[f"dec{i}_b2"] = nrm((3, 3, oc, oc)), zeros(oc)
        in_ch = oc
    # SegmentationHead
    p["seg_w"], p["seg_b"] = nrm((3, 3, DEC_CH[-1], N_CLASSES)), zeros(N_CLASSES)
    return p


# ----------------------------------- main ----------------------------------- #
if __name__ == "__main__":
    key = jax.random.PRNGKey(0)
    pkey, xkey = jax.random.split(key)
    params = init_params(pkey)
    x = jax.random.normal(xkey, (BATCH, 3, IMG, IMG), jnp.float32)

    fwd = jax.jit(lambda inp: dm_net_forward(inp, params))
    out = fwd(x)
    jax.block_until_ready(out)
    assert out.shape == (BATCH, N_CLASSES, IMG, IMG), out.shape
    assert jnp.all(jnp.isfinite(out))
    print("KERNEL_OK")
</pallas_src>

<mosaic_0001>
module attributes {stable_mosaic.version = 11 : i64} {
  func.func @_conv_kernel(%arg0: i32, %arg1: memref<1x2x17x102xf32, #tpu.memory_space<vmem>>, %arg2: memref<3x102x32xf32, #tpu.memory_space<vmem>>, %arg3: memref<1x32xf32, #tpu.memory_space<vmem>>, %arg4: memref<1x16x32xf32, #tpu.memory_space<vmem>>) attributes {dimension_semantics = [#tpu.dimension_semantics<parallel>], iteration_bounds = array<i64: 2>, scalar_prefetch = 0 : i64, scratch_operands = 0 : i64, tpu.core_type = #tpu.core_type<tc>, window_params = [{transform_indices = @transform_0, window_bounds = array<i64: 1, 2, 17, 102>}, {pipeline_mode = #tpu.pipeline_mode<synchronous>, transform_indices = @transform_1, window_bounds = array<i64: 3, 102, 32>}, {pipeline_mode = #tpu.pipeline_mode<synchronous>, transform_indices = @transform_2, window_bounds = array<i64: 1, 32>}, {transform_indices = @transform_3, window_bounds = array<i64: 1, 16, 32>}]} {
    %c0 = arith.constant 0 : index
    %c0_0 = arith.constant 0 : index
    %c0_1 = arith.constant 0 : index
    %c0_2 = arith.constant 0 : index
    %0 = vector.load %arg1[%c0, %c0_0, %c0_1, %c0_2] : memref<1x2x17x102xf32, #tpu.memory_space<vmem>>, vector<1x1x17x102xf32>
    %1 = vector.shape_cast %0 : vector<1x1x17x102xf32> to vector<17x102xf32>
    %c0_3 = arith.constant 0 : index
    %c1 = arith.constant 1 : index
    %c0_4 = arith.constant 0 : index
    %c0_5 = arith.constant 0 : index
    %2 = vector.load %arg1[%c0_3, %c1, %c0_4, %c0_5] : memref<1x2x17x102xf32, #tpu.memory_space<vmem>>, vector<1x1x17x102xf32>
    %3 = vector.shape_cast %2 : vector<1x1x17x102xf32> to vector<17x102xf32>
    %4 = vector.extract_strided_slice %1 {offsets = [0, 0], sizes = [16, 102], strides = [1, 1]} : vector<17x102xf32> to vector<16x102xf32>
    %c0_6 = arith.constant 0 : index
    %c0_7 = arith.constant 0 : index
    %c0_8 = arith.constant 0 : index
    %5 = vector.load %arg2[%c0_6, %c0_7, %c0_8] : memref<3x102x32xf32, #tpu.memory_space<vmem>>, vector<1x102x32xf32>
    %6 = vector.shape_cast %5 : vector<1x102x32xf32> to vector<102x32xf32>
    %cst = arith.constant dense<0.000000e+00> : vector<16x32xf32>
    %7 = tpu.matmul %4, %6, %cst {dimension_numbers = #tpu.dot_dimension_numbers<[1], [0], [0], [1], [0, 0, 1, 1], [], []>} : vector<16x102xf32>, vector<102x32xf32>, vector<16x32xf32> -> vector<16x32xf32>
    %8 = vector.extract_strided_slice %3 {offsets = [0, 0], sizes = [16, 102], strides = [1, 1]} : vector<17x102xf32> to vector<16x102xf32>
    %c1_9 = arith.constant 1 : index
    %c0_10 = arith.constant 0 : index
    %c0_11 = arith.constant 0 : index
    %9 = vector.load %arg2[%c1_9, %c0_10, %c0_11] : memref<3x102x32xf32, #tpu.memory_space<vmem>>, vector<1x102x32xf32>
    %10 = vector.shape_cast %9 : vector<1x102x32xf32> to vector<102x32xf32>
    %cst_12 = arith.constant dense<0.000000e+00> : vector<16x32xf32>
    %11 = tpu.matmul %8, %10, %cst_12 {dimension_numbers = #tpu.dot_dimension_numbers<[1], [0], [0], [1], [0, 0, 1, 1], [], []>} : vector<16x102xf32>, vector<102x32xf32>, vector<16x32xf32> -> vector<16x32xf32>
    %12 = arith.addf %7, %11 : vector<16x32xf32>
    %13 = vector.extract_strided_slice %1 {offsets = [1, 0], sizes = [16, 102], strides = [1, 1]} : vector<17x102xf32> to vector<16x102xf32>
    %c2 = arith.constant 2 : index
    %c0_13 = arith.constant 0 : index
    %c0_14 = arith.constant 0 : index
    %14 = vector.load %arg2[%c2, %c0_13, %c0_14] : memref<3x102x32xf32, #tpu.memory_space<vmem>>, vector<1x102x32xf32>
    %15 = vector.shape_cast %14 : vector<1x102x32xf32> to vector<102x32xf32>
    %cst_15 = arith.constant dense<0.000000e+00> : vector<16x32xf32>
    %16 = tpu.matmul %13, %15, %cst_15 {dimension_numbers = #tpu.dot_dimension_numbers<[1], [0], [0], [1], [0, 0, 1, 1], [], []>} : vector<16x102xf32>, vector<102x32xf32>, vector<16x32xf32> -> vector<16x32xf32>
    %17 = arith.addf %12, %16 : vector<16x32xf32>
    %c0_16 = arith.constant 0 : index
    %c0_17 = arith.constant 0 : index
    %18 = vector.load %arg3[%c0_16, %c0_17] : memref<1x32xf32, #tpu.memory_space<vmem>>, vector<1x32xf32>
    %19 = vector.broadcast %18 : vector<1x32xf32> to vector<16x32xf32>
    %20 = arith.addf %17, %19 : vector<16x32xf32>
    %cst_18 = arith.constant 0.000000e+00 : f32
    %21 = vector.broadcast %cst_18 : f32 to vector<16x32xf32>
    %22 = arith.maximumf %20, %21 : vector<16x32xf32>
    %c0_19 = arith.constant 0 : index
    %c0_20 = arith.constant 0 : index
    %c0_21 = arith.constant 0 : index
    %23 = vector.load %arg4[%c0_19, %c0_20, %c0_21] : memref<1x16x32xf32, #tpu.memory_space<vmem>>, vector<1x16x32xf32>
    %24 = vector.shape_cast %23 : vector<1x16x32xf32> to vector<16x32xf32>
    %25 = vector.shape_cast %22 : vector<16x32xf32> to vector<1x16x32xf32>
    tpu.vector_store %arg4[%c0_19, %c0_20, %c0_21], %25 {strides = array<i32>} : memref<1x16x32xf32, #tpu.memory_space<vmem>>, vector<1x16x32xf32>,
    return
  }
  func.func @transform_0(%arg0: i32) -> (i32, i32, i32, i32) {
    %c0_i32 = arith.constant 0 : i32
    %c0_i32_0 = arith.constant 0 : i32
    %c0_i32_1 = arith.constant 0 : i32
    %c0_i32_2 = arith.constant 0 : i32
    return %arg0, %c0_i32, %c0_i32_0, %c0_i32_1 : i32, i32, i32, i32
  }
  func.func @transform_1(%arg0: i32) -> (i32, i32, i32) {
    %c0_i32 = arith.constant 0 : i32
    %c0_i32_0 = arith.constant 0 : i32
    %c0_i32_1 = arith.constant 0 : i32
    %c0_i32_2 = arith.constant 0 : i32
    return %c0_i32, %c0_i32_0, %c0_i32_1 : i32, i32, i32
  }
  func.func @transform_2(%arg0: i32) -> (i32, i32) {
    %c0_i32 = arith.constant 0 : i32
    %c0_i32_0 = arith.constant 0 : i32
    %c0_i32_1 = arith.constant 0 : i32
    return %c0_i32, %c0_i32_0 : i32, i32
  }
  func.func @transform_3(%arg0: i32) -> (i32, i32, i32) {
    %c0_i32 = arith.constant 0 : i32
    %c0_i32_0 = arith.constant 0 : i32
    %c0_i32_1 = arith.constant 0 : i32
    return %arg0, %c0_i32, %c0_i32_0 : i32, i32, i32
  }
}

module attributes {stable_mosaic.version = 11 : i64} {
  func.func @_conv_kernel(%arg0: i32, %arg1: memref<1x2x9x36xf32, #tpu.memory_space<vmem>>, %arg2: memref<3x36x64xf32, #tpu.memory_space<vmem>>, %arg3: memref<1x64xf32, #tpu.memory_space<vmem>>, %arg4: memref<1x8x64xf32, #tpu.memory_space<vmem>>) attributes {dimension_semantics = [#tpu.dimension_semantics<parallel>], iteration_bounds = array<i64: 2>, scalar_prefetch = 0 : i64, scratch_operands = 0 : i64, tpu.core_type = #tpu.core_type<tc>, window_params = [{transform_indices = @transform_0, window_bounds = array<i64: 1, 2, 9, 36>}, {pipeline_mode = #tpu.pipeline_mode<synchronous>, transform_indices = @transform_1, window_bounds = array<i64: 3, 36, 64>}, {pipeline_mode = #tpu.pipeline_mode<synchronous>, transform_indices = @transform_2, window_bounds = array<i64: 1, 64>}, {transform_indices = @transform_3, window_bounds = array<i64: 1, 8, 64>}]} {
    %c0 = arith.constant 0 : index
    %c0_0 = arith.constant 0 : index
    %c0_1 = arith.constant 0 : index
    %c0_2 = arith.constant 0 : index
    %0 = vector.load %arg1[%c0, %c0_0, %c0_1, %c0_2] : memref<1x2x9x36xf32, #tpu.memory_space<vmem>>, vector<1x1x9x36xf32>
    %1 = vector.shape_cast %0 : vector<1x1x9x36xf32> to vector<9x36xf32>
    %c0_3 = arith.constant 0 : index
    %c1 = arith.constant 1 : index
    %c0_4 = arith.constant 0 : index
    %c0_5 = arith.constant 0 : index
    %2 = vector.load %arg1[%c0_3, %c1, %c0_4, %c0_5] : memref<1x2x9x36xf32, #tpu.memory_space<vmem>>, vector<1x1x9x36xf32>
    %3 = vector.shape_cast %2 : vector<1x1x9x36xf32> to vector<9x36xf32>
    %4 = vector.extract_strided_slice %1 {offsets = [0, 0], sizes = [8, 36], strides = [1, 1]} : vector<9x36xf32> to vector<8x36xf32>
    %c0_6 = arith.constant 0 : index
    %c0_7 = arith.constant 0 : index
    %c0_8 = arith.constant 0 : index
    %5 = vector.load %arg2[%c0_6, %c0_7, %c0_8] : memref<3x36x64xf32, #tpu.memory_space<vmem>>, vector<1x36x64xf32>
    %6 = vector.shape_cast %5 : vector<1x36x64xf32> to vector<36x64xf32>
    %cst = arith.constant dense<0.000000e+00> : vector<8x64xf32>
    %7 = tpu.matmul %4, %6, %cst {dimension_numbers = #tpu.dot_dimension_numbers<[1], [0], [0], [1], [0, 0, 1, 1], [], []>} : vector<8x36xf32>, vector<36x64xf32>, vector<8x64xf32> -> vector<8x64xf32>
    %8 = vector.extract_strided_slice %3 {offsets = [0, 0], sizes = [8, 36], strides = [1, 1]} : vector<9x36xf32> to vector<8x36xf32>
    %c1_9 = arith.constant 1 : index
    %c0_10 = arith.constant 0 : index
    %c0_11 = arith.constant 0 : index
    %9 = vector.load %arg2[%c1_9, %c0_10, %c0_11] : memref<3x36x64xf32, #tpu.memory_space<vmem>>, vector<1x36x64xf32>
    %10 = vector.shape_cast %9 : vector<1x36x64xf32> to vector<36x64xf32>
    %cst_12 = arith.constant dense<0.000000e+00> : vector<8x64xf32>
    %11 = tpu.matmul %8, %10, %cst_12 {dimension_numbers = #tpu.dot_dimension_numbers<[1], [0], [0], [1], [0, 0, 1, 1], [], []>} : vector<8x36xf32>, vector<36x64xf32>, vector<8x64xf32> -> vector<8x64xf32>
    %12 = arith.addf %7, %11 : vector<8x64xf32>
    %13 = vector.extract_strided_slice %1 {offsets = [1, 0], sizes = [8, 36], strides = [1, 1]} : vector<9x36xf32> to vector<8x36xf32>
    %c2 = arith.constant 2 : index
    %c0_13 = arith.constant 0 : index
    %c0_14 = arith.constant 0 : index
    %14 = vector.load %arg2[%c2, %c0_13, %c0_14] : memref<3x36x64xf32, #tpu.memory_space<vmem>>, vector<1x36x64xf32>
    %15 = vector.shape_cast %14 : vector<1x36x64xf32> to vector<36x64xf32>
    %cst_15 = arith.constant dense<0.000000e+00> : vector<8x64xf32>
    %16 = tpu.matmul %13, %15, %cst_15 {dimension_numbers = #tpu.dot_dimension_numbers<[1], [0], [0], [1], [0, 0, 1, 1], [], []>} : vector<8x36xf32>, vector<36x64xf32>, vector<8x64xf32> -> vector<8x64xf32>
    %17 = arith.addf %12, %16 : vector<8x64xf32>
    %c0_16 = arith.constant 0 : index
    %c0_17 = arith.constant 0 : index
    %18 = vector.load %arg3[%c0_16, %c0_17] : memref<1x64xf32, #tpu.memory_space<vmem>>, vector<1x64xf32>
    %19 = vector.broadcast %18 : vector<1x64xf32> to vector<8x64xf32>
    %20 = arith.addf %17, %19 : vector<8x64xf32>
    %cst_18 = arith.constant 0.000000e+00 : f32
    %21 = vector.broadcast %cst_18 : f32 to vector<8x64xf32>
    %22 = arith.maximumf %20, %21 : vector<8x64xf32>
    %c0_19 = arith.constant 0 : index
    %c0_20 = arith.constant 0 : index
    %c0_21 = arith.constant 0 : index
    %23 = vector.load %arg4[%c0_19, %c0_20, %c0_21] : memref<1x8x64xf32, #tpu.memory_space<vmem>>, vector<1x8x64xf32>
    %24 = vector.shape_cast %23 : vector<1x8x64xf32> to vector<8x64xf32>
    %25 = vector.shape_cast %22 : vector<8x64xf32> to vector<1x8x64xf32>
    tpu.vector_store %arg4[%c0_19, %c0_20, %c0_21], %25 {strides = array<i32>} : memref<1x8x64xf32, #tpu.memory_space<vmem>>, vector<1x8x64xf32>,
    return
  }
  func.func @transform_0(%arg0: i32) -> (i32, i32, i32, i32) {
    %c0_i32 = arith.constant 0 : i32
    %c0_i32_0 = arith.constant 0 : i32
    %c0_i32_1 = arith.constant 0 : i32
    %c0_i32_2 = arith.constant 0 : i32
    return %arg0, %c0_i32, %c0_i32_0, %c0_i32_1 : i32, i32, i32, i32
  }
  func.func @transform_1(%arg0: i32) -> (i32, i32, i32) {
    %c0_i32 = arith.constant 0 : i32
    %c0_i32_0 = arith.constant 0 : i32
    %c0_i32_1 = arith.constant 0 : i32
    %c0_i32_2 = arith.constant 0 : i32
    return %c0_i32, %c0_i32_0, %c0_i32_1 : i32, i32, i32
  }
  func.func @transform_2(%arg0: i32) -> (i32, i32) {
    %c0_i32 = arith.constant 0 : i32
    %c0_i32_0 = arith.constant 0 : i32
    %c0_i32_1 = arith.constant 0 : i32
    return %c0_i32, %c0_i32_0 : i32, i32
  }
  func.func @transform_3(%arg0: i32) -> (i32, i32, i32) {
    %c0_i32 = arith.constant 0 : i32
    %c0_i32_0 = arith.constant 0 : i32
    %c0_i32_1 = arith.constant 0 : i32
    return %arg0, %c0_i32, %c0_i32_0 : i32, i32, i32
  }
}

module attributes {stable_mosaic.version = 11 : i64} {
  func.func @_conv_kernel(%arg0: i32, %arg1: memref<1x2x5x80xf32, #tpu.memory_space<vmem>>, %arg2: memref<3x80x64xf32, #tpu.memory_space<vmem>>, %arg3: memref<1x64xf32, #tpu.memory_space<vmem>>, %arg4: memref<1x4x64xf32, #tpu.memory_space<vmem>>) attributes {dimension_semantics = [#tpu.dimension_semantics<parallel>], iteration_bounds = array<i64: 2>, scalar_prefetch = 0 : i64, scratch_operands = 0 : i64, tpu.core_type = #tpu.core_type<tc>, window_params = [{transform_indices = @transform_0, window_bounds = array<i64: 1, 2, 5, 80>}, {pipeline_mode = #tpu.pipeline_mode<synchronous>, transform_indices = @transform_1, window_bounds = array<i64: 3, 80, 64>}, {pipeline_mode = #tpu.pipeline_mode<synchronous>, transform_indices = @transform_2, window_bounds = array<i64: 1, 64>}, {transform_indices = @transform_3, window_bounds = array<i64: 1, 4, 64>}]} {
    %c0 = arith.constant 0 : index
    %c0_0 = arith.constant 0 : index
    %c0_1 = arith.constant 0 : index
    %c0_2 = arith.constant 0 : index
    %0 = vector.load %arg1[%c0, %c0_0, %c0_1, %c0_2] : memref<1x2x5x80xf32, #tpu.memory_space<vmem>>, vector<1x1x5x80xf32>
    %1 = vector.shape_cast %0 : vector<1x1x5x80xf32> to vector<5x80xf32>
    %c0_3 = arith.constant 0 : index
    %c1 = arith.constant 1 : index
    %c0_4 = arith.constant 0 : index
    %c0_5 = arith.constant 0 : index
    %2 = vector.load %arg1[%c0_3, %c1, %c0_4, %c0_5] : memref<1x2x5x80xf32, #tpu.memory_space<vmem>>, vector<1x1x5x80xf32>
    %3 = vector.shape_cast %2 : vector<1x1x5x80xf32> to vector<5x80xf32>
    %4 = vector.extract_strided_slice %1 {offsets = [0, 0], sizes = [4, 80], strides = [1, 1]} : vector<5x80xf32> to vector<4x80xf32>
    %c0_6 = arith.constant 0 : index
    %c0_7 = arith.constant 0 : index
    %c0_8 = arith.constant 0 : index
    %5 = vector.load %arg2[%c0_6, %c0_7, %c0_8] : memref<3x80x64xf32, #tpu.memory_space<vmem>>, vector<1x80x64xf32>
    %6 = vector.shape_cast %5 : vector<1x80x64xf32> to vector<80x64xf32>
    %cst = arith.constant dense<0.000000e+00> : vector<4x64xf32>
    %7 = tpu.matmul %4, %6, %cst {dimension_numbers = #tpu.dot_dimension_numbers<[1], [0], [0], [1], [0, 0, 1, 1], [], []>} : vector<4x80xf32>, vector<80x64xf32>, vector<4x64xf32> -> vector<4x64xf32>
    %8 = vector.extract_strided_slice %3 {offsets = [0, 0], sizes = [4, 80], strides = [1, 1]} : vector<5x80xf32> to vector<4x80xf32>
    %c1_9 = arith.constant 1 : index
    %c0_10 = arith.constant 0 : index
    %c0_11 = arith.constant 0 : index
    %9 = vector.load %arg2[%c1_9, %c0_10, %c0_11] : memref<3x80x64xf32, #tpu.memory_space<vmem>>, vector<1x80x64xf32>
    %10 = vector.shape_cast %9 : vector<1x80x64xf32> to vector<80x64xf32>
    %cst_12 = arith.constant dense<0.000000e+00> : vector<4x64xf32>
    %11 = tpu.matmul %8, %10, %cst_12 {dimension_numbers = #tpu.dot_dimension_numbers<[1], [0], [0], [1], [0, 0, 1, 1], [], []>} : vector<4x80xf32>, vector<80x64xf32>, vector<4x64xf32> -> vector<4x64xf32>
    %12 = arith.addf %7, %11 : vector<4x64xf32>
    %13 = vector.extract_strided_slice %1 {offsets = [1, 0], sizes = [4, 80], strides = [1, 1]} : vector<5x80xf32> to vector<4x80xf32>
    %c2 = arith.constant 2 : index
    %c0_13 = arith.constant 0 : index
    %c0_14 = arith.constant 0 : index
    %14 = vector.load %arg2[%c2, %c0_13, %c0_14] : memref<3x80x64xf32, #tpu.memory_space<vmem>>, vector<1x80x64xf32>
    %15 = vector.shape_cast %14 : vector<1x80x64xf32> to vector<80x64xf32>
    %cst_15 = arith.constant dense<0.000000e+00> : vector<4x64xf32>
    %16 = tpu.matmul %13, %15, %cst_15 {dimension_numbers = #tpu.dot_dimension_numbers<[1], [0], [0], [1], [0, 0, 1, 1], [], []>} : vector<4x80xf32>, vector<80x64xf32>, vector<4x64xf32> -> vector<4x64xf32>
    %17 = arith.addf %12, %16 : vector<4x64xf32>
    %c0_16 = arith.constant 0 : index
    %c0_17 = arith.constant 0 : index
    %18 = vector.load %arg3[%c0_16, %c0_17] : memref<1x64xf32, #tpu.memory_space<vmem>>, vector<1x64xf32>
    %19 = vector.broadcast %18 : vector<1x64xf32> to vector<4x64xf32>
    %20 = arith.addf %17, %19 : vector<4x64xf32>
    %cst_18 = arith.constant 0.000000e+00 : f32
    %21 = vector.broadcast %cst_18 : f32 to vector<4x64xf32>
    %22 = arith.maximumf %20, %21 : vector<4x64xf32>
    %c0_19 = arith.constant 0 : index
    %c0_20 = arith.constant 0 : index
    %c0_21 = arith.constant 0 : index
    %23 = vector.load %arg4[%c0_19, %c0_20, %c0_21] : memref<1x4x64xf32, #tpu.memory_space<vmem>>, vector<1x4x64xf32>
    %24 = vector.shape_cast %23 : vector<1x4x64xf32> to vector<4x64xf32>
    %25 = vector.shape_cast %22 : vector<4x64xf32> to vector<1x4x64xf32>
    tpu.vector_store %arg4[%c0_19, %c0_20, %c0_21], %25 {strides = array<i32>} : memref<1x4x64xf32, #tpu.memory_space<vmem>>, vector<1x4x64xf32>,
    return
  }
  func.func @transform_0(%arg0: i32) -> (i32, i32, i32, i32) {
    %c0_i32 = arith.constant 0 : i32
    %c0_i32_0 = arith.constant 0 : i32
    %c0_i32_1 = arith.constant 0 : i32
    %c0_i32_2 = arith.constant 0 : i32
    return %arg0, %c0_i32, %c0_i32_0, %c0_i32_1 : i32, i32, i32, i32
  }
  func.func @transform_1(%arg0: i32) -> (i32, i32, i32) {
    %c0_i32 = arith.constant 0 : i32
    %c0_i32_0 = arith.constant 0 : i32
    %c0_i32_1 = arith.constant 0 : i32
    %c0_i32_2 = arith.constant 0 : i32
    return %c0_i32, %c0_i32_0, %c0_i32_1 : i32, i32, i32
  }
  func.func @transform_2(%arg0: i32) -> (i32, i32) {
    %c0_i32 = arith.constant 0 : i32
    %c0_i32_0 = arith.constant 0 : i32
    %c0_i32_1 = arith.constant 0 : i32
    return %c0_i32, %c0_i32_0 : i32, i32
  }
  func.func @transform_3(%arg0: i32) -> (i32, i32, i32) {
    %c0_i32 = arith.constant 0 : i32
    %c0_i32_0 = arith.constant 0 : i32
    %c0_i32_1 = arith.constant 0 : i32
    return %arg0, %c0_i32, %c0_i32_0 : i32, i32, i32
  }
}

module attributes {stable_mosaic.version = 11 : i64} {
  func.func @_conv_kernel(%arg0: i32, %arg1: memref<1x2x3x96xf32, #tpu.memory_space<vmem>>, %arg2: memref<3x96x64xf32, #tpu.memory_space<vmem>>, %arg3: memref<1x64xf32, #tpu.memory_space<vmem>>, %arg4: memref<1x2x64xf32, #tpu.memory_space<vmem>>) attributes {dimension_semantics = [#tpu.dimension_semantics<parallel>], iteration_bounds = array<i64: 2>, scalar_prefetch = 0 : i64, scratch_operands = 0 : i64, tpu.core_type = #tpu.core_type<tc>, window_params = [{transform_indices = @transform_0, window_bounds = array<i64: 1, 2, 3, 96>}, {pipeline_mode = #tpu.pipeline_mode<synchronous>, transform_indices = @transform_1, window_bounds = array<i64: 3, 96, 64>}, {pipeline_mode = #tpu.pipeline_mode<synchronous>, transform_indices = @transform_2, window_bounds = array<i64: 1, 64>}, {transform_indices = @transform_3, window_bounds = array<i64: 1, 2, 64>}]} {
    %c0 = arith.constant 0 : index
    %c0_0 = arith.constant 0 : index
    %c0_1 = arith.constant 0 : index
    %c0_2 = arith.constant 0 : index
    %0 = vector.load %arg1[%c0, %c0_0, %c0_1, %c0_2] : memref<1x2x3x96xf32, #tpu.memory_space<vmem>>, vector<1x1x3x96xf32>
    %1 = vector.shape_cast %0 : vector<1x1x3x96xf32> to vector<3x96xf32>
    %c0_3 = arith.constant 0 : index
    %c1 = arith.constant 1 : index
    %c0_4 = arith.constant 0 : index
    %c0_5 = arith.constant 0 : index
    %2 = vector.load %arg1[%c0_3, %c1, %c0_4, %c0_5] : memref<1x2x3x96xf32, #tpu.memory_space<vmem>>, vector<1x1x3x96xf32>
    %3 = vector.shape_cast %2 : vector<1x1x3x96xf32> to vector<3x96xf32>
    %4 = vector.extract_strided_slice %1 {offsets = [0, 0], sizes = [2, 96], strides = [1, 1]} : vector<3x96xf32> to vector<2x96xf32>
    %c0_6 = arith.constant 0 : index
    %c0_7 = arith.constant 0 : index
    %c0_8 = arith.constant 0 : index
    %5 = vector.load %arg2[%c0_6, %c0_7, %c0_8] : memref<3x96x64xf32, #tpu.memory_space<vmem>>, vector<1x96x64xf32>
    %6 = vector.shape_cast %5 : vector<1x96x64xf32> to vector<96x64xf32>
    %cst = arith.constant dense<0.000000e+00> : vector<2x64xf32>
    %7 = tpu.matmul %4, %6, %cst {dimension_numbers = #tpu.dot_dimension_numbers<[1], [0], [0], [1], [0, 0, 1, 1], [], []>} : vector<2x96xf32>, vector<96x64xf32>, vector<2x64xf32> -> vector<2x64xf32>
    %8 = vector.extract_strided_slice %3 {offsets = [0, 0], sizes = [2, 96], strides = [1, 1]} : vector<3x96xf32> to vector<2x96xf32>
    %c1_9 = arith.constant 1 : index
    %c0_10 = arith.constant 0 : index
    %c0_11 = arith.constant 0 : index
    %9 = vector.load %arg2[%c1_9, %c0_10, %c0_11] : memref<3x96x64xf32, #tpu.memory_space<vmem>>, vector<1x96x64xf32>
    %10 = vector.shape_cast %9 : vector<1x96x64xf32> to vector<96x64xf32>
    %cst_12 = arith.constant dense<0.000000e+00> : vector<2x64xf32>
    %11 = tpu.matmul %8, %10, %cst_12 {dimension_numbers = #tpu.dot_dimension_numbers<[1], [0], [0], [1], [0, 0, 1, 1], [], []>} : vector<2x96xf32>, vector<96x64xf32>, vector<2x64xf32> -> vector<2x64xf32>
    %12 = arith.addf %7, %11 : vector<2x64xf32>
    %13 = vector.extract_strided_slice %1 {offsets = [1, 0], sizes = [2, 96], strides = [1, 1]} : vector<3x96xf32> to vector<2x96xf32>
    %c2 = arith.constant 2 : index
    %c0_13 = arith.constant 0 : index
    %c0_14 = arith.constant 0 : index
    %14 = vector.load %arg2[%c2, %c0_13, %c0_14] : memref<3x96x64xf32, #tpu.memory_space<vmem>>, vector<1x96x64xf32>
    %15 = vector.shape_cast %14 : vector<1x96x64xf32> to vector<96x64xf32>
    %cst_15 = arith.constant dense<0.000000e+00> : vector<2x64xf32>
    %16 = tpu.matmul %13, %15, %cst_15 {dimension_numbers = #tpu.dot_dimension_numbers<[1], [0], [0], [1], [0, 0, 1, 1], [], []>} : vector<2x96xf32>, vector<96x64xf32>, vector<2x64xf32> -> vector<2x64xf32>
    %17 = arith.addf %12, %16 : vector<2x64xf32>
    %c0_16 = arith.constant 0 : index
    %c0_17 = arith.constant 0 : index
    %18 = vector.load %arg3[%c0_16, %c0_17] : memref<1x64xf32, #tpu.memory_space<vmem>>, vector<1x64xf32>
    %19 = vector.broadcast %18 : vector<1x64xf32> to vector<2x64xf32>
    %20 = arith.addf %17, %19 : vector<2x64xf32>
    %cst_18 = arith.constant 0.000000e+00 : f32
    %21 = vector.broadcast %cst_18 : f32 to vector<2x64xf32>
    %22 = arith.maximumf %20, %21 : vector<2x64xf32>
    %c0_19 = arith.constant 0 : index
    %c0_20 = arith.constant 0 : index
    %c0_21 = arith.constant 0 : index
    %23 = vector.load %arg4[%c0_19, %c0_20, %c0_21] : memref<1x2x64xf32, #tpu.memory_space<vmem>>, vector<1x2x64xf32>
    %24 = vector.shape_cast %23 : vector<1x2x64xf32> to vector<2x64xf32>
    %25 = vector.shape_cast %22 : vector<2x64xf32> to vector<1x2x64xf32>
    tpu.vector_store %arg4[%c0_19, %c0_20, %c0_21], %25 {strides = array<i32>} : memref<1x2x64xf32, #tpu.memory_space<vmem>>, vector<1x2x64xf32>,
    return
  }
  func.func @transform_0(%arg0: i32) -> (i32, i32, i32, i32) {
    %c0_i32 = arith.constant 0 : i32
    %c0_i32_0 = arith.constant 0 : i32
    %c0_i32_1 = arith.constant 0 : i32
    %c0_i32_2 = arith.constant 0 : i32
    return %arg0, %c0_i32, %c0_i32_0, %c0_i32_1 : i32, i32, i32, i32
  }
  func.func @transform_1(%arg0: i32) -> (i32, i32, i32) {
    %c0_i32 = arith.constant 0 : i32
    %c0_i32_0 = arith.constant 0 : i32
    %c0_i32_1 = arith.constant 0 : i32
    %c0_i32_2 = arith.constant 0 : i32
    return %c0_i32, %c0_i32_0, %c0_i32_1 : i32, i32, i32
  }
  func.func @transform_2(%arg0: i32) -> (i32, i32) {
    %c0_i32 = arith.constant 0 : i32
    %c0_i32_0 = arith.constant 0 : i32
    %c0_i32_1 = arith.constant 0 : i32
    return %c0_i32, %c0_i32_0 : i32, i32
  }
  func.func @transform_3(%arg0: i32) -> (i32, i32, i32) {
    %c0_i32 = arith.constant 0 : i32
    %c0_i32_0 = arith.constant 0 : i32
    %c0_i32_1 = arith.constant 0 : i32
    return %arg0, %c0_i32, %c0_i32_0 : i32, i32, i32
  }
}

module attributes {stable_mosaic.version = 11 : i64} {
  func.func @_transformer_kernel(%arg0: i32, %arg1: memref<1x4x32xf32, #tpu.memory_space<vmem>>, %arg2: memref<1x4x32xf32, #tpu.memory_space<vmem>>, %arg3: memref<32x32xf32, #tpu.memory_space<vmem>>, %arg4: memref<1x32xf32, #tpu.memory_space<vmem>>, %arg5: memref<4x32xf32, #tpu.memory_space<vmem>>, %arg6: memref<2x1x32xf32, #tpu.memory_space<vmem>>, %arg7: memref<2x1x32xf32, #tpu.memory_space<vmem>>, %arg8: memref<2x4x32x8xf32, #tpu.memory_space<vmem>>, %arg9: memref<2x4x1x8xf32, #tpu.memory_space<vmem>>, %arg10: memref<2x4x32x8xf32, #tpu.memory_space<vmem>>, %arg11: memref<2x4x1x8xf32, #tpu.memory_space<vmem>>, %arg12: memref<2x4x32x8xf32, #tpu.memory_space<vmem>>, %arg13: memref<2x4x1x8xf32, #tpu.memory_space<vmem>>, %arg14: memref<2x4x8x32xf32, #tpu.memory_space<vmem>>, %arg15: memref<2x1x32xf32, #tpu.memory_space<vmem>>, %arg16: memref<2x1x32xf32, #tpu.memory_space<vmem>>, %arg17: memref<2x1x32xf32, #tpu.memory_space<vmem>>, %arg18: memref<2x32x64xf32, #tpu.memory_space<vmem>>, %arg19: memref<2x1x64xf32, #tpu.memory_space<vmem>>, %arg20: memref<2x64x32xf32, #tpu.memory_space<vmem>>, %arg21: memref<2x1x32xf32, #tpu.memory_space<vmem>>, %arg22: memref<1x32xf32, #tpu.memory_space<vmem>>, %arg23: memref<1x32xf32, #tpu.memory_space<vmem>>, %arg24: memref<32x32xf32, #tpu.memory_space<vmem>>, %arg25: memref<1x32xf32, #tpu.memory_space<vmem>>, %arg26: memref<32x32xf32, #tpu.memory_space<vmem>>, %arg27: memref<1x32xf32, #tpu.memory_space<vmem>>, %arg28: memref<32x32xf32, #tpu.memory_space<vmem>>, %arg29: memref<1x32xf32, #tpu.memory_space<vmem>>, %arg30: memref<32x32xf32, #tpu.memory_space<vmem>>, %arg31: memref<1x32xf32, #tpu.memory_space<vmem>>, %arg32: memref<32x32xf32, #tpu.memory_space<vmem>>, %arg33: memref<1x32xf32, #tpu.memory_space<vmem>>, %arg34: memref<1x4x32xf32, #tpu.memory_space<vmem>>, %arg35: memref<1x1x32xf32, #tpu.memory_space<vmem>>) attributes {dimension_semantics = [#tpu.dimension_semantics<parallel>], iteration_bounds = array<i64: 2>, scalar_prefetch = 0 : i64, scratch_operands = 0 : i64, tpu.core_type = #tpu.core_type<tc>, window_params = [{transform_indices = @transform_0, window_bounds = array<i64: 1, 4, 32>}, {transform_indices = @transform_1, window_bounds = array<i64: 1, 4, 32>}, {pipeline_mode = #tpu.pipeline_mode<synchronous>, transform_indices = @transform_2, window_bounds = array<i64: 32, 32>}, {pipeline_mode = #tpu.pipeline_mode<synchronous>, transform_indices = @transform_3, window_bounds = array<i64: 1, 32>}, {pipeline_mode = #tpu.pipeline_mode<synchronous>, transform_indices = @transform_4, window_bounds = array<i64: 4, 32>}, {pipeline_mode = #tpu.pipeline_mode<synchronous>, transform_indices = @transform_5, window_bounds = array<i64: 2, 1, 32>}, {pipeline_mode = #tpu.pipeline_mode<synchronous>, transform_indices = @transform_6, window_bounds = array<i64: 2, 1, 32>}, {pipeline_mode = #tpu.pipeline_mode<synchronous>, transform_indices = @transform_7, window_bounds = array<i64: 2, 4, 32, 8>}, {pipeline_mode = #tpu.pipeline_mode<synchronous>, transform_indices = @transform_8, window_bounds = array<i64: 2, 4, 1, 8>}, {pipeline_mode = #tpu.pipeline_mode<synchronous>, transform_indices = @transform_9, window_bounds = array<i64: 2, 4, 32, 8>}, {pipeline_mode = #tpu.pipeline_mode<synchronous>, transform_indices = @transform_10, window_bounds = array<i64: 2, 4, 1, 8>}, {pipeline_mode = #tpu.pipeline_mode<synchronous>, transform_indices = @transform_11, window_bounds = array<i64: 2, 4, 32, 8>}, {pipeline_mode = #tpu.pipeline_mode<synchronous>, transform_indices = @transform_12, window_bounds = array<i64: 2, 4, 1, 8>}, {pipeline_mode = #tpu.pipeline_mode<synchronous>, transform_indices = @transform_13, window_bounds = array<i64: 2, 4, 8, 32>}, {pipeline_mode = #tpu.pipeline_mode<synchronous>, transform_indices = @transform_14, window_bounds = array<i64: 2, 1, 32>}, {pipeline_mode = #tpu.pipeline_mode<synchronous>, transform_indices = @transform_15, window_bounds = array<i64: 2, 1, 32>}, {pipeline_mode = #tpu.pipeline_mode<synchronous>, transform_indices = @transform_16, window_bounds = array<i64: 2, 1, 32>}, {pipeline_mode = #tpu.pipeline_mode<synchronous>, transform_indices = @transform_17, window_bounds = array<i64: 2, 32, 64>}, {pipeline_mode = #tpu.pipeline_mode<synchronous>, transform_indices = @transform_18, window_bounds = array<i64: 2, 1, 64>}, {pipeline_mode = #tpu.pipeline_mode<synchronous>, transform_indices = @transform_19, window_bounds = array<i64: 2, 64, 32>}, {pipeline_mode = #tpu.pipeline_mode<synchronous>, transform_indices = @transform_20, window_bounds = array<i64: 2, 1, 32>}, {pipeline_mode = #tpu.pipeline_mode<synchronous>, transform_indices = @transform_21, window_bounds = array<i64: 1, 32>}, {pipeline_mode = #tpu.pipeline_mode<synchronous>, transform_indices = @transform_22, window_bounds = array<i64: 1, 32>}, {pipeline_mode = #tpu.pipeline_mode<synchronous>, transform_indices = @transform_23, window_bounds = array<i64: 32, 32>}, {pipeline_mode = #tpu.pipeline_mode<synchronous>, transform_indices = @transform_24, window_bounds = array<i64: 1, 32>}, {pipeline_mode = #tpu.pipeline_mode<synchronous>, transform_indices = @transform_25, window_bounds = array<i64: 32, 32>}, {pipeline_mode = #tpu.pipeline_mode<synchronous>, transform_indices = @transform_26, window_bounds = array<i64: 1, 32>}, {pipeline_mode = #tpu.pipeline_mode<synchronous>, transform_indices = @transform_27, window_bounds = array<i64: 32, 32>}, {pipeline_mode = #tpu.pipeline_mode<synchronous>, transform_indices = @transform_28, window_bounds = array<i64: 1, 32>}, {pipeline_mode = #tpu.pipeline_mode<synchronous>, transform_indices = @transform_29, window_bounds = array<i64: 32, 32>}, {pipeline_mode = #tpu.pipeline_mode<synchronous>, transform_indices = @transform_30, window_bounds = array<i64: 1, 32>}, {pipeline_mode = #tpu.pipeline_mode<synchronous>, transform_indices = @transform_31, window_bounds = array<i64: 32, 32>}, {pipeline_mode = #tpu.pipeline_mode<synchronous>, transform_indices = @transform_32, window_bounds = array<i64: 1, 32>}, {transform_indices = @transform_33, window_bounds = array<i64: 1, 4, 32>}, {transform_indices = @transform_34, window_bounds = array<i64: 1, 1, 32>}]} {
    %c0 = arith.constant 0 : index
    %c0_0 = arith.constant 0 : index
    %c0_1 = arith.constant 0 : index
    %0 = vector.load %arg1[%c0, %c0_0, %c0_1] : memref<1x4x32xf32, #tpu.memory_space<vmem>>, vector<1x4x32xf32>
    %1 = vector.shape_cast %0 : vector<1x4x32xf32> to vector<4x32xf32>
    %c0_2 = arith.constant 0 : index
    %c0_3 = arith.constant 0 : index
    %2 = vector.load %arg3[%c0_2, %c0_3] : memref<32x32xf32, #tpu.memory_space<vmem>>, vector<32x32xf32>
    %cst = arith.constant dense<0.000000e+00> : vector<4x32xf32>
    %3 = tpu.matmul %1, %2, %cst {dimension_numbers = #tpu.dot_dimension_numbers<[1], [0], [0], [1], [0, 0, 1, 1], [], []>} : vector<4x32xf32>, vector<32x32xf32>, vector<4x32xf32> -> vector<4x32xf32>
    %c0_4 = arith.constant 0 : index
    %c0_5 = arith.constant 0 : index
    %4 = vector.load %arg4[%c0_4, %c0_5] : memref<1x32xf32, #tpu.memory_space<vmem>>, vector<1x32xf32>
    %5 = vector.broadcast %4 : vector<1x32xf32> to vector<4x32xf32>
    %6 = arith.addf %3, %5 : vector<4x32xf32>
    %c0_6 = arith.constant 0 : index
    %c0_7 = arith.constant 0 : index
    %7 = vector.load %arg5[%c0_6, %c0_7] : memref<4x32xf32, #tpu.memory_space<vmem>>, vector<4x32xf32>
    %8 = arith.addf %6, %7 : vector<4x32xf32>
    %c0_8 = arith.constant 0 : index
    %c0_9 = arith.constant 0 : index
    %c0_10 = arith.constant 0 : index
    %9 = vector.load %arg6[%c0_8, %c0_9, %c0_10] : memref<2x1x32xf32, #tpu.memory_space<vmem>>, vector<1x1x32xf32>
    %10 = vector.shape_cast %9 : vector<1x1x32xf32> to vector<1x32xf32>
    %c0_11 = arith.constant 0 : index
    %c0_12 = arith.constant 0 : index
    %c0_13 = arith.constant 0 : index
    %11 = vector.load %arg7[%c0_11, %c0_12, %c0_13] : memref<2x1x32xf32, #tpu.memory_space<vmem>>, vector<1x1x32xf32>
    %12 = vector.shape_cast %11 : vector<1x1x32xf32> to vector<1x32xf32>
    %cst_14 = arith.constant dense<0.000000e+00> : vector<4xf32>
    %13 = vector.multi_reduction <add>, %8, %cst_14 [1] : vector<4x32xf32> to vector<4xf32>
    %14 = vector.shape_cast %13 : vector<4xf32> to vector<4x1xf32>
    %cst_15 = arith.constant 3.200000e+01 : f32
    %15 = vector.broadcast %cst_15 : f32 to vector<4x1xf32>
    %16 = arith.divf %14, %15 : vector<4x1xf32>
    %17 = vector.broadcast %16 : vector<4x1xf32> to vector<4x32xf32>
    %18 = arith.subf %8, %17 : vector<4x32xf32>
    %19 = arith.mulf %18, %18 : vector<4x32xf32>
    %cst_16 = arith.constant dense<0.000000e+00> : vector<4xf32>
    %20 = vector.multi_reduction <add>, %19, %cst_16 [1] : vector<4x32xf32> to vector<4xf32>
    %21 = vector.shape_cast %20 : vector<4xf32> to vector<4x1xf32>
    %cst_17 = arith.constant 3.200000e+01 : f32
    %22 = vector.broadcast %cst_17 : f32 to vector<4x1xf32>
    %23 = arith.divf %21, %22 : vector<4x1xf32>
    %24 = vector.broadcast %16 : vector<4x1xf32> to vector<4x32xf32>
    %25 = arith.subf %8, %24 : vector<4x32xf32>
    %cst_18 = arith.constant 9.99999997E-7 : f32
    %26 = vector.broadcast %cst_18 : f32 to vector<4x1xf32>
    %27 = arith.addf %23, %26 : vector<4x1xf32>
    %28 = math.rsqrt %27 : vector<4x1xf32>
    %29 = vector.broadcast %28 : vector<4x1xf32> to vector<4x32xf32>
    %30 = arith.mulf %25, %29 : vector<4x32xf32>
    %31 = vector.broadcast %10 : vector<1x32xf32> to vector<4x32xf32>
    %32 = arith.mulf %30, %31 : vector<4x32xf32>
    %33 = vector.broadcast %12 : vector<1x32xf32> to vector<4x32xf32>
    %34 = arith.addf %32, %33 : vector<4x32xf32>
    %cst_19 = arith.constant 0.000000e+00 : f32
    %35 = vector.broadcast %cst_19 : f32 to vector<4x32xf32>
    %c0_20 = arith.constant 0 : index
    %c0_21 = arith.constant 0 : index
    %c0_22 = arith.constant 0 : index
    %c0_23 = arith.constant 0 : index
    %36 = vector.load %arg8[%c0_20, %c0_21, %c0_22, %c0_23] : memref<2x4x32x8xf32, #tpu.memory_space<vmem>>, vector<1x1x32x8xf32>
    %37 = vector.shape_cast %36 : vector<1x1x32x8xf32> to vector<32x8xf32>
    %cst_24 = arith.constant dense<0.000000e+00> : vector<4x8xf32>
    %38 = tpu.matmul %34, %37, %cst_24 {dimension_numbers = #tpu.dot_dimension_numbers<[1], [0], [0], [1], [0, 0, 1, 1], [], []>} : vector<4x32xf32>, vector<32x8xf32>, vector<4x8xf32> -> vector<4x8xf32>
    %c0_25 = arith.constant 0 : index
    %c0_26 = arith.constant 0 : index
    %c0_27 = arith.constant 0 : index
    %c0_28 = arith.constant 0 : index
    %39 = vector.load %arg9[%c0_25, %c0_26, %c0_27, %c0_28] : memref<2x4x1x8xf32, #tpu.memory_space<vmem>>, vector<1x1x1x8xf32>
    %40 = vector.shape_cast %39 : vector<1x1x1x8xf32> to vector<1x8xf32>
    %41 = vector.broadcast %40 : vector<1x8xf32> to vector<4x8xf32>
    %42 = arith.addf %38, %41 : vector<4x8xf32>
    %c0_29 = arith.constant 0 : index
    %c0_30 = arith.constant 0 : index
    %c0_31 = arith.constant 0 : index
    %c0_32 = arith.constant 0 : index
    %43 = vector.load %arg10[%c0_29, %c0_30, %c0_31, %c0_32] : memref<2x4x32x8xf32, #tpu.memory_space<vmem>>, vector<1x1x32x8xf32>
    %44 = vector.shape_cast %43 : vector<1x1x32x8xf32> to vector<32x8xf32>
    %cst_33 = arith.constant dense<0.000000e+00> : vector<4x8xf32>
    %45 = tpu.matmul %34, %44, %cst_33 {dimension_numbers = #tpu.dot_dimension_numbers<[1], [0], [0], [1], [0, 0, 1, 1], [], []>} : vector<4x32xf32>, vector<32x8xf32>, vector<4x8xf32> -> vector<4x8xf32>
    %c0_34 = arith.constant 0 : index
    %c0_35 = arith.constant 0 : index
    %c0_36 = arith.constant 0 : index
    %c0_37 = arith.constant 0 : index
    %46 = vector.load %arg11[%c0_34, %c0_35, %c0_36, %c0_37] : memref<2x4x1x8xf32, #tpu.memory_space<vmem>>, vector<1x1x1x8xf32>
    %47 = vector.shape_cast %46 : vector<1x1x1x8xf32> to vector<1x8xf32>
    %48 = vector.broadcast %47 : vector<1x8xf32> to vector<4x8xf32>
    %49 = arith.addf %45, %48 : vector<4x8xf32>
    %c0_38 = arith.constant 0 : index
    %c0_39 = arith.constant 0 : index
    %c0_40 = arith.constant 0 : index
    %c0_41 = arith.constant 0 : index
    %50 = vector.load %arg12[%c0_38, %c0_39, %c0_40, %c0_41] : memref<2x4x32x8xf32, #tpu.memory_space<vmem>>, vector<1x1x32x8xf32>
    %51 = vector.shape_cast %50 : vector<1x1x32x8xf32> to vector<32x8xf32>
    %cst_42 = arith.constant dense<0.000000e+00> : vector<4x8xf32>
    %52 = tpu.matmul %34, %51, %cst_42 {dimension_numbers = #tpu.dot_dimension_numbers<[1], [0], [0], [1], [0, 0, 1, 1], [], []>} : vector<4x32xf32>, vector<32x8xf32>, vector<4x8xf32> -> vector<4x8xf32>
    %c0_43 = arith.constant 0 : index
    %c0_44 = arith.constant 0 : index
    %c0_45 = arith.constant 0 : index
    %c0_46 = arith.constant 0 : index
    %53 = vector.load %arg13[%c0_43, %c0_44, %c0_45, %c0_46] : memref<2x4x1x8xf32, #tpu.memory_space<vmem>>, vector<1x1x1x8xf32>
    %54 = vector.shape_cast %53 : vector<1x1x1x8xf32> to vector<1x8xf32>
    %55 = vector.broadcast %54 : vector<1x8xf32> to vector<4x8xf32>
    %56 = arith.addf %52, %55 : vector<4x8xf32>
    %cst_47 = arith.constant dense<0.000000e+00> : vector<4x4xf32>
    %57 = tpu.matmul %42, %49, %cst_47 {dimension_numbers = #tpu.dot_dimension_numbers<[1], [1], [0], [0], [0, 0, 1, 0], [], []>} : vector<4x8xf32>, vector<4x8xf32>, vector<4x4xf32> -> vector<4x4xf32>
    %cst_48 = arith.constant 0.353553385 : f32
    %58 = vector.broadcast %cst_48 : f32 to vector<4x4xf32>
    %59 = arith.mulf %57, %58 : vector<4x4xf32>
    %cst_49 = arith.constant dense<0xFF800000> : vector<4xf32>
    %60 = vector.multi_reduction <maximumf>, %59, %cst_49 [1] : vector<4x4xf32> to vector<4xf32>
    %61 = vector.shape_cast %60 : vector<4xf32> to vector<4x1xf32>
    %62 = vector.broadcast %61 : vector<4x1xf32> to vector<4x4xf32>
    %63 = arith.subf %59, %62 : vector<4x4xf32>
    %64 = math.exp %63 : vector<4x4xf32>
    %cst_50 = arith.constant dense<0.000000e+00> : vector<4xf32>
    %65 = vector.multi_reduction <add>, %64, %cst_50 [1] : vector<4x4xf32> to vector<4xf32>
    %66 = vector.shape_cast %65 : vector<4xf32> to vector<4x1xf32>
    %67 = vector.broadcast %66 : vector<4x1xf32> to vector<4x4xf32>
    %68 = arith.divf %64, %67 : vector<4x4xf32>
    %cst_51 = arith.constant dense<0.000000e+00> : vector<4x8xf32>
    %69 = tpu.matmul %68, %56, %cst_51 {dimension_numbers = #tpu.dot_dimension_numbers<[1], [0], [0], [1], [0, 0, 1, 1], [], []>} : vector<4x4xf32>, vector<4x8xf32>, vector<4x8xf32> -> vector<4x8xf32>
    %c0_52 = arith.constant 0 : index
    %c0_53 = arith.constant 0 : index
    %c0_54 = arith.constant 0 : index
    %c0_55 = arith.constant 0 : index
    %70 = vector.load %arg14[%c0_52, %c0_53, %c0_54, %c0_55] : memref<2x4x8x32xf32, #tpu.memory_space<vmem>>, vector<1x1x8x32xf32>
    %71 = vector.shape_cast %70 : vector<1x1x8x32xf32> to vector<8x32xf32>
    %cst_56 = arith.constant dense<0.000000e+00> : vector<4x32xf32>
    %72 = tpu.matmul %69, %71, %cst_56 {dimension_numbers = #tpu.dot_dimension_numbers<[1], [0], [0], [1], [0, 0, 1, 1], [], []>} : vector<4x8xf32>, vector<8x32xf32>, vector<4x32xf32> -> vector<4x32xf32>
    %73 = arith.addf %35, %72 : vector<4x32xf32>
    %c0_57 = arith.constant 0 : index
    %c1 = arith.constant 1 : index
    %c0_58 = arith.constant 0 : index
    %c0_59 = arith.constant 0 : index
    %74 = vector.load %arg8[%c0_57, %c1, %c0_58, %c0_59] : memref<2x4x32x8xf32, #tpu.memory_space<vmem>>, vector<1x1x32x8xf32>
    %75 = vector.shape_cast %74 : vector<1x1x32x8xf32> to vector<32x8xf32>
    %cst_60 = arith.constant dense<0.000000e+00> : vector<4x8xf32>
    %76 = tpu.matmul %34, %75, %cst_60 {dimension_numbers = #tpu.dot_dimension_numbers<[1], [0], [0], [1], [0, 0, 1, 1], [], []>} : vector<4x32xf32>, vector<32x8xf32>, vector<4x8xf32> -> vector<4x8xf32>
    %c0_61 = arith.constant 0 : index
    %c1_62 = arith.constant 1 : index
    %c0_63 = arith.constant 0 : index
    %c0_64 = arith.constant 0 : index
    %77 = vector.load %arg9[%c0_61, %c1_62, %c0_63, %c0_64] : memref<2x4x1x8xf32, #tpu.memory_space<vmem>>, vector<1x1x1x8xf32>
    %78 = vector.shape_cast %77 : vector<1x1x1x8xf32> to vector<1x8xf32>
    %79 = vector.broadcast %78 : vector<1x8xf32> to vector<4x8xf32>
    %80 = arith.addf %76, %79 : vector<4x8xf32>
    %c0_65 = arith.constant 0 : index
    %c1_66 = arith.constant 1 : index
    %c0_67 = arith.constant 0 : index
    %c0_68 = arith.constant 0 : index
    %81 = vector.load %arg10[%c0_65, %c1_66, %c0_67, %c0_68] : memref<2x4x32x8xf32, #tpu.memory_space<vmem>>, vector<1x1x32x8xf32>
    %82 = vector.shape_cast %81 : vector<1x1x32x8xf32> to vector<32x8xf32>
    %cst_69 = arith.constant dense<0.000000e+00> : vector<4x8xf32>
    %83 = tpu.matmul %34, %82, %cst_69 {dimension_numbers = #tpu.dot_dimension_numbers<[1], [0], [0], [1], [0, 0, 1, 1], [], []>} : vector<4x32xf32>, vector<32x8xf32>, vector<4x8xf32> -> vector<4x8xf32>
    %c0_70 = arith.constant 0 : index
    %c1_71 = arith.constant 1 : index
    %c0_72 = arith.constant 0 : index
    %c0_73 = arith.constant 0 : index
    %84 = vector.load %arg11[%c0_70, %c1_71, %c0_72, %c0_73] : memref<2x4x1x8xf32, #tpu.memory_space<vmem>>, vector<1x1x1x8xf32>
    %85 = vector.shape_cast %84 : vector<1x1x1x8xf32> to vector<1x8xf32>
    %86 = vector.broadcast %85 : vector<1x8xf32> to vector<4x8xf32>
    %87 = arith.addf %83, %86 : vector<4x8xf32>
    %c0_74 = arith.constant 0 : index
    %c1_75 = arith.constant 1 : index
    %c0_76 = arith.constant 0 : index
    %c0_77 = arith.constant 0 : index
    %88 = vector.load %arg12[%c0_74, %c1_75, %c0_76, %c0_77] : memref<2x4x32x8xf32, #tpu.memory_space<vmem>>, vector<1x1x32x8xf32>
    %89 = vector.shape_cast %88 : vector<1x1x32x8xf32> to vector<32x8xf32>
    %cst_78 = arith.constant dense<0.000000e+00> : vector<4x8xf32>
    %90 = tpu.matmul %34, %89, %cst_78 {dimension_numbers = #tpu.dot_dimension_numbers<[1], [0], [0], [1], [0, 0, 1, 1], [], []>} : vector<4x32xf32>, vector<32x8xf32>, vector<4x8xf32> -> vector<4x8xf32>
    %c0_79 = arith.constant 0 : index
    %c1_80 = arith.constant 1 : index
    %c0_81 = arith.constant 0 : index
    %c0_82 = arith.constant 0 : index
    %91 = vector.load %arg13[%c0_79, %c1_80, %c0_81, %c0_82] : memref<2x4x1x8xf32, #tpu.memory_space<vmem>>, vector<1x1x1x8xf32>
    %92 = vector.shape_cast %91 : vector<1x1x1x8xf32> to vector<1x8xf32>
    %93 = vector.broadcast %92 : vector<1x8xf32> to vector<4x8xf32>
    %94 = arith.addf %90, %93 : vector<4x8xf32>
    %cst_83 = arith.constant dense<0.000000e+00> : vector<4x4xf32>
    %95 = tpu.matmul %80, %87, %cst_83 {dimension_numbers = #tpu.dot_dimension_numbers<[1], [1], [0], [0], [0, 0, 1, 0], [], []>} : vector<4x8xf32>, vector<4x8xf32>, vector<4x4xf32> -> vector<4x4xf32>
    %cst_84 = arith.constant 0.353553385 : f32
    %96 = vector.broadcast %cst_84 : f32 to vector<4x4xf32>
    %97 = arith.mulf %95, %96 : vector<4x4xf32>
    %cst_85 = arith.constant dense<0xFF800000> : vector<4xf32>
    %98 = vector.multi_reduction <maximumf>, %97, %cst_85 [1] : vector<4x4xf32> to vector<4xf32>
    %99 = vector.shape_cast %98 : vector<4xf32> to vector<4x1xf32>
    %100 = vector.broadcast %99 : vector<4x1xf32> to vector<4x4xf32>
    %101 = arith.subf %97, %100 : vector<4x4xf32>
    %102 = math.exp %101 : vector<4x4xf32>
    %cst_86 = arith.constant dense<0.000000e+00> : vector<4xf32>
    %103 = vector.multi_reduction <add>, %102, %cst_86 [1] : vector<4x4xf32> to vector<4xf32>
    %104 = vector.shape_cast %103 : vector<4xf32> to vector<4x1xf32>
    %105 = vector.broadcast %104 : vector<4x1xf32> to vector<4x4xf32>
    %106 = arith.divf %102, %105 : vector<4x4xf32>
    %cst_87 = arith.constant dense<0.000000e+00> : vector<4x8xf32>
    %107 = tpu.matmul %106, %94, %cst_87 {dimension_numbers = #tpu.dot_dimension_numbers<[1], [0], [0], [1], [0, 0, 1, 1], [], []>} : vector<4x4xf32>, vector<4x8xf32>, vector<4x8xf32> -> vector<4x8xf32>
    %c0_88 = arith.constant 0 : index
    %c1_89 = arith.constant 1 : index
    %c0_90 = arith.constant 0 : index
    %c0_91 = arith.constant 0 : index
    %108 = vector.load %arg14[%c0_88, %c1_89, %c0_90, %c0_91] : memref<2x4x8x32xf32, #tpu.memory_space<vmem>>, vector<1x1x8x32xf32>
    %109 = vector.shape_cast %108 : vector<1x1x8x32xf32> to vector<8x32xf32>
    %cst_92 = arith.constant dense<0.000000e+00> : vector<4x32xf32>
    %110 = tpu.matmul %107, %109, %cst_92 {dimension_numbers = #tpu.dot_dimension_numbers<[1], [0], [0], [1], [0, 0, 1, 1], [], []>} : vector<4x8xf32>, vector<8x32xf32>, vector<4x32xf32> -> vector<4x32xf32>
    %111 = arith.addf %73, %110 : vector<4x32xf32>
    %c0_93 = arith.constant 0 : index
    %c2 = arith.constant 2 : index
    %c0_94 = arith.constant 0 : index
    %c0_95 = arith.constant 0 : index
    %112 = vector.load %arg8[%c0_93, %c2, %c0_94, %c0_95] : memref<2x4x32x8xf32, #tpu.memory_space<vmem>>, vector<1x1x32x8xf32>
    %113 = vector.shape_cast %112 : vector<1x1x32x8xf32> to vector<32x8xf32>
    %cst_96 = arith.constant dense<0.000000e+00> : vector<4x8xf32>
    %114 = tpu.matmul %34, %113, %cst_96 {dimension_numbers = #tpu.dot_dimension_numbers<[1], [0], [0], [1], [0, 0, 1, 1], [], []>} : vector<4x32xf32>, vector<32x8xf32>, vector<4x8xf32> -> vector<4x8xf32>
    %c0_97 = arith.constant 0 : index
    %c2_98 = arith.constant 2 : index
    %c0_99 = arith.constant 0 : index
    %c0_100 = arith.constant 0 : index
    %115 = vector.load %arg9[%c0_97, %c2_98, %c0_99, %c0_100] : memref<2x4x1x8xf32, #tpu.memory_space<vmem>>, vector<1x1x1x8xf32>
    %116 = vector.shape_cast %115 : vector<1x1x1x8xf32> to vector<1x8xf32>
    %117 = vector.broadcast %116 : vector<1x8xf32> to vector<4x8xf32>
    %118 = arith.addf %114, %117 : vector<4x8xf32>
    %c0_101 = arith.constant 0 : index
    %c2_102 = arith.constant 2 : index
    %c0_103 = arith.constant 0 : index
    %c0_104 = arith.constant 0 : index
    %119 = vector.load %arg10[%c0_101, %c2_102, %c0_103, %c0_104] : memref<2x4x32x8xf32, #tpu.memory_space<vmem>>, vector<1x1x32x8xf32>
    %120 = vector.shape_cast %119 : vector<1x1x32x8xf32> to vector<32x8xf32>
    %cst_105 = arith.constant dense<0.000000e+00> : vector<4x8xf32>
    %121 = tpu.matmul %34, %120, %cst_105 {dimension_numbers = #tpu.dot_dimension_numbers<[1], [0], [0], [1], [0, 0, 1, 1], [], []>} : vector<4x32xf32>, vector<32x8xf32>, vector<4x8xf32> -> vector<4x8xf32>
    %c0_106 = arith.constant 0 : index
    %c2_107 = arith.constant 2 : index
    %c0_108 = arith.constant 0 : index
    %c0_109 = arith.constant 0 : index
    %122 = vector.load %arg11[%c0_106, %c2_107, %c0_108, %c0_109] : memref<2x4x1x8xf32, #tpu.memory_space<vmem>>, vector<1x1x1x8xf32>
    %123 = vector.shape_cast %122 : vector<1x1x1x8xf32> to vector<1x8xf32>
    %124 = vector.broadcast %123 : vector<1x8xf32> to vector<4x8xf32>
    %125 = arith.addf %121, %124 : vector<4x8xf32>
    %c0_110 = arith.constant 0 : index
    %c2_111 = arith.constant 2 : index
    %c0_112 = arith.constant 0 : index
    %c0_113 = arith.constant 0 : index
    %126 = vector.load %arg12[%c0_110, %c2_111, %c0_112, %c0_113] : memref<2x4x32x8xf32, #tpu.memory_space<vmem>>, vector<1x1x32x8xf32>
    %127 = vector.shape_cast %126 : vector<1x1x32x8xf32> to vector<32x8xf32>
    %cst_114 = arith.constant dense<0.000000e+00> : vector<4x8xf32>
    %128 = tpu.matmul %34, %127, %cst_114 {dimension_numbers = #tpu.dot_dimension_numbers<[1], [0], [0], [1], [0, 0, 1, 1], [], []>} : vector<4x32xf32>, vector<32x8xf32>, vector<4x8xf32> -> vector<4x8xf32>
    %c0_115 = arith.constant 0 : index
    %c2_116 = arith.constant 2 : index
    %c0_117 = arith.constant 0 : index
    %c0_118 = arith.constant 0 : index
    %129 = vector.load %arg13[%c0_115, %c2_116, %c0_117, %c0_118] : memref<2x4x1x8xf32, #tpu.memory_space<vmem>>, vector<1x1x1x8xf32>
    %130 = vector.shape_cast %129 : vector<1x1x1x8xf32> to vector<1x8xf32>
    %131 = vector.broadcast %130 : vector<1x8xf32> to vector<4x8xf32>
    %132 = arith.addf %128, %131 : vector<4x8xf32>
    %cst_119 = arith.constant dense<0.000000e+00> : vector<4x4xf32>
    %133 = tpu.matmul %118, %125, %cst_119 {dimension_numbers = #tpu.dot_dimension_numbers<[1], [1], [0], [0], [0, 0, 1, 0], [], []>} : vector<4x8xf32>, vector<4x8xf32>, vector<4x4xf32> -> vector<4x4xf32>
    %cst_120 = arith.constant 0.353553385 : f32
    %134 = vector.broadcast %cst_120 : f32 to vector<4x4xf32>
    %135 = arith.mulf %133, %134 : vector<4x4xf32>
    %cst_121 = arith.constant dense<0xFF800000> : vector<4xf32>
    %136 = vector.multi_reduction <maximumf>, %135, %cst_121 [1] : vector<4x4xf32> to vector<4xf32>
    %137 = vector.shape_cast %136 : vector<4xf32> to vector<4x1xf32>
    %138 = vector.broadcast %137 : vector<4x1xf32> to vector<4x4xf32>
    %139 = arith.subf %135, %138 : vector<4x4xf32>
    %140 = math.exp %139 : vector<4x4xf32>
    %cst_122 = arith.constant dense<0.000000e+00> : vector<4xf32>
    %141 = vector.multi_reduction <add>, %140, %cst_122 [1] : vector<4x4xf32> to vector<4xf32>
    %142 = vector.shape_cast %141 : vector<4xf32> to vector<4x1xf32>
    %143 = vector.broadcast %142 : vector<4x1xf32> to vector<4x4xf32>
    %144 = arith.divf %140, %143 : vector<4x4xf32>
    %cst_123 = arith.constant dense<0.000000e+00> : vector<4x8xf32>
    %145 = tpu.matmul %144, %132, %cst_123 {dimension_numbers = #tpu.dot_dimension_numbers<[1], [0], [0], [1], [0, 0, 1, 1], [], []>} : vector<4x4xf32>, vector<4x8xf32>, vector<4x8xf32> -> vector<4x8xf32>
    %c0_124 = arith.constant 0 : index
    %c2_125 = arith.constant 2 : index
    %c0_126 = arith.constant 0 : index
    %c0_127 = arith.constant 0 : index
    %146 = vector.load %arg14[%c0_124, %c2_125, %c0_126, %c0_127] : memref<2x4x8x32xf32, #tpu.memory_space<vmem>>, vector<1x1x8x32xf32>
    %147 = vector.shape_cast %146 : vector<1x1x8x32xf32> to vector<8x32xf32>
    %cst_128 = arith.constant dense<0.000000e+00> : vector<4x32xf32>
    %148 = tpu.matmul %145, %147, %cst_128 {dimension_numbers = #tpu.dot_dimension_numbers<[1], [0], [0], [1], [0, 0, 1, 1], [], []>} : vector<4x8xf32>, vector<8x32xf32>, vector<4x32xf32> -> vector<4x32xf32>
    %149 = arith.addf %111, %148 : vector<4x32xf32>
    %c0_129 = arith.constant 0 : index
    %c3 = arith.constant 3 : index
    %c0_130 = arith.constant 0 : index
    %c0_131 = arith.constant 0 : index
    %150 = vector.load %arg8[%c0_129, %c3, %c0_130, %c0_131] : memref<2x4x32x8xf32, #tpu.memory_space<vmem>>, vector<1x1x32x8xf32>
    %151 = vector.shape_cast %150 : vector<1x1x32x8xf32> to vector<32x8xf32>
    %cst_132 = arith.constant dense<0.000000e+00> : vector<4x8xf32>
    %152 = tpu.matmul %34, %151, %cst_132 {dimension_numbers = #tpu.dot_dimension_numbers<[1], [0], [0], [1], [0, 0, 1, 1], [], []>} : vector<4x32xf32>, vector<32x8xf32>, vector<4x8xf32> -> vector<4x8xf32>
    %c0_133 = arith.constant 0 : index
    %c3_134 = arith.constant 3 : index
    %c0_135 = arith.constant 0 : index
    %c0_136 = arith.constant 0 : index
    %153 = vector.load %arg9[%c0_133, %c3_134, %c0_135, %c0_136] : memref<2x4x1x8xf32, #tpu.memory_space<vmem>>, vector<1x1x1x8xf32>
    %154 = vector.shape_cast %153 : vector<1x1x1x8xf32> to vector<1x8xf32>
    %155 = vector.broadcast %154 : vector<1x8xf32> to vector<4x8xf32>
    %156 = arith.addf %152, %155 : vector<4x8xf32>
    %c0_137 = arith.constant 0 : index
    %c3_138 = arith.constant 3 : index
    %c0_139 = arith.constant 0 : index
    %c0_140 = arith.constant 0 : index
    %157 = vector.load %arg10[%c0_137, %c3_138, %c0_139, %c0_140] : memref<2x4x32x8xf32, #tpu.memory_space<vmem>>, vector<1x1x32x8xf32>
    %158 = vector.shape_cast %157 : vector<1x1x32x8xf32> to vector<32x8xf32>
    %cst_141 = arith.constant dense<0.000000e+00> : vector<4x8xf32>
    %159 = tpu.matmul %34, %158, %cst_141 {dimension_numbers = #tpu.dot_dimension_numbers<[1], [0], [0], [1], [0, 0, 1, 1], [], []>} : vector<4x32xf32>, vector<32x8xf32>, vector<4x8xf32> -> vector<4x8xf32>
    %c0_142 = arith.constant 0 : index
    %c3_143 = arith.constant 3 : index
    %c0_144 = arith.constant 0 : index
    %c0_145 = arith.constant 0 : index
    %160 = vector.load %arg11[%c0_142, %c3_143, %c0_144, %c0_145] : memref<2x4x1x8xf32, #tpu.memory_space<vmem>>, vector<1x1x1x8xf32>
    %161 = vector.shape_cast %160 : vector<1x1x1x8xf32> to vector<1x8xf32>
    %162 = vector.broadcast %161 : vector<1x8xf32> to vector<4x8xf32>
    %163 = arith.addf %159, %162 : vector<4x8xf32>
    %c0_146 = arith.constant 0 : index
    %c3_147 = arith.constant 3 : index
    %c0_148 = arith.constant 0 : index
    %c0_149 = arith.constant 0 : index
    %164 = vector.load %arg12[%c0_146, %c3_147, %c0_148, %c0_149] : memref<2x4x32x8xf32, #tpu.memory_space<vmem>>, vector<1x1x32x8xf32>
    %165 = vector.shape_cast %164 : vector<1x1x32x8xf32> to vector<32x8xf32>
    %cst_150 = arith.constant dense<0.000000e+00> : vector<4x8xf32>
    %166 = tpu.matmul %34, %165, %cst_150 {dimension_numbers = #tpu.dot_dimension_numbers<[1], [0], [0], [1], [0, 0, 1, 1], [], []>} : vector<4x32xf32>, vector<32x8xf32>, vector<4x8xf32> -> vector<4x8xf32>
    %c0_151 = arith.constant 0 : index
    %c3_152 = arith.constant 3 : index
    %c0_153 = arith.constant 0 : index
    %c0_154 = arith.constant 0 : index
    %167 = vector.load %arg13[%c0_151, %c3_152, %c0_153, %c0_154] : memref<2x4x1x8xf32, #tpu.memory_space<vmem>>, vector<1x1x1x8xf32>
    %168 = vector.shape_cast %167 : vector<1x1x1x8xf32> to vector<1x8xf32>
    %169 = vector.broadcast %168 : vector<1x8xf32> to vector<4x8xf32>
    %170 = arith.addf %166, %169 : vector<4x8xf32>
    %cst_155 = arith.constant dense<0.000000e+00> : vector<4x4xf32>
    %171 = tpu.matmul %156, %163, %cst_155 {dimension_numbers = #tpu.dot_dimension_numbers<[1], [1], [0], [0], [0, 0, 1, 0], [], []>} : vector<4x8xf32>, vector<4x8xf32>, vector<4x4xf32> -> vector<4x4xf32>
    %cst_156 = arith.constant 0.353553385 : f32
    %172 = vector.broadcast %cst_156 : f32 to vector<4x4xf32>
    %173 = arith.mulf %171, %172 : vector<4x4xf32>
    %cst_157 = arith.constant dense<0xFF800000> : vector<4xf32>
    %174 = vector.multi_reduction <maximumf>, %173, %cst_157 [1] : vector<4x4xf32> to vector<4xf32>
    %175 = vector.shape_cast %174 : vector<4xf32> to vector<4x1xf32>
    %176 = vector.broadcast %175 : vector<4x1xf32> to vector<4x4xf32>
    %177 = arith.subf %173, %176 : vector<4x4xf32>
    %178 = math.exp %177 : vector<4x4xf32>
    %cst_158 = arith.constant dense<0.000000e+00> : vector<4xf32>
    %179 = vector.multi_reduction <add>, %178, %cst_158 [1] : vector<4x4xf32> to vector<4xf32>
    %180 = vector.shape_cast %179 : vector<4xf32> to vector<4x1xf32>
    %181 = vector.broadcast %180 : vector<4x1xf32> to vector<4x4xf32>
    %182 = arith.divf %178, %181 : vector<4x4xf32>
    %cst_159 = arith.constant dense<0.000000e+00> : vector<4x8xf32>
    %183 = tpu.matmul %182, %170, %cst_159 {dimension_numbers = #tpu.dot_dimension_numbers<[1], [0], [0], [1], [0, 0, 1, 1], [], []>} : vector<4x4xf32>, vector<4x8xf32>, vector<4x8xf32> -> vector<4x8xf32>
    %c0_160 = arith.constant 0 : index
    %c3_161 = arith.constant 3 : index
    %c0_162 = arith.constant 0 : index
    %c0_163 = arith.constant 0 : index
    %184 = vector.load %arg14[%c0_160, %c3_161, %c0_162, %c0_163] : memref<2x4x8x32xf32, #tpu.memory_space<vmem>>, vector<1x1x8x32xf32>
    %185 = vector.shape_cast %184 : vector<1x1x8x32xf32> to vector<8x32xf32>
    %cst_164 = arith.constant dense<0.000000e+00> : vector<4x32xf32>
    %186 = tpu.matmul %183, %185, %cst_164 {dimension_numbers = #tpu.dot_dimension_numbers<[1], [0], [0], [1], [0, 0, 1, 1], [], []>} : vector<4x8xf32>, vector<8x32xf32>, vector<4x32xf32> -> vector<4x32xf32>
    %187 = arith.addf %149, %186 : vector<4x32xf32>
    %188 = arith.addf %8, %187 : vector<4x32xf32>
    %c0_165 = arith.constant 0 : index
    %c0_166 = arith.constant 0 : index
    %c0_167 = arith.constant 0 : index
    %189 = vector.load %arg15[%c0_165, %c0_166, %c0_167] : memref<2x1x32xf32, #tpu.memory_space<vmem>>, vector<1x1x32xf32>
    %190 = vector.shape_cast %189 : vector<1x1x32xf32> to vector<1x32xf32>
    %191 = vector.broadcast %190 : vector<1x32xf32> to vector<4x32xf32>
    %192 = arith.addf %188, %191 : vector<4x32xf32>
    %c0_168 = arith.constant 0 : index
    %c0_169 = arith.constant 0 : index
    %c0_170 = arith.constant 0 : index
    %193 = vector.load %arg16[%c0_168, %c0_169, %c0_170] : memref<2x1x32xf32, #tpu.memory_space<vmem>>, vector<1x1x32xf32>
    %194 = vector.shape_cast %193 : vector<1x1x32xf32> to vector<1x32xf32>
    %c0_171 = arith.constant 0 : index
    %c0_172 = arith.constant 0 : index
    %c0_173 = arith.constant 0 : index
    %195 = vector.load %arg17[%c0_171, %c0_172, %c0_173] : memref<2x1x32xf32, #tpu.memory_space<vmem>>, vector<1x1x32xf32>
    %196 = vector.shape_cast %195 : vector<1x1x32xf32> to vector<1x32xf32>
    %cst_174 = arith.constant dense<0.000000e+00> : vector<4xf32>
    %197 = vector.multi_reduction <add>, %192, %cst_174 [1] : vector<4x32xf32> to vector<4xf32>
    %198 = vector.shape_cast %197 : vector<4xf32> to vector<4x1xf32>
    %cst_175 = arith.constant 3.200000e+01 : f32
    %199 = vector.broadcast %cst_175 : f32 to vector<4x1xf32>
    %200 = arith.divf %198, %199 : vector<4x1xf32>
    %201 = vector.broadcast %200 : vector<4x1xf32> to vector<4x32xf32>
    %202 = arith.subf %192, %201 : vector<4x32xf32>
    %203 = arith.mulf %202, %202 : vector<4x32xf32>
    %cst_176 = arith.constant dense<0.000000e+00> : vector<4xf32>
    %204 = vector.multi_reduction <add>, %203, %cst_176 [1] : vector<4x32xf32> to vector<4xf32>
    %205 = vector.shape_cast %204 : vector<4xf32> to vector<4x1xf32>
    %cst_177 = arith.constant 3.200000e+01 : f32
    %206 = vector.broadcast %cst_177 : f32 to vector<4x1xf32>
    %207 = arith.divf %205, %206 : vector<4x1xf32>
    %208 = vector.broadcast %200 : vector<4x1xf32> to vector<4x32xf32>
    %209 = arith.subf %192, %208 : vector<4x32xf32>
    %cst_178 = arith.constant 9.99999997E-7 : f32
    %210 = vector.broadcast %cst_178 : f32 to vector<4x1xf32>
    %211 = arith.addf %207, %210 : vector<4x1xf32>
    %212 = math.rsqrt %211 : vector<4x1xf32>
    %213 = vector.broadcast %212 : vector<4x1xf32> to vector<4x32xf32>
    %214 = arith.mulf %209, %213 : vector<4x32xf32>
    %215 = vector.broadcast %194 : vector<1x32xf32> to vector<4x32xf32>
    %216 = arith.mulf %214, %215 : vector<4x32xf32>
    %217 = vector.broadcast %196 : vector<1x32xf32> to vector<4x32xf32>
    %218 = arith.addf %216, %217 : vector<4x32xf32>
    %c0_179 = arith.constant 0 : index
    %c0_180 = arith.constant 0 : index
    %c0_181 = arith.constant 0 : index
    %219 = vector.load %arg18[%c0_179, %c0_180, %c0_181] : memref<2x32x64xf32, #tpu.memory_space<vmem>>, vector<1x32x64xf32>
    %220 = vector.shape_cast %219 : vector<1x32x64xf32> to vector<32x64xf32>
    %cst_182 = arith.constant dense<0.000000e+00> : vector<4x64xf32>
    %221 = tpu.matmul %218, %220, %cst_182 {dimension_numbers = #tpu.dot_dimension_numbers<[1], [0], [0], [1], [0, 0, 1, 1], [], []>} : vector<4x32xf32>, vector<32x64xf32>, vector<4x64xf32> -> vector<4x64xf32>
    %c0_183 = arith.constant 0 : index
    %c0_184 = arith.constant 0 : index
    %c0_185 = arith.constant 0 : index
    %222 = vector.load %arg19[%c0_183, %c0_184, %c0_185] : memref<2x1x64xf32, #tpu.memory_space<vmem>>, vector<1x1x64xf32>
    %223 = vector.shape_cast %222 : vector<1x1x64xf32> to vector<1x64xf32>
    %224 = vector.broadcast %223 : vector<1x64xf32> to vector<4x64xf32>
    %225 = arith.addf %221, %224 : vector<4x64xf32>
    %226 = arith.mulf %225, %225 : vector<4x64xf32>
    %227 = arith.mulf %225, %226 : vector<4x64xf32>
    %cst_186 = arith.constant 4.471500e-02 : f32
    %228 = vector.broadcast %cst_186 : f32 to vector<4x64xf32>
    %229 = arith.mulf %228, %227 : vector<4x64xf32>
    %230 = arith.addf %225, %229 : vector<4x64xf32>
    %cst_187 = arith.constant 0.797884583 : f32
    %231 = vector.broadcast %cst_187 : f32 to vector<4x64xf32>
    %232 = arith.mulf %231, %230 : vector<4x64xf32>
    %233 = math.tanh %232 : vector<4x64xf32>
    %cst_188 = arith.constant 1.000000e+00 : f32
    %234 = vector.broadcast %cst_188 : f32 to vector<4x64xf32>
    %235 = arith.addf %234, %233 : vector<4x64xf32>
    %cst_189 = arith.constant 5.000000e-01 : f32
    %236 = vector.broadcast %cst_189 : f32 to vector<4x64xf32>
    %237 = arith.mulf %236, %235 : vector<4x64xf32>
    %238 = arith.mulf %225, %237 : vector<4x64xf32>
    %c0_190 = arith.constant 0 : index
    %c0_191 = arith.constant 0 : index
    %c0_192 = arith.constant 0 : index
    %239 = vector.load %arg20[%c0_190, %c0_191, %c0_192] : memref<2x64x32xf32, #tpu.memory_space<vmem>>, vector<1x64x32xf32>
    %240 = vector.shape_cast %239 : vector<1x64x32xf32> to vector<64x32xf32>
    %cst_193 = arith.constant dense<0.000000e+00> : vector<4x32xf32>
    %241 = tpu.matmul %238, %240, %cst_193 {dimension_numbers = #tpu.dot_dimension_numbers<[1], [0], [0], [1], [0, 0, 1, 1], [], []>} : vector<4x64xf32>, vector<64x32xf32>, vector<4x32xf32> -> vector<4x32xf32>
    %c0_194 = arith.constant 0 : index
    %c0_195 = arith.constant 0 : index
    %c0_196 = arith.constant 0 : index
    %242 = vector.load %arg21[%c0_194, %c0_195, %c0_196] : memref<2x1x32xf32, #tpu.memory_space<vmem>>, vector<1x1x32xf32>
    %243 = vector.shape_cast %242 : vector<1x1x32xf32> to vector<1x32xf32>
    %244 = vector.broadcast %243 : vector<1x32xf32> to vector<4x32xf32>
    %245 = arith.addf %241, %244 : vector<4x32xf32>
    %246 = arith.addf %192, %245 : vector<4x32xf32>
    %c1_197 = arith.constant 1 : index
    %c0_198 = arith.constant 0 : index
    %c0_199 = arith.constant 0 : index
    %247 = vector.load %arg6[%c1_197, %c0_198, %c0_199] : memref<2x1x32xf32, #tpu.memory_space<vmem>>, vector<1x1x32xf32>
    %248 = vector.shape_cast %247 : vector<1x1x32xf32> to vector<1x32xf32>
    %c1_200 = arith.constant 1 : index
    %c0_201 = arith.constant 0 : index
    %c0_202 = arith.constant 0 : index
    %249 = vector.load %arg7[%c1_200, %c0_201, %c0_202] : memref<2x1x32xf32, #tpu.memory_space<vmem>>, vector<1x1x32xf32>
    %250 = vector.shape_cast %249 : vector<1x1x32xf32> to vector<1x32xf32>
    %cst_203 = arith.constant dense<0.000000e+00> : vector<4xf32>
    %251 = vector.multi_reduction <add>, %246, %cst_203 [1] : vector<4x32xf32> to vector<4xf32>
    %252 = vector.shape_cast %251 : vector<4xf32> to vector<4x1xf32>
    %cst_204 = arith.constant 3.200000e+01 : f32
    %253 = vector.broadcast %cst_204 : f32 to vector<4x1xf32>
    %254 = arith.divf %252, %253 : vector<4x1xf32>
    %255 = vector.broadcast %254 : vector<4x1xf32> to vector<4x32xf32>
    %256 = arith.subf %246, %255 : vector<4x32xf32>
    %257 = arith.mulf %256, %256 : vector<4x32xf32>
    %cst_205 = arith.constant dense<0.000000e+00> : vector<4xf32>
    %258 = vector.multi_reduction <add>, %257, %cst_205 [1] : vector<4x32xf32> to vector<4xf32>
    %259 = vector.shape_cast %258 : vector<4xf32> to vector<4x1xf32>
    %cst_206 = arith.constant 3.200000e+01 : f32
    %260 = vector.broadcast %cst_206 : f32 to vector<4x1xf32>
    %261 = arith.divf %259, %260 : vector<4x1xf32>
    %262 = vector.broadcast %254 : vector<4x1xf32> to vector<4x32xf32>
    %263 = arith.subf %246, %262 : vector<4x32xf32>
    %cst_207 = arith.constant 9.99999997E-7 : f32
    %264 = vector.broadcast %cst_207 : f32 to vector<4x1xf32>
    %265 = arith.addf %261, %264 : vector<4x1xf32>
    %266 = math.rsqrt %265 : vector<4x1xf32>
    %267 = vector.broadcast %266 : vector<4x1xf32> to vector<4x32xf32>
    %268 = arith.mulf %263, %267 : vector<4x32xf32>
    %269 = vector.broadcast %248 : vector<1x32xf32> to vector<4x32xf32>
    %270 = arith.mulf %268, %269 : vector<4x32xf32>
    %271 = vector.broadcast %250 : vector<1x32xf32> to vector<4x32xf32>
    %272 = arith.addf %270, %271 : vector<4x32xf32>
    %cst_208 = arith.constant 0.000000e+00 : f32
    %273 = vector.broadcast %cst_208 : f32 to vector<4x32xf32>
    %c1_209 = arith.constant 1 : index
    %c0_210 = arith.constant 0 : index
    %c0_211 = arith.constant 0 : index
    %c0_212 = arith.constant 0 : index
    %274 = vector.load %arg8[%c1_209, %c0_210, %c0_211, %c0_212] : memref<2x4x32x8xf32, #tpu.memory_space<vmem>>, vector<1x1x32x8xf32>
    %275 = vector.shape_cast %274 : vector<1x1x32x8xf32> to vector<32x8xf32>
    %cst_213 = arith.constant dense<0.000000e+00> : vector<4x8xf32>
    %276 = tpu.matmul %272, %275, %cst_213 {dimension_numbers = #tpu.dot_dimension_numbers<[1], [0], [0], [1], [0, 0, 1, 1], [], []>} : vector<4x32xf32>, vector<32x8xf32>, vector<4x8xf32> -> vector<4x8xf32>
    %c1_214 = arith.constant 1 : index
    %c0_215 = arith.constant 0 : index
    %c0_216 = arith.constant 0 : index
    %c0_217 = arith.constant 0 : index
    %277 = vector.load %arg9[%c1_214, %c0_215, %c0_216, %c0_217] : memref<2x4x1x8xf32, #tpu.memory_space<vmem>>, vector<1x1x1x8xf32>
    %278 = vector.shape_cast %277 : vector<1x1x1x8xf32> to vector<1x8xf32>
    %279 = vector.broadcast %278 : vector<1x8xf32> to vector<4x8xf32>
    %280 = arith.addf %276, %279 : vector<4x8xf32>
    %c1_218 = arith.constant 1 : index
    %c0_219 = arith.constant 0 : index
    %c0_220 = arith.constant 0 : index
    %c0_221 = arith.constant 0 : index
    %281 = vector.load %arg10[%c1_218, %c0_219, %c0_220, %c0_221] : memref<2x4x32x8xf32, #tpu.memory_space<vmem>>, vector<1x1x32x8xf32>
    %282 = vector.shape_cast %281 : vector<1x1x32x8xf32> to vector<32x8xf32>
    %cst_222 = arith.constant dense<0.000000e+00> : vector<4x8xf32>
    %283 = tpu.matmul %272, %282, %cst_222 {dimension_numbers = #tpu.dot_dimension_numbers<[1], [0], [0], [1], [0, 0, 1, 1], [], []>} : vector<4x32xf32>, vector<32x8xf32>, vector<4x8xf32> -> vector<4x8xf32>
    %c1_223 = arith.constant 1 : index
    %c0_224 = arith.constant 0 : index
    %c0_225 = arith.constant 0 : index
    %c0_226 = arith.constant 0 : index
    %284 = vector.load %arg11[%c1_223, %c0_224, %c0_225, %c0_226] : memref<2x4x1x8xf32, #tpu.memory_space<vmem>>, vector<1x1x1x8xf32>
    %285 = vector.shape_cast %284 : vector<1x1x1x8xf32> to vector<1x8xf32>
    %286 = vector.broadcast %285 : vector<1x8xf32> to vector<4x8xf32>
    %287 = arith.addf %283, %286 : vector<4x8xf32>
    %c1_227 = arith.constant 1 : index
    %c0_228 = arith.constant 0 : index
    %c0_229 = arith.constant 0 : index
    %c0_230 = arith.constant 0 : index
    %288 = vector.load %arg12[%c1_227, %c0_228, %c0_229, %c0_230] : memref<2x4x32x8xf32, #tpu.memory_space<vmem>>, vector<1x1x32x8xf32>
    %289 = vector.shape_cast %288 : vector<1x1x32x8xf32> to vector<32x8xf32>
    %cst_231 = arith.constant dense<0.000000e+00> : vector<4x8xf32>
    %290 = tpu.matmul %272, %289, %cst_231 {dimension_numbers = #tpu.dot_dimension_numbers<[1], [0], [0], [1], [0, 0, 1, 1], [], []>} : vector<4x32xf32>, vector<32x8xf32>, vector<4x8xf32> -> vector<4x8xf32>
    %c1_232 = arith.constant 1 : index
    %c0_233 = arith.constant 0 : index
    %c0_234 = arith.constant 0 : index
    %c0_235 = arith.constant 0 : index
    %291 = vector.load %arg13[%c1_232, %c0_233, %c0_234, %c0_235] : memref<2x4x1x8xf32, #tpu.memory_space<vmem>>, vector<1x1x1x8xf32>
    %292 = vector.shape_cast %291 : vector<1x1x1x8xf32> to vector<1x8xf32>
    %293 = vector.broadcast %292 : vector<1x8xf32> to vector<4x8xf32>
    %294 = arith.addf %290, %293 : vector<4x8xf32>
    %cst_236 = arith.constant dense<0.000000e+00> : vector<4x4xf32>
    %295 = tpu.matmul %280, %287, %cst_236 {dimension_numbers = #tpu.dot_dimension_numbers<[1], [1], [0], [0], [0, 0, 1, 0], [], []>} : vector<4x8xf32>, vector<4x8xf32>, vector<4x4xf32> -> vector<4x4xf32>
    %cst_237 = arith.constant 0.353553385 : f32
    %296 = vector.broadcast %cst_237 : f32 to vector<4x4xf32>
    %297 = arith.mulf %295, %296 : vector<4x4xf32>
    %cst_238 = arith.constant dense<0xFF800000> : vector<4xf32>
    %298 = vector.multi_reduction <maximumf>, %297, %cst_238 [1] : vector<4x4xf32> to vector<4xf32>
    %299 = vector.shape_cast %298 : vector<4xf32> to vector<4x1xf32>
    %300 = vector.broadcast %299 : vector<4x1xf32> to vector<4x4xf32>
    %301 = arith.subf %297, %300 : vector<4x4xf32>
    %302 = math.exp %301 : vector<4x4xf32>
    %cst_239 = arith.constant dense<0.000000e+00> : vector<4xf32>
    %303 = vector.multi_reduction <add>, %302, %cst_239 [1] : vector<4x4xf32> to vector<4xf32>
    %304 = vector.shape_cast %303 : vector<4xf32> to vector<4x1xf32>
    %305 = vector.broadcast %304 : vector<4x1xf32> to vector<4x4xf32>
    %306 = arith.divf %302, %305 : vector<4x4xf32>
    %cst_240 = arith.constant dense<0.000000e+00> : vector<4x8xf32>
    %307 = tpu.matmul %306, %294, %cst_240 {dimension_numbers = #tpu.dot_dimension_numbers<[1], [0], [0], [1], [0, 0, 1, 1], [], []>} : vector<4x4xf32>, vector<4x8xf32>, vector<4x8xf32> -> vector<4x8xf32>
    %c1_241 = arith.constant 1 : index
    %c0_242 = arith.constant 0 : index
    %c0_243 = arith.constant 0 : index
    %c0_244 = arith.constant 0 : index
    %308 = vector.load %arg14[%c1_241, %c0_242, %c0_243, %c0_244] : memref<2x4x8x32xf32, #tpu.memory_space<vmem>>, vector<1x1x8x32xf32>
    %309 = vector.shape_cast %308 : vector<1x1x8x32xf32> to vector<8x32xf32>
    %cst_245 = arith.constant dense<0.000000e+00> : vector<4x32xf32>
    %310 = tpu.matmul %307, %309, %cst_245 {dimension_numbers = #tpu.dot_dimension_numbers<[1], [0], [0], [1], [0, 0, 1, 1], [], []>} : vector<4x8xf32>, vector<8x32xf32>, vector<4x32xf32> -> vector<4x32xf32>
    %311 = arith.addf %273, %310 : vector<4x32xf32>
    %c1_246 = arith.constant 1 : index
    %c1_247 = arith.constant 1 : index
    %c0_248 = arith.constant 0 : index
    %c0_249 = arith.constant 0 : index
    %312 = vector.load %arg8[%c1_246, %c1_247, %c0_248, %c0_249] : memref<2x4x32x8xf32, #tpu.memory_space<vmem>>, vector<1x1x32x8xf32>
    %313 = vector.shape_cast %312 : vector<1x1x32x8xf32> to vector<32x8xf32>
    %cst_250 = arith.constant dense<0.000000e+00> : vector<4x8xf32>
    %314 = tpu.matmul %272, %313, %cst_250 {dimension_numbers = #tpu.dot_dimension_numbers<[1], [0], [0], [1], [0, 0, 1, 1], [], []>} : vector<4x32xf32>, vector<32x8xf32>, vector<4x8xf32> -> vector<4x8xf32>
    %c1_251 = arith.constant 1 : index
    %c1_252 = arith.constant 1 : index
    %c0_253 = arith.constant 0 : index
    %c0_254 = arith.constant 0 : index
    %315 = vector.load %arg9[%c1_251, %c1_252, %c0_253, %c0_254] : memref<2x4x1x8xf32, #tpu.memory_space<vmem>>, vector<1x1x1x8xf32>
    %316 = vector.shape_cast %315 : vector<1x1x1x8xf32> to vector<1x8xf32>
    %317 = vector.broadcast %316 : vector<1x8xf32> to vector<4x8xf32>
    %318 = arith.addf %314, %317 : vector<4x8xf32>
    %c1_255 = arith.constant 1 : index
    %c1_256 = arith.constant 1 : index
    %c0_257 = arith.constant 0 : index
    %c0_258 = arith.constant 0 : index
    %319 = vector.load %arg10[%c1_255, %c1_256, %c0_257, %c0_258] : memref<2x4x32x8xf32, #tpu.memory_space<vmem>>, vector<1x1x32x8xf32>
    %320 = vector.shape_cast %319 : vector<1x1x32x8xf32> to vector<32x8xf32>
    %cst_259 = arith.constant dense<0.000000e+00> : vector<4x8xf32>
    %321 = tpu.matmul %272, %320, %cst_259 {dimension_numbers = #tpu.dot_dimension_numbers<[1], [0], [0], [1], [0, 0, 1, 1], [], []>} : vector<4x32xf32>, vector<32x8xf32>, vector<4x8xf32> -> vector<4x8xf32>
    %c1_260 = arith.constant 1 : index
    %c1_261 = arith.constant 1 : index
    %c0_262 = arith.constant 0 : index
    %c0_263 = arith.constant 0 : index
    %322 = vector.load %arg11[%c1_260, %c1_261, %c0_262, %c0_263] : memref<2x4x1x8xf32, #tpu.memory_space<vmem>>, vector<1x1x1x8xf32>
    %323 = vector.shape_cast %322 : vector<1x1x1x8xf32> to vector<1x8xf32>
    %324 = vector.broadcast %323 : vector<1x8xf32> to vector<4x8xf32>
    %325 = arith.addf %321, %324 : vector<4x8xf32>
    %c1_264 = arith.constant 1 : index
    %c1_265 = arith.constant 1 : index
    %c0_266 = arith.constant 0 : index
    %c0_267 = arith.constant 0 : index
    %326 = vector.load %arg12[%c1_264, %c1_265, %c0_266, %c0_267] : memref<2x4x32x8xf32, #tpu.memory_space<vmem>>, vector<1x1x32x8xf32>
    %327 = vector.shape_cast %326 : vector<1x1x32x8xf32> to vector<32x8xf32>
    %cst_268 = arith.constant dense<0.000000e+00> : vector<4x8xf32>
    %328 = tpu.matmul %272, %327, %cst_268 {dimension_numbers = #tpu.dot_dimension_numbers<[1], [0], [0], [1], [0, 0, 1, 1], [], []>} : vector<4x32xf32>, vector<32x8xf32>, vector<4x8xf32> -> vector<4x8xf32>
    %c1_269 = arith.constant 1 : index
    %c1_270 = arith.constant 1 : index
    %c0_271 = arith.constant 0 : index
    %c0_272 = arith.constant 0 : index
    %329 = vector.load %arg13[%c1_269, %c1_270, %c0_271, %c0_272] : memref<2x4x1x8xf32, #tpu.memory_space<vmem>>, vector<1x1x1x8xf32>
    %330 = vector.shape_cast %329 : vector<1x1x1x8xf32> to vector<1x8xf32>
    %331 = vector.broadcast %330 : vector<1x8xf32> to vector<4x8xf32>
    %332 = arith.addf %328, %331 : vector<4x8xf32>
    %cst_273 = arith.constant dense<0.000000e+00> : vector<4x4xf32>
    %333 = tpu.matmul %318, %325, %cst_273 {dimension_numbers = #tpu.dot_dimension_numbers<[1], [1], [0], [0], [0, 0, 1, 0], [], []>} : vector<4x8xf32>, vector<4x8xf32>, vector<4x4xf32> -> vector<4x4xf32>
    %cst_274 = arith.constant 0.353553385 : f32
    %334 = vector.broadcast %cst_274 : f32 to vector<4x4xf32>
    %335 = arith.mulf %333, %334 : vector<4x4xf32>
    %cst_275 = arith.constant dense<0xFF800000> : vector<4xf32>
    %336 = vector.multi_reduction <maximumf>, %335, %cst_275 [1] : vector<4x4xf32> to vector<4xf32>
    %337 = vector.shape_cast %336 : vector<4xf32> to vector<4x1xf32>
    %338 = vector.broadcast %337 : vector<4x1xf32> to vector<4x4xf32>
    %339 = arith.subf %335, %338 : vector<4x4xf32>
    %340 = math.exp %339 : vector<4x4xf32>
    %cst_276 = arith.constant dense<0.000000e+00> : vector<4xf32>
    %341 = vector.multi_reduction <add>, %340, %cst_276 [1] : vector<4x4xf32> to vector<4xf32>
    %342 = vector.shape_cast %341 : vector<4xf32> to vector<4x1xf32>
    %343 = vector.broadcast %342 : vector<4x1xf32> to vector<4x4xf32>
    %344 = arith.divf %340, %343 : vector<4x4xf32>
    %cst_277 = arith.constant dense<0.000000e+00> : vector<4x8xf32>
    %345 = tpu.matmul %344, %332, %cst_277 {dimension_numbers = #tpu.dot_dimension_numbers<[1], [0], [0], [1], [0, 0, 1, 1], [], []>} : vector<4x4xf32>, vector<4x8xf32>, vector<4x8xf32> -> vector<4x8xf32>
    %c1_278 = arith.constant 1 : index
    %c1_279 = arith.constant 1 : index
    %c0_280 = arith.constant 0 : index
    %c0_281 = arith.constant 0 : index
    %346 = vector.load %arg14[%c1_278, %c1_279, %c0_280, %c0_281] : memref<2x4x8x32xf32, #tpu.memory_space<vmem>>, vector<1x1x8x32xf32>
    %347 = vector.shape_cast %346 : vector<1x1x8x32xf32> to vector<8x32xf32>
    %cst_282 = arith.constant dense<0.000000e+00> : vector<4x32xf32>
    %348 = tpu.matmul %345, %347, %cst_282 {dimension_numbers = #tpu.dot_dimension_numbers<[1], [0], [0], [1], [0, 0, 1, 1], [], []>} : vector<4x8xf32>, vector<8x32xf32>, vector<4x32xf32> -> vector<4x32xf32>
    %349 = arith.addf %311, %348 : vector<4x32xf32>
    %c1_283 = arith.constant 1 : index
    %c2_284 = arith.constant 2 : index
    %c0_285 = arith.constant 0 : index
    %c0_286 = arith.constant 0 : index
    %350 = vector.load %arg8[%c1_283, %c2_284, %c0_285, %c0_286] : memref<2x4x32x8xf32, #tpu.memory_space<vmem>>, vector<1x1x32x8xf32>
    %351 = vector.shape_cast %350 : vector<1x1x32x8xf32> to vector<32x8xf32>
    %cst_287 = arith.constant dense<0.000000e+00> : vector<4x8xf32>
    %352 = tpu.matmul %272, %351, %cst_287 {dimension_numbers = #tpu.dot_dimension_numbers<[1], [0], [0], [1], [0, 0, 1, 1], [], []>} : vector<4x32xf32>, vector<32x8xf32>, vector<4x8xf32> -> vector<4x8xf32>
    %c1_288 = arith.constant 1 : index
    %c2_289 = arith.constant 2 : index
    %c0_290 = arith.constant 0 : index
    %c0_291 = arith.constant 0 : index
    %353 = vector.load %arg9[%c1_288, %c2_289, %c0_290, %c0_291] : memref<2x4x1x8xf32, #tpu.memory_space<vmem>>, vector<1x1x1x8xf32>
    %354 = vector.shape_cast %353 : vector<1x1x1x8xf32> to vector<1x8xf32>
    %355 = vector.broadcast %354 : vector<1x8xf32> to vector<4x8xf32>
    %356 = arith.addf %352, %355 : vector<4x8xf32>
    %c1_292 = arith.constant 1 : index
    %c2_293 = arith.constant 2 : index
    %c0_294 = arith.constant 0 : index
    %c0_295 = arith.constant 0 : index
    %357 = vector.load %arg10[%c1_292, %c2_293, %c0_294, %c0_295] : memref<2x4x32x8xf32, #tpu.memory_space<vmem>>, vector<1x1x32x8xf32>
    %358 = vector.shape_cast %357 : vector<1x1x32x8xf32> to vector<32x8xf32>
    %cst_296 = arith.constant dense<0.000000e+00> : vector<4x8xf32>
    %359 = tpu.matmul %272, %358, %cst_296 {dimension_numbers = #tpu.dot_dimension_numbers<[1], [0], [0], [1], [0, 0, 1, 1], [], []>} : vector<4x32xf32>, vector<32x8xf32>, vector<4x8xf32> -> vector<4x8xf32>
    %c1_297 = arith.constant 1 : index
    %c2_298 = arith.constant 2 : index
    %c0_299 = arith.constant 0 : index
    %c0_300 = arith.constant 0 : index
    %360 = vector.load %arg11[%c1_297, %c2_298, %c0_299, %c0_300] : memref<2x4x1x8xf32, #tpu.memory_space<vmem>>, vector<1x1x1x8xf32>
    %361 = vector.shape_cast %360 : vector<1x1x1x8xf32> to vector<1x8xf32>
    %362 = vector.broadcast %361 : vector<1x8xf32> to vector<4x8xf32>
    %363 = arith.addf %359, %362 : vector<4x8xf32>
    %c1_301 = arith.constant 1 : index
    %c2_302 = arith.constant 2 : index
    %c0_303 = arith.constant 0 : index
    %c0_304 = arith.constant 0 : index
    %364 = vector.load %arg12[%c1_301, %c2_302, %c0_303, %c0_304] : memref<2x4x32x8xf32, #tpu.memory_space<vmem>>, vector<1x1x32x8xf32>
    %365 = vector.shape_cast %364 : vector<1x1x32x8xf32> to vector<32x8xf32>
    %cst_305 = arith.constant dense<0.000000e+00> : vector<4x8xf32>
    %366 = tpu.matmul %272, %365, %cst_305 {dimension_numbers = #tpu.dot_dimension_numbers<[1], [0], [0], [1], [0, 0, 1, 1], [], []>} : vector<4x32xf32>, vector<32x8xf32>, vector<4x8xf32> -> vector<4x8xf32>
    %c1_306 = arith.constant 1 : index
    %c2_307 = arith.constant 2 : index
    %c0_308 = arith.constant 0 : index
    %c0_309 = arith.constant 0 : index
    %367 = vector.load %arg13[%c1_306, %c2_307, %c0_308, %c0_309] : memref<2x4x1x8xf32, #tpu.memory_space<vmem>>, vector<1x1x1x8xf32>
    %368 = vector.shape_cast %367 : vector<1x1x1x8xf32> to vector<1x8xf32>
    %369 = vector.broadcast %368 : vector<1x8xf32> to vector<4x8xf32>
    %370 = arith.addf %366, %369 : vector<4x8xf32>
    %cst_310 = arith.constant dense<0.000000e+00> : vector<4x4xf32>
    %371 = tpu.matmul %356, %363, %cst_310 {dimension_numbers = #tpu.dot_dimension_numbers<[1], [1], [0], [0], [0, 0, 1, 0], [], []>} : vector<4x8xf32>, vector<4x8xf32>, vector<4x4xf32> -> vector<4x4xf32>
    %cst_311 = arith.constant 0.353553385 : f32
    %372 = vector.broadcast %cst_311 : f32 to vector<4x4xf32>
    %373 = arith.mulf %371, %372 : vector<4x4xf32>
    %cst_312 = arith.constant dense<0xFF800000> : vector<4xf32>
    %374 = vector.multi_reduction <maximumf>, %373, %cst_312 [1] : vector<4x4xf32> to vector<4xf32>
    %375 = vector.shape_cast %374 : vector<4xf32> to vector<4x1xf32>
    %376 = vector.broadcast %375 : vector<4x1xf32> to vector<4x4xf32>
    %377 = arith.subf %373, %376 : vector<4x4xf32>
    %378 = math.exp %377 : vector<4x4xf32>
    %cst_313 = arith.constant dense<0.000000e+00> : vector<4xf32>
    %379 = vector.multi_reduction <add>, %378, %cst_313 [1] : vector<4x4xf32> to vector<4xf32>
    %380 = vector.shape_cast %379 : vector<4xf32> to vector<4x1xf32>
    %381 = vector.broadcast %380 : vector<4x1xf32> to vector<4x4xf32>
    %382 = arith.divf %378, %381 : vector<4x4xf32>
    %cst_314 = arith.constant dense<0.000000e+00> : vector<4x8xf32>
    %383 = tpu.matmul %382, %370, %cst_314 {dimension_numbers = #tpu.dot_dimension_numbers<[1], [0], [0], [1], [0, 0, 1, 1], [], []>} : vector<4x4xf32>, vector<4x8xf32>, vector<4x8xf32> -> vector<4x8xf32>
    %c1_315 = arith.constant 1 : index
    %c2_316 = arith.constant 2 : index
    %c0_317 = arith.constant 0 : index
    %c0_318 = arith.constant 0 : index
    %384 = vector.load %arg14[%c1_315, %c2_316, %c0_317, %c0_318] : memref<2x4x8x32xf32, #tpu.memory_space<vmem>>, vector<1x1x8x32xf32>
    %385 = vector.shape_cast %384 : vector<1x1x8x32xf32> to vector<8x32xf32>
    %cst_319 = arith.constant dense<0.000000e+00> : vector<4x32xf32>
    %386 = tpu.matmul %383, %385, %cst_319 {dimension_numbers = #tpu.dot_dimension_numbers<[1], [0], [0], [1], [0, 0, 1, 1], [], []>} : vector<4x8xf32>, vector<8x32xf32>, vector<4x32xf32> -> vector<4x32xf32>
    %387 = arith.addf %349, %386 : vector<4x32xf32>
    %c1_320 = arith.constant 1 : index
    %c3_321 = arith.constant 3 : index
    %c0_322 = arith.constant 0 : index
    %c0_323 = arith.constant 0 : index
    %388 = vector.load %arg8[%c1_320, %c3_321, %c0_322, %c0_323] : memref<2x4x32x8xf32, #tpu.memory_space<vmem>>, vector<1x1x32x8xf32>
    %389 = vector.shape_cast %388 : vector<1x1x32x8xf32> to vector<32x8xf32>
    %cst_324 = arith.constant dense<0.000000e+00> : vector<4x8xf32>
    %390 = tpu.matmul %272, %389, %cst_324 {dimension_numbers = #tpu.dot_dimension_numbers<[1], [0], [0], [1], [0, 0, 1, 1], [], []>} : vector<4x32xf32>, vector<32x8xf32>, vector<4x8xf32> -> vector<4x8xf32>
    %c1_325 = arith.constant 1 : index
    %c3_326 = arith.constant 3 : index
    %c0_327 = arith.constant 0 : index
    %c0_328 = arith.constant 0 : index
    %391 = vector.load %arg9[%c1_325, %c3_326, %c0_327, %c0_328] : memref<2x4x1x8xf32, #tpu.memory_space<vmem>>, vector<1x1x1x8xf32>
    %392 = vector.shape_cast %391 : vector<1x1x1x8xf32> to vector<1x8xf32>
    %393 = vector.broadcast %392 : vector<1x8xf32> to vector<4x8xf32>
    %394 = arith.addf %390, %393 : vector<4x8xf32>
    %c1_329 = arith.constant 1 : index
    %c3_330 = arith.constant 3 : index
    %c0_331 = arith.constant 0 : index
    %c0_332 = arith.constant 0 : index
    %395 = vector.load %arg10[%c1_329, %c3_330, %c0_331, %c0_332] : memref<2x4x32x8xf32, #tpu.memory_space<vmem>>, vector<1x1x32x8xf32>
    %396 = vector.shape_cast %395 : vector<1x1x32x8xf32> to vector<32x8xf32>
    %cst_333 = arith.constant dense<0.000000e+00> : vector<4x8xf32>
    %397 = tpu.matmul %272, %396, %cst_333 {dimension_numbers = #tpu.dot_dimension_numbers<[1], [0], [0], [1], [0, 0, 1, 1], [], []>} : vector<4x32xf32>, vector<32x8xf32>, vector<4x8xf32> -> vector<4x8xf32>
    %c1_334 = arith.constant 1 : index
    %c3_335 = arith.constant 3 : index
    %c0_336 = arith.constant 0 : index
    %c0_337 = arith.constant 0 : index
    %398 = vector.load %arg11[%c1_334, %c3_335, %c0_336, %c0_337] : memref<2x4x1x8xf32, #tpu.memory_space<vmem>>, vector<1x1x1x8xf32>
    %399 = vector.shape_cast %398 : vector<1x1x1x8xf32> to vector<1x8xf32>
    %400 = vector.broadcast %399 : vector<1x8xf32> to vector<4x8xf32>
    %401 = arith.addf %397, %400 : vector<4x8xf32>
    %c1_338 = arith.constant 1 : index
    %c3_339 = arith.constant 3 : index
    %c0_340 = arith.constant 0 : index
    %c0_341 = arith.constant 0 : index
    %402 = vector.load %arg12[%c1_338, %c3_339, %c0_340, %c0_341] : memref<2x4x32x8xf32, #tpu.memory_space<vmem>>, vector<1x1x32x8xf32>
    %403 = vector.shape_cast %402 : vector<1x1x32x8xf32> to vector<32x8xf32>
    %cst_342 = arith.constant dense<0.000000e+00> : vector<4x8xf32>
    %404 = tpu.matmul %272, %403, %cst_342 {dimension_numbers = #tpu.dot_dimension_numbers<[1], [0], [0], [1], [0, 0, 1, 1], [], []>} : vector<4x32xf32>, vector<32x8xf32>, vector<4x8xf32> -> vector<4x8xf32>
    %c1_343 = arith.constant 1 : index
    %c3_344 = arith.constant 3 : index
    %c0_345 = arith.constant 0 : index
    %c0_346 = arith.constant 0 : index
    %405 = vector.load %arg13[%c1_343, %c3_344, %c0_345, %c0_346] : memref<2x4x1x8xf32, #tpu.memory_space<vmem>>, vector<1x1x1x8xf32>
    %406 = vector.shape_cast %405 : vector<1x1x1x8xf32> to vector<1x8xf32>
    %407 = vector.broadcast %406 : vector<1x8xf32> to vector<4x8xf32>
    %408 = arith.addf %404, %407 : vector<4x8xf32>
    %cst_347 = arith.constant dense<0.000000e+00> : vector<4x4xf32>
    %409 = tpu.matmul %394, %401, %cst_347 {dimension_numbers = #tpu.dot_dimension_numbers<[1], [1], [0], [0], [0, 0, 1, 0], [], []>} : vector<4x8xf32>, vector<4x8xf32>, vector<4x4xf32> -> vector<4x4xf32>
    %cst_348 = arith.constant 0.353553385 : f32
    %410 = vector.broadcast %cst_348 : f32 to vector<4x4xf32>
    %411 = arith.mulf %409, %410 : vector<4x4xf32>
    %cst_349 = arith.constant dense<0xFF800000> : vector<4xf32>
    %412 = vector.multi_reduction <maximumf>, %411, %cst_349 [1] : vector<4x4xf32> to vector<4xf32>
    %413 = vector.shape_cast %412 : vector<4xf32> to vector<4x1xf32>
    %414 = vector.broadcast %413 : vector<4x1xf32> to vector<4x4xf32>
    %415 = arith.subf %411, %414 : vector<4x4xf32>
    %416 = math.exp %415 : vector<4x4xf32>
    %cst_350 = arith.constant dense<0.000000e+00> : vector<4xf32>
    %417 = vector.multi_reduction <add>, %416, %cst_350 [1] : vector<4x4xf32> to vector<4xf32>
    %418 = vector.shape_cast %417 : vector<4xf32> to vector<4x1xf32>
    %419 = vector.broadcast %418 : vector<4x1xf32> to vector<4x4xf32>
    %420 = arith.divf %416, %419 : vector<4x4xf32>
    %cst_351 = arith.constant dense<0.000000e+00> : vector<4x8xf32>
    %421 = tpu.matmul %420, %408, %cst_351 {dimension_numbers = #tpu.dot_dimension_numbers<[1], [0], [0], [1], [0, 0, 1, 1], [], []>} : vector<4x4xf32>, vector<4x8xf32>, vector<4x8xf32> -> vector<4x8xf32>
    %c1_352 = arith.constant 1 : index
    %c3_353 = arith.constant 3 : index
    %c0_354 = arith.constant 0 : index
    %c0_355 = arith.constant 0 : index
    %422 = vector.load %arg14[%c1_352, %c3_353, %c0_354, %c0_355] : memref<2x4x8x32xf32, #tpu.memory_space<vmem>>, vector<1x1x8x32xf32>
    %423 = vector.shape_cast %422 : vector<1x1x8x32xf32> to vector<8x32xf32>
    %cst_356 = arith.constant dense<0.000000e+00> : vector<4x32xf32>
    %424 = tpu.matmul %421, %423, %cst_356 {dimension_numbers = #tpu.dot_dimension_numbers<[1], [0], [0], [1], [0, 0, 1, 1], [], []>} : vector<4x8xf32>, vector<8x32xf32>, vector<4x32xf32> -> vector<4x32xf32>
    %425 = arith.addf %387, %424 : vector<4x32xf32>
    %426 = arith.addf %246, %425 : vector<4x32xf32>
    %c1_357 = arith.constant 1 : index
    %c0_358 = arith.constant 0 : index
    %c0_359 = arith.constant 0 : index
    %427 = vector.load %arg15[%c1_357, %c0_358, %c0_359] : memref<2x1x32xf32, #tpu.memory_space<vmem>>, vector<1x1x32xf32>
    %428 = vector.shape_cast %427 : vector<1x1x32xf32> to vector<1x32xf32>
    %429 = vector.broadcast %428 : vector<1x32xf32> to vector<4x32xf32>
    %430 = arith.addf %426, %429 : vector<4x32xf32>
    %c1_360 = arith.constant 1 : index
    %c0_361 = arith.constant 0 : index
    %c0_362 = arith.constant 0 : index
    %431 = vector.load %arg16[%c1_360, %c0_361, %c0_362] : memref<2x1x32xf32, #tpu.memory_space<vmem>>, vector<1x1x32xf32>
    %432 = vector.shape_cast %431 : vector<1x1x32xf32> to vector<1x32xf32>
    %c1_363 = arith.constant 1 : index
    %c0_364 = arith.constant 0 : index
    %c0_365 = arith.constant 0 : index
    %433 = vector.load %arg17[%c1_363, %c0_364, %c0_365] : memref<2x1x32xf32, #tpu.memory_space<vmem>>, vector<1x1x32xf32>
    %434 = vector.shape_cast %433 : vector<1x1x32xf32> to vector<1x32xf32>
    %cst_366 = arith.constant dense<0.000000e+00> : vector<4xf32>
    %435 = vector.multi_reduction <add>, %430, %cst_366 [1] : vector<4x32xf32> to vector<4xf32>
    %436 = vector.shape_cast %435 : vector<4xf32> to vector<4x1xf32>
    %cst_367 = arith.constant 3.200000e+01 : f32
    %437 = vector.broadcast %cst_367 : f32 to vector<4x1xf32>
    %438 = arith.divf %436, %437 : vector<4x1xf32>
    %439 = vector.broadcast %438 : vector<4x1xf32> to vector<4x32xf32>
    %440 = arith.subf %430, %439 : vector<4x32xf32>
    %441 = arith.mulf %440, %440 : vector<4x32xf32>
    %cst_368 = arith.constant dense<0.000000e+00> : vector<4xf32>
    %442 = vector.multi_reduction <add>, %441, %cst_368 [1] : vector<4x32xf32> to vector<4xf32>
    %443 = vector.shape_cast %442 : vector<4xf32> to vector<4x1xf32>
    %cst_369 = arith.constant 3.200000e+01 : f32
    %444 = vector.broadcast %cst_369 : f32 to vector<4x1xf32>
    %445 = arith.divf %443, %444 : vector<4x1xf32>
    %446 = vector.broadcast %438 : vector<4x1xf32> to vector<4x32xf32>
    %447 = arith.subf %430, %446 : vector<4x32xf32>
    %cst_370 = arith.constant 9.99999997E-7 : f32
    %448 = vector.broadcast %cst_370 : f32 to vector<4x1xf32>
    %449 = arith.addf %445, %448 : vector<4x1xf32>
    %450 = math.rsqrt %449 : vector<4x1xf32>
    %451 = vector.broadcast %450 : vector<4x1xf32> to vector<4x32xf32>
    %452 = arith.mulf %447, %451 : vector<4x32xf32>
    %453 = vector.broadcast %432 : vector<1x32xf32> to vector<4x32xf32>
    %454 = arith.mulf %452, %453 : vector<4x32xf32>
    %455 = vector.broadcast %434 : vector<1x32xf32> to vector<4x32xf32>
    %456 = arith.addf %454, %455 : vector<4x32xf32>
    %c1_371 = arith.constant 1 : index
    %c0_372 = arith.constant 0 : index
    %c0_373 = arith.constant 0 : index
    %457 = vector.load %arg18[%c1_371, %c0_372, %c0_373] : memref<2x32x64xf32, #tpu.memory_space<vmem>>, vector<1x32x64xf32>
    %458 = vector.shape_cast %457 : vector<1x32x64xf32> to vector<32x64xf32>
    %cst_374 = arith.constant dense<0.000000e+00> : vector<4x64xf32>
    %459 = tpu.matmul %456, %458, %cst_374 {dimension_numbers = #tpu.dot_dimension_numbers<[1], [0], [0], [1], [0, 0, 1, 1], [], []>} : vector<4x32xf32>, vector<32x64xf32>, vector<4x64xf32> -> vector<4x64xf32>
    %c1_375 = arith.constant 1 : index
    %c0_376 = arith.constant 0 : index
    %c0_377 = arith.constant 0 : index
    %460 = vector.load %arg19[%c1_375, %c0_376, %c0_377] : memref<2x1x64xf32, #tpu.memory_space<vmem>>, vector<1x1x64xf32>
    %461 = vector.shape_cast %460 : vector<1x1x64xf32> to vector<1x64xf32>
    %462 = vector.broadcast %461 : vector<1x64xf32> to vector<4x64xf32>
    %463 = arith.addf %459, %462 : vector<4x64xf32>
    %464 = arith.mulf %463, %463 : vector<4x64xf32>
    %465 = arith.mulf %463, %464 : vector<4x64xf32>
    %cst_378 = arith.constant 4.471500e-02 : f32
    %466 = vector.broadcast %cst_378 : f32 to vector<4x64xf32>
    %467 = arith.mulf %466, %465 : vector<4x64xf32>
    %468 = arith.addf %463, %467 : vector<4x64xf32>
    %cst_379 = arith.constant 0.797884583 : f32
    %469 = vector.broadcast %cst_379 : f32 to vector<4x64xf32>
    %470 = arith.mulf %469, %468 : vector<4x64xf32>
    %471 = math.tanh %470 : vector<4x64xf32>
    %cst_380 = arith.constant 1.000000e+00 : f32
    %472 = vector.broadcast %cst_380 : f32 to vector<4x64xf32>
    %473 = arith.addf %472, %471 : vector<4x64xf32>
    %cst_381 = arith.constant 5.000000e-01 : f32
    %474 = vector.broadcast %cst_381 : f32 to vector<4x64xf32>
    %475 = arith.mulf %474, %473 : vector<4x64xf32>
    %476 = arith.mulf %463, %475 : vector<4x64xf32>
    %c1_382 = arith.constant 1 : index
    %c0_383 = arith.constant 0 : index
    %c0_384 = arith.constant 0 : index
    %477 = vector.load %arg20[%c1_382, %c0_383, %c0_384] : memref<2x64x32xf32, #tpu.memory_space<vmem>>, vector<1x64x32xf32>
    %478 = vector.shape_cast %477 : vector<1x64x32xf32> to vector<64x32xf32>
    %cst_385 = arith.constant dense<0.000000e+00> : vector<4x32xf32>
    %479 = tpu.matmul %476, %478, %cst_385 {dimension_numbers = #tpu.dot_dimension_numbers<[1], [0], [0], [1], [0, 0, 1, 1], [], []>} : vector<4x64xf32>, vector<64x32xf32>, vector<4x32xf32> -> vector<4x32xf32>
    %c1_386 = arith.constant 1 : index
    %c0_387 = arith.constant 0 : index
    %c0_388 = arith.constant 0 : index
    %480 = vector.load %arg21[%c1_386, %c0_387, %c0_388] : memref<2x1x32xf32, #tpu.memory_space<vmem>>, vector<1x1x32xf32>
    %481 = vector.shape_cast %480 : vector<1x1x32xf32> to vector<1x32xf32>
    %482 = vector.broadcast %481 : vector<1x32xf32> to vector<4x32xf32>
    %483 = arith.addf %479, %482 : vector<4x32xf32>
    %484 = arith.addf %430, %483 : vector<4x32xf32>
    %c0_389 = arith.constant 0 : index
    %c0_390 = arith.constant 0 : index
    %485 = vector.load %arg22[%c0_389, %c0_390] : memref<1x32xf32, #tpu.memory_space<vmem>>, vector<1x32xf32>
    %c0_391 = arith.constant 0 : index
    %c0_392 = arith.constant 0 : index
    %486 = vector.load %arg23[%c0_391, %c0_392] : memref<1x32xf32, #tpu.memory_space<vmem>>, vector<1x32xf32>
    %cst_393 = arith.constant dense<0.000000e+00> : vector<4xf32>
    %487 = vector.multi_reduction <add>, %484, %cst_393 [1] : vector<4x32xf32> to vector<4xf32>
    %488 = vector.shape_cast %487 : vector<4xf32> to vector<4x1xf32>
    %cst_394 = arith.constant 3.200000e+01 : f32
    %489 = vector.broadcast %cst_394 : f32 to vector<4x1xf32>
    %490 = arith.divf %488, %489 : vector<4x1xf32>
    %491 = vector.broadcast %490 : vector<4x1xf32> to vector<4x32xf32>
    %492 = arith.subf %484, %491 : vector<4x32xf32>
    %493 = arith.mulf %492, %492 : vector<4x32xf32>
    %cst_395 = arith.constant dense<0.000000e+00> : vector<4xf32>
    %494 = vector.multi_reduction <add>, %493, %cst_395 [1] : vector<4x32xf32> to vector<4xf32>
    %495 = vector.shape_cast %494 : vector<4xf32> to vector<4x1xf32>
    %cst_396 = arith.constant 3.200000e+01 : f32
    %496 = vector.broadcast %cst_396 : f32 to vector<4x1xf32>
    %497 = arith.divf %495, %496 : vector<4x1xf32>
    %498 = vector.broadcast %490 : vector<4x1xf32> to vector<4x32xf32>
    %499 = arith.subf %484, %498 : vector<4x32xf32>
    %cst_397 = arith.constant 9.99999997E-7 : f32
    %500 = vector.broadcast %cst_397 : f32 to vector<4x1xf32>
    %501 = arith.addf %497, %500 : vector<4x1xf32>
    %502 = math.rsqrt %501 : vector<4x1xf32>
    %503 = vector.broadcast %502 : vector<4x1xf32> to vector<4x32xf32>
    %504 = arith.mulf %499, %503 : vector<4x32xf32>
    %505 = vector.broadcast %485 : vector<1x32xf32> to vector<4x32xf32>
    %506 = arith.mulf %504, %505 : vector<4x32xf32>
    %507 = vector.broadcast %486 : vector<1x32xf32> to vector<4x32xf32>
    %508 = arith.addf %506, %507 : vector<4x32xf32>
    %c0_398 = arith.constant 0 : index
    %c0_399 = arith.constant 0 : index
    %c0_400 = arith.constant 0 : index
    %509 = vector.load %arg2[%c0_398, %c0_399, %c0_400] : memref<1x4x32xf32, #tpu.memory_space<vmem>>, vector<1x4x32xf32>
    %510 = vector.shape_cast %509 : vector<1x4x32xf32> to vector<4x32xf32>
    %c0_401 = arith.constant 0 : index
    %c0_402 = arith.constant 0 : index
    %511 = vector.load %arg24[%c0_401, %c0_402] : memref<32x32xf32, #tpu.memory_space<vmem>>, vector<32x32xf32>
    %cst_403 = arith.constant dense<0.000000e+00> : vector<4x32xf32>
    %512 = tpu.matmul %510, %511, %cst_403 {dimension_numbers = #tpu.dot_dimension_numbers<[1], [0], [0], [1], [0, 0, 1, 1], [], []>} : vector<4x32xf32>, vector<32x32xf32>, vector<4x32xf32> -> vector<4x32xf32>
    %c0_404 = arith.constant 0 : index
    %c0_405 = arith.constant 0 : index
    %513 = vector.load %arg25[%c0_404, %c0_405] : memref<1x32xf32, #tpu.memory_space<vmem>>, vector<1x32xf32>
    %514 = vector.broadcast %513 : vector<1x32xf32> to vector<4x32xf32>
    %515 = arith.addf %512, %514 : vector<4x32xf32>
    %c0_406 = arith.constant 0 : index
    %c0_407 = arith.constant 0 : index
    %516 = vector.load %arg26[%c0_406, %c0_407] : memref<32x32xf32, #tpu.memory_space<vmem>>, vector<32x32xf32>
    %cst_408 = arith.constant dense<0.000000e+00> : vector<4x32xf32>
    %517 = tpu.matmul %508, %516, %cst_408 {dimension_numbers = #tpu.dot_dimension_numbers<[1], [0], [0], [1], [0, 0, 1, 1], [], []>} : vector<4x32xf32>, vector<32x32xf32>, vector<4x32xf32> -> vector<4x32xf32>
    %c0_409 = arith.constant 0 : index
    %c0_410 = arith.constant 0 : index
    %518 = vector.load %arg27[%c0_409, %c0_410] : memref<1x32xf32, #tpu.memory_space<vmem>>, vector<1x32xf32>
    %519 = vector.broadcast %518 : vector<1x32xf32> to vector<4x32xf32>
    %520 = arith.addf %517, %519 : vector<4x32xf32>
    %c0_411 = arith.constant 0 : index
    %c0_412 = arith.constant 0 : index
    %521 = vector.load %arg28[%c0_411, %c0_412] : memref<32x32xf32, #tpu.memory_space<vmem>>, vector<32x32xf32>
    %cst_413 = arith.constant dense<0.000000e+00> : vector<4x32xf32>
    %522 = tpu.matmul %508, %521, %cst_413 {dimension_numbers = #tpu.dot_dimension_numbers<[1], [0], [0], [1], [0, 0, 1, 1], [], []>} : vector<4x32xf32>, vector<32x32xf32>, vector<4x32xf32> -> vector<4x32xf32>
    %c0_414 = arith.constant 0 : index
    %c0_415 = arith.constant 0 : index
    %523 = vector.load %arg29[%c0_414, %c0_415] : memref<1x32xf32, #tpu.memory_space<vmem>>, vector<1x32xf32>
    %524 = vector.broadcast %523 : vector<1x32xf32> to vector<4x32xf32>
    %525 = arith.addf %522, %524 : vector<4x32xf32>
    %cst_416 = arith.constant dense<0.000000e+00> : vector<4x4xf32>
    %526 = tpu.matmul %515, %520, %cst_416 {dimension_numbers = #tpu.dot_dimension_numbers<[1], [1], [0], [0], [0, 0, 1, 0], [], []>} : vector<4x32xf32>, vector<4x32xf32>, vector<4x4xf32> -> vector<4x4xf32>
    %cst_417 = arith.constant 0.176776692 : f32
    %527 = vector.broadcast %cst_417 : f32 to vector<4x4xf32>
    %528 = arith.mulf %526, %527 : vector<4x4xf32>
    %cst_418 = arith.constant dense<0xFF800000> : vector<4xf32>
    %529 = vector.multi_reduction <maximumf>, %528, %cst_418 [1] : vector<4x4xf32> to vector<4xf32>
    %530 = vector.shape_cast %529 : vector<4xf32> to vector<4x1xf32>
    %531 = vector.broadcast %530 : vector<4x1xf32> to vector<4x4xf32>
    %532 = arith.subf %528, %531 : vector<4x4xf32>
    %533 = math.exp %532 : vector<4x4xf32>
    %cst_419 = arith.constant dense<0.000000e+00> : vector<4xf32>
    %534 = vector.multi_reduction <add>, %533, %cst_419 [1] : vector<4x4xf32> to vector<4xf32>
    %535 = vector.shape_cast %534 : vector<4xf32> to vector<4x1xf32>
    %536 = vector.broadcast %535 : vector<4x1xf32> to vector<4x4xf32>
    %537 = arith.divf %533, %536 : vector<4x4xf32>
    %cst_420 = arith.constant dense<0.000000e+00> : vector<4x32xf32>
    %538 = tpu.matmul %537, %525, %cst_420 {dimension_numbers = #tpu.dot_dimension_numbers<[1], [0], [0], [1], [0, 0, 1, 1], [], []>} : vector<4x4xf32>, vector<4x32xf32>, vector<4x32xf32> -> vector<4x32xf32>
    %c0_421 = arith.constant 0 : index
    %c0_422 = arith.constant 0 : index
    %539 = vector.load %arg30[%c0_421, %c0_422] : memref<32x32xf32, #tpu.memory_space<vmem>>, vector<32x32xf32>
    %cst_423 = arith.constant dense<0.000000e+00> : vector<4x32xf32>
    %540 = tpu.matmul %538, %539, %cst_423 {dimension_numbers = #tpu.dot_dimension_numbers<[1], [0], [0], [1], [0, 0, 1, 1], [], []>} : vector<4x32xf32>, vector<32x32xf32>, vector<4x32xf32> -> vector<4x32xf32>
    %541 = arith.addf %510, %540 : vector<4x32xf32>
    %c0_424 = arith.constant 0 : index
    %c0_425 = arith.constant 0 : index
    %542 = vector.load %arg31[%c0_424, %c0_425] : memref<1x32xf32, #tpu.memory_space<vmem>>, vector<1x32xf32>
    %543 = vector.broadcast %542 : vector<1x32xf32> to vector<4x32xf32>
    %544 = arith.addf %541, %543 : vector<4x32xf32>
    %cst_426 = arith.constant 2.500000e-01 : f32
    %545 = vector.broadcast %cst_426 : f32 to vector<1x4xf32>
    %546 = arith.negf %544 : vector<4x32xf32>
    %547 = math.exp %546 : vector<4x32xf32>
    %cst_427 = arith.constant 1.000000e+00 : f32
    %548 = vector.broadcast %cst_427 : f32 to vector<4x32xf32>
    %549 = arith.addf %548, %547 : vector<4x32xf32>
    %550 = arith.divf %548, %549 : vector<4x32xf32>
    %cst_428 = arith.constant dense<0.000000e+00> : vector<1x32xf32>
    %551 = tpu.matmul %545, %550, %cst_428 {dimension_numbers = #tpu.dot_dimension_numbers<[1], [0], [0], [1], [0, 0, 1, 1], [], []>} : vector<1x4xf32>, vector<4x32xf32>, vector<1x32xf32> -> vector<1x32xf32>
    %c0_429 = arith.constant 0 : index
    %c0_430 = arith.constant 0 : index
    %c0_431 = arith.constant 0 : index
    %552 = vector.load %arg35[%c0_429, %c0_430, %c0_431] : memref<1x1x32xf32, #tpu.memory_space<vmem>>, vector<1x1x32xf32>
    %553 = vector.shape_cast %552 : vector<1x1x32xf32> to vector<1x32xf32>
    %554 = vector.shape_cast %551 : vector<1x32xf32> to vector<1x1x32xf32>
    tpu.vector_store %arg35[%c0_429, %c0_430, %c0_431], %554 {strides = array<i32>} : memref<1x1x32xf32, #tpu.memory_space<vmem>>, vector<1x1x32xf32>,
    %c0_432 = arith.constant 0 : index
    %c0_433 = arith.constant 0 : index
    %555 = vector.load %arg32[%c0_432, %c0_433] : memref<32x32xf32, #tpu.memory_space<vmem>>, vector<32x32xf32>
    %cst_434 = arith.constant dense<0.000000e+00> : vector<4x32xf32>
    %556 = tpu.matmul %508, %555, %cst_434 {dimension_numbers = #tpu.dot_dimension_numbers<[1], [0], [0], [1], [0, 0, 1, 1], [], []>} : vector<4x32xf32>, vector<32x32xf32>, vector<4x32xf32> -> vector<4x32xf32>
    %557 = arith.addf %508, %556 : vector<4x32xf32>
    %c0_435 = arith.constant 0 : index
    %c0_436 = arith.constant 0 : index
    %558 = vector.load %arg33[%c0_435, %c0_436] : memref<1x32xf32, #tpu.memory_space<vmem>>, vector<1x32xf32>
    %559 = vector.broadcast %558 : vector<1x32xf32> to vector<4x32xf32>
    %560 = arith.addf %557, %559 : vector<4x32xf32>
    %cst_437 = arith.constant 0.000000e+00 : f32
    %561 = vector.broadcast %cst_437 : f32 to vector<4x32xf32>
    %562 = arith.maximumf %560, %561 : vector<4x32xf32>
    %c0_438 = arith.constant 0 : index
    %c0_439 = arith.constant 0 : index
    %c0_440 = arith.constant 0 : index
    %563 = vector.load %arg34[%c0_438, %c0_439, %c0_440] : memref<1x4x32xf32, #tpu.memory_space<vmem>>, vector<1x4x32xf32>
    %564 = vector.shape_cast %563 : vector<1x4x32xf32> to vector<4x32xf32>
    %565 = vector.shape_cast %562 : vector<4x32xf32> to vector<1x4x32xf32>
    tpu.vector_store %arg34[%c0_438, %c0_439, %c0_440], %565 {strides = array<i32>} : memref<1x4x32xf32, #tpu.memory_space<vmem>>, vector<1x4x32xf32>,
    return
  }
  func.func @transform_0(%arg0: i32) -> (i32, i32, i32) {
    %c0_i32 = arith.constant 0 : i32
    %c0_i32_0 = arith.constant 0 : i32
    %c0_i32_1 = arith.constant 0 : i32
    return %arg0, %c0_i32, %c0_i32_0 : i32, i32, i32
  }
  func.func @transform_1(%arg0: i32) -> (i32, i32, i32) {
    %c0_i32 = arith.constant 0 : i32
    %c0_i32_0 = arith.constant 0 : i32
    %c0_i32_1 = arith.constant 0 : i32
    return %arg0, %c0_i32, %c0_i32_0 : i32, i32, i32
  }
  func.func @transform_2(%arg0: i32) -> (i32, i32) {
    %c0_i32 = arith.constant 0 : i32
    %c0_i32_0 = arith.constant 0 : i32
    %c0_i32_1 = arith.constant 0 : i32
    return %c0_i32, %c0_i32_0 : i32, i32
  }
  func.func @transform_3(%arg0: i32) -> (i32, i32) {
    %c0_i32 = arith.constant 0 : i32
    %c0_i32_0 = arith.constant 0 : i32
    %c0_i32_1 = arith.constant 0 : i32
    return %c0_i32, %c0_i32_0 : i32, i32
  }
  func.func @transform_4(%arg0: i32) -> (i32, i32) {
    %c0_i32 = arith.constant 0 : i32
    %c0_i32_0 = arith.constant 0 : i32
    %c0_i32_1 = arith.constant 0 : i32
    return %c0_i32, %c0_i32_0 : i32, i32
  }
  func.func @transform_5(%arg0: i32) -> (i32, i32, i32) {
    %c0_i32 = arith.constant 0 : i32
    %c0_i32_0 = arith.constant 0 : i32
    %c0_i32_1 = arith.constant 0 : i32
    %c0_i32_2 = arith.constant 0 : i32
    return %c0_i32, %c0_i32_0, %c0_i32_1 : i32, i32, i32
  }
  func.func @transform_6(%arg0: i32) -> (i32, i32, i32) {
    %c0_i32 = arith.constant 0 : i32
    %c0_i32_0 = arith.constant 0 : i32
    %c0_i32_1 = arith.constant 0 : i32
    %c0_i32_2 = arith.constant 0 : i32
    return %c0_i32, %c0_i32_0, %c0_i32_1 : i32, i32, i32
  }
  func.func @transform_7(%arg0: i32) -> (i32, i32, i32, i32) {
    %c0_i32 = arith.constant 0 : i32
    %c0_i32_0 = arith.constant 0 : i32
    %c0_i32_1 = arith.constant 0 : i32
    %c0_i32_2 = arith.constant 0 : i32
    %c0_i32_3 = arith.constant 0 : i32
    return %c0_i32, %c0_i32_0, %c0_i32_1, %c0_i32_2 : i32, i32, i32, i32
  }
  func.func @transform_8(%arg0: i32) -> (i32, i32, i32, i32) {
    %c0_i32 = arith.constant 0 : i32
    %c0_i32_0 = arith.constant 0 : i32
    %c0_i32_1 = arith.constant 0 : i32
    %c0_i32_2 = arith.constant 0 : i32
    %c0_i32_3 = arith.constant 0 : i32
    return %c0_i32, %c0_i32_0, %c0_i32_1, %c0_i32_2 : i32, i32, i32, i32
  }
  func.func @transform_9(%arg0: i32) -> (i32, i32, i32, i32) {
    %c0_i32 = arith.constant 0 : i32
    %c0_i32_0 = arith.constant 0 : i32
    %c0_i32_1 = arith.constant 0 : i32
    %c0_i32_2 = arith.constant 0 : i32
    %c0_i32_3 = arith.constant 0 : i32
    return %c0_i32, %c0_i32_0, %c0_i32_1, %c0_i32_2 : i32, i32, i32, i32
  }
  func.func @transform_10(%arg0: i32) -> (i32, i32, i32, i32) {
    %c0_i32 = arith.constant 0 : i32
    %c0_i32_0 = arith.constant 0 : i32
    %c0_i32_1 = arith.constant 0 : i32
    %c0_i32_2 = arith.constant 0 : i32
    %c0_i32_3 = arith.constant 0 : i32
    return %c0_i32, %c0_i32_0, %c0_i32_1, %c0_i32_2 : i32, i32, i32, i32
  }
  func.func @transform_11(%arg0: i32) -> (i32, i32, i32, i32) {
    %c0_i32 = arith.constant 0 : i32
    %c0_i32_0 = arith.constant 0 : i32
    %c0_i32_1 = arith.constant 0 : i32
    %c0_i32_2 = arith.constant 0 : i32
    %c0_i32_3 = arith.constant 0 : i32
    return %c0_i32, %c0_i32_0, %c0_i32_1, %c0_i32_2 : i32, i32, i32, i32
  }
  func.func @transform_12(%arg0: i32) -> (i32, i32, i32, i32) {
    %c0_i32 = arith.constant 0 : i32
    %c0_i32_0 = arith.constant 0 : i32
    %c0_i32_1 = arith.constant 0 : i32
    %c0_i32_2 = arith.constant 0 : i32
    %c0_i32_3 = arith.constant 0 : i32
    return %c0_i32, %c0_i32_0, %c0_i32_1, %c0_i32_2 : i32, i32, i32, i32
  }
  func.func @transform_13(%arg0: i32) -> (i32, i32, i32, i32) {
    %c0_i32 = arith.constant 0 : i32
    %c0_i32_0 = arith.constant 0 : i32
    %c0_i32_1 = arith.constant 0 : i32
    %c0_i32_2 = arith.constant 0 : i32
    %c0_i32_3 = arith.constant 0 : i32
    return %c0_i32, %c0_i32_0, %c0_i32_1, %c0_i32_2 : i32, i32, i32, i32
  }
  func.func @transform_14(%arg0: i32) -> (i32, i32, i32) {
    %c0_i32 = arith.constant 0 : i32
    %c0_i32_0 = arith.constant 0 : i32
    %c0_i32_1 = arith.constant 0 : i32
    %c0_i32_2 = arith.constant 0 : i32
    return %c0_i32, %c0_i32_0, %c0_i32_1 : i32, i32, i32
  }
  func.func @transform_15(%arg0: i32) -> (i32, i32, i32) {
    %c0_i32 = arith.constant 0 : i32
    %c0_i32_0 = arith.constant 0 : i32
    %c0_i32_1 = arith.constant 0 : i32
    %c0_i32_2 = arith.constant 0 : i32
    return %c0_i32, %c0_i32_0, %c0_i32_1 : i32, i32, i32
  }
  func.func @transform_16(%arg0: i32) -> (i32, i32, i32) {
    %c0_i32 = arith.constant 0 : i32
    %c0_i32_0 = arith.constant 0 : i32
    %c0_i32_1 = arith.constant 0 : i32
    %c0_i32_2 = arith.constant 0 : i32
    return %c0_i32, %c0_i32_0, %c0_i32_1 : i32, i32, i32
  }
  func.func @transform_17(%arg0: i32) -> (i32, i32, i32) {
    %c0_i32 = arith.constant 0 : i32
    %c0_i32_0 = arith.constant 0 : i32
    %c0_i32_1 = arith.constant 0 : i32
    %c0_i32_2 = arith.constant 0 : i32
    return %c0_i32, %c0_i32_0, %c0_i32_1 : i32, i32, i32
  }
  func.func @transform_18(%arg0: i32) -> (i32, i32, i32) {
    %c0_i32 = arith.constant 0 : i32
    %c0_i32_0 = arith.constant 0 : i32
    %c0_i32_1 = arith.constant 0 : i32
    %c0_i32_2 = arith.constant 0 : i32
    return %c0_i32, %c0_i32_0, %c0_i32_1 : i32, i32, i32
  }
  func.func @transform_19(%arg0: i32) -> (i32, i32, i32) {
    %c0_i32 = arith.constant 0 : i32
    %c0_i32_0 = arith.constant 0 : i32
    %c0_i32_1 = arith.constant 0 : i32
    %c0_i32_2 = arith.constant 0 : i32
    return %c0_i32, %c0_i32_0, %c0_i32_1 : i32, i32, i32
  }
  func.func @transform_20(%arg0: i32) -> (i32, i32, i32) {
    %c0_i32 = arith.constant 0 : i32
    %c0_i32_0 = arith.constant 0 : i32
    %c0_i32_1 = arith.constant 0 : i32
    %c0_i32_2 = arith.constant 0 : i32
    return %c0_i32, %c0_i32_0, %c0_i32_1 : i32, i32, i32
  }
  func.func @transform_21(%arg0: i32) -> (i32, i32) {
    %c0_i32 = arith.constant 0 : i32
    %c0_i32_0 = arith.constant 0 : i32
    %c0_i32_1 = arith.constant 0 : i32
    return %c0_i32, %c0_i32_0 : i32, i32
  }
  func.func @transform_22(%arg0: i32) -> (i32, i32) {
    %c0_i32 = arith.constant 0 : i32
    %c0_i32_0 = arith.constant 0 : i32
    %c0_i32_1 = arith.constant 0 : i32
    return %c0_i32, %c0_i32_0 : i32, i32
  }
  func.func @transform_23(%arg0: i32) -> (i32, i32) {
    %c0_i32 = arith.constant 0 : i32
    %c0_i32_0 = arith.constant 0 : i32
    %c0_i32_1 = arith.constant 0 : i32
    return %c0_i32, %c0_i32_0 : i32, i32
  }
  func.func @transform_24(%arg0: i32) -> (i32, i32) {
    %c0_i32 = arith.constant 0 : i32
    %c0_i32_0 = arith.constant 0 : i32
    %c0_i32_1 = arith.constant 0 : i32
    return %c0_i32, %c0_i32_0 : i32, i32
  }
  func.func @transform_25(%arg0: i32) -> (i32, i32) {
    %c0_i32 = arith.constant 0 : i32
    %c0_i32_0 = arith.constant 0 : i32
    %c0_i32_1 = arith.constant 0 : i32
    return %c0_i32, %c0_i32_0 : i32, i32
  }
  func.func @transform_26(%arg0: i32) -> (i32, i32) {
    %c0_i32 = arith.constant 0 : i32
    %c0_i32_0 = arith.constant 0 : i32
    %c0_i32_1 = arith.constant 0 : i32
    return %c0_i32, %c0_i32_0 : i32, i32
  }
  func.func @transform_27(%arg0: i32) -> (i32, i32) {
    %c0_i32 = arith.constant 0 : i32
    %c0_i32_0 = arith.constant 0 : i32
    %c0_i32_1 = arith.constant 0 : i32
    return %c0_i32, %c0_i32_0 : i32, i32
  }
  func.func @transform_28(%arg0: i32) -> (i32, i32) {
    %c0_i32 = arith.constant 0 : i32
    %c0_i32_0 = arith.constant 0 : i32
    %c0_i32_1 = arith.constant 0 : i32
    return %c0_i32, %c0_i32_0 : i32, i32
  }
  func.func @transform_29(%arg0: i32) -> (i32, i32) {
    %c0_i32 = arith.constant 0 : i32
    %c0_i32_0 = arith.constant 0 : i32
    %c0_i32_1 = arith.constant 0 : i32
    return %c0_i32, %c0_i32_0 : i32, i32
  }
  func.func @transform_30(%arg0: i32) -> (i32, i32) {
    %c0_i32 = arith.constant 0 : i32
    %c0_i32_0 = arith.constant 0 : i32
    %c0_i32_1 = arith.constant 0 : i32
    return %c0_i32, %c0_i32_0 : i32, i32
  }
  func.func @transform_31(%arg0: i32) -> (i32, i32) {
    %c0_i32 = arith.constant 0 : i32
    %c0_i32_0 = arith.constant 0 : i32
    %c0_i32_1 = arith.constant 0 : i32
    return %c0_i32, %c0_i32_0 : i32, i32
  }
  func.func @transform_32(%arg0: i32) -> (i32, i32) {
    %c0_i32 = arith.constant 0 : i32
    %c0_i32_0 = arith.constant 0 : i32
    %c0_i32_1 = arith.constant 0 : i32
    return %c0_i32, %c0_i32_0 : i32, i32
  }
  func.func @transform_33(%arg0: i32) -> (i32, i32, i32) {
    %c0_i32 = arith.constant 0 : i32
    %c0_i32_0 = arith.constant 0 : i32
    %c0_i32_1 = arith.constant 0 : i32
    return %arg0, %c0_i32, %c0_i32_0 : i32, i32, i32
  }
  func.func @transform_34(%arg0: i32) -> (i32, i32, i32) {
    %c0_i32 = arith.constant 0 : i32
    %c0_i32_0 = arith.constant 0 : i32
    %c0_i32_1 = arith.constant 0 : i32
    return %arg0, %c0_i32, %c0_i32_0 : i32, i32, i32
  }
}

module attributes {stable_mosaic.version = 11 : i64} {
  func.func @_conv_kernel(%arg0: i32, %arg1: memref<1x1x4x128xf32, #tpu.memory_space<vmem>>, %arg2: memref<3x128x64xf32, #tpu.memory_space<vmem>>, %arg3: memref<1x64xf32, #tpu.memory_space<vmem>>, %arg4: memref<1x1x64xf32, #tpu.memory_space<vmem>>, %arg5: memref<1x2x64xf32, #tpu.memory_space<vmem>>) attributes {dimension_semantics = [#tpu.dimension_semantics<parallel>], iteration_bounds = array<i64: 2>, scalar_prefetch = 0 : i64, scratch_operands = 0 : i64, tpu.core_type = #tpu.core_type<tc>, window_params = [{transform_indices = @transform_0, window_bounds = array<i64: 1, 1, 4, 128>}, {pipeline_mode = #tpu.pipeline_mode<synchronous>, transform_indices = @transform_1, window_bounds = array<i64: 3, 128, 64>}, {pipeline_mode = #tpu.pipeline_mode<synchronous>, transform_indices = @transform_2, window_bounds = array<i64: 1, 64>}, {transform_indices = @transform_3, window_bounds = array<i64: 1, 1, 64>}, {transform_indices = @transform_4, window_bounds = array<i64: 1, 2, 64>}]} {
    %c0 = arith.constant 0 : index
    %c0_0 = arith.constant 0 : index
    %c0_1 = arith.constant 0 : index
    %c0_2 = arith.constant 0 : index
    %0 = vector.load %arg1[%c0, %c0_0, %c0_1, %c0_2] : memref<1x1x4x128xf32, #tpu.memory_space<vmem>>, vector<1x1x4x128xf32>
    %1 = vector.shape_cast %0 : vector<1x1x4x128xf32> to vector<4x128xf32>
    %2 = vector.extract_strided_slice %1 {offsets = [0, 0], sizes = [2, 128], strides = [1, 1]} : vector<4x128xf32> to vector<2x128xf32>
    %c0_3 = arith.constant 0 : index
    %c0_4 = arith.constant 0 : index
    %c0_5 = arith.constant 0 : index
    %3 = vector.load %arg2[%c0_3, %c0_4, %c0_5] : memref<3x128x64xf32, #tpu.memory_space<vmem>>, vector<1x128x64xf32>
    %4 = vector.shape_cast %3 : vector<1x128x64xf32> to vector<128x64xf32>
    %cst = arith.constant dense<0.000000e+00> : vector<2x64xf32>
    %5 = tpu.matmul %2, %4, %cst {dimension_numbers = #tpu.dot_dimension_numbers<[1], [0], [0], [1], [0, 0, 1, 1], [], []>} : vector<2x128xf32>, vector<128x64xf32>, vector<2x64xf32> -> vector<2x64xf32>
    %6 = vector.extract_strided_slice %1 {offsets = [1, 0], sizes = [2, 128], strides = [1, 1]} : vector<4x128xf32> to vector<2x128xf32>
    %c1 = arith.constant 1 : index
    %c0_6 = arith.constant 0 : index
    %c0_7 = arith.constant 0 : index
    %7 = vector.load %arg2[%c1, %c0_6, %c0_7] : memref<3x128x64xf32, #tpu.memory_space<vmem>>, vector<1x128x64xf32>
    %8 = vector.shape_cast %7 : vector<1x128x64xf32> to vector<128x64xf32>
    %cst_8 = arith.constant dense<0.000000e+00> : vector<2x64xf32>
    %9 = tpu.matmul %6, %8, %cst_8 {dimension_numbers = #tpu.dot_dimension_numbers<[1], [0], [0], [1], [0, 0, 1, 1], [], []>} : vector<2x128xf32>, vector<128x64xf32>, vector<2x64xf32> -> vector<2x64xf32>
    %10 = arith.addf %5, %9 : vector<2x64xf32>
    %11 = vector.extract_strided_slice %1 {offsets = [2, 0], sizes = [2, 128], strides = [1, 1]} : vector<4x128xf32> to vector<2x128xf32>
    %c2 = arith.constant 2 : index
    %c0_9 = arith.constant 0 : index
    %c0_10 = arith.constant 0 : index
    %12 = vector.load %arg2[%c2, %c0_9, %c0_10] : memref<3x128x64xf32, #tpu.memory_space<vmem>>, vector<1x128x64xf32>
    %13 = vector.shape_cast %12 : vector<1x128x64xf32> to vector<128x64xf32>
    %cst_11 = arith.constant dense<0.000000e+00> : vector<2x64xf32>
    %14 = tpu.matmul %11, %13, %cst_11 {dimension_numbers = #tpu.dot_dimension_numbers<[1], [0], [0], [1], [0, 0, 1, 1], [], []>} : vector<2x128xf32>, vector<128x64xf32>, vector<2x64xf32> -> vector<2x64xf32>
    %15 = arith.addf %10, %14 : vector<2x64xf32>
    %c0_12 = arith.constant 0 : index
    %c0_13 = arith.constant 0 : index
    %16 = vector.load %arg3[%c0_12, %c0_13] : memref<1x64xf32, #tpu.memory_space<vmem>>, vector<1x64xf32>
    %17 = vector.broadcast %16 : vector<1x64xf32> to vector<2x64xf32>
    %18 = arith.addf %15, %17 : vector<2x64xf32>
    %cst_14 = arith.constant 0.000000e+00 : f32
    %19 = vector.broadcast %cst_14 : f32 to vector<2x64xf32>
    %20 = arith.maximumf %18, %19 : vector<2x64xf32>
    %c0_15 = arith.constant 0 : index
    %c0_16 = arith.constant 0 : index
    %c0_17 = arith.constant 0 : index
    %21 = vector.load %arg4[%c0_15, %c0_16, %c0_17] : memref<1x1x64xf32, #tpu.memory_space<vmem>>, vector<1x1x64xf32>
    %22 = vector.shape_cast %21 : vector<1x1x64xf32> to vector<1x64xf32>
    %23 = vector.broadcast %22 : vector<1x64xf32> to vector<2x64xf32>
    %24 = arith.mulf %20, %23 : vector<2x64xf32>
    %c0_18 = arith.constant 0 : index
    %c0_19 = arith.constant 0 : index
    %c0_20 = arith.constant 0 : index
    %25 = vector.load %arg5[%c0_18, %c0_19, %c0_20] : memref<1x2x64xf32, #tpu.memory_space<vmem>>, vector<1x2x64xf32>
    %26 = vector.shape_cast %25 : vector<1x2x64xf32> to vector<2x64xf32>
    %27 = vector.shape_cast %24 : vector<2x64xf32> to vector<1x2x64xf32>
    tpu.vector_store %arg5[%c0_18, %c0_19, %c0_20], %27 {strides = array<i32>} : memref<1x2x64xf32, #tpu.memory_space<vmem>>, vector<1x2x64xf32>,
    return
  }
  func.func @transform_0(%arg0: i32) -> (i32, i32, i32, i32) {
    %c0_i32 = arith.constant 0 : i32
    %c0_i32_0 = arith.constant 0 : i32
    %c0_i32_1 = arith.constant 0 : i32
    %c0_i32_2 = arith.constant 0 : i32
    return %arg0, %c0_i32, %c0_i32_0, %c0_i32_1 : i32, i32, i32, i32
  }
  func.func @transform_1(%arg0: i32) -> (i32, i32, i32) {
    %c0_i32 = arith.constant 0 : i32
    %c0_i32_0 = arith.constant 0 : i32
    %c0_i32_1 = arith.constant 0 : i32
    %c0_i32_2 = arith.constant 0 : i32
    return %c0_i32, %c0_i32_0, %c0_i32_1 : i32, i32, i32
  }
  func.func @transform_2(%arg0: i32) -> (i32, i32) {
    %c0_i32 = arith.constant 0 : i32
    %c0_i32_0 = arith.constant 0 : i32
    %c0_i32_1 = arith.constant 0 : i32
    return %c0_i32, %c0_i32_0 : i32, i32
  }
  func.func @transform_3(%arg0: i32) -> (i32, i32, i32) {
    %c0_i32 = arith.constant 0 : i32
    %c0_i32_0 = arith.constant 0 : i32
    %c0_i32_1 = arith.constant 0 : i32
    return %arg0, %c0_i32, %c0_i32_0 : i32, i32, i32
  }
  func.func @transform_4(%arg0: i32) -> (i32, i32, i32) {
    %c0_i32 = arith.constant 0 : i32
    %c0_i32_0 = arith.constant 0 : i32
    %c0_i32_1 = arith.constant 0 : i32
    return %arg0, %c0_i32, %c0_i32_0 : i32, i32, i32
  }
}

module attributes {stable_mosaic.version = 11 : i64} {
  func.func @_conv_kernel(%arg0: i32, %arg1: memref<1x1x6x96xf32, #tpu.memory_space<vmem>>, %arg2: memref<3x96x64xf32, #tpu.memory_space<vmem>>, %arg3: memref<1x64xf32, #tpu.memory_space<vmem>>, %arg4: memref<1x4x64xf32, #tpu.memory_space<vmem>>) attributes {dimension_semantics = [#tpu.dimension_semantics<parallel>], iteration_bounds = array<i64: 2>, scalar_prefetch = 0 : i64, scratch_operands = 0 : i64, tpu.core_type = #tpu.core_type<tc>, window_params = [{transform_indices = @transform_0, window_bounds = array<i64: 1, 1, 6, 96>}, {pipeline_mode = #tpu.pipeline_mode<synchronous>, transform_indices = @transform_1, window_bounds = array<i64: 3, 96, 64>}, {pipeline_mode = #tpu.pipeline_mode<synchronous>, transform_indices = @transform_2, window_bounds = array<i64: 1, 64>}, {transform_indices = @transform_3, window_bounds = array<i64: 1, 4, 64>}]} {
    %c0 = arith.constant 0 : index
    %c0_0 = arith.constant 0 : index
    %c0_1 = arith.constant 0 : index
    %c0_2 = arith.constant 0 : index
    %0 = vector.load %arg1[%c0, %c0_0, %c0_1, %c0_2] : memref<1x1x6x96xf32, #tpu.memory_space<vmem>>, vector<1x1x6x96xf32>
    %1 = vector.shape_cast %0 : vector<1x1x6x96xf32> to vector<6x96xf32>
    %2 = vector.extract_strided_slice %1 {offsets = [0, 0], sizes = [4, 96], strides = [1, 1]} : vector<6x96xf32> to vector<4x96xf32>
    %c0_3 = arith.constant 0 : index
    %c0_4 = arith.constant 0 : index
    %c0_5 = arith.constant 0 : index
    %3 = vector.load %arg2[%c0_3, %c0_4, %c0_5] : memref<3x96x64xf32, #tpu.memory_space<vmem>>, vector<1x96x64xf32>
    %4 = vector.shape_cast %3 : vector<1x96x64xf32> to vector<96x64xf32>
    %cst = arith.constant dense<0.000000e+00> : vector<4x64xf32>
    %5 = tpu.matmul %2, %4, %cst {dimension_numbers = #tpu.dot_dimension_numbers<[1], [0], [0], [1], [0, 0, 1, 1], [], []>} : vector<4x96xf32>, vector<96x64xf32>, vector<4x64xf32> -> vector<4x64xf32>
    %6 = vector.extract_strided_slice %1 {offsets = [1, 0], sizes = [4, 96], strides = [1, 1]} : vector<6x96xf32> to vector<4x96xf32>
    %c1 = arith.constant 1 : index
    %c0_6 = arith.constant 0 : index
    %c0_7 = arith.constant 0 : index
    %7 = vector.load %arg2[%c1, %c0_6, %c0_7] : memref<3x96x64xf32, #tpu.memory_space<vmem>>, vector<1x96x64xf32>
    %8 = vector.shape_cast %7 : vector<1x96x64xf32> to vector<96x64xf32>
    %cst_8 = arith.constant dense<0.000000e+00> : vector<4x64xf32>
    %9 = tpu.matmul %6, %8, %cst_8 {dimension_numbers = #tpu.dot_dimension_numbers<[1], [0], [0], [1], [0, 0, 1, 1], [], []>} : vector<4x96xf32>, vector<96x64xf32>, vector<4x64xf32> -> vector<4x64xf32>
    %10 = arith.addf %5, %9 : vector<4x64xf32>
    %11 = vector.extract_strided_slice %1 {offsets = [2, 0], sizes = [4, 96], strides = [1, 1]} : vector<6x96xf32> to vector<4x96xf32>
    %c2 = arith.constant 2 : index
    %c0_9 = arith.constant 0 : index
    %c0_10 = arith.constant 0 : index
    %12 = vector.load %arg2[%c2, %c0_9, %c0_10] : memref<3x96x64xf32, #tpu.memory_space<vmem>>, vector<1x96x64xf32>
    %13 = vector.shape_cast %12 : vector<1x96x64xf32> to vector<96x64xf32>
    %cst_11 = arith.constant dense<0.000000e+00> : vector<4x64xf32>
    %14 = tpu.matmul %11, %13, %cst_11 {dimension_numbers = #tpu.dot_dimension_numbers<[1], [0], [0], [1], [0, 0, 1, 1], [], []>} : vector<4x96xf32>, vector<96x64xf32>, vector<4x64xf32> -> vector<4x64xf32>
    %15 = arith.addf %10, %14 : vector<4x64xf32>
    %c0_12 = arith.constant 0 : index
    %c0_13 = arith.constant 0 : index
    %16 = vector.load %arg3[%c0_12, %c0_13] : memref<1x64xf32, #tpu.memory_space<vmem>>, vector<1x64xf32>
    %17 = vector.broadcast %16 : vector<1x64xf32> to vector<4x64xf32>
    %18 = arith.addf %15, %17 : vector<4x64xf32>
    %cst_14 = arith.constant 0.000000e+00 : f32
    %19 = vector.broadcast %cst_14 : f32 to vector<4x64xf32>
    %20 = arith.maximumf %18, %19 : vector<4x64xf32>
    %c0_15 = arith.constant 0 : index
    %c0_16 = arith.constant 0 : index
    %c0_17 = arith.constant 0 : index
    %21 = vector.load %arg4[%c0_15, %c0_16, %c0_17] : memref<1x4x64xf32, #tpu.memory_space<vmem>>, vector<1x4x64xf32>
    %22 = vector.shape_cast %21 : vector<1x4x64xf32> to vector<4x64xf32>
    %23 = vector.shape_cast %20 : vector<4x64xf32> to vector<1x4x64xf32>
    tpu.vector_store %arg4[%c0_15, %c0_16, %c0_17], %23 {strides = array<i32>} : memref<1x4x64xf32, #tpu.memory_space<vmem>>, vector<1x4x64xf32>,
    return
  }
  func.func @transform_0(%arg0: i32) -> (i32, i32, i32, i32) {
    %c0_i32 = arith.constant 0 : i32
    %c0_i32_0 = arith.constant 0 : i32
    %c0_i32_1 = arith.constant 0 : i32
    %c0_i32_2 = arith.constant 0 : i32
    return %arg0, %c0_i32, %c0_i32_0, %c0_i32_1 : i32, i32, i32, i32
  }
  func.func @transform_1(%arg0: i32) -> (i32, i32, i32) {
    %c0_i32 = arith.constant 0 : i32
    %c0_i32_0 = arith.constant 0 : i32
    %c0_i32_1 = arith.constant 0 : i32
    %c0_i32_2 = arith.constant 0 : i32
    return %c0_i32, %c0_i32_0, %c0_i32_1 : i32, i32, i32
  }
  func.func @transform_2(%arg0: i32) -> (i32, i32) {
    %c0_i32 = arith.constant 0 : i32
    %c0_i32_0 = arith.constant 0 : i32
    %c0_i32_1 = arith.constant 0 : i32
    return %c0_i32, %c0_i32_0 : i32, i32
  }
  func.func @transform_3(%arg0: i32) -> (i32, i32, i32) {
    %c0_i32 = arith.constant 0 : i32
    %c0_i32_0 = arith.constant 0 : i32
    %c0_i32_1 = arith.constant 0 : i32
    return %arg0, %c0_i32, %c0_i32_0 : i32, i32, i32
  }
}

module attributes {stable_mosaic.version = 11 : i64} {
  func.func @_conv_kernel(%arg0: i32, %arg1: memref<1x1x6x288xf32, #tpu.memory_space<vmem>>, %arg2: memref<3x288x64xf32, #tpu.memory_space<vmem>>, %arg3: memref<1x64xf32, #tpu.memory_space<vmem>>, %arg4: memref<1x4x64xf32, #tpu.memory_space<vmem>>) attributes {dimension_semantics = [#tpu.dimension_semantics<parallel>], iteration_bounds = array<i64: 2>, scalar_prefetch = 0 : i64, scratch_operands = 0 : i64, tpu.core_type = #tpu.core_type<tc>, window_params = [{transform_indices = @transform_0, window_bounds = array<i64: 1, 1, 6, 288>}, {pipeline_mode = #tpu.pipeline_mode<synchronous>, transform_indices = @transform_1, window_bounds = array<i64: 3, 288, 64>}, {pipeline_mode = #tpu.pipeline_mode<synchronous>, transform_indices = @transform_2, window_bounds = array<i64: 1, 64>}, {transform_indices = @transform_3, window_bounds = array<i64: 1, 4, 64>}]} {
    %c0 = arith.constant 0 : index
    %c0_0 = arith.constant 0 : index
    %c0_1 = arith.constant 0 : index
    %c0_2 = arith.constant 0 : index
    %0 = vector.load %arg1[%c0, %c0_0, %c0_1, %c0_2] : memref<1x1x6x288xf32, #tpu.memory_space<vmem>>, vector<1x1x6x288xf32>
    %1 = vector.shape_cast %0 : vector<1x1x6x288xf32> to vector<6x288xf32>
    %2 = vector.extract_strided_slice %1 {offsets = [0, 0], sizes = [4, 288], strides = [1, 1]} : vector<6x288xf32> to vector<4x288xf32>
    %c0_3 = arith.constant 0 : index
    %c0_4 = arith.constant 0 : index
    %c0_5 = arith.constant 0 : index
    %3 = vector.load %arg2[%c0_3, %c0_4, %c0_5] : memref<3x288x64xf32, #tpu.memory_space<vmem>>, vector<1x288x64xf32>
    %4 = vector.shape_cast %3 : vector<1x288x64xf32> to vector<288x64xf32>
    %cst = arith.constant dense<0.000000e+00> : vector<4x64xf32>
    %5 = tpu.matmul %2, %4, %cst {dimension_numbers = #tpu.dot_dimension_numbers<[1], [0], [0], [1], [0, 0, 1, 1], [], []>} : vector<4x288xf32>, vector<288x64xf32>, vector<4x64xf32> -> vector<4x64xf32>
    %6 = vector.extract_strided_slice %1 {offsets = [1, 0], sizes = [4, 288], strides = [1, 1]} : vector<6x288xf32> to vector<4x288xf32>
    %c1 = arith.constant 1 : index
    %c0_6 = arith.constant 0 : index
    %c0_7 = arith.constant 0 : index
    %7 = vector.load %arg2[%c1, %c0_6, %c0_7] : memref<3x288x64xf32, #tpu.memory_space<vmem>>, vector<1x288x64xf32>
    %8 = vector.shape_cast %7 : vector<1x288x64xf32> to vector<288x64xf32>
    %cst_8 = arith.constant dense<0.000000e+00> : vector<4x64xf32>
    %9 = tpu.matmul %6, %8, %cst_8 {dimension_numbers = #tpu.dot_dimension_numbers<[1], [0], [0], [1], [0, 0, 1, 1], [], []>} : vector<4x288xf32>, vector<288x64xf32>, vector<4x64xf32> -> vector<4x64xf32>
    %10 = arith.addf %5, %9 : vector<4x64xf32>
    %11 = vector.extract_strided_slice %1 {offsets = [2, 0], sizes = [4, 288], strides = [1, 1]} : vector<6x288xf32> to vector<4x288xf32>
    %c2 = arith.constant 2 : index
    %c0_9 = arith.constant 0 : index
    %c0_10 = arith.constant 0 : index
    %12 = vector.load %arg2[%c2, %c0_9, %c0_10] : memref<3x288x64xf32, #tpu.memory_space<vmem>>, vector<1x288x64xf32>
    %13 = vector.shape_cast %12 : vector<1x288x64xf32> to vector<288x64xf32>
    %cst_11 = arith.constant dense<0.000000e+00> : vector<4x64xf32>
    %14 = tpu.matmul %11, %13, %cst_11 {dimension_numbers = #tpu.dot_dimension_numbers<[1], [0], [0], [1], [0, 0, 1, 1], [], []>} : vector<4x288xf32>, vector<288x64xf32>, vector<4x64xf32> -> vector<4x64xf32>
    %15 = arith.addf %10, %14 : vector<4x64xf32>
    %c0_12 = arith.constant 0 : index
    %c0_13 = arith.constant 0 : index
    %16 = vector.load %arg3[%c0_12, %c0_13] : memref<1x64xf32, #tpu.memory_space<vmem>>, vector<1x64xf32>
    %17 = vector.broadcast %16 : vector<1x64xf32> to vector<4x64xf32>
    %18 = arith.addf %15, %17 : vector<4x64xf32>
    %cst_14 = arith.constant 0.000000e+00 : f32
    %19 = vector.broadcast %cst_14 : f32 to vector<4x64xf32>
    %20 = arith.maximumf %18, %19 : vector<4x64xf32>
    %c0_15 = arith.constant 0 : index
    %c0_16 = arith.constant 0 : index
    %c0_17 = arith.constant 0 : index
    %21 = vector.load %arg4[%c0_15, %c0_16, %c0_17] : memref<1x4x64xf32, #tpu.memory_space<vmem>>, vector<1x4x64xf32>
    %22 = vector.shape_cast %21 : vector<1x4x64xf32> to vector<4x64xf32>
    %23 = vector.shape_cast %20 : vector<4x64xf32> to vector<1x4x64xf32>
    tpu.vector_store %arg4[%c0_15, %c0_16, %c0_17], %23 {strides = array<i32>} : memref<1x4x64xf32, #tpu.memory_space<vmem>>, vector<1x4x64xf32>,
    return
  }
  func.func @transform_0(%arg0: i32) -> (i32, i32, i32, i32) {
    %c0_i32 = arith.constant 0 : i32
    %c0_i32_0 = arith.constant 0 : i32
    %c0_i32_1 = arith.constant 0 : i32
    %c0_i32_2 = arith.constant 0 : i32
    return %arg0, %c0_i32, %c0_i32_0, %c0_i32_1 : i32, i32, i32, i32
  }
  func.func @transform_1(%arg0: i32) -> (i32, i32, i32) {
    %c0_i32 = arith.constant 0 : i32
    %c0_i32_0 = arith.constant 0 : i32
    %c0_i32_1 = arith.constant 0 : i32
    %c0_i32_2 = arith.constant 0 : i32
    return %c0_i32, %c0_i32_0, %c0_i32_1 : i32, i32, i32
  }
  func.func @transform_2(%arg0: i32) -> (i32, i32) {
    %c0_i32 = arith.constant 0 : i32
    %c0_i32_0 = arith.constant 0 : i32
    %c0_i32_1 = arith.constant 0 : i32
    return %c0_i32, %c0_i32_0 : i32, i32
  }
  func.func @transform_3(%arg0: i32) -> (i32, i32, i32) {
    %c0_i32 = arith.constant 0 : i32
    %c0_i32_0 = arith.constant 0 : i32
    %c0_i32_1 = arith.constant 0 : i32
    return %arg0, %c0_i32, %c0_i32_0 : i32, i32, i32
  }
}

module attributes {stable_mosaic.version = 11 : i64} {
  func.func @_conv_kernel(%arg0: i32, %arg1: memref<1x1x10x240xf32, #tpu.memory_space<vmem>>, %arg2: memref<3x240x64xf32, #tpu.memory_space<vmem>>, %arg3: memref<1x64xf32, #tpu.memory_space<vmem>>, %arg4: memref<1x8x64xf32, #tpu.memory_space<vmem>>) attributes {dimension_semantics = [#tpu.dimension_semantics<parallel>], iteration_bounds = array<i64: 2>, scalar_prefetch = 0 : i64, scratch_operands = 0 : i64, tpu.core_type = #tpu.core_type<tc>, window_params = [{transform_indices = @transform_0, window_bounds = array<i64: 1, 1, 10, 240>}, {pipeline_mode = #tpu.pipeline_mode<synchronous>, transform_indices = @transform_1, window_bounds = array<i64: 3, 240, 64>}, {pipeline_mode = #tpu.pipeline_mode<synchronous>, transform_indices = @transform_2, window_bounds = array<i64: 1, 64>}, {transform_indices = @transform_3, window_bounds = array<i64: 1, 8, 64>}]} {
    %c0 = arith.constant 0 : index
    %c0_0 = arith.constant 0 : index
    %c0_1 = arith.constant 0 : index
    %c0_2 = arith.constant 0 : index
    %0 = vector.load %arg1[%c0, %c0_0, %c0_1, %c0_2] : memref<1x1x10x240xf32, #tpu.memory_space<vmem>>, vector<1x1x10x240xf32>
    %1 = vector.shape_cast %0 : vector<1x1x10x240xf32> to vector<10x240xf32>
    %2 = vector.extract_strided_slice %1 {offsets = [0, 0], sizes = [8, 240], strides = [1, 1]} : vector<10x240xf32> to vector<8x240xf32>
    %c0_3 = arith.constant 0 : index
    %c0_4 = arith.constant 0 : index
    %c0_5 = arith.constant 0 : index
    %3 = vector.load %arg2[%c0_3, %c0_4, %c0_5] : memref<3x240x64xf32, #tpu.memory_space<vmem>>, vector<1x240x64xf32>
    %4 = vector.shape_cast %3 : vector<1x240x64xf32> to vector<240x64xf32>
    %cst = arith.constant dense<0.000000e+00> : vector<8x64xf32>
    %5 = tpu.matmul %2, %4, %cst {dimension_numbers = #tpu.dot_dimension_numbers<[1], [0], [0], [1], [0, 0, 1, 1], [], []>} : vector<8x240xf32>, vector<240x64xf32>, vector<8x64xf32> -> vector<8x64xf32>
    %6 = vector.extract_strided_slice %1 {offsets = [1, 0], sizes = [8, 240], strides = [1, 1]} : vector<10x240xf32> to vector<8x240xf32>
    %c1 = arith.constant 1 : index
    %c0_6 = arith.constant 0 : index
    %c0_7 = arith.constant 0 : index
    %7 = vector.load %arg2[%c1, %c0_6, %c0_7] : memref<3x240x64xf32, #tpu.memory_space<vmem>>, vector<1x240x64xf32>
    %8 = vector.shape_cast %7 : vector<1x240x64xf32> to vector<240x64xf32>
    %cst_8 = arith.constant dense<0.000000e+00> : vector<8x64xf32>
    %9 = tpu.matmul %6, %8, %cst_8 {dimension_numbers = #tpu.dot_dimension_numbers<[1], [0], [0], [1], [0, 0, 1, 1], [], []>} : vector<8x240xf32>, vector<240x64xf32>, vector<8x64xf32> -> vector<8x64xf32>
    %10 = arith.addf %5, %9 : vector<8x64xf32>
    %11 = vector.extract_strided_slice %1 {offsets = [2, 0], sizes = [8, 240], strides = [1, 1]} : vector<10x240xf32> to vector<8x240xf32>
    %c2 = arith.constant 2 : index
    %c0_9 = arith.constant 0 : index
    %c0_10 = arith.constant 0 : index
    %12 = vector.load %arg2[%c2, %c0_9, %c0_10] : memref<3x240x64xf32, #tpu.memory_space<vmem>>, vector<1x240x64xf32>
    %13 = vector.shape_cast %12 : vector<1x240x64xf32> to vector<240x64xf32>
    %cst_11 = arith.constant dense<0.000000e+00> : vector<8x64xf32>
    %14 = tpu.matmul %11, %13, %cst_11 {dimension_numbers = #tpu.dot_dimension_numbers<[1], [0], [0], [1], [0, 0, 1, 1], [], []>} : vector<8x240xf32>, vector<240x64xf32>, vector<8x64xf32> -> vector<8x64xf32>
    %15 = arith.addf %10, %14 : vector<8x64xf32>
    %c0_12 = arith.constant 0 : index
    %c0_13 = arith.constant 0 : index
    %16 = vector.load %arg3[%c0_12, %c0_13] : memref<1x64xf32, #tpu.memory_space<vmem>>, vector<1x64xf32>
    %17 = vector.broadcast %16 : vector<1x64xf32> to vector<8x64xf32>
    %18 = arith.addf %15, %17 : vector<8x64xf32>
    %cst_14 = arith.constant 0.000000e+00 : f32
    %19 = vector.broadcast %cst_14 : f32 to vector<8x64xf32>
    %20 = arith.maximumf %18, %19 : vector<8x64xf32>
    %c0_15 = arith.constant 0 : index
    %c0_16 = arith.constant 0 : index
    %c0_17 = arith.constant 0 : index
    %21 = vector.load %arg4[%c0_15, %c0_16, %c0_17] : memref<1x8x64xf32, #tpu.memory_space<vmem>>, vector<1x8x64xf32>
    %22 = vector.shape_cast %21 : vector<1x8x64xf32> to vector<8x64xf32>
    %23 = vector.shape_cast %20 : vector<8x64xf32> to vector<1x8x64xf32>
    tpu.vector_store %arg4[%c0_15, %c0_16, %c0_17], %23 {strides = array<i32>} : memref<1x8x64xf32, #tpu.memory_space<vmem>>, vector<1x8x64xf32>,
    return
  }
  func.func @transform_0(%arg0: i32) -> (i32, i32, i32, i32) {
    %c0_i32 = arith.constant 0 : i32
    %c0_i32_0 = arith.constant 0 : i32
    %c0_i32_1 = arith.constant 0 : i32
    %c0_i32_2 = arith.constant 0 : i32
    return %arg0, %c0_i32, %c0_i32_0, %c0_i32_1 : i32, i32, i32, i32
  }
  func.func @transform_1(%arg0: i32) -> (i32, i32, i32) {
    %c0_i32 = arith.constant 0 : i32
    %c0_i32_0 = arith.constant 0 : i32
    %c0_i32_1 = arith.constant 0 : i32
    %c0_i32_2 = arith.constant 0 : i32
    return %c0_i32, %c0_i32_0, %c0_i32_1 : i32, i32, i32
  }
  func.func @transform_2(%arg0: i32) -> (i32, i32) {
    %c0_i32 = arith.constant 0 : i32
    %c0_i32_0 = arith.constant 0 : i32
    %c0_i32_1 = arith.constant 0 : i32
    return %c0_i32, %c0_i32_0 : i32, i32
  }
  func.func @transform_3(%arg0: i32) -> (i32, i32, i32) {
    %c0_i32 = arith.constant 0 : i32
    %c0_i32_0 = arith.constant 0 : i32
    %c0_i32_1 = arith.constant 0 : i32
    return %arg0, %c0_i32, %c0_i32_0 : i32, i32, i32
  }
}

module attributes {stable_mosaic.version = 11 : i64} {
  func.func @_conv_kernel(%arg0: i32, %arg1: memref<1x1x10x80xf32, #tpu.memory_space<vmem>>, %arg2: memref<3x80x64xf32, #tpu.memory_space<vmem>>, %arg3: memref<1x64xf32, #tpu.memory_space<vmem>>, %arg4: memref<1x8x64xf32, #tpu.memory_space<vmem>>) attributes {dimension_semantics = [#tpu.dimension_semantics<parallel>], iteration_bounds = array<i64: 2>, scalar_prefetch = 0 : i64, scratch_operands = 0 : i64, tpu.core_type = #tpu.core_type<tc>, window_params = [{transform_indices = @transform_0, window_bounds = array<i64: 1, 1, 10, 80>}, {pipeline_mode = #tpu.pipeline_mode<synchronous>, transform_indices = @transform_1, window_bounds = array<i64: 3, 80, 64>}, {pipeline_mode = #tpu.pipeline_mode<synchronous>, transform_indices = @transform_2, window_bounds = array<i64: 1, 64>}, {transform_indices = @transform_3, window_bounds = array<i64: 1, 8, 64>}]} {
    %c0 = arith.constant 0 : index
    %c0_0 = arith.constant 0 : index
    %c0_1 = arith.constant 0 : index
    %c0_2 = arith.constant 0 : index
    %0 = vector.load %arg1[%c0, %c0_0, %c0_1, %c0_2] : memref<1x1x10x80xf32, #tpu.memory_space<vmem>>, vector<1x1x10x80xf32>
    %1 = vector.shape_cast %0 : vector<1x1x10x80xf32> to vector<10x80xf32>
    %2 = vector.extract_strided_slice %1 {offsets = [0, 0], sizes = [8, 80], strides = [1, 1]} : vector<10x80xf32> to vector<8x80xf32>
    %c0_3 = arith.constant 0 : index
    %c0_4 = arith.constant 0 : index
    %c0_5 = arith.constant 0 : index
    %3 = vector.load %arg2[%c0_3, %c0_4, %c0_5] : memref<3x80x64xf32, #tpu.memory_space<vmem>>, vector<1x80x64xf32>
    %4 = vector.shape_cast %3 : vector<1x80x64xf32> to vector<80x64xf32>
    %cst = arith.constant dense<0.000000e+00> : vector<8x64xf32>
    %5 = tpu.matmul %2, %4, %cst {dimension_numbers = #tpu.dot_dimension_numbers<[1], [0], [0], [1], [0, 0, 1, 1], [], []>} : vector<8x80xf32>, vector<80x64xf32>, vector<8x64xf32> -> vector<8x64xf32>
    %6 = vector.extract_strided_slice %1 {offsets = [1, 0], sizes = [8, 80], strides = [1, 1]} : vector<10x80xf32> to vector<8x80xf32>
    %c1 = arith.constant 1 : index
    %c0_6 = arith.constant 0 : index
    %c0_7 = arith.constant 0 : index
    %7 = vector.load %arg2[%c1, %c0_6, %c0_7] : memref<3x80x64xf32, #tpu.memory_space<vmem>>, vector<1x80x64xf32>
    %8 = vector.shape_cast %7 : vector<1x80x64xf32> to vector<80x64xf32>
    %cst_8 = arith.constant dense<0.000000e+00> : vector<8x64xf32>
    %9 = tpu.matmul %6, %8, %cst_8 {dimension_numbers = #tpu.dot_dimension_numbers<[1], [0], [0], [1], [0, 0, 1, 1], [], []>} : vector<8x80xf32>, vector<80x64xf32>, vector<8x64xf32> -> vector<8x64xf32>
    %10 = arith.addf %5, %9 : vector<8x64xf32>
    %11 = vector.extract_strided_slice %1 {offsets = [2, 0], sizes = [8, 80], strides = [1, 1]} : vector<10x80xf32> to vector<8x80xf32>
    %c2 = arith.constant 2 : index
    %c0_9 = arith.constant 0 : index
    %c0_10 = arith.constant 0 : index
    %12 = vector.load %arg2[%c2, %c0_9, %c0_10] : memref<3x80x64xf32, #tpu.memory_space<vmem>>, vector<1x80x64xf32>
    %13 = vector.shape_cast %12 : vector<1x80x64xf32> to vector<80x64xf32>
    %cst_11 = arith.constant dense<0.000000e+00> : vector<8x64xf32>
    %14 = tpu.matmul %11, %13, %cst_11 {dimension_numbers = #tpu.dot_dimension_numbers<[1], [0], [0], [1], [0, 0, 1, 1], [], []>} : vector<8x80xf32>, vector<80x64xf32>, vector<8x64xf32> -> vector<8x64xf32>
    %15 = arith.addf %10, %14 : vector<8x64xf32>
    %c0_12 = arith.constant 0 : index
    %c0_13 = arith.constant 0 : index
    %16 = vector.load %arg3[%c0_12, %c0_13] : memref<1x64xf32, #tpu.memory_space<vmem>>, vector<1x64xf32>
    %17 = vector.broadcast %16 : vector<1x64xf32> to vector<8x64xf32>
    %18 = arith.addf %15, %17 : vector<8x64xf32>
    %cst_14 = arith.constant 0.000000e+00 : f32
    %19 = vector.broadcast %cst_14 : f32 to vector<8x64xf32>
    %20 = arith.maximumf %18, %19 : vector<8x64xf32>
    %c0_15 = arith.constant 0 : index
    %c0_16 = arith.constant 0 : index
    %c0_17 = arith.constant 0 : index
    %21 = vector.load %arg4[%c0_15, %c0_16, %c0_17] : memref<1x8x64xf32, #tpu.memory_space<vmem>>, vector<1x8x64xf32>
    %22 = vector.shape_cast %21 : vector<1x8x64xf32> to vector<8x64xf32>
    %23 = vector.shape_cast %20 : vector<8x64xf32> to vector<1x8x64xf32>
    tpu.vector_store %arg4[%c0_15, %c0_16, %c0_17], %23 {strides = array<i32>} : memref<1x8x64xf32, #tpu.memory_space<vmem>>, vector<1x8x64xf32>,
    return
  }
  func.func @transform_0(%arg0: i32) -> (i32, i32, i32, i32) {
    %c0_i32 = arith.constant 0 : i32
    %c0_i32_0 = arith.constant 0 : i32
    %c0_i32_1 = arith.constant 0 : i32
    %c0_i32_2 = arith.constant 0 : i32
    return %arg0, %c0_i32, %c0_i32_0, %c0_i32_1 : i32, i32, i32, i32
  }
  func.func @transform_1(%arg0: i32) -> (i32, i32, i32) {
    %c0_i32 = arith.constant 0 : i32
    %c0_i32_0 = arith.constant 0 : i32
    %c0_i32_1 = arith.constant 0 : i32
    %c0_i32_2 = arith.constant 0 : i32
    return %c0_i32, %c0_i32_0, %c0_i32_1 : i32, i32, i32
  }
  func.func @transform_2(%arg0: i32) -> (i32, i32) {
    %c0_i32 = arith.constant 0 : i32
    %c0_i32_0 = arith.constant 0 : i32
    %c0_i32_1 = arith.constant 0 : i32
    return %c0_i32, %c0_i32_0 : i32, i32
  }
  func.func @transform_3(%arg0: i32) -> (i32, i32, i32) {
    %c0_i32 = arith.constant 0 : i32
    %c0_i32_0 = arith.constant 0 : i32
    %c0_i32_1 = arith.constant 0 : i32
    return %arg0, %c0_i32, %c0_i32_0 : i32, i32, i32
  }
}

module attributes {stable_mosaic.version = 11 : i64} {
  func.func @_conv_kernel(%arg0: i32, %arg1: memref<1x1x18x180xf32, #tpu.memory_space<vmem>>, %arg2: memref<3x180x64xf32, #tpu.memory_space<vmem>>, %arg3: memref<1x64xf32, #tpu.memory_space<vmem>>, %arg4: memref<1x16x64xf32, #tpu.memory_space<vmem>>) attributes {dimension_semantics = [#tpu.dimension_semantics<parallel>], iteration_bounds = array<i64: 2>, scalar_prefetch = 0 : i64, scratch_operands = 0 : i64, tpu.core_type = #tpu.core_type<tc>, window_params = [{transform_indices = @transform_0, window_bounds = array<i64: 1, 1, 18, 180>}, {pipeline_mode = #tpu.pipeline_mode<synchronous>, transform_indices = @transform_1, window_bounds = array<i64: 3, 180, 64>}, {pipeline_mode = #tpu.pipeline_mode<synchronous>, transform_indices = @transform_2, window_bounds = array<i64: 1, 64>}, {transform_indices = @transform_3, window_bounds = array<i64: 1, 16, 64>}]} {
    %c0 = arith.constant 0 : index
    %c0_0 = arith.constant 0 : index
    %c0_1 = arith.constant 0 : index
    %c0_2 = arith.constant 0 : index
    %0 = vector.load %arg1[%c0, %c0_0, %c0_1, %c0_2] : memref<1x1x18x180xf32, #tpu.memory_space<vmem>>, vector<1x1x18x180xf32>
    %1 = vector.shape_cast %0 : vector<1x1x18x180xf32> to vector<18x180xf32>
    %2 = vector.extract_strided_slice %1 {offsets = [0, 0], sizes = [16, 180], strides = [1, 1]} : vector<18x180xf32> to vector<16x180xf32>
    %c0_3 = arith.constant 0 : index
    %c0_4 = arith.constant 0 : index
    %c0_5 = arith.constant 0 : index
    %3 = vector.load %arg2[%c0_3, %c0_4, %c0_5] : memref<3x180x64xf32, #tpu.memory_space<vmem>>, vector<1x180x64xf32>
    %4 = vector.shape_cast %3 : vector<1x180x64xf32> to vector<180x64xf32>
    %cst = arith.constant dense<0.000000e+00> : vector<16x64xf32>
    %5 = tpu.matmul %2, %4, %cst {dimension_numbers = #tpu.dot_dimension_numbers<[1], [0], [0], [1], [0, 0, 1, 1], [], []>} : vector<16x180xf32>, vector<180x64xf32>, vector<16x64xf32> -> vector<16x64xf32>
    %6 = vector.extract_strided_slice %1 {offsets = [1, 0], sizes = [16, 180], strides = [1, 1]} : vector<18x180xf32> to vector<16x180xf32>
    %c1 = arith.constant 1 : index
    %c0_6 = arith.constant 0 : index
    %c0_7 = arith.constant 0 : index
    %7 = vector.load %arg2[%c1, %c0_6, %c0_7] : memref<3x180x64xf32, #tpu.memory_space<vmem>>, vector<1x180x64xf32>
    %8 = vector.shape_cast %7 : vector<1x180x64xf32> to vector<180x64xf32>
    %cst_8 = arith.constant dense<0.000000e+00> : vector<16x64xf32>
    %9 = tpu.matmul %6, %8, %cst_8 {dimension_numbers = #tpu.dot_dimension_numbers<[1], [0], [0], [1], [0, 0, 1, 1], [], []>} : vector<16x180xf32>, vector<180x64xf32>, vector<16x64xf32> -> vector<16x64xf32>
    %10 = arith.addf %5, %9 : vector<16x64xf32>
    %11 = vector.extract_strided_slice %1 {offsets = [2, 0], sizes = [16, 180], strides = [1, 1]} : vector<18x180xf32> to vector<16x180xf32>
    %c2 = arith.constant 2 : index
    %c0_9 = arith.constant 0 : index
    %c0_10 = arith.constant 0 : index
    %12 = vector.load %arg2[%c2, %c0_9, %c0_10] : memref<3x180x64xf32, #tpu.memory_space<vmem>>, vector<1x180x64xf32>
    %13 = vector.shape_cast %12 : vector<1x180x64xf32> to vector<180x64xf32>
    %cst_11 = arith.constant dense<0.000000e+00> : vector<16x64xf32>
    %14 = tpu.matmul %11, %13, %cst_11 {dimension_numbers = #tpu.dot_dimension_numbers<[1], [0], [0], [1], [0, 0, 1, 1], [], []>} : vector<16x180xf32>, vector<180x64xf32>, vector<16x64xf32> -> vector<16x64xf32>
    %15 = arith.addf %10, %14 : vector<16x64xf32>
    %c0_12 = arith.constant 0 : index
    %c0_13 = arith.constant 0 : index
    %16 = vector.load %arg3[%c0_12, %c0_13] : memref<1x64xf32, #tpu.memory_space<vmem>>, vector<1x64xf32>
    %17 = vector.broadcast %16 : vector<1x64xf32> to vector<16x64xf32>
    %18 = arith.addf %15, %17 : vector<16x64xf32>
    %cst_14 = arith.constant 0.000000e+00 : f32
    %19 = vector.broadcast %cst_14 : f32 to vector<16x64xf32>
    %20 = arith.maximumf %18, %19 : vector<16x64xf32>
    %c0_15 = arith.constant 0 : index
    %c0_16 = arith.constant 0 : index
    %c0_17 = arith.constant 0 : index
    %21 = vector.load %arg4[%c0_15, %c0_16, %c0_17] : memref<1x16x64xf32, #tpu.memory_space<vmem>>, vector<1x16x64xf32>
    %22 = vector.shape_cast %21 : vector<1x16x64xf32> to vector<16x64xf32>
    %23 = vector.shape_cast %20 : vector<16x64xf32> to vector<1x16x64xf32>
    tpu.vector_store %arg4[%c0_15, %c0_16, %c0_17], %23 {strides = array<i32>} : memref<1x16x64xf32, #tpu.memory_space<vmem>>, vector<1x16x64xf32>,
    return
  }
  func.func @transform_0(%arg0: i32) -> (i32, i32, i32, i32) {
    %c0_i32 = arith.constant 0 : i32
    %c0_i32_0 = arith.constant 0 : i32
    %c0_i32_1 = arith.constant 0 : i32
    %c0_i32_2 = arith.constant 0 : i32
    return %arg0, %c0_i32, %c0_i32_0, %c0_i32_1 : i32, i32, i32, i32
  }
  func.func @transform_1(%arg0: i32) -> (i32, i32, i32) {
    %c0_i32 = arith.constant 0 : i32
    %c0_i32_0 = arith.constant 0 : i32
    %c0_i32_1 = arith.constant 0 : i32
    %c0_i32_2 = arith.constant 0 : i32
    return %c0_i32, %c0_i32_0, %c0_i32_1 : i32, i32, i32
  }
  func.func @transform_2(%arg0: i32) -> (i32, i32) {
    %c0_i32 = arith.constant 0 : i32
    %c0_i32_0 = arith.constant 0 : i32
    %c0_i32_1 = arith.constant 0 : i32
    return %c0_i32, %c0_i32_0 : i32, i32
  }
  func.func @transform_3(%arg0: i32) -> (i32, i32, i32) {
    %c0_i32 = arith.constant 0 : i32
    %c0_i32_0 = arith.constant 0 : i32
    %c0_i32_1 = arith.constant 0 : i32
    return %arg0, %c0_i32, %c0_i32_0 : i32, i32, i32
  }
}

module attributes {stable_mosaic.version = 11 : i64} {
  func.func @_conv_kernel(%arg0: i32, %arg1: memref<1x1x18x72xf32, #tpu.memory_space<vmem>>, %arg2: memref<3x72x64xf32, #tpu.memory_space<vmem>>, %arg3: memref<1x64xf32, #tpu.memory_space<vmem>>, %arg4: memref<1x16x64xf32, #tpu.memory_space<vmem>>) attributes {dimension_semantics = [#tpu.dimension_semantics<parallel>], iteration_bounds = array<i64: 2>, scalar_prefetch = 0 : i64, scratch_operands = 0 : i64, tpu.core_type = #tpu.core_type<tc>, window_params = [{transform_indices = @transform_0, window_bounds = array<i64: 1, 1, 18, 72>}, {pipeline_mode = #tpu.pipeline_mode<synchronous>, transform_indices = @transform_1, window_bounds = array<i64: 3, 72, 64>}, {pipeline_mode = #tpu.pipeline_mode<synchronous>, transform_indices = @transform_2, window_bounds = array<i64: 1, 64>}, {transform_indices = @transform_3, window_bounds = array<i64: 1, 16, 64>}]} {
    %c0 = arith.constant 0 : index
    %c0_0 = arith.constant 0 : index
    %c0_1 = arith.constant 0 : index
    %c0_2 = arith.constant 0 : index
    %0 = vector.load %arg1[%c0, %c0_0, %c0_1, %c0_2] : memref<1x1x18x72xf32, #tpu.memory_space<vmem>>, vector<1x1x18x72xf32>
    %1 = vector.shape_cast %0 : vector<1x1x18x72xf32> to vector<18x72xf32>
    %2 = vector.extract_strided_slice %1 {offsets = [0, 0], sizes = [16, 72], strides = [1, 1]} : vector<18x72xf32> to vector<16x72xf32>
    %c0_3 = arith.constant 0 : index
    %c0_4 = arith.constant 0 : index
    %c0_5 = arith.constant 0 : index
    %3 = vector.load %arg2[%c0_3, %c0_4, %c0_5] : memref<3x72x64xf32, #tpu.memory_space<vmem>>, vector<1x72x64xf32>
    %4 = vector.shape_cast %3 : vector<1x72x64xf32> to vector<72x64xf32>
    %cst = arith.constant dense<0.000000e+00> : vector<16x64xf32>
    %5 = tpu.matmul %2, %4, %cst {dimension_numbers = #tpu.dot_dimension_numbers<[1], [0], [0], [1], [0, 0, 1, 1], [], []>} : vector<16x72xf32>, vector<72x64xf32>, vector<16x64xf32> -> vector<16x64xf32>
    %6 = vector.extract_strided_slice %1 {offsets = [1, 0], sizes = [16, 72], strides = [1, 1]} : vector<18x72xf32> to vector<16x72xf32>
    %c1 = arith.constant 1 : index
    %c0_6 = arith.constant 0 : index
    %c0_7 = arith.constant 0 : index
    %7 = vector.load %arg2[%c1, %c0_6, %c0_7] : memref<3x72x64xf32, #tpu.memory_space<vmem>>, vector<1x72x64xf32>
    %8 = vector.shape_cast %7 : vector<1x72x64xf32> to vector<72x64xf32>
    %cst_8 = arith.constant dense<0.000000e+00> : vector<16x64xf32>
    %9 = tpu.matmul %6, %8, %cst_8 {dimension_numbers = #tpu.dot_dimension_numbers<[1], [0], [0], [1], [0, 0, 1, 1], [], []>} : vector<16x72xf32>, vector<72x64xf32>, vector<16x64xf32> -> vector<16x64xf32>
    %10 = arith.addf %5, %9 : vector<16x64xf32>
    %11 = vector.extract_strided_slice %1 {offsets = [2, 0], sizes = [16, 72], strides = [1, 1]} : vector<18x72xf32> to vector<16x72xf32>
    %c2 = arith.constant 2 : index
    %c0_9 = arith.constant 0 : index
    %c0_10 = arith.constant 0 : index
    %12 = vector.load %arg2[%c2, %c0_9, %c0_10] : memref<3x72x64xf32, #tpu.memory_space<vmem>>, vector<1x72x64xf32>
    %13 = vector.shape_cast %12 : vector<1x72x64xf32> to vector<72x64xf32>
    %cst_11 = arith.constant dense<0.000000e+00> : vector<16x64xf32>
    %14 = tpu.matmul %11, %13, %cst_11 {dimension_numbers = #tpu.dot_dimension_numbers<[1], [0], [0], [1], [0, 0, 1, 1], [], []>} : vector<16x72xf32>, vector<72x64xf32>, vector<16x64xf32> -> vector<16x64xf32>
    %15 = arith.addf %10, %14 : vector<16x64xf32>
    %c0_12 = arith.constant 0 : index
    %c0_13 = arith.constant 0 : index
    %16 = vector.load %arg3[%c0_12, %c0_13] : memref<1x64xf32, #tpu.memory_space<vmem>>, vector<1x64xf32>
    %17 = vector.broadcast %16 : vector<1x64xf32> to vector<16x64xf32>
    %18 = arith.addf %15, %17 : vector<16x64xf32>
    %cst_14 = arith.constant 0.000000e+00 : f32
    %19 = vector.broadcast %cst_14 : f32 to vector<16x64xf32>
    %20 = arith.maximumf %18, %19 : vector<16x64xf32>
    %c0_15 = arith.constant 0 : index
    %c0_16 = arith.constant 0 : index
    %c0_17 = arith.constant 0 : index
    %21 = vector.load %arg4[%c0_15, %c0_16, %c0_17] : memref<1x16x64xf32, #tpu.memory_space<vmem>>, vector<1x16x64xf32>
    %22 = vector.shape_cast %21 : vector<1x16x64xf32> to vector<16x64xf32>
    %23 = vector.shape_cast %20 : vector<16x64xf32> to vector<1x16x64xf32>
    tpu.vector_store %arg4[%c0_15, %c0_16, %c0_17], %23 {strides = array<i32>} : memref<1x16x64xf32, #tpu.memory_space<vmem>>, vector<1x16x64xf32>,
    return
  }
  func.func @transform_0(%arg0: i32) -> (i32, i32, i32, i32) {
    %c0_i32 = arith.constant 0 : i32
    %c0_i32_0 = arith.constant 0 : i32
    %c0_i32_1 = arith.constant 0 : i32
    %c0_i32_2 = arith.constant 0 : i32
    return %arg0, %c0_i32, %c0_i32_0, %c0_i32_1 : i32, i32, i32, i32
  }
  func.func @transform_1(%arg0: i32) -> (i32, i32, i32) {
    %c0_i32 = arith.constant 0 : i32
    %c0_i32_0 = arith.constant 0 : i32
    %c0_i32_1 = arith.constant 0 : i32
    %c0_i32_2 = arith.constant 0 : i32
    return %c0_i32, %c0_i32_0, %c0_i32_1 : i32, i32, i32
  }
  func.func @transform_2(%arg0: i32) -> (i32, i32) {
    %c0_i32 = arith.constant 0 : i32
    %c0_i32_0 = arith.constant 0 : i32
    %c0_i32_1 = arith.constant 0 : i32
    return %c0_i32, %c0_i32_0 : i32, i32
  }
  func.func @transform_3(%arg0: i32) -> (i32, i32, i32) {
    %c0_i32 = arith.constant 0 : i32
    %c0_i32_0 = arith.constant 0 : i32
    %c0_i32_1 = arith.constant 0 : i32
    return %arg0, %c0_i32, %c0_i32_0 : i32, i32, i32
  }
}

module attributes {stable_mosaic.version = 11 : i64} {
  func.func @_conv_kernel(%arg0: i32, %arg1: memref<1x1x34x136xf32, #tpu.memory_space<vmem>>, %arg2: memref<3x136x64xf32, #tpu.memory_space<vmem>>, %arg3: memref<1x64xf32, #tpu.memory_space<vmem>>, %arg4: memref<1x32x64xf32, #tpu.memory_space<vmem>>) attributes {dimension_semantics = [#tpu.dimension_semantics<parallel>], iteration_bounds = array<i64: 2>, scalar_prefetch = 0 : i64, scratch_operands = 0 : i64, tpu.core_type = #tpu.core_type<tc>, window_params = [{transform_indices = @transform_0, window_bounds = array<i64: 1, 1, 34, 136>}, {pipeline_mode = #tpu.pipeline_mode<synchronous>, transform_indices = @transform_1, window_bounds = array<i64: 3, 136, 64>}, {pipeline_mode = #tpu.pipeline_mode<synchronous>, transform_indices = @transform_2, window_bounds = array<i64: 1, 64>}, {transform_indices = @transform_3, window_bounds = array<i64: 1, 32, 64>}]} {
    %c0 = arith.constant 0 : index
    %c0_0 = arith.constant 0 : index
    %c0_1 = arith.constant 0 : index
    %c0_2 = arith.constant 0 : index
    %0 = vector.load %arg1[%c0, %c0_0, %c0_1, %c0_2] : memref<1x1x34x136xf32, #tpu.memory_space<vmem>>, vector<1x1x34x136xf32>
    %1 = vector.shape_cast %0 : vector<1x1x34x136xf32> to vector<34x136xf32>
    %2 = vector.extract_strided_slice %1 {offsets = [0, 0], sizes = [32, 136], strides = [1, 1]} : vector<34x136xf32> to vector<32x136xf32>
    %c0_3 = arith.constant 0 : index
    %c0_4 = arith.constant 0 : index
    %c0_5 = arith.constant 0 : index
    %3 = vector.load %arg2[%c0_3, %c0_4, %c0_5] : memref<3x136x64xf32, #tpu.memory_space<vmem>>, vector<1x136x64xf32>
    %4 = vector.shape_cast %3 : vector<1x136x64xf32> to vector<136x64xf32>
    %cst = arith.constant dense<0.000000e+00> : vector<32x64xf32>
    %5 = tpu.matmul %2, %4, %cst {dimension_numbers = #tpu.dot_dimension_numbers<[1], [0], [0], [1], [0, 0, 1, 1], [], []>} : vector<32x136xf32>, vector<136x64xf32>, vector<32x64xf32> -> vector<32x64xf32>
    %6 = vector.extract_strided_slice %1 {offsets = [1, 0], sizes = [32, 136], strides = [1, 1]} : vector<34x136xf32> to vector<32x136xf32>
    %c1 = arith.constant 1 : index
    %c0_6 = arith.constant 0 : index
    %c0_7 = arith.constant 0 : index
    %7 = vector.load %arg2[%c1, %c0_6, %c0_7] : memref<3x136x64xf32, #tpu.memory_space<vmem>>, vector<1x136x64xf32>
    %8 = vector.shape_cast %7 : vector<1x136x64xf32> to vector<136x64xf32>
    %cst_8 = arith.constant dense<0.000000e+00> : vector<32x64xf32>
    %9 = tpu.matmul %6, %8, %cst_8 {dimension_numbers = #tpu.dot_dimension_numbers<[1], [0], [0], [1], [0, 0, 1, 1], [], []>} : vector<32x136xf32>, vector<136x64xf32>, vector<32x64xf32> -> vector<32x64xf32>
    %10 = arith.addf %5, %9 : vector<32x64xf32>
    %11 = vector.extract_strided_slice %1 {offsets = [2, 0], sizes = [32, 136], strides = [1, 1]} : vector<34x136xf32> to vector<32x136xf32>
    %c2 = arith.constant 2 : index
    %c0_9 = arith.constant 0 : index
    %c0_10 = arith.constant 0 : index
    %12 = vector.load %arg2[%c2, %c0_9, %c0_10] : memref<3x136x64xf32, #tpu.memory_space<vmem>>, vector<1x136x64xf32>
    %13 = vector.shape_cast %12 : vector<1x136x64xf32> to vector<136x64xf32>
    %cst_11 = arith.constant dense<0.000000e+00> : vector<32x64xf32>
    %14 = tpu.matmul %11, %13, %cst_11 {dimension_numbers = #tpu.dot_dimension_numbers<[1], [0], [0], [1], [0, 0, 1, 1], [], []>} : vector<32x136xf32>, vector<136x64xf32>, vector<32x64xf32> -> vector<32x64xf32>
    %15 = arith.addf %10, %14 : vector<32x64xf32>
    %c0_12 = arith.constant 0 : index
    %c0_13 = arith.constant 0 : index
    %16 = vector.load %arg3[%c0_12, %c0_13] : memref<1x64xf32, #tpu.memory_space<vmem>>, vector<1x64xf32>
    %17 = vector.broadcast %16 : vector<1x64xf32> to vector<32x64xf32>
    %18 = arith.addf %15, %17 : vector<32x64xf32>
    %c0_14 = arith.constant 0 : index
    %c0_15 = arith.constant 0 : index
    %c0_16 = arith.constant 0 : index
    %19 = vector.load %arg4[%c0_14, %c0_15, %c0_16] : memref<1x32x64xf32, #tpu.memory_space<vmem>>, vector<1x32x64xf32>
    %20 = vector.shape_cast %19 : vector<1x32x64xf32> to vector<32x64xf32>
    %21 = vector.shape_cast %18 : vector<32x64xf32> to vector<1x32x64xf32>
    tpu.vector_store %arg4[%c0_14, %c0_15, %c0_16], %21 {strides = array<i32>} : memref<1x32x64xf32, #tpu.memory_space<vmem>>, vector<1x32x64xf32>,
    return
  }
  func.func @transform_0(%arg0: i32) -> (i32, i32, i32, i32) {
    %c0_i32 = arith.constant 0 : i32
    %c0_i32_0 = arith.constant 0 : i32
    %c0_i32_1 = arith.constant 0 : i32
    %c0_i32_2 = arith.constant 0 : i32
    return %arg0, %c0_i32, %c0_i32_0, %c0_i32_1 : i32, i32, i32, i32
  }
  func.func @transform_1(%arg0: i32) -> (i32, i32, i32) {
    %c0_i32 = arith.constant 0 : i32
    %c0_i32_0 = arith.constant 0 : i32
    %c0_i32_1 = arith.constant 0 : i32
    %c0_i32_2 = arith.constant 0 : i32
    return %c0_i32, %c0_i32_0, %c0_i32_1 : i32, i32, i32
  }
  func.func @transform_2(%arg0: i32) -> (i32, i32) {
    %c0_i32 = arith.constant 0 : i32
    %c0_i32_0 = arith.constant 0 : i32
    %c0_i32_1 = arith.constant 0 : i32
    return %c0_i32, %c0_i32_0 : i32, i32
  }
  func.func @transform_3(%arg0: i32) -> (i32, i32, i32) {
    %c0_i32 = arith.constant 0 : i32
    %c0_i32_0 = arith.constant 0 : i32
    %c0_i32_1 = arith.constant 0 : i32
    return %arg0, %c0_i32, %c0_i32_0 : i32, i32, i32
  }
}

</mosaic_0001>

<bundles_post_ra>
// kernel: _lambda_.13
= control target key start
LH: loop header
LB: loop body
LE: loop exit
PB: predicated region body
PF: predicated region fallthrough
CT: control target
= control target key end

     0   :  { %s842_s12 = smov 0   ;;  %s1008_s0 = inlined_call_operand.vmem [shape: f32[2,2,17,102], index: 0, kind: input, shape index: {}]   ;;  %s1009_s1 = inlined_call_operand.vmem [shape: f32[3,102,32], index: 1, kind: input, shape index: {}]   ;;  %s1010_s2 = inlined_call_operand.vmem [shape: f32[1,32], index: 2, kind: input, shape index: {}]   ;;  %s1011_s3 = inlined_call_operand.vmem [shape: f32[2,16,32], index: 3, kind: output, shape index: {}]  }
   0x1 LB: > { %s548_s13 = sadd.s32 4294967295, %s820_s12   ;;  %p552_p0 = scmp.ge.s32.totalorder %s820_s12, 1  ;;  %s820_s12 = sphi %s842_s12, %s13_s12  }
   0x2   : > { %p137_p1 = scmp.lt.s32.totalorder %s820_s12, 3 }
   0x4   : > { %p138_p2 = pnand %p552_p0, %p137_p1 }
   0x5   : > { %v177_v0 = vld [vmem:[%s1009_s1] sm:$0xff] (!%p138_p2)  ;;  %v178_v1 = vld [vmem:[%s1009_s1 + $0x8] sm:$0xff] (!%p138_p2)  ;;  %v179_v2 = vld [vmem:[%s1009_s1 + $0x10] sm:$0xff] (!%p138_p2)  ;;  %p161_p3 = scmp.lt.s32.totalorder (!%p138_p2), %s548_s13, 1  ;;  %vm204_vm0 = vcmask (!%p138_p2), 834560   ;;  %vm211_vm1 = vcmask (!%p138_p2), 1045504  }
   0x6   : > { %141 = sbr.rel (%p138_p2) target bundleno = 280 (0x118), region = 32  ;;  %v753_v3 = vpack.c.bf16 (!%p138_p2), %v178_v1, %v177_v0  ;;  %v180_v4 = vld [vmem:[%s1009_s1 + $0x18] sm:$0xff] (!%p138_p2)  ;;  %v181_v6 = vld [vmem:[%s1009_s1 + $0x20] sm:$0xff] (!%p138_p2)  ;;  %v182_v7 = vld [vmem:[%s1009_s1 + $0x28] sm:$0xff] (!%p138_p2)  ;;  %vm389_vm2 = vcmask (!%p138_p2), 1046528   ;;  %vm490_vm3 = vcmask (!%p138_p2), 261120  }
   0x7   : > { %v757_v5 = vpack.c.bf16 (!%p138_p2), %v180_v4, %v179_v2  ;;  %v558_v8 = vld [vmem:[%s1009_s1 + $0x68] sm:$0xff] (!%p138_p2)  ;;  %v559_v9 = vld [vmem:[%s1009_s1 + $0x70] sm:$0xff] (!%p138_p2)  ;;  %v761_v10 = vpack.c.bf16 (!%p138_p2), %v182_v7, %v181_v6  ;;  %v560_v12 = vld [vmem:[%s1009_s1 + $0x78] sm:$0xff] (!%p138_p2) }
   0x8   : > { %754 = vmatprep.subr.bf16.mxu0 (!%p138_p2), %v753_v3  ;;  %v729_v11 = vpack.c.bf16 (!%p138_p2), %v559_v9, %v558_v8  ;;  %v183_v13 = vld [vmem:[%s1009_s1 + $0x30] sm:$0xff] (!%p138_p2)  ;;  %v184_v14 = vld [vmem:[%s1009_s1 + $0x38] sm:$0xff] (!%p138_p2)  ;;  %v561_v15 = vld [vmem:[%s1009_s1 + $0x80] sm:$0xff] (!%p138_p2) }
   0x9   : > { %756 = vmatpush3.bf16.msra.mxu0 (!%p138_p2), %v753_v3  ;;  %v733_v17 = vpack.c.bf16 (!%p138_p2), %v561_v15, %v560_v12  ;;  %v562_v18 = vld [vmem:[%s1009_s1 + $0x88] sm:$0xff] (!%p138_p2)  ;;  %v563_v19 = vld [vmem:[%s1009_s1 + $0x90] sm:$0xff] (!%p138_p2)  ;;  %v765_v20 = vpack.c.bf16 (!%p138_p2), %v184_v14, %v183_v13  ;;  %v185_v21 = vld [vmem:[%s1009_s1 + $0x40] sm:$0xff] (!%p138_p2) }
   0xa   : > { %758 = vmatprep.subr.bf16.mxu0 (!%p138_p2), %v757_v5  ;;  %730 = vmatprep.subr.bf16.mxu1 (!%p138_p2), %v729_v11  ;;  %v737_v22 = vpack.c.bf16 (!%p138_p2), %v563_v19, %v562_v18  ;;  %v186_v23 = vld [vmem:[%s1009_s1 + $0x48] sm:$0xff] (!%p138_p2)  ;;  %v564_v24 = vld [vmem:[%s1009_s1 + $0x98] sm:$0xff] (!%p138_p2)  ;;  %v565_v25 = vld [vmem:[%s1009_s1 + $0xa0] sm:$0xff] (!%p138_p2) }
   0xb   : > { %732 = vmatpush3.bf16.msra.mxu1 (!%p138_p2), %v729_v11  ;;  %v769_v26 = vpack.c.bf16 (!%p138_p2), %v186_v23, %v185_v21  ;;  %v187_v27 = vld [vmem:[%s1009_s1 + $0x50] sm:$0xff] (!%p138_p2)  ;;  %v741_v28 = vpack.c.bf16 (!%p138_p2), %v565_v25, %v564_v24  ;;  %v188_v30 = vld [vmem:[%s1009_s1 + $0x58] sm:$0xff] (!%p138_p2)  ;;  %v566_v31 = vld [vmem:[%s1009_s1 + $0xa8] sm:$0xff] (!%p138_p2) }
   0xc   : > { %734 = vmatprep.subr.bf16.mxu1 (!%p138_p2), %v733_v17  ;;  %v567_v32 = vld [vmem:[%s1009_s1 + $0xb0] sm:$0xff] (!%p138_p2)  ;;  %v773_v33 = vpack.c.bf16 (!%p138_p2), %v188_v30, %v187_v27  ;;  %v568_v35 = vld [vmem:[%s1009_s1 + $0xb8] sm:$0xff] (!%p138_p2)  ;;  %v569_v36 = vld [vmem:[%s1009_s1 + $0xc0] sm:$0xff] (!%p138_p2) }
   0xd   : > { %s1013_s13 = smov (!%p161_p3, %s548_s13), 1  ;;  %760 = vmatpush3.bf16.msra.mxu0 %v757_v5  ;;  %v745_v34 = vpack.c.bf16 %v567_v32, %v566_v31  ;;  %v749_v37 = vpack.c.bf16 %v569_v36, %v568_v35  ;;  %v189_v38 = vld [vmem:[%s1009_s1 + $0x60] sm:$0x3f]  ;;  %v577_v39 = vld [vmem:[%s1009_s1 + $0xd0] sm:$0xff]  ;;  %v578_v40 = vld [vmem:[%s1009_s1 + $0xd8] sm:$0xff] }
   0xe   : > { %s805_s30 = smul.u32 48, %s1013_s13  ;;  %762 = vmatprep.subr.bf16.mxu0 %v761_v10  ;;  %v579_v44 = vld [vmem:[%s1009_s1 + $0xe0] sm:$0xff]  ;;  %v580_v45 = vld [vmem:[%s1009_s1 + $0xe8] sm:$0xff]  ;;  %v777_v46 = vpack.c.bf16 %v578_v40, %v577_v39  ;;  %v581_v49 = vld [vmem:[%s1009_s1 + $0xf0] sm:$0xff]  ;;  %s596_s24 = sshll.u32 %s1013_s13, 4 }
   0xf   : > { %736 = vmatpush3.bf16.msra.mxu1 %v733_v17  ;;  %v781_v47 = vpack.c.bf16 %v580_v45, %v579_v44  ;;  %v570_v48 = vld [vmem:[%s1009_s1 + $0xc8] sm:$0x3f]  ;;  %v582_v50 = vld [vmem:[%s1009_s1 + $0xf8] sm:$0xff]  ;;  %v583_v54 = vld [vmem:[%s1009_s1 + $0x100] sm:$0xff]  ;;  %s170_s27 = scalar_lea.vmem %s1011_s3, %s596_s24 }
  0x10   : > { %s889_s14 = scalar_lea.vmem %s1008_s0, %s805_s30  ;;  %738 = vmatprep.subr.bf16.mxu1 %v737_v22  ;;  %v785_v53 = vpack.c.bf16 %v582_v50, %v581_v49  ;;  %v584_v55 = vld [vmem:[%s1009_s1 + $0x108] sm:$0xff]  ;;  %v585_v57 = vld [vmem:[%s1009_s1 + $0x110] sm:$0xff]  ;;  %v586_v58 = vld [vmem:[%s1009_s1 + $0x118] sm:$0xff] }
  0x11   : > { %v895_v16 = vld [vmem:[%s889_s14] sm:$0xff]  ;;  %764 = vmatpush3.bf16.msra.mxu0 %v761_v10  ;;  %v556_v29 = vld [vmem:[%s889_s14 + $0x18] sm:$0xff]  ;;  %v172_v41 = vld [vmem:[%s889_s14 + $0x8] sm:$0xff]  ;;  %v789_v56 = vpack.c.bf16 %v584_v55, %v583_v54  ;;  %v793_v59 = vpack.c.bf16 %v586_v58, %v585_v57 }
  0x12   : > { %697 = vmatprep.mubr.msk.f32.mxu0 %vm204_vm0, %v895_v16  ;;  %766 = vmatprep.subr.bf16.mxu0 %v765_v20  ;;  %v390_v42 = vrot.slane %v895_v16, 1  ;;  %v391_v43 = vrot.slane %v172_v41, 1  ;;  %v557_v52 = vld [vmem:[%s889_s14 + $0x20] sm:$0xff]  ;;  %v588_v61 = vld [vmem:[%s1009_s1 + $0x128] sm:$0xff]  ;;  %v173_v63 = vld [vmem:[%s889_s14 + $0x10] sm:$0x1] }
  0x13   : > { %668 = vmatprep.mubr.msk.f32.mxu1 %vm204_vm0, %v556_v29  ;;  %740 = vmatpush3.bf16.msra.mxu1 %v737_v22  ;;  %v587_v60 = vld [vmem:[%s1009_s1 + $0x120] sm:$0xff]  ;;  %v589_v0 = vld [vmem:[%s1009_s1 + $0x130] sm:$0x3f]  ;;  %v393_v1 = vrot.slane %v173_v63, 1 }
  0x14   : > { %742 = vmatprep.subr.bf16.mxu1 %v741_v28  ;;  %v392_v51 = vsel %vm389_vm2, %v390_v42, %v391_v43  ;;  %v797_v62 = vpack.c.bf16 %v588_v61, %v587_v60  ;;  %v593_v6 = vld [vmem:[%s1010_s2] ss:$0 sm:$0xff] }
  0x15   : > { %768 = vmatpush3.bf16.msra.mxu0 %v765_v20  ;;  %v394_v2 = vsel %vm389_vm2, %v391_v43, %v393_v1 }
  0x16   : > { %770 = vmatprep.subr.bf16.mxu0 %v769_v26 }
  0x17   : > { %744 = vmatpush3.bf16.msra.mxu1 %v741_v28 }
  0x18   : > { %746 = vmatprep.subr.bf16.mxu1 %v745_v34 }
  0x19   : > { %772 = vmatpush3.bf16.msra.mxu0 %v769_v26 }
  0x1a   : > { %774 = vmatprep.subr.bf16.mxu0 %v773_v33 }
  0x1b   : > { %748 = vmatpush3.bf16.msra.mxu1 %v745_v34 }
  0x1c   : > { %750 = vmatprep.subr.bf16.mxu1 %v749_v37 }
  0x1d   : > { %776 = vmatpush3.bf16.msra.mxu0 %v773_v33 }
  0x1e   : > { %695 = vmatprep.subr.msk.mxu0 %vm211_vm1, %v189_v38 }
  0x1f   : > { %752 = vmatpush3.bf16.msra.mxu1 %v749_v37 }
  0x20   : > { %666 = vmatprep.subr.msk.mxu1 %vm211_vm1, %v570_v48 }
  0x21   : > { %696 = vmatpush3.msk.msra.mxu0 %vm211_vm1, %v189_v38 }
  0x22   : > { %778 = vmatprep.subr.bf16.mxu0 %v777_v46  ;;  %698 = vmatmul.mubr.msk.f32.vlgmr.msra.gmra.mrb[0].mxu0 %vm204_vm0, %v172_v41 }
  0x23   : > { %780 = vmatpush3.bf16.msra.mxu0 %v777_v46  ;;  %726 = vmatprep.mubr.msk.f32.mxu0 %vm204_vm0, %v392_v51 }
  0x24   : > { %782 = vmatprep.subr.bf16.mxu0 %v781_v47  ;;  %667 = vmatpush3.msk.msra.mxu1 %vm211_vm1, %v570_v48 }
  0x25   : > { %669 = vmatmul.mubr.msk.f32.vlgmr.msra.gmra.mrb[0].mxu1 %vm204_vm0, %v557_v52 }
  0x27   : > { %784 = vmatpush3.bf16.msra.mxu0 %v781_v47 }
  0x28   : > { %786 = vmatprep.subr.bf16.mxu0 %v785_v53 }
  0x2b   : > { %788 = vmatpush3.bf16.msra.mxu0 %v785_v53 }
  0x2c   : > { %790 = vmatprep.subr.bf16.mxu0 %v789_v56 }
  0x2f   : > { %792 = vmatpush3.bf16.msra.mxu0 %v789_v56 }
  0x30   : > { %794 = vmatprep.subr.bf16.mxu0 %v793_v59 }
  0x33   : > { %796 = vmatpush3.bf16.msra.mxu0 %v793_v59 }
  0x34   : > { %798 = vmatprep.subr.bf16.mxu0 %v797_v62 }
  0x37   : > { %800 = vmatpush3.bf16.msra.mxu0 %v797_v62 }
  0x38   : > { %724 = vmatprep.subr.msk.mxu0 %vm211_vm1, %v589_v0 }
  0x3b   : > { %725 = vmatpush3.msk.msra.mxu0 %vm211_vm1, %v589_v0 }
  0x3c   : > { %727 = vmatmul.mubr.msk.f32.vlgmr.msra.gmra.mrb[0].mxu0 %vm204_vm0, %v394_v2 }
  0xf8   : > { %v670_v3 = vpop.f32.mrb[0].mxu1 }
  0xf9   : > { %v281_v4 = vpop.f32.mrb[1].mxu1 }
 0x10f   : > { %v728_v5 = vpop.f32.mrb[0].mxu0 }
 0x110   : > { %v801_v7 = vadd.f32 %v728_v5, %v670_v3  ;;  %v468_v8 = vpop.f32.mrb[1].mxu0 }
 0x111   : > { %v802_v9 = vadd.f32 %v468_v8, %v281_v4 }
 0x112   : > { %v487_v10 = vadd.f32 %v801_v7, %v593_v6 }
 0x113   : > { %v486_v11 = vadd.f32 %v802_v9, %v593_v6 }
 0x114   : > { %v489_v12 = vmax.f32 %v487_v10, 0.0 }
 0x115   : > { %v488_v13 = vmax.f32 %v486_v11, 0.0 }
 0x116   : > { %492 = vst.msk [vmem:[%s170_s27 + $0x8] sm:$0xff] %vm490_vm3, %v489_v12 }
 0x117   : > { %491 = vst.msk [vmem:[%s170_s27] sm:$0xff] %vm490_vm3, %v488_v13 }
 0x118 PF: > { %s13_s12 = sadd.s32 1, %s820_s12  }
 0x119   : > { %p10_p4 = scmp.ge.s32.totalorder %s13_s12, 4  }
 0x11b   :  { %12 = sbr.rel (!%p10_p4) target bundleno = 1 (0x1), region = 65 }

// kernel: _lambda_.14
= control target key start
LH: loop header
LB: loop body
LE: loop exit
PB: predicated region body
PF: predicated region fallthrough
CT: control target
= control target key end

     0   :  { %s635_s12 = smov 0   ;;  %s713_s0 = inlined_call_operand.vmem [shape: f32[2,2,9,36], index: 0, kind: input, shape index: {}]   ;;  %s714_s1 = inlined_call_operand.vmem [shape: f32[3,36,64], index: 1, kind: input, shape index: {}]   ;;  %s715_s2 = inlined_call_operand.vmem [shape: f32[1,64], index: 2, kind: input, shape index: {}]   ;;  %s716_s3 = inlined_call_operand.vmem [shape: f32[2,8,64], index: 3, kind: output, shape index: {}]  }
   0x1 LB: > { %s489_s13 = sadd.s32 4294967295, %s610_s12   ;;  %p493_p0 = scmp.ge.s32.totalorder %s610_s12, 1  ;;  %s610_s12 = sphi %s635_s12, %s13_s12  }
   0x2   : > { %p137_p1 = scmp.lt.s32.totalorder %s610_s12, 3 }
   0x4   : > { %p138_p2 = pnand %p493_p0, %p137_p1 }
   0x5   : > { %v498_v0 = vld [vmem:[%s714_s1 + $0x28] sm:$0xff] (!%p138_p2)  ;;  %v499_v1 = vld [vmem:[%s714_s1 + $0x30] sm:$0xff] (!%p138_p2)  ;;  %v173_v2 = vld [vmem:[%s714_s1] sm:$0xff] (!%p138_p2)  ;;  %v612_v3 = vmov (!%p138_p2), 0.0|0.0   ;;  %p160_p3 = scmp.lt.s32.totalorder (!%p138_p2), %s489_s13, 1  ;;  %vm613_vm0 = vmmov (!%p138_p2), 0  }
   0x6   : > { %141 = sbr.rel (%p138_p2) target bundleno = 247 (0xf7), region = 32  ;;  %575 = vmatprep.subr.bf16.mxu0 (!%p138_p2), %v612_v3  ;;  %v576_v4 = vpack.c.bf16 (!%p138_p2), %v499_v1, %v498_v0  ;;  %581 = vmatprep.subr.bf16.mxu1 (!%p138_p2), %v612_v3  ;;  %v174_v5 = vld [vmem:[%s714_s1 + $0x8] sm:$0xff] (!%p138_p2)  ;;  %v500_v6 = vld [vmem:[%s714_s1 + $0x38] sm:$0xff] (!%p138_p2)  ;;  %v501_v7 = vld [vmem:[%s714_s1 + $0x40] sm:$0xff] (!%p138_p2)  ;;  %v614_v11 = vmov (!%p138_p2), 0.0   ;;  %vm188_vm1 = vcmask (!%p138_p2), 1043456  }
   0x7   : > { %v582_v8 = vpack.c.bf16 (!%p138_p2), %v174_v5, %v173_v2  ;;  %v175_v9 = vld [vmem:[%s714_s1 + $0x10] sm:$0xff] (!%p138_p2)  ;;  %v176_v10 = vld [vmem:[%s714_s1 + $0x18] sm:$0xff] (!%p138_p2)  ;;  %546 = vmatprep.mubr.msk.f32.mxu0 (!%p138_p2), %vm613_vm0, %v614_v11  ;;  %559 = vmatprep.mubr.msk.f32.mxu1 (!%p138_p2), %vm613_vm0, %v614_v11  ;;  %v579_v12 = vpack.c.bf16 (!%p138_p2), %v501_v7, %v500_v6  ;;  %v502_v16 = vld [vmem:[%s714_s1 + $0x48] sm:$0xf] (!%p138_p2)  ;;  %vm184_vm2 = vcmask (!%p138_p2), 293888   ;;  %vm345_vm3 = vcmask (!%p138_p2), 1046528  }
   0x8   : > { %577 = vmatpush3.bf16.msra.mxu0 (!%p138_p2), %v576_v4  ;;  %v585_v13 = vpack.c.bf16 (!%p138_p2), %v176_v10, %v175_v9  ;;  %v507_v14 = vld [vmem:[%s714_s1 + $0x50] sm:$0xff] (!%p138_p2)  ;;  %v508_v15 = vld [vmem:[%s714_s1 + $0x58] sm:$0xff] (!%p138_p2)  ;;  %v177_v18 = vld [vmem:[%s714_s1 + $0x20] sm:$0xf] (!%p138_p2)  ;;  %vm434_vm4 = vcmask (!%p138_p2), 523264  }
   0x9   : > { %583 = vmatpush3.bf16.msra.mxu1 (!%p138_p2), %v582_v8  ;;  %578 = vmatprep.subr.bf16.mxu0 (!%p138_p2), %v612_v3  ;;  %v588_v20 = vpack.c.bf16 (!%p138_p2), %v508_v15, %v507_v14  ;;  %v509_v21 = vld [vmem:[%s714_s1 + $0x60] sm:$0xff] (!%p138_p2)  ;;  %v510_v22 = vld [vmem:[%s714_s1 + $0x68] sm:$0xff] (!%p138_p2)  ;;  %v511_v27 = vld [vmem:[%s714_s1 + $0x70] sm:$0xf] (!%p138_p2) }
   0xa   : > { %584 = vmatprep.subr.bf16.mxu1 (!%p138_p2), %v612_v3  ;;  %v591_v24 = vpack.c.bf16 (!%p138_p2), %v510_v22, %v509_v21  ;;  %v514_v35 = vld [vmem:[%s715_s2] ss:$0 sm:$0xff] (!%p138_p2) }
   0xc   : > { %580 = vmatpush3.bf16.msra.mxu0 (!%p138_p2), %v579_v12 }
   0xd   : > { %s718_s13 = smov (!%p160_p3, %s489_s13), 1  ;;  %586 = vmatpush3.bf16.msra.mxu1 %v585_v13  ;;  %544 = vmatprep.subr.mxu0 %v614_v11 }
   0xe   : > { %s517_s30 = sshll.u32 %s718_s13, 5  ;;  %557 = vmatprep.subr.mxu1 %v614_v11  ;;  %s496_s25 = sshll.u32 %s718_s13, 3 }
   0xf   : > { %s164_s6 = scalar_lea.vmem %s713_s0, %s517_s30  ;;  %s168_s28 = scalar_lea.vmem %s716_s3, %s496_s25 }
  0x10   : > { %v497_v17 = vld [vmem:[%s164_s6 + $0x10] sm:$0xff]  ;;  %v169_v19 = vld [vmem:[%s164_s6] sm:$0xff]  ;;  %545 = vmatpush3.msk.msra.mxu0 %vm188_vm1, %v502_v16  ;;  %v170_v23 = vld [vmem:[%s164_s6 + $0x8] sm:$0x1] }
  0x11   : > { %547 = vmatmul.mubr.msk.f32.vlgmr.msra.gmra.mrb[0].mxu0 %vm184_vm2, %v497_v17  ;;  %558 = vmatpush3.msk.msra.mxu1 %vm188_vm1, %v177_v18  ;;  %v347_v25 = vrot.slane %v170_v23, 1  ;;  %v346_v26 = vrot.slane %v169_v19, 1 }
  0x12   : > { %587 = vmatprep.subr.bf16.mxu0 %v612_v3  ;;  %560 = vmatmul.mubr.msk.f32.vlgmr.msra.gmra.mrb[0].mxu1 %vm184_vm2, %v169_v19 }
  0x13   : > { %589 = vmatpush3.bf16.msra.mxu0 %v588_v20  ;;  %572 = vmatprep.mubr.msk.f32.mxu0 %vm613_vm0, %v614_v11  ;;  %v348_v28 = vsel %vm345_vm3, %v346_v26, %v347_v25 }
  0x14   : > { %590 = vmatprep.subr.bf16.mxu0 %v612_v3 }
  0x17   : > { %592 = vmatpush3.bf16.msra.mxu0 %v591_v24 }
  0x18   : > { %570 = vmatprep.subr.mxu0 %v614_v11 }
  0x1b   : > { %571 = vmatpush3.msk.msra.mxu0 %vm188_vm1, %v511_v27 }
  0x1c   : > { %573 = vmatmul.mubr.msk.f32.vlgmr.msra.gmra.mrb[2].mxu0 %vm184_vm2, %v348_v28 }
  0xe4   : > { %v258_v29 = vpop.f32.mrb[0].mxu0 }
  0xe5   : > { %v548_v30 = vpop.f32.mrb[1].mxu0  ;;  %v334_v31 = vpop.f32.mrb[0].mxu1 }
  0xe6   : > { %v335_v32 = vadd.f32 %v334_v31, %v258_v29  ;;  %v561_v33 = vpop.f32.mrb[1].mxu1 }
  0xef   : > { %v420_v34 = vpop.f32.mrb[2].mxu0 }
  0xf0   : > { %v424_v36 = vadd.f32 %v420_v34, %v335_v32  ;;  %v574_v37 = vpop.f32.mrb[3].mxu0 }
  0xf2   : > { %v432_v38 = vadd.f32 %v514_v35, %v424_v36 }
  0xf4   : > { %v433_v39 = vmax.f32 %v432_v38, 0.0 }
  0xf6   : > { %435 = vst.msk [vmem:[%s168_s28] sm:$0xff] %vm434_vm4, %v433_v39 }
  0xf7 PF: > { %s13_s12 = sadd.s32 1, %s610_s12  }
  0xf8   : > { %p10_p4 = scmp.ge.s32.totalorder %s13_s12, 4  }
  0xfa   :  { %12 = sbr.rel (!%p10_p4) target bundleno = 1 (0x1), region = 65 }

// kernel: _lambda_.15
= control target key start
LH: loop header
LB: loop body
LE: loop exit
PB: predicated region body
PF: predicated region fallthrough
CT: control target
= control target key end

     0   :  { %s714_s12 = smov 0   ;;  %s853_s0 = inlined_call_operand.vmem [shape: f32[2,2,5,80], index: 0, kind: input, shape index: {}]   ;;  %s854_s1 = inlined_call_operand.vmem [shape: f32[3,80,64], index: 1, kind: input, shape index: {}]   ;;  %s855_s2 = inlined_call_operand.vmem [shape: f32[1,64], index: 2, kind: input, shape index: {}]   ;;  %s856_s3 = inlined_call_operand.vmem [shape: f32[2,4,64], index: 3, kind: output, shape index: {}]  }
   0x1 LB: > { %s489_s13 = sadd.s32 4294967295, %s689_s12   ;;  %p493_p0 = scmp.ge.s32.totalorder %s689_s12, 1  ;;  %s689_s12 = sphi %s714_s12, %s13_s12  }
   0x2   : > { %p137_p1 = scmp.lt.s32.totalorder %s689_s12, 3 }
   0x4   : > { %p138_p2 = pnand %p493_p0, %p137_p1 }
   0x5   : > { %v498_v0 = vld [vmem:[%s854_s1 + $0x50] sm:$0xff] (!%p138_p2)  ;;  %v499_v1 = vld [vmem:[%s854_s1 + $0x58] sm:$0xff] (!%p138_p2)  ;;  %v172_v2 = vld [vmem:[%s854_s1] sm:$0xff] (!%p138_p2)  ;;  %v691_v3 = vmov (!%p138_p2), 0.0|0.0   ;;  %vm692_vm0 = vmmov (!%p138_p2), 0   ;;  %v693_v11 = vmov (!%p138_p2), 0.0  }
   0x6   : > { %141 = sbr.rel (%p138_p2) target bundleno = 266 (0x10a), region = 32  ;;  %627 = vmatprep.subr.bf16.mxu0 (!%p138_p2), %v691_v3  ;;  %v628_v4 = vpack.c.bf16 (!%p138_p2), %v499_v1, %v498_v0  ;;  %642 = vmatprep.subr.bf16.mxu1 (!%p138_p2), %v691_v3  ;;  %v173_v5 = vld [vmem:[%s854_s1 + $0x8] sm:$0xff] (!%p138_p2)  ;;  %v500_v6 = vld [vmem:[%s854_s1 + $0x60] sm:$0xff] (!%p138_p2)  ;;  %v174_v9 = vld [vmem:[%s854_s1 + $0x10] sm:$0xff] (!%p138_p2)  ;;  %p160_p3 = scmp.lt.s32.totalorder (!%p138_p2), %s489_s13, 1  ;;  %vm193_vm1 = vcmask (!%p138_p2), 654336  }
   0x7   : > { %v501_v7 = vld [vmem:[%s854_s1 + $0x68] sm:$0xff] (!%p138_p2)  ;;  %v643_v8 = vpack.c.bf16 (!%p138_p2), %v173_v5, %v172_v2  ;;  %v175_v10 = vld [vmem:[%s854_s1 + $0x18] sm:$0xff] (!%p138_p2)  ;;  %578 = vmatprep.mubr.msk.f32.mxu0 (!%p138_p2), %vm692_vm0, %v693_v11  ;;  %601 = vmatprep.mubr.msk.f32.mxu1 (!%p138_p2), %vm692_vm0, %v693_v11  ;;  %v502_v14 = vld [vmem:[%s854_s1 + $0x70] sm:$0xff] (!%p138_p2)  ;;  %vm434_vm2 = vcmask (!%p138_p2), 519168  }
   0x8   : > { %629 = vmatpush3.bf16.msra.mxu0 (!%p138_p2), %v628_v4  ;;  %v631_v12 = vpack.c.bf16 (!%p138_p2), %v501_v7, %v500_v6  ;;  %v646_v13 = vpack.c.bf16 (!%p138_p2), %v175_v10, %v174_v9  ;;  %v503_v15 = vld [vmem:[%s854_s1 + $0x78] sm:$0xff] (!%p138_p2)  ;;  %v176_v16 = vld [vmem:[%s854_s1 + $0x20] sm:$0xff] (!%p138_p2)  ;;  %v177_v17 = vld [vmem:[%s854_s1 + $0x28] sm:$0xff] (!%p138_p2) }
   0x9   : > { %644 = vmatpush3.bf16.msra.mxu1 (!%p138_p2), %v643_v8  ;;  %630 = vmatprep.subr.bf16.mxu0 (!%p138_p2), %v691_v3  ;;  %v634_v18 = vpack.c.bf16 (!%p138_p2), %v503_v15, %v502_v14  ;;  %v649_v19 = vpack.c.bf16 (!%p138_p2), %v177_v17, %v176_v16  ;;  %v504_v20 = vld [vmem:[%s854_s1 + $0x80] sm:$0xff] (!%p138_p2)  ;;  %v505_v21 = vld [vmem:[%s854_s1 + $0x88] sm:$0xff] (!%p138_p2)  ;;  %v178_v22 = vld [vmem:[%s854_s1 + $0x30] sm:$0xff] (!%p138_p2) }
   0xa   : > { %645 = vmatprep.subr.bf16.mxu1 (!%p138_p2), %v691_v3  ;;  %v179_v23 = vld [vmem:[%s854_s1 + $0x38] sm:$0xff] (!%p138_p2)  ;;  %v637_v24 = vpack.c.bf16 (!%p138_p2), %v505_v21, %v504_v20  ;;  %v506_v26 = vld [vmem:[%s854_s1 + $0x90] sm:$0xff] (!%p138_p2)  ;;  %v180_v28 = vld [vmem:[%s854_s1 + $0x40] sm:$0xff] (!%p138_p2) }
   0xb   : > { %v652_v25 = vpack.c.bf16 (!%p138_p2), %v179_v23, %v178_v22  ;;  %v507_v27 = vld [vmem:[%s854_s1 + $0x98] sm:$0xff] (!%p138_p2)  ;;  %v181_v29 = vld [vmem:[%s854_s1 + $0x48] sm:$0xff] (!%p138_p2)  ;;  %v510_v32 = vld [vmem:[%s854_s1 + $0xa0] sm:$0xff] (!%p138_p2) }
   0xc   : > { %632 = vmatpush3.bf16.msra.mxu0 (!%p138_p2), %v631_v12  ;;  %v640_v30 = vpack.c.bf16 (!%p138_p2), %v507_v27, %v506_v26  ;;  %v655_v31 = vpack.c.bf16 (!%p138_p2), %v181_v29, %v180_v28  ;;  %v511_v33 = vld [vmem:[%s854_s1 + $0xa8] sm:$0xff] (!%p138_p2)  ;;  %v512_v37 = vld [vmem:[%s854_s1 + $0xb0] sm:$0xff] (!%p138_p2)  ;;  %v513_v38 = vld [vmem:[%s854_s1 + $0xb8] sm:$0xff] (!%p138_p2) }
   0xd   : > { %647 = vmatpush3.bf16.msra.mxu1 %v646_v13  ;;  %633 = vmatprep.subr.bf16.mxu0 %v691_v3  ;;  %s858_s13 = smov (!%p160_p3, %s489_s13), 1  ;;  %v658_v35 = vpack.c.bf16 %v511_v33, %v510_v32  ;;  %v661_v39 = vpack.c.bf16 %v513_v38, %v512_v37  ;;  %v514_v40 = vld [vmem:[%s854_s1 + $0xc0] sm:$0xff]  ;;  %v515_v41 = vld [vmem:[%s854_s1 + $0xc8] sm:$0xff]  ;;  %v516_v43 = vld [vmem:[%s854_s1 + $0xd0] sm:$0xff] }
   0xe   : > { %648 = vmatprep.subr.bf16.mxu1 %v691_v3  ;;  %s524_s29 = sshll.u32 %s858_s13, 4  ;;  %v664_v42 = vpack.c.bf16 %v515_v41, %v514_v40  ;;  %v517_v44 = vld [vmem:[%s854_s1 + $0xd8] sm:$0xff]  ;;  %v518_v46 = vld [vmem:[%s854_s1 + $0xe0] sm:$0xff]  ;;  %v519_v47 = vld [vmem:[%s854_s1 + $0xe8] sm:$0xff]  ;;  %s496_s30 = sshll.u32 %s858_s13, 2 }
   0xf   : > { %s164_s5 = scalar_lea.vmem %s853_s0, %s524_s29  ;;  %v667_v45 = vpack.c.bf16 %v517_v44, %v516_v43  ;;  %v670_v48 = vpack.c.bf16 %v519_v47, %v518_v46  ;;  %v521_v56 = vld [vmem:[%s855_s2] ss:$0 sm:$0xff]  ;;  %s168_s6 = scalar_lea.vmem %s856_s3, %s496_s30 }
  0x10   : > { %635 = vmatpush3.bf16.msra.mxu0 %v634_v18  ;;  %v497_v34 = vld [vmem:[%s164_s5 + $0x8] sm:$0x1f]  ;;  %v169_v36 = vld [vmem:[%s164_s5] sm:$0x1f] }
  0x11   : > { %650 = vmatpush3.bf16.msra.mxu1 %v649_v19  ;;  %636 = vmatprep.subr.bf16.mxu0 %v691_v3  ;;  %v351_v49 = vrot.slane %v169_v36, 1 }
  0x12   : > { %651 = vmatprep.subr.bf16.mxu1 %v691_v3 }
  0x14   : > { %638 = vmatpush3.bf16.msra.mxu0 %v637_v24 }
  0x15   : > { %653 = vmatpush3.bf16.msra.mxu1 %v652_v25  ;;  %639 = vmatprep.subr.bf16.mxu0 %v691_v3 }
  0x16   : > { %654 = vmatprep.subr.bf16.mxu1 %v691_v3 }
  0x18   : > { %641 = vmatpush3.bf16.msra.mxu0 %v640_v30 }
  0x19   : > { %656 = vmatpush3.bf16.msra.mxu1 %v655_v31  ;;  %657 = vmatprep.subr.bf16.mxu0 %v691_v3 }
  0x1b   : > { %579 = vmatmul.mubr.msk.f32.vlgmr.msra.gmra.mrb[0].mxu0 %vm193_vm1, %v497_v34 }
  0x1c   : > { %602 = vmatmul.mubr.msk.f32.vlgmr.msra.gmra.mrb[0].mxu1 %vm193_vm1, %v169_v36  ;;  %659 = vmatpush3.bf16.msra.mxu0 %v658_v35 }
  0x1d   : > { %660 = vmatprep.subr.bf16.mxu0 %v691_v3  ;;  %624 = vmatprep.mubr.msk.f32.mxu0 %vm692_vm0, %v693_v11 }
  0x20   : > { %662 = vmatpush3.bf16.msra.mxu0 %v661_v39 }
  0x21   : > { %663 = vmatprep.subr.bf16.mxu0 %v691_v3 }
  0x24   : > { %665 = vmatpush3.bf16.msra.mxu0 %v664_v42 }
  0x25   : > { %666 = vmatprep.subr.bf16.mxu0 %v691_v3 }
  0x28   : > { %668 = vmatpush3.bf16.msra.mxu0 %v667_v45 }
  0x29   : > { %669 = vmatprep.subr.bf16.mxu0 %v691_v3 }
  0x2c   : > { %671 = vmatpush3.bf16.msra.mxu0 %v670_v48 }
  0x2f   : > { %625 = vmatmul.mubr.msk.f32.vlgmr.msra.gmra.mrb[2].mxu0 %vm193_vm1, %v351_v49 }
  0xee   : > { %v263_v50 = vpop.f32.mrb[0].mxu0 }
  0xef   : > { %v580_v51 = vpop.f32.mrb[1].mxu0  ;;  %v336_v52 = vpop.f32.mrb[0].mxu1 }
  0xf0   : > { %v337_v53 = vadd.f32 %v336_v52, %v263_v50  ;;  %v603_v54 = vpop.f32.mrb[1].mxu1 }
 0x102   : > { %v420_v55 = vpop.f32.mrb[2].mxu0 }
 0x103   : > { %v424_v57 = vadd.f32 %v420_v55, %v337_v53  ;;  %v626_v58 = vpop.f32.mrb[3].mxu0 }
 0x105   : > { %v432_v59 = vadd.f32 %v521_v56, %v424_v57 }
 0x107   : > { %v433_v60 = vmax.f32 %v432_v59, 0.0 }
 0x109   : > { %435 = vst.msk [vmem:[%s168_s6] sm:$0xf] %vm434_vm2, %v433_v60 }
 0x10a PF: > { %s13_s12 = sadd.s32 1, %s689_s12  }
 0x10b   : > { %p10_p4 = scmp.ge.s32.totalorder %s13_s12, 4  }
 0x10d   :  { %12 = sbr.rel (!%p10_p4) target bundleno = 1 (0x1), region = 65 }

// kernel: _lambda_.16
= control target key start
LH: loop header
LB: loop body
LE: loop exit
PB: predicated region body
PF: predicated region fallthrough
CT: control target
= control target key end

     0   :  { %s751_s12 = smov 0   ;;  %s914_s0 = inlined_call_operand.vmem [shape: f32[2,2,3,96], index: 0, kind: input, shape index: {}]   ;;  %s915_s1 = inlined_call_operand.vmem [shape: f32[3,96,64], index: 1, kind: input, shape index: {}]   ;;  %s916_s2 = inlined_call_operand.vmem [shape: f32[1,64], index: 2, kind: input, shape index: {}]   ;;  %s917_s3 = inlined_call_operand.vmem [shape: f32[2,2,64], index: 3, kind: output, shape index: {}]  }
   0x1 LB: > { %s495_s13 = sadd.s32 4294967295, %s726_s12   ;;  %p499_p0 = scmp.ge.s32.totalorder %s726_s12, 1  ;;  %s726_s12 = sphi %s751_s12, %s13_s12  }
   0x2   : > { %p137_p1 = scmp.lt.s32.totalorder %s726_s12, 3 }
   0x4   : > { %p138_p2 = pnand %p499_p0, %p137_p1 }
   0x5   : > { %v504_v0 = vld [vmem:[%s915_s1 + $0x60] sm:$0xff] (!%p138_p2)  ;;  %v505_v1 = vld [vmem:[%s915_s1 + $0x68] sm:$0xff] (!%p138_p2)  ;;  %v728_v3 = vmov (!%p138_p2), 0.0|0.0   ;;  %v506_v6 = vld [vmem:[%s915_s1 + $0x70] sm:$0xff] (!%p138_p2)  ;;  %vm729_vm0 = vmmov (!%p138_p2), 0   ;;  %v730_v11 = vmov (!%p138_p2), 0.0  }
   0x6   : > { %141 = sbr.rel (%p138_p2) target bundleno = 274 (0x112), region = 32  ;;  %v172_v2 = vld [vmem:[%s915_s1] sm:$0xff] (!%p138_p2)  ;;  %655 = vmatprep.subr.bf16.mxu0 (!%p138_p2), %v728_v3  ;;  %v656_v4 = vpack.c.bf16 (!%p138_p2), %v505_v1, %v504_v0  ;;  %673 = vmatprep.subr.bf16.mxu1 (!%p138_p2), %v728_v3  ;;  %v173_v5 = vld [vmem:[%s915_s1 + $0x8] sm:$0xff] (!%p138_p2)  ;;  %v507_v7 = vld [vmem:[%s915_s1 + $0x78] sm:$0xff] (!%p138_p2)  ;;  %p160_p3 = scmp.lt.s32.totalorder (!%p138_p2), %s495_s13, 1  ;;  %vm197_vm1 = vcmask (!%p138_p2), 785408  }
   0x7   : > { %v674_v8 = vpack.c.bf16 (!%p138_p2), %v173_v5, %v172_v2  ;;  %v174_v9 = vld [vmem:[%s915_s1 + $0x10] sm:$0xff] (!%p138_p2)  ;;  %v175_v10 = vld [vmem:[%s915_s1 + $0x18] sm:$0xff] (!%p138_p2)  ;;  %598 = vmatprep.mubr.msk.f32.mxu0 (!%p138_p2), %vm729_vm0, %v730_v11  ;;  %625 = vmatprep.mubr.msk.f32.mxu1 (!%p138_p2), %vm729_vm0, %v730_v11  ;;  %v659_v12 = vpack.c.bf16 (!%p138_p2), %v507_v7, %v506_v6  ;;  %v508_v14 = vld [vmem:[%s915_s1 + $0x80] sm:$0xff] (!%p138_p2)  ;;  %vm440_vm2 = vcmask (!%p138_p2), 517120  }
   0x8   : > { %657 = vmatpush3.bf16.msra.mxu0 (!%p138_p2), %v656_v4  ;;  %v677_v13 = vpack.c.bf16 (!%p138_p2), %v175_v10, %v174_v9  ;;  %v509_v15 = vld [vmem:[%s915_s1 + $0x88] sm:$0xff] (!%p138_p2)  ;;  %v176_v16 = vld [vmem:[%s915_s1 + $0x20] sm:$0xff] (!%p138_p2)  ;;  %v510_v20 = vld [vmem:[%s915_s1 + $0x90] sm:$0xff] (!%p138_p2) }
   0x9   : > { %675 = vmatpush3.bf16.msra.mxu1 (!%p138_p2), %v674_v8  ;;  %658 = vmatprep.subr.bf16.mxu0 (!%p138_p2), %v728_v3  ;;  %v177_v17 = vld [vmem:[%s915_s1 + $0x28] sm:$0xff] (!%p138_p2)  ;;  %v662_v18 = vpack.c.bf16 (!%p138_p2), %v509_v15, %v508_v14  ;;  %v511_v21 = vld [vmem:[%s915_s1 + $0x98] sm:$0xff] (!%p138_p2)  ;;  %v178_v22 = vld [vmem:[%s915_s1 + $0x30] sm:$0xff] (!%p138_p2) }
   0xa   : > { %676 = vmatprep.subr.bf16.mxu1 (!%p138_p2), %v728_v3  ;;  %v680_v19 = vpack.c.bf16 (!%p138_p2), %v177_v17, %v176_v16  ;;  %v179_v23 = vld [vmem:[%s915_s1 + $0x38] sm:$0xff] (!%p138_p2)  ;;  %v665_v24 = vpack.c.bf16 (!%p138_p2), %v511_v21, %v510_v20  ;;  %v512_v26 = vld [vmem:[%s915_s1 + $0xa0] sm:$0xff] (!%p138_p2)  ;;  %v513_v27 = vld [vmem:[%s915_s1 + $0xa8] sm:$0xff] (!%p138_p2) }
   0xb   : > { %v683_v25 = vpack.c.bf16 (!%p138_p2), %v179_v23, %v178_v22  ;;  %v180_v28 = vld [vmem:[%s915_s1 + $0x40] sm:$0xff] (!%p138_p2)  ;;  %v181_v29 = vld [vmem:[%s915_s1 + $0x48] sm:$0xff] (!%p138_p2)  ;;  %v668_v30 = vpack.c.bf16 (!%p138_p2), %v513_v27, %v512_v26  ;;  %v514_v32 = vld [vmem:[%s915_s1 + $0xb0] sm:$0xff] (!%p138_p2) }
   0xc   : > { %660 = vmatpush3.bf16.msra.mxu0 (!%p138_p2), %v659_v12  ;;  %v686_v31 = vpack.c.bf16 (!%p138_p2), %v181_v29, %v180_v28  ;;  %v515_v33 = vld [vmem:[%s915_s1 + $0xb8] sm:$0xff] (!%p138_p2)  ;;  %v182_v34 = vld [vmem:[%s915_s1 + $0x50] sm:$0xff] (!%p138_p2)  ;;  %v518_v38 = vld [vmem:[%s915_s1 + $0xc0] sm:$0xff] (!%p138_p2) }
   0xd   : > { %678 = vmatpush3.bf16.msra.mxu1 %v677_v13  ;;  %661 = vmatprep.subr.bf16.mxu0 %v728_v3  ;;  %s919_s13 = smov (!%p160_p3, %s495_s13), 1  ;;  %v183_v35 = vld [vmem:[%s915_s1 + $0x58] sm:$0xff]  ;;  %v671_v36 = vpack.c.bf16 %v515_v33, %v514_v32  ;;  %v519_v39 = vld [vmem:[%s915_s1 + $0xc8] sm:$0xff]  ;;  %v520_v43 = vld [vmem:[%s915_s1 + $0xd0] sm:$0xff] }
   0xe   : > { %679 = vmatprep.subr.bf16.mxu1 %v728_v3  ;;  %s534_s10 = sshll.u32 %s919_s13, 3  ;;  %v689_v37 = vpack.c.bf16 %v183_v35, %v182_v34  ;;  %v692_v41 = vpack.c.bf16 %v519_v39, %v518_v38  ;;  %v521_v44 = vld [vmem:[%s915_s1 + $0xd8] sm:$0xff]  ;;  %v522_v46 = vld [vmem:[%s915_s1 + $0xe0] sm:$0xff]  ;;  %v523_v47 = vld [vmem:[%s915_s1 + $0xe8] sm:$0xff]  ;;  %s502_s17 = sshll.u32 %s919_s13, 1 }
   0xf   : > { %s164_s15 = scalar_lea.vmem %s914_s0, %s534_s10  ;;  %v695_v45 = vpack.c.bf16 %v521_v44, %v520_v43  ;;  %v698_v48 = vpack.c.bf16 %v523_v47, %v522_v46  ;;  %v524_v49 = vld [vmem:[%s915_s1 + $0xf0] sm:$0xff]  ;;  %v525_v50 = vld [vmem:[%s915_s1 + $0xf8] sm:$0xff]  ;;  %v526_v52 = vld [vmem:[%s915_s1 + $0x100] sm:$0xff]  ;;  %s168_s20 = scalar_lea.vmem %s917_s3, %s502_s17 }
  0x10   : > { %663 = vmatpush3.bf16.msra.mxu0 %v662_v18  ;;  %v503_v40 = vld [vmem:[%s164_s15 + $0x4] sm:$0x7]  ;;  %v169_v42 = vld [vmem:[%s164_s15] sm:$0x7]  ;;  %v701_v51 = vpack.c.bf16 %v525_v50, %v524_v49  ;;  %v527_v53 = vld [vmem:[%s915_s1 + $0x108] sm:$0xff] }
  0x11   : > { %681 = vmatpush3.bf16.msra.mxu1 %v680_v19  ;;  %664 = vmatprep.subr.bf16.mxu0 %v728_v3  ;;  %v704_v54 = vpack.c.bf16 %v527_v53, %v526_v52  ;;  %v528_v55 = vld [vmem:[%s915_s1 + $0x110] sm:$0xff]  ;;  %v529_v56 = vld [vmem:[%s915_s1 + $0x118] sm:$0xff]  ;;  %v357_v58 = vrot.slane %v169_v42, 1  ;;  %v531_v1 = vld [vmem:[%s916_s2] ss:$0 sm:$0xff] }
  0x12   : > { %682 = vmatprep.subr.bf16.mxu1 %v728_v3  ;;  %v707_v57 = vpack.c.bf16 %v529_v56, %v528_v55 }
  0x14   : > { %666 = vmatpush3.bf16.msra.mxu0 %v665_v24 }
  0x15   : > { %684 = vmatpush3.bf16.msra.mxu1 %v683_v25  ;;  %667 = vmatprep.subr.bf16.mxu0 %v728_v3 }
  0x16   : > { %685 = vmatprep.subr.bf16.mxu1 %v728_v3 }
  0x18   : > { %669 = vmatpush3.bf16.msra.mxu0 %v668_v30 }
  0x19   : > { %687 = vmatpush3.bf16.msra.mxu1 %v686_v31  ;;  %670 = vmatprep.subr.bf16.mxu0 %v728_v3 }
  0x1a   : > { %688 = vmatprep.subr.bf16.mxu1 %v728_v3 }
  0x1c   : > { %672 = vmatpush3.bf16.msra.mxu0 %v671_v36 }
  0x1d   : > { %690 = vmatpush3.bf16.msra.mxu1 %v689_v37  ;;  %691 = vmatprep.subr.bf16.mxu0 %v728_v3 }
  0x1f   : > { %599 = vmatmul.mubr.msk.f32.vlgmr.msra.gmra.mrb[0].mxu0 %vm197_vm1, %v503_v40 }
  0x20   : > { %626 = vmatmul.mubr.msk.f32.vlgmr.msra.gmra.mrb[0].mxu1 %vm197_vm1, %v169_v42  ;;  %693 = vmatpush3.bf16.msra.mxu0 %v692_v41 }
  0x21   : > { %694 = vmatprep.subr.bf16.mxu0 %v728_v3  ;;  %652 = vmatprep.mubr.msk.f32.mxu0 %vm729_vm0, %v730_v11 }
  0x24   : > { %696 = vmatpush3.bf16.msra.mxu0 %v695_v45 }
  0x25   : > { %697 = vmatprep.subr.bf16.mxu0 %v728_v3 }
  0x28   : > { %699 = vmatpush3.bf16.msra.mxu0 %v698_v48 }
  0x29   : > { %700 = vmatprep.subr.bf16.mxu0 %v728_v3 }
  0x2c   : > { %702 = vmatpush3.bf16.msra.mxu0 %v701_v51 }
  0x2d   : > { %703 = vmatprep.subr.bf16.mxu0 %v728_v3 }
  0x30   : > { %705 = vmatpush3.bf16.msra.mxu0 %v704_v54 }
  0x31   : > { %706 = vmatprep.subr.bf16.mxu0 %v728_v3 }
  0x34   : > { %708 = vmatpush3.bf16.msra.mxu0 %v707_v57 }
  0x37   : > { %653 = vmatmul.mubr.msk.f32.vlgmr.msra.gmra.mrb[2].mxu0 %vm197_vm1, %v357_v58 }
  0xf2   : > { %v267_v59 = vpop.f32.mrb[0].mxu0 }
  0xf3   : > { %v600_v60 = vpop.f32.mrb[1].mxu0  ;;  %v340_v61 = vpop.f32.mrb[0].mxu1 }
  0xf4   : > { %v341_v62 = vadd.f32 %v340_v61, %v267_v59  ;;  %v627_v63 = vpop.f32.mrb[1].mxu1 }
 0x10a   : > { %v426_v0 = vpop.f32.mrb[2].mxu0 }
 0x10b   : > { %v430_v2 = vadd.f32 %v426_v0, %v341_v62  ;;  %v654_v4 = vpop.f32.mrb[3].mxu0 }
 0x10d   : > { %v438_v5 = vadd.f32 %v531_v1, %v430_v2 }
 0x10f   : > { %v439_v3 = vmax.f32 %v438_v5, 0.0 }
 0x111   : > { %441 = vst.msk [vmem:[%s168_s20] sm:$0x3] %vm440_vm2, %v439_v3 }
 0x112 PF: > { %s13_s12 = sadd.s32 1, %s726_s12  }
 0x113   : > { %p10_p4 = scmp.ge.s32.totalorder %s13_s12, 4  }
 0x115   :  { %12 = sbr.rel (!%p10_p4) target bundleno = 1 (0x1), region = 65 }

// kernel: _lambda_.18
= control target key start
LH: loop header
LB: loop body
LE: loop exit
PB: predicated region body
PF: predicated region fallthrough
CT: control target
= control target key end

     0   :  { %s873_s15 = smov 0   ;;  %s1079_s0 = inlined_call_operand.vmem [shape: f32[2,1,4,128], index: 0, kind: input, shape index: {}]   ;;  %s1080_s1 = inlined_call_operand.vmem [shape: f32[3,128,64], index: 1, kind: input, shape index: {}]   ;;  %s1081_s2 = inlined_call_operand.vmem [shape: f32[1,64], index: 2, kind: input, shape index: {}]   ;;  %s1082_s3 = inlined_call_operand.vmem [shape: f32[2,1,64], index: 3, kind: input, shape index: {}]   ;;  %s1083_s4 = inlined_call_operand.vmem [shape: f32[2,2,64], index: 4, kind: output, shape index: {}]  }
   0x1 LB: > { %s555_s16 = sadd.s32 4294967295, %s843_s15   ;;  %p559_p0 = scmp.ge.s32.totalorder %s843_s15, 1  ;;  %s843_s15 = sphi %s873_s15, %s14_s15  }
   0x2   : > { %p169_p1 = scmp.lt.s32.totalorder %s843_s15, 3 }
   0x4   : > { %p170_p2 = pnand %p559_p0, %p169_p1 }
   0x5   : > { %v562_v0 = vld [vmem:[%s1080_s1 + $0x80] sm:$0xff] (!%p170_p2)  ;;  %v563_v1 = vld [vmem:[%s1080_s1 + $0x88] sm:$0xff] (!%p170_p2)  ;;  %v845_v3 = vmov (!%p170_p2), 0.0|0.0   ;;  %v564_v6 = vld [vmem:[%s1080_s1 + $0x90] sm:$0xff] (!%p170_p2)  ;;  %vm846_vm0 = vmmov (!%p170_p2), 0   ;;  %v847_v11 = vmov (!%p170_p2), 0.0  }
   0x6   : > { %173 = sbr.rel (%p170_p2) target bundleno = 292 (0x124), region = 36  ;;  %v208_v2 = vld [vmem:[%s1080_s1] sm:$0xff] (!%p170_p2)  ;;  %754 = vmatprep.subr.bf16.mxu0 (!%p170_p2), %v845_v3  ;;  %v755_v4 = vpack.c.bf16 (!%p170_p2), %v563_v1, %v562_v0  ;;  %778 = vmatprep.subr.bf16.mxu1 (!%p170_p2), %v845_v3  ;;  %v209_v5 = vld [vmem:[%s1080_s1 + $0x8] sm:$0xff] (!%p170_p2)  ;;  %v565_v7 = vld [vmem:[%s1080_s1 + $0x98] sm:$0xff] (!%p170_p2)  ;;  %p196_p3 = scmp.lt.s32.totalorder (!%p170_p2), %s555_s16, 1  ;;  %vm491_vm1 = vcmask (!%p170_p2), 517120  }
   0x7   : > { %v779_v8 = vpack.c.bf16 (!%p170_p2), %v209_v5, %v208_v2  ;;  %v210_v9 = vld [vmem:[%s1080_s1 + $0x10] sm:$0xff] (!%p170_p2)  ;;  %v211_v10 = vld [vmem:[%s1080_s1 + $0x18] sm:$0xff] (!%p170_p2)  ;;  %681 = vmatprep.mubr.msk.f32.mxu0 (!%p170_p2), %vm846_vm0, %v847_v11  ;;  %716 = vmatprep.mubr.msk.f32.mxu1 (!%p170_p2), %vm846_vm0, %v847_v11  ;;  %v758_v12 = vpack.c.bf16 (!%p170_p2), %v565_v7, %v564_v6  ;;  %v566_v14 = vld [vmem:[%s1080_s1 + $0xa0] sm:$0xff] (!%p170_p2) }
   0x8   : > { %756 = vmatpush3.bf16.msra.mxu0 (!%p170_p2), %v755_v4  ;;  %v782_v13 = vpack.c.bf16 (!%p170_p2), %v211_v10, %v210_v9  ;;  %v567_v15 = vld [vmem:[%s1080_s1 + $0xa8] sm:$0xff] (!%p170_p2)  ;;  %v212_v16 = vld [vmem:[%s1080_s1 + $0x20] sm:$0xff] (!%p170_p2)  ;;  %v568_v20 = vld [vmem:[%s1080_s1 + $0xb0] sm:$0xff] (!%p170_p2) }
   0x9   : > { %780 = vmatpush3.bf16.msra.mxu1 (!%p170_p2), %v779_v8  ;;  %757 = vmatprep.subr.bf16.mxu0 (!%p170_p2), %v845_v3  ;;  %v213_v17 = vld [vmem:[%s1080_s1 + $0x28] sm:$0xff] (!%p170_p2)  ;;  %v761_v18 = vpack.c.bf16 (!%p170_p2), %v567_v15, %v566_v14  ;;  %v569_v21 = vld [vmem:[%s1080_s1 + $0xb8] sm:$0xff] (!%p170_p2)  ;;  %v214_v22 = vld [vmem:[%s1080_s1 + $0x30] sm:$0xff] (!%p170_p2) }
   0xa   : > { %781 = vmatprep.subr.bf16.mxu1 (!%p170_p2), %v845_v3  ;;  %v785_v19 = vpack.c.bf16 (!%p170_p2), %v213_v17, %v212_v16  ;;  %v215_v23 = vld [vmem:[%s1080_s1 + $0x38] sm:$0xff] (!%p170_p2)  ;;  %v764_v24 = vpack.c.bf16 (!%p170_p2), %v569_v21, %v568_v20  ;;  %v570_v26 = vld [vmem:[%s1080_s1 + $0xc0] sm:$0xff] (!%p170_p2)  ;;  %v571_v27 = vld [vmem:[%s1080_s1 + $0xc8] sm:$0xff] (!%p170_p2) }
   0xb   : > { %v788_v25 = vpack.c.bf16 (!%p170_p2), %v215_v23, %v214_v22  ;;  %v216_v28 = vld [vmem:[%s1080_s1 + $0x40] sm:$0xff] (!%p170_p2)  ;;  %v217_v29 = vld [vmem:[%s1080_s1 + $0x48] sm:$0xff] (!%p170_p2)  ;;  %v767_v30 = vpack.c.bf16 (!%p170_p2), %v571_v27, %v570_v26  ;;  %v572_v32 = vld [vmem:[%s1080_s1 + $0xd0] sm:$0xff] (!%p170_p2) }
   0xc   : > { %759 = vmatpush3.bf16.msra.mxu0 (!%p170_p2), %v758_v12  ;;  %v791_v31 = vpack.c.bf16 (!%p170_p2), %v217_v29, %v216_v28  ;;  %v573_v33 = vld [vmem:[%s1080_s1 + $0xd8] sm:$0xff] (!%p170_p2)  ;;  %v218_v34 = vld [vmem:[%s1080_s1 + $0x50] sm:$0xff] (!%p170_p2)  ;;  %v574_v38 = vld [vmem:[%s1080_s1 + $0xe0] sm:$0xff] (!%p170_p2) }
   0xd   : > { %783 = vmatpush3.bf16.msra.mxu1 %v782_v13  ;;  %760 = vmatprep.subr.bf16.mxu0 %v845_v3  ;;  %v219_v35 = vld [vmem:[%s1080_s1 + $0x58] sm:$0xff]  ;;  %s1085_s16 = smov (!%p196_p3, %s555_s16), 1  ;;  %v770_v36 = vpack.c.bf16 %v573_v33, %v572_v32  ;;  %v575_v39 = vld [vmem:[%s1080_s1 + $0xe8] sm:$0xff]  ;;  %v220_v40 = vld [vmem:[%s1080_s1 + $0x60] sm:$0xff] }
   0xe   : > { %784 = vmatprep.subr.bf16.mxu1 %v845_v3  ;;  %v794_v37 = vpack.c.bf16 %v219_v35, %v218_v34  ;;  %v221_v41 = vld [vmem:[%s1080_s1 + $0x68] sm:$0xff]  ;;  %s560_s25 = sshll.u32 %s1085_s16, 2  ;;  %v773_v42 = vpack.c.bf16 %v575_v39, %v574_v38  ;;  %v576_v44 = vld [vmem:[%s1080_s1 + $0xf0] sm:$0xff]  ;;  %v577_v45 = vld [vmem:[%s1080_s1 + $0xf8] sm:$0xff]  ;;  %s561_s26 = sshll.u32 %s1085_s16, 1 }
   0xf   : > { %v797_v43 = vpack.c.bf16 %v221_v41, %v220_v40  ;;  %s199_s6 = scalar_lea.vmem %s1079_s0, %s560_s25  ;;  %v222_v46 = vld [vmem:[%s1080_s1 + $0x70] sm:$0xff]  ;;  %v223_v47 = vld [vmem:[%s1080_s1 + $0x78] sm:$0xff]  ;;  %v776_v48 = vpack.c.bf16 %v577_v45, %v576_v44  ;;  %v578_v51 = vld [vmem:[%s1080_s1 + $0x100] sm:$0xff]  ;;  %s202_s25 = scalar_lea.vmem %s1082_s3, %s1085_s16 }
  0x10   : > { %762 = vmatpush3.bf16.msra.mxu0 %v761_v18  ;;  %v207_v49 = vld [vmem:[%s199_s6] sm:$0xf]  ;;  %v800_v50 = vpack.c.bf16 %v223_v47, %v222_v46  ;;  %v579_v52 = vld [vmem:[%s1080_s1 + $0x108] sm:$0xff]  ;;  %v580_v55 = vld [vmem:[%s1080_s1 + $0x110] sm:$0xff]  ;;  %s206_s29 = scalar_lea.vmem %s1083_s4, %s561_s26 }
  0x11   : > { %786 = vmatpush3.bf16.msra.mxu1 %v785_v19  ;;  %763 = vmatprep.subr.bf16.mxu0 %v845_v3  ;;  %v242_v53 = vrot.slane %v207_v49, 1  ;;  %v803_v54 = vpack.c.bf16 %v579_v52, %v578_v51  ;;  %v581_v56 = vld [vmem:[%s1080_s1 + $0x118] sm:$0xff]  ;;  %v582_v58 = vld [vmem:[%s1080_s1 + $0x120] sm:$0xff]  ;;  %v583_v59 = vld [vmem:[%s1080_s1 + $0x128] sm:$0xff]  ;;  %v401_v13 = vrot.slane %v207_v49, 2 }
  0x12   : > { %787 = vmatprep.subr.bf16.mxu1 %v845_v3  ;;  %v806_v57 = vpack.c.bf16 %v581_v56, %v580_v55  ;;  %v809_v60 = vpack.c.bf16 %v583_v59, %v582_v58  ;;  %v584_v61 = vld [vmem:[%s1080_s1 + $0x130] sm:$0xff]  ;;  %v585_v62 = vld [vmem:[%s1080_s1 + $0x138] sm:$0xff]  ;;  %v586_v0 = vld [vmem:[%s1080_s1 + $0x140] sm:$0xff] }
  0x13   : > { %v812_v63 = vpack.c.bf16 %v585_v62, %v584_v61  ;;  %v587_v1 = vld [vmem:[%s1080_s1 + $0x148] sm:$0xff]  ;;  %v588_v4 = vld [vmem:[%s1080_s1 + $0x150] sm:$0xff]  ;;  %v589_v5 = vld [vmem:[%s1080_s1 + $0x158] sm:$0xff] }
  0x14   : > { %765 = vmatpush3.bf16.msra.mxu0 %v764_v24  ;;  %v815_v2 = vpack.c.bf16 %v587_v1, %v586_v0  ;;  %v818_v6 = vpack.c.bf16 %v589_v5, %v588_v4  ;;  %v590_v7 = vld [vmem:[%s1080_s1 + $0x160] sm:$0xff]  ;;  %v591_v8 = vld [vmem:[%s1080_s1 + $0x168] sm:$0xff]  ;;  %v592_v10 = vld [vmem:[%s1080_s1 + $0x170] sm:$0xff] }
  0x15   : > { %789 = vmatpush3.bf16.msra.mxu1 %v788_v25  ;;  %766 = vmatprep.subr.bf16.mxu0 %v845_v3  ;;  %v821_v9 = vpack.c.bf16 %v591_v8, %v590_v7  ;;  %v594_v20 = vld [vmem:[%s1081_s2] ss:$0 sm:$0xff] }
  0x16   : > { %790 = vmatprep.subr.bf16.mxu1 %v845_v3  ;;  %v595_v23 = vld [vmem:[%s202_s25] ss:$0 sm:$0xff] }
  0x18   : > { %768 = vmatpush3.bf16.msra.mxu0 %v767_v30 }
  0x19   : > { %792 = vmatpush3.bf16.msra.mxu1 %v791_v31  ;;  %769 = vmatprep.subr.bf16.mxu0 %v845_v3 }
  0x1a   : > { %793 = vmatprep.subr.bf16.mxu1 %v845_v3 }
  0x1c   : > { %771 = vmatpush3.bf16.msra.mxu0 %v770_v36 }
  0x1d   : > { %795 = vmatpush3.bf16.msra.mxu1 %v794_v37  ;;  %772 = vmatprep.subr.bf16.mxu0 %v845_v3 }
  0x1e   : > { %796 = vmatprep.subr.bf16.mxu1 %v845_v3 }
  0x20   : > { %774 = vmatpush3.bf16.msra.mxu0 %v773_v42 }
  0x21   : > { %798 = vmatpush3.bf16.msra.mxu1 %v797_v43  ;;  %775 = vmatprep.subr.bf16.mxu0 %v845_v3 }
  0x22   : > { %799 = vmatprep.subr.bf16.mxu1 %v845_v3 }
  0x24   : > { %777 = vmatpush3.bf16.msra.mxu0 %v776_v48 }
  0x25   : > { %801 = vmatpush3.bf16.msra.mxu1 %v800_v50  ;;  %802 = vmatprep.subr.bf16.mxu0 %v845_v3 }
  0x27   : > { %682 = vmatmul.mubr.f32.vlgmr.msra.gmra.mrb[0].mxu0 %v242_v53 }
  0x28   : > { %717 = vmatmul.mubr.f32.vlgmr.msra.gmra.mrb[0].mxu1 %v207_v49  ;;  %804 = vmatpush3.bf16.msra.mxu0 %v803_v54 }
  0x29   : > { %805 = vmatprep.subr.bf16.mxu0 %v845_v3  ;;  %751 = vmatprep.mubr.msk.f32.mxu0 %vm846_vm0, %v847_v11  ;;  %v593_v11 = vld [vmem:[%s1080_s1 + $0x178] sm:$0xff] }
  0x2a   : > { %v824_v12 = vpack.c.bf16 %v593_v11, %v592_v10 }
  0x2c   : > { %807 = vmatpush3.bf16.msra.mxu0 %v806_v57 }
  0x2d   : > { %808 = vmatprep.subr.bf16.mxu0 %v845_v3 }
  0x30   : > { %810 = vmatpush3.bf16.msra.mxu0 %v809_v60 }
  0x31   : > { %811 = vmatprep.subr.bf16.mxu0 %v845_v3 }
  0x34   : > { %813 = vmatpush3.bf16.msra.mxu0 %v812_v63 }
  0x35   : > { %814 = vmatprep.subr.bf16.mxu0 %v845_v3 }
  0x38   : > { %816 = vmatpush3.bf16.msra.mxu0 %v815_v2 }
  0x39   : > { %817 = vmatprep.subr.bf16.mxu0 %v845_v3 }
  0x3c   : > { %819 = vmatpush3.bf16.msra.mxu0 %v818_v6 }
  0x3d   : > { %820 = vmatprep.subr.bf16.mxu0 %v845_v3 }
  0x40   : > { %822 = vmatpush3.bf16.msra.mxu0 %v821_v9 }
  0x41   : > { %823 = vmatprep.subr.bf16.mxu0 %v845_v3 }
  0x44   : > { %825 = vmatpush3.bf16.msra.mxu0 %v824_v12 }
  0x47   : > { %752 = vmatmul.mubr.f32.vlgmr.msra.gmra.mrb[2].mxu0 %v401_v13 }
  0xfa   : > { %v310_v14 = vpop.f32.mrb[0].mxu0 }
  0xfb   : > { %v683_v15 = vpop.f32.mrb[1].mxu0  ;;  %v380_v16 = vpop.f32.mrb[0].mxu1 }
  0xfc   : > { %v381_v17 = vadd.f32 %v380_v16, %v310_v14  ;;  %v718_v18 = vpop.f32.mrb[1].mxu1 }
 0x11a   : > { %v469_v19 = vpop.f32.mrb[2].mxu0 }
 0x11b   : > { %v473_v21 = vadd.f32 %v469_v19, %v381_v17  ;;  %v753_v22 = vpop.f32.mrb[3].mxu0 }
 0x11d   : > { %v481_v3 = vadd.f32 %v594_v20, %v473_v21 }
 0x11f   : > { %v482_v24 = vmax.f32 %v481_v3, 0.0 }
 0x121   : > { %v490_v25 = vmul.f32 %v595_v23, %v482_v24 }
 0x123   : > { %492 = vst.msk [vmem:[%s206_s29] sm:$0x3] %vm491_vm1, %v490_v25 }
 0x124 PF: > { %s14_s15 = sadd.s32 1, %s843_s15  }
 0x125   : > { %p11_p4 = scmp.ge.s32.totalorder %s14_s15, 4  }
 0x127   :  { %13 = sbr.rel (!%p11_p4) target bundleno = 1 (0x1), region = 71 }

// kernel: _lambda_.20
= control target key start
LH: loop header
LB: loop body
LE: loop exit
PB: predicated region body
PF: predicated region fallthrough
CT: control target
= control target key end

     0   :  { %s743_s12 = smov 0   ;;  %s906_s0 = inlined_call_operand.vmem [shape: f32[2,1,6,96], index: 0, kind: input, shape index: {}]   ;;  %s907_s1 = inlined_call_operand.vmem [shape: f32[3,96,64], index: 1, kind: input, shape index: {}]   ;;  %s908_s2 = inlined_call_operand.vmem [shape: f32[1,64], index: 2, kind: input, shape index: {}]   ;;  %s909_s3 = inlined_call_operand.vmem [shape: f32[2,4,64], index: 3, kind: output, shape index: {}]  }
   0x1 LB: > { %s490_s13 = sadd.s32 4294967295, %s718_s12   ;;  %p494_p0 = scmp.ge.s32.totalorder %s718_s12, 1  ;;  %s718_s12 = sphi %s743_s12, %s13_s12  }
   0x2   : > { %p136_p1 = scmp.lt.s32.totalorder %s718_s12, 3 }
   0x4   : > { %p137_p2 = pnand %p494_p0, %p136_p1 }
   0x5   : > { %v497_v0 = vld [vmem:[%s907_s1 + $0x60] sm:$0xff] (!%p137_p2)  ;;  %v498_v1 = vld [vmem:[%s907_s1 + $0x68] sm:$0xff] (!%p137_p2)  ;;  %v720_v3 = vmov (!%p137_p2), 0.0|0.0   ;;  %v499_v6 = vld [vmem:[%s907_s1 + $0x70] sm:$0xff] (!%p137_p2)  ;;  %vm721_vm0 = vmmov (!%p137_p2), 0   ;;  %v722_v11 = vmov (!%p137_p2), 0.0  }
   0x6   : > { %140 = sbr.rel (%p137_p2) target bundleno = 274 (0x112), region = 32  ;;  %v167_v2 = vld [vmem:[%s907_s1] sm:$0xff] (!%p137_p2)  ;;  %647 = vmatprep.subr.bf16.mxu0 (!%p137_p2), %v720_v3  ;;  %v648_v4 = vpack.c.bf16 (!%p137_p2), %v498_v1, %v497_v0  ;;  %665 = vmatprep.subr.bf16.mxu1 (!%p137_p2), %v720_v3  ;;  %v168_v5 = vld [vmem:[%s907_s1 + $0x8] sm:$0xff] (!%p137_p2)  ;;  %v500_v7 = vld [vmem:[%s907_s1 + $0x78] sm:$0xff] (!%p137_p2)  ;;  %p158_p3 = scmp.lt.s32.totalorder (!%p137_p2), %s490_s13, 1  ;;  %vm194_vm1 = vcmask (!%p137_p2), 785408  }
   0x7   : > { %v666_v8 = vpack.c.bf16 (!%p137_p2), %v168_v5, %v167_v2  ;;  %v169_v9 = vld [vmem:[%s907_s1 + $0x10] sm:$0xff] (!%p137_p2)  ;;  %v170_v10 = vld [vmem:[%s907_s1 + $0x18] sm:$0xff] (!%p137_p2)  ;;  %590 = vmatprep.mubr.msk.f32.mxu0 (!%p137_p2), %vm721_vm0, %v722_v11  ;;  %617 = vmatprep.mubr.msk.f32.mxu1 (!%p137_p2), %vm721_vm0, %v722_v11  ;;  %v651_v12 = vpack.c.bf16 (!%p137_p2), %v500_v7, %v499_v6  ;;  %v501_v14 = vld [vmem:[%s907_s1 + $0x80] sm:$0xff] (!%p137_p2)  ;;  %vm435_vm2 = vcmask (!%p137_p2), 519168  }
   0x8   : > { %649 = vmatpush3.bf16.msra.mxu0 (!%p137_p2), %v648_v4  ;;  %v669_v13 = vpack.c.bf16 (!%p137_p2), %v170_v10, %v169_v9  ;;  %v502_v15 = vld [vmem:[%s907_s1 + $0x88] sm:$0xff] (!%p137_p2)  ;;  %v171_v16 = vld [vmem:[%s907_s1 + $0x20] sm:$0xff] (!%p137_p2)  ;;  %v503_v20 = vld [vmem:[%s907_s1 + $0x90] sm:$0xff] (!%p137_p2) }
   0x9   : > { %667 = vmatpush3.bf16.msra.mxu1 (!%p137_p2), %v666_v8  ;;  %650 = vmatprep.subr.bf16.mxu0 (!%p137_p2), %v720_v3  ;;  %v172_v17 = vld [vmem:[%s907_s1 + $0x28] sm:$0xff] (!%p137_p2)  ;;  %v654_v18 = vpack.c.bf16 (!%p137_p2), %v502_v15, %v501_v14  ;;  %v504_v21 = vld [vmem:[%s907_s1 + $0x98] sm:$0xff] (!%p137_p2)  ;;  %v173_v22 = vld [vmem:[%s907_s1 + $0x30] sm:$0xff] (!%p137_p2) }
   0xa   : > { %668 = vmatprep.subr.bf16.mxu1 (!%p137_p2), %v720_v3  ;;  %v672_v19 = vpack.c.bf16 (!%p137_p2), %v172_v17, %v171_v16  ;;  %v174_v23 = vld [vmem:[%s907_s1 + $0x38] sm:$0xff] (!%p137_p2)  ;;  %v657_v24 = vpack.c.bf16 (!%p137_p2), %v504_v21, %v503_v20  ;;  %v505_v26 = vld [vmem:[%s907_s1 + $0xa0] sm:$0xff] (!%p137_p2)  ;;  %v506_v27 = vld [vmem:[%s907_s1 + $0xa8] sm:$0xff] (!%p137_p2) }
   0xb   : > { %v675_v25 = vpack.c.bf16 (!%p137_p2), %v174_v23, %v173_v22  ;;  %v175_v28 = vld [vmem:[%s907_s1 + $0x40] sm:$0xff] (!%p137_p2)  ;;  %v176_v29 = vld [vmem:[%s907_s1 + $0x48] sm:$0xff] (!%p137_p2)  ;;  %v660_v30 = vpack.c.bf16 (!%p137_p2), %v506_v27, %v505_v26  ;;  %v507_v32 = vld [vmem:[%s907_s1 + $0xb0] sm:$0xff] (!%p137_p2) }
   0xc   : > { %652 = vmatpush3.bf16.msra.mxu0 (!%p137_p2), %v651_v12  ;;  %v678_v31 = vpack.c.bf16 (!%p137_p2), %v176_v29, %v175_v28  ;;  %v508_v33 = vld [vmem:[%s907_s1 + $0xb8] sm:$0xff] (!%p137_p2)  ;;  %v177_v34 = vld [vmem:[%s907_s1 + $0x50] sm:$0xff] (!%p137_p2)  ;;  %v511_v39 = vld [vmem:[%s907_s1 + $0xc0] sm:$0xff] (!%p137_p2) }
   0xd   : > { %670 = vmatpush3.bf16.msra.mxu1 %v669_v13  ;;  %653 = vmatprep.subr.bf16.mxu0 %v720_v3  ;;  %s911_s13 = smov (!%p158_p3, %s490_s13), 1  ;;  %v178_v35 = vld [vmem:[%s907_s1 + $0x58] sm:$0xff]  ;;  %v663_v36 = vpack.c.bf16 %v508_v33, %v507_v32  ;;  %v512_v40 = vld [vmem:[%s907_s1 + $0xc8] sm:$0xff]  ;;  %v513_v43 = vld [vmem:[%s907_s1 + $0xd0] sm:$0xff] }
   0xe   : > { %671 = vmatprep.subr.bf16.mxu1 %v720_v3  ;;  %s495_s29 = sshll.u32 %s911_s13, 3  ;;  %v681_v38 = vpack.c.bf16 %v178_v35, %v177_v34  ;;  %v684_v42 = vpack.c.bf16 %v512_v40, %v511_v39  ;;  %v514_v44 = vld [vmem:[%s907_s1 + $0xd8] sm:$0xff]  ;;  %v515_v46 = vld [vmem:[%s907_s1 + $0xe0] sm:$0xff]  ;;  %v516_v47 = vld [vmem:[%s907_s1 + $0xe8] sm:$0xff]  ;;  %s496_s17 = sshll.u32 %s911_s13, 2 }
   0xf   : > { %s161_s9 = scalar_lea.vmem %s906_s0, %s495_s29  ;;  %v687_v45 = vpack.c.bf16 %v514_v44, %v513_v43  ;;  %v690_v48 = vpack.c.bf16 %v516_v47, %v515_v46  ;;  %v517_v49 = vld [vmem:[%s907_s1 + $0xf0] sm:$0xff]  ;;  %v518_v50 = vld [vmem:[%s907_s1 + $0xf8] sm:$0xff]  ;;  %v519_v52 = vld [vmem:[%s907_s1 + $0x100] sm:$0xff]  ;;  %s165_s20 = scalar_lea.vmem %s909_s3, %s496_s17 }
  0x10   : > { %655 = vmatpush3.bf16.msra.mxu0 %v654_v18  ;;  %v166_v37 = vld [vmem:[%s161_s9] sm:$0x3f]  ;;  %v693_v51 = vpack.c.bf16 %v518_v50, %v517_v49  ;;  %v520_v53 = vld [vmem:[%s907_s1 + $0x108] sm:$0xff]  ;;  %v521_v55 = vld [vmem:[%s907_s1 + $0x110] sm:$0xff] }
  0x11   : > { %673 = vmatpush3.bf16.msra.mxu1 %v672_v19  ;;  %656 = vmatprep.subr.bf16.mxu0 %v720_v3  ;;  %v193_v41 = vrot.slane %v166_v37, 1  ;;  %v696_v54 = vpack.c.bf16 %v520_v53, %v519_v52  ;;  %v522_v56 = vld [vmem:[%s907_s1 + $0x118] sm:$0xff]  ;;  %v352_v58 = vrot.slane %v166_v37, 2  ;;  %v524_v1 = vld [vmem:[%s908_s2] ss:$0 sm:$0xff] }
  0x12   : > { %674 = vmatprep.subr.bf16.mxu1 %v720_v3  ;;  %v699_v57 = vpack.c.bf16 %v522_v56, %v521_v55 }
  0x14   : > { %658 = vmatpush3.bf16.msra.mxu0 %v657_v24 }
  0x15   : > { %676 = vmatpush3.bf16.msra.mxu1 %v675_v25  ;;  %659 = vmatprep.subr.bf16.mxu0 %v720_v3 }
  0x16   : > { %677 = vmatprep.subr.bf16.mxu1 %v720_v3 }
  0x18   : > { %661 = vmatpush3.bf16.msra.mxu0 %v660_v30 }
  0x19   : > { %679 = vmatpush3.bf16.msra.mxu1 %v678_v31  ;;  %662 = vmatprep.subr.bf16.mxu0 %v720_v3 }
  0x1a   : > { %680 = vmatprep.subr.bf16.mxu1 %v720_v3 }
  0x1c   : > { %664 = vmatpush3.bf16.msra.mxu0 %v663_v36 }
  0x1d   : > { %682 = vmatpush3.bf16.msra.mxu1 %v681_v38  ;;  %683 = vmatprep.subr.bf16.mxu0 %v720_v3 }
  0x1f   : > { %591 = vmatmul.mubr.msk.f32.vlgmr.msra.gmra.mrb[0].mxu0 %vm194_vm1, %v193_v41 }
  0x20   : > { %618 = vmatmul.mubr.msk.f32.vlgmr.msra.gmra.mrb[0].mxu1 %vm194_vm1, %v166_v37  ;;  %685 = vmatpush3.bf16.msra.mxu0 %v684_v42 }
  0x21   : > { %686 = vmatprep.subr.bf16.mxu0 %v720_v3  ;;  %644 = vmatprep.mubr.msk.f32.mxu0 %vm721_vm0, %v722_v11 }
  0x24   : > { %688 = vmatpush3.bf16.msra.mxu0 %v687_v45 }
  0x25   : > { %689 = vmatprep.subr.bf16.mxu0 %v720_v3 }
  0x28   : > { %691 = vmatpush3.bf16.msra.mxu0 %v690_v48 }
  0x29   : > { %692 = vmatprep.subr.bf16.mxu0 %v720_v3 }
  0x2c   : > { %694 = vmatpush3.bf16.msra.mxu0 %v693_v51 }
  0x2d   : > { %695 = vmatprep.subr.bf16.mxu0 %v720_v3 }
  0x30   : > { %697 = vmatpush3.bf16.msra.mxu0 %v696_v54 }
  0x31   : > { %698 = vmatprep.subr.bf16.mxu0 %v720_v3 }
  0x34   : > { %700 = vmatpush3.bf16.msra.mxu0 %v699_v57 }
  0x37   : > { %645 = vmatmul.mubr.msk.f32.vlgmr.msra.gmra.mrb[2].mxu0 %vm194_vm1, %v352_v58 }
  0xf2   : > { %v263_v59 = vpop.f32.mrb[0].mxu0 }
  0xf3   : > { %v592_v60 = vpop.f32.mrb[1].mxu0  ;;  %v335_v61 = vpop.f32.mrb[0].mxu1 }
  0xf4   : > { %v336_v62 = vadd.f32 %v335_v61, %v263_v59  ;;  %v619_v63 = vpop.f32.mrb[1].mxu1 }
 0x10a   : > { %v421_v0 = vpop.f32.mrb[2].mxu0 }
 0x10b   : > { %v425_v2 = vadd.f32 %v421_v0, %v336_v62  ;;  %v646_v4 = vpop.f32.mrb[3].mxu0 }
 0x10d   : > { %v433_v5 = vadd.f32 %v524_v1, %v425_v2 }
 0x10f   : > { %v434_v3 = vmax.f32 %v433_v5, 0.0 }
 0x111   : > { %436 = vst.msk [vmem:[%s165_s20] sm:$0xf] %vm435_vm2, %v434_v3 }
 0x112 PF: > { %s13_s12 = sadd.s32 1, %s718_s12  }
 0x113   : > { %p10_p4 = scmp.ge.s32.totalorder %s13_s12, 4  }
 0x115   :  { %12 = sbr.rel (!%p10_p4) target bundleno = 1 (0x1), region = 64 }

// kernel: _lambda_.19
= control target key start
LH: loop header
LB: loop body
LE: loop exit
PB: predicated region body
PF: predicated region fallthrough
CT: control target
= control target key end

     0   :  { %s1182_s12 = smov 0   ;;  %s1565_s0 = inlined_call_operand.vmem [shape: f32[2,1,6,288], index: 0, kind: input, shape index: {}]   ;;  %s1566_s1 = inlined_call_operand.vmem [shape: f32[3,288,64], index: 1, kind: input, shape index: {}]   ;;  %s1567_s2 = inlined_call_operand.vmem [shape: f32[1,64], index: 2, kind: input, shape index: {}]   ;;  %s1568_s3 = inlined_call_operand.vmem [shape: f32[2,4,64], index: 3, kind: output, shape index: {}]  }
   0x1 LB: > { %s787_s13 = sadd.s32 4294967295, %s1157_s12   ;;  %p791_p0 = scmp.ge.s32.totalorder %s1157_s12, 1  ;;  %s1157_s12 = sphi %s1182_s12, %s13_s12  }
   0x2   : > { %p137_p1 = scmp.lt.s32.totalorder %s1157_s12, 3 }
   0x4   : > { %p138_p2 = pnand %p791_p0, %p137_p1 }
   0x5   : > { %v810_v0 = vld [vmem:[%s1566_s1 + $0x1a0] sm:$0xff] (!%p138_p2)  ;;  %v811_v1 = vld [vmem:[%s1566_s1 + $0x1a8] sm:$0xff] (!%p138_p2)  ;;  %v1159_v3 = vmov (!%p138_p2), 0.0|0.0   ;;  %vm1160_vm0 = vmmov (!%p138_p2), 0   ;;  %v1161_v8 = vmov (!%p138_p2), 0.0   ;;  %p160_p3 = scmp.lt.s32.totalorder (!%p138_p2), %s787_s13, 1 }
   0x6   : > { %141 = sbr.rel (%p138_p2) target bundleno = 297 (0x129), region = 32  ;;  %v826_v2 = vld [vmem:[%s1566_s1 + $0x220] sm:$0xff] (!%p138_p2)  ;;  %1057 = vmatprep.subr.bf16.mxu1 (!%p138_p2), %v1159_v3  ;;  %v1025_v4 = vpack.c.bf16 (!%p138_p2), %v811_v1, %v810_v0  ;;  %v827_v5 = vld [vmem:[%s1566_s1 + $0x228] sm:$0xff] (!%p138_p2)  ;;  %1000 = vmatprep.mubr.msk.f32.mxu1 (!%p138_p2), %vm1160_vm0, %v1161_v8  ;;  %v812_v11 = vld [vmem:[%s1566_s1 + $0x1b0] sm:$0xff] (!%p138_p2)  ;;  %vm253_vm1 = vcmask (!%p138_p2), 261120   ;;  %vm732_vm2 = vcmask (!%p138_p2), 519168  }
   0x7   : > { %v794_v6 = vld [vmem:[%s1566_s1 + $0x120] sm:$0xff] (!%p138_p2)  ;;  %v795_v7 = vld [vmem:[%s1566_s1 + $0x128] sm:$0xff] (!%p138_p2)  ;;  %v1058_v9 = vpack.c.bf16 (!%p138_p2), %v827_v5, %v826_v2  ;;  %v813_v12 = vld [vmem:[%s1566_s1 + $0x1b8] sm:$0xff] (!%p138_p2) }
   0x8   : > { %v1027_v10 = vpack.c.bf16 (!%p138_p2), %v795_v7, %v794_v6  ;;  %v828_v13 = vld [vmem:[%s1566_s1 + $0x230] sm:$0xff] (!%p138_p2)  ;;  %1026 = vmatprep.subr.bf16.mxu0 (!%p138_p2), %v1025_v4  ;;  %v1029_v14 = vpack.c.bf16 (!%p138_p2), %v813_v12, %v812_v11  ;;  %v829_v15 = vld [vmem:[%s1566_s1 + $0x238] sm:$0xff] (!%p138_p2)  ;;  %v188_v20 = vld [vmem:[%s1566_s1 + $0x80] sm:$0xff] (!%p138_p2) }
   0x9   : > { %v796_v16 = vld [vmem:[%s1566_s1 + $0x130] sm:$0xff] (!%p138_p2)  ;;  %v797_v17 = vld [vmem:[%s1566_s1 + $0x138] sm:$0xff] (!%p138_p2)  ;;  %1059 = vmatpush3.bf16.msra.mxu1 (!%p138_p2), %v1058_v9  ;;  %v1061_v18 = vpack.c.bf16 (!%p138_p2), %v829_v15, %v828_v13  ;;  %v189_v21 = vld [vmem:[%s1566_s1 + $0x88] sm:$0xff] (!%p138_p2) }
   0xa   : > { %1028 = vmatpush3.bf16.msra.mxu0 (!%p138_p2), %v1027_v10  ;;  %v1031_v19 = vpack.c.bf16 (!%p138_p2), %v797_v17, %v796_v16  ;;  %v814_v22 = vld [vmem:[%s1566_s1 + $0x1c0] sm:$0xff] (!%p138_p2)  ;;  %1060 = vmatprep.subr.bf16.mxu1 (!%p138_p2), %v1159_v3  ;;  %v1063_v23 = vpack.c.bf16 (!%p138_p2), %v189_v21, %v188_v20  ;;  %v815_v24 = vld [vmem:[%s1566_s1 + $0x1c8] sm:$0xff] (!%p138_p2)  ;;  %v190_v30 = vld [vmem:[%s1566_s1 + $0x90] sm:$0xff] (!%p138_p2) }
   0xb   : > { %1030 = vmatprep.subr.bf16.mxu0 (!%p138_p2), %v1029_v14  ;;  %v172_v25 = vld [vmem:[%s1566_s1] sm:$0xff] (!%p138_p2)  ;;  %v173_v26 = vld [vmem:[%s1566_s1 + $0x8] sm:$0xff] (!%p138_p2)  ;;  %v1033_v27 = vpack.c.bf16 (!%p138_p2), %v815_v24, %v814_v22  ;;  %v191_v31 = vld [vmem:[%s1566_s1 + $0x98] sm:$0xff] (!%p138_p2) }
   0xc   : > { %v798_v28 = vld [vmem:[%s1566_s1 + $0x140] sm:$0xff] (!%p138_p2)  ;;  %v799_v29 = vld [vmem:[%s1566_s1 + $0x148] sm:$0xff] (!%p138_p2)  ;;  %v816_v32 = vld [vmem:[%s1566_s1 + $0x1d0] sm:$0xff] (!%p138_p2)  ;;  %v1065_v35 = vpack.c.bf16 (!%p138_p2), %v173_v26, %v172_v25  ;;  %v1067_v40 = vpack.c.bf16 (!%p138_p2), %v191_v31, %v190_v30 }
   0xd   : > { %s1570_s13 = smov (!%p160_p3, %s787_s13), 1  ;;  %v817_v33 = vld [vmem:[%s1566_s1 + $0x1d8] sm:$0xff]  ;;  %1062 = vmatpush3.bf16.msra.mxu1 %v1061_v18  ;;  %v1035_v36 = vpack.c.bf16 %v799_v29, %v798_v28  ;;  %v174_v37 = vld [vmem:[%s1566_s1 + $0x10] sm:$0xff]  ;;  %v192_v44 = vld [vmem:[%s1566_s1 + $0xa0] sm:$0xff] }
   0xe   : > { %s1139_s21 = smul.u32 24, %s1570_s13  ;;  %1032 = vmatpush3.bf16.msra.mxu0 %v1031_v19  ;;  %v175_v38 = vld [vmem:[%s1566_s1 + $0x18] sm:$0xff]  ;;  %1064 = vmatprep.subr.bf16.mxu1 %v1063_v23  ;;  %v1037_v41 = vpack.c.bf16 %v817_v33, %v816_v32  ;;  %v800_v42 = vld [vmem:[%s1566_s1 + $0x150] sm:$0xff]  ;;  %v193_v45 = vld [vmem:[%s1566_s1 + $0xa8] sm:$0xff]  ;;  %s793_s14 = sshll.u32 %s1570_s13, 2 }
   0xf   : > { %1034 = vmatprep.subr.bf16.mxu0 %v1033_v27  ;;  %v801_v43 = vld [vmem:[%s1566_s1 + $0x158] sm:$0xff]  ;;  %v818_v46 = vld [vmem:[%s1566_s1 + $0x1e0] sm:$0xff]  ;;  %v819_v47 = vld [vmem:[%s1566_s1 + $0x1e8] sm:$0xff]  ;;  %v1069_v48 = vpack.c.bf16 %v175_v38, %v174_v37  ;;  %v1071_v52 = vpack.c.bf16 %v193_v45, %v192_v44  ;;  %s168_s17 = scalar_lea.vmem %s1568_s3, %s793_s14 }
  0x10   : > { %s1263_s7 = scalar_lea.vmem %s1565_s0, %s1139_s21  ;;  %v1039_v49 = vpack.c.bf16 %v801_v43, %v800_v42  ;;  %v176_v50 = vld [vmem:[%s1566_s1 + $0x20] sm:$0xff]  ;;  %v177_v51 = vld [vmem:[%s1566_s1 + $0x28] sm:$0xff]  ;;  %v1041_v53 = vpack.c.bf16 %v819_v47, %v818_v46  ;;  %v194_v56 = vld [vmem:[%s1566_s1 + $0xb0] sm:$0xff] }
  0x11   : > { %v1275_v34 = vld [vmem:[%s1263_s7 + $0x10] sm:$0x3f]  ;;  %v802_v54 = vld [vmem:[%s1566_s1 + $0x160] sm:$0xff]  ;;  %v803_v55 = vld [vmem:[%s1566_s1 + $0x168] sm:$0xff]  ;;  %v1073_v60 = vpack.c.bf16 %v177_v51, %v176_v50 }
  0x12   : > { %v250_v39 = vrot.slane %v1275_v34, 1  ;;  %1036 = vmatpush3.bf16.msra.mxu0 %v1035_v36  ;;  %v195_v57 = vld [vmem:[%s1566_s1 + $0xb8] sm:$0xff]  ;;  %v820_v58 = vld [vmem:[%s1566_s1 + $0x1f0] sm:$0xff]  ;;  %v1043_v61 = vpack.c.bf16 %v803_v55, %v802_v54  ;;  %v196_v5 = vld [vmem:[%s1566_s1 + $0xc0] sm:$0xff] }
  0x13   : > { %1038 = vmatprep.subr.bf16.mxu0 %v1037_v41  ;;  %v821_v59 = vld [vmem:[%s1566_s1 + $0x1f8] sm:$0xff]  ;;  %v178_v62 = vld [vmem:[%s1566_s1 + $0x30] sm:$0xff]  ;;  %v1075_v0 = vpack.c.bf16 %v195_v57, %v194_v56  ;;  %v197_v6 = vld [vmem:[%s1566_s1 + $0xc8] sm:$0xff] }
  0x14   : > { %1001 = vmatmul.mubr.msk.f32.vlgmr.msra.gmra.mrb[0].mxu1 %vm253_vm1, %v250_v39  ;;  %v179_v63 = vld [vmem:[%s1566_s1 + $0x38] sm:$0xff]  ;;  %v1045_v1 = vpack.c.bf16 %v821_v59, %v820_v58  ;;  %v804_v2 = vld [vmem:[%s1566_s1 + $0x170] sm:$0xff]  ;;  %v822_v7 = vld [vmem:[%s1566_s1 + $0x200] sm:$0xff]  ;;  %v1079_v15 = vpack.c.bf16 %v197_v6, %v196_v5 }
  0x15   : > { %1066 = vmatpush3.bf16.msra.mxu1 %v1065_v35  ;;  %v805_v4 = vld [vmem:[%s1566_s1 + $0x178] sm:$0xff]  ;;  %v823_v9 = vld [vmem:[%s1566_s1 + $0x208] sm:$0xff]  ;;  %v1077_v10 = vpack.c.bf16 %v179_v63, %v178_v62  ;;  %v180_v12 = vld [vmem:[%s1566_s1 + $0x40] sm:$0xff] }
  0x16   : > { %1068 = vmatprep.subr.bf16.mxu1 %v1067_v40  ;;  %1040 = vmatpush3.bf16.msra.mxu0 %v1039_v49  ;;  %v1047_v11 = vpack.c.bf16 %v805_v4, %v804_v2  ;;  %v181_v13 = vld [vmem:[%s1566_s1 + $0x48] sm:$0xff]  ;;  %v1049_v16 = vpack.c.bf16 %v823_v9, %v822_v7  ;;  %v806_v17 = vld [vmem:[%s1566_s1 + $0x180] sm:$0xff]  ;;  %v198_v19 = vld [vmem:[%s1566_s1 + $0xd0] sm:$0xff] }
  0x17   : > { %1042 = vmatprep.subr.bf16.mxu0 %v1041_v53  ;;  %v1358_v14 = vld [vmem:[%s1263_s7 + $0x8] sm:$0x3f]  ;;  %v199_v21 = vld [vmem:[%s1566_s1 + $0xd8] sm:$0xff]  ;;  %v824_v22 = vld [vmem:[%s1566_s1 + $0x210] sm:$0xff]  ;;  %v1081_v24 = vpack.c.bf16 %v181_v13, %v180_v12 }
  0x18   : > { %v807_v18 = vld [vmem:[%s1566_s1 + $0x188] sm:$0xff]  ;;  %v249_v20 = vrot.slane %v1358_v14, 1  ;;  %v825_v23 = vld [vmem:[%s1566_s1 + $0x218] sm:$0xff]  ;;  %462 = vmatprep.mubr.f32.mxu1 %v1358_v14  ;;  %v182_v26 = vld [vmem:[%s1566_s1 + $0x50] sm:$0xff]  ;;  %v1083_v28 = vpack.c.bf16 %v199_v21, %v198_v19 }
  0x19   : > { %1070 = vmatpush3.bf16.msra.mxu1 %v1069_v48  ;;  %v1051_v25 = vpack.c.bf16 %v807_v18, %v806_v17  ;;  %v183_v27 = vld [vmem:[%s1566_s1 + $0x58] sm:$0xff]  ;;  %v1053_v29 = vpack.c.bf16 %v825_v23, %v824_v22  ;;  %v808_v30 = vld [vmem:[%s1566_s1 + $0x190] sm:$0xff]  ;;  %v200_v32 = vld [vmem:[%s1566_s1 + $0xe0] sm:$0xff] }
  0x1a   : > { %1072 = vmatprep.subr.bf16.mxu1 %v1071_v52  ;;  %1044 = vmatpush3.bf16.msra.mxu0 %v1043_v61  ;;  %v809_v31 = vld [vmem:[%s1566_s1 + $0x198] sm:$0xff]  ;;  %v201_v33 = vld [vmem:[%s1566_s1 + $0xe8] sm:$0xff]  ;;  %v848_v35 = vld [vmem:[%s1566_s1 + $0x2c0] sm:$0xff]  ;;  %v1085_v37 = vpack.c.bf16 %v183_v27, %v182_v26  ;;  %v576_v61 = vrot.slane %v1358_v14, 2 }
  0x1b   : > { %1046 = vmatprep.subr.bf16.mxu0 %v1045_v1  ;;  %320 = vmatprep.mubr.f32.mxu0 %v249_v20  ;;  %v849_v36 = vld [vmem:[%s1566_s1 + $0x2c8] sm:$0xff]  ;;  %v1055_v38 = vpack.c.bf16 %v809_v31, %v808_v30  ;;  %v1405_v39 = vld [vmem:[%s1263_s7] sm:$0x3f]  ;;  %v1087_v42 = vpack.c.bf16 %v201_v33, %v200_v32  ;;  %v202_v46 = vld [vmem:[%s1566_s1 + $0xf0] sm:$0xff] }
  0x1c   : > { %v184_v40 = vld [vmem:[%s1566_s1 + $0x60] sm:$0xff]  ;;  %v185_v41 = vld [vmem:[%s1566_s1 + $0x68] sm:$0xff]  ;;  %v1101_v43 = vpack.c.bf16 %v849_v36, %v848_v35  ;;  %v203_v47 = vld [vmem:[%s1566_s1 + $0xf8] sm:$0xff]  ;;  %v248_v50 = vrot.slane %v1405_v39, 1 }
  0x1d   : > { %1074 = vmatpush3.bf16.msra.mxu1 %v1073_v60  ;;  %v832_v44 = vld [vmem:[%s1566_s1 + $0x240] sm:$0xff]  ;;  %v833_v45 = vld [vmem:[%s1566_s1 + $0x248] sm:$0xff]  ;;  %v850_v48 = vld [vmem:[%s1566_s1 + $0x2d0] sm:$0xff]  ;;  %v1089_v51 = vpack.c.bf16 %v185_v41, %v184_v40  ;;  %v1091_v54 = vpack.c.bf16 %v203_v47, %v202_v46 }
  0x1e   : > { %1076 = vmatprep.subr.bf16.mxu1 %v1075_v0  ;;  %1048 = vmatpush3.bf16.msra.mxu0 %v1047_v11  ;;  %v851_v49 = vld [vmem:[%s1566_s1 + $0x2d8] sm:$0xff]  ;;  %v1103_v52 = vpack.c.bf16 %v833_v45, %v832_v44  ;;  %v186_v53 = vld [vmem:[%s1566_s1 + $0x70] sm:$0xff]  ;;  %v852_v59 = vld [vmem:[%s1566_s1 + $0x2e0] sm:$0xff]  ;;  %v577_v45 = vrot.slane %v1275_v34, 2 }
  0x1f   : > { %1050 = vmatprep.subr.bf16.mxu0 %v1049_v16  ;;  %v187_v55 = vld [vmem:[%s1566_s1 + $0x78] sm:$0xff]  ;;  %v1105_v56 = vpack.c.bf16 %v851_v49, %v850_v48  ;;  %v834_v57 = vld [vmem:[%s1566_s1 + $0x250] sm:$0xff]  ;;  %v853_v60 = vld [vmem:[%s1566_s1 + $0x2e8] sm:$0xff] }
  0x20   : > { %v835_v58 = vld [vmem:[%s1566_s1 + $0x258] sm:$0xff]  ;;  %v1093_v62 = vpack.c.bf16 %v187_v55, %v186_v53  ;;  %v204_v0 = vld [vmem:[%s1566_s1 + $0x100] sm:$0xff]  ;;  %v205_v1 = vld [vmem:[%s1566_s1 + $0x108] sm:$0xff]  ;;  %v1109_v2 = vpack.c.bf16 %v853_v60, %v852_v59 }
  0x21   : > { %1078 = vmatpush3.bf16.msra.mxu1 %v1077_v10  ;;  %v1107_v63 = vpack.c.bf16 %v835_v58, %v834_v57  ;;  %v836_v4 = vld [vmem:[%s1566_s1 + $0x260] sm:$0xff]  ;;  %v837_v5 = vld [vmem:[%s1566_s1 + $0x268] sm:$0xff]  ;;  %v854_v6 = vld [vmem:[%s1566_s1 + $0x2f0] sm:$0xff]  ;;  %v1096_v9 = vpack.c.bf16 %v205_v1, %v204_v0 }
  0x22   : > { %1080 = vmatprep.subr.bf16.mxu1 %v1079_v15  ;;  %1052 = vmatpush3.bf16.msra.mxu0 %v1051_v25  ;;  %v855_v7 = vld [vmem:[%s1566_s1 + $0x2f8] sm:$0xff]  ;;  %v1111_v10 = vpack.c.bf16 %v837_v5, %v836_v4  ;;  %v206_v11 = vld [vmem:[%s1566_s1 + $0x110] sm:$0xff]  ;;  %v856_v16 = vld [vmem:[%s1566_s1 + $0x300] sm:$0xff] }
  0x23   : > { %1054 = vmatprep.subr.bf16.mxu0 %v1053_v29  ;;  %v207_v12 = vld [vmem:[%s1566_s1 + $0x118] sm:$0xff]  ;;  %v1113_v13 = vpack.c.bf16 %v855_v7, %v854_v6  ;;  %v838_v14 = vld [vmem:[%s1566_s1 + $0x270] sm:$0xff]  ;;  %v857_v17 = vld [vmem:[%s1566_s1 + $0x308] sm:$0xff] }
  0x24   : > { %v839_v15 = vld [vmem:[%s1566_s1 + $0x278] sm:$0xff]  ;;  %v1099_v18 = vpack.c.bf16 %v207_v12, %v206_v11  ;;  %v840_v20 = vld [vmem:[%s1566_s1 + $0x280] sm:$0xff]  ;;  %v1117_v21 = vpack.c.bf16 %v857_v17, %v856_v16  ;;  %v841_v22 = vld [vmem:[%s1566_s1 + $0x288] sm:$0xff] }
  0x25   : > { %1082 = vmatpush3.bf16.msra.mxu1 %v1081_v24  ;;  %v1115_v19 = vpack.c.bf16 %v839_v15, %v838_v14  ;;  %v864_v23 = vld [vmem:[%s1566_s1 + $0x340] sm:$0xff]  ;;  %v865_v24 = vld [vmem:[%s1566_s1 + $0x348] sm:$0xff]  ;;  %v858_v25 = vld [vmem:[%s1566_s1 + $0x310] sm:$0xff]  ;;  %v1119_v27 = vpack.c.bf16 %v841_v22, %v840_v20 }
  0x26   : > { %1084 = vmatprep.subr.bf16.mxu1 %v1083_v28  ;;  %1056 = vmatpush3.bf16.msra.mxu0 %v1055_v38  ;;  %v859_v26 = vld [vmem:[%s1566_s1 + $0x318] sm:$0xff]  ;;  %v842_v28 = vld [vmem:[%s1566_s1 + $0x290] sm:$0xff]  ;;  %v1134_v29 = vpack.c.bf16 %v865_v24, %v864_v23  ;;  %v860_v35 = vld [vmem:[%s1566_s1 + $0x320] sm:$0xff] }
  0x27   : > { %1102 = vmatprep.subr.bf16.mxu0 %v1101_v43  ;;  %v1121_v30 = vpack.c.bf16 %v859_v26, %v858_v25  ;;  %v843_v31 = vld [vmem:[%s1566_s1 + $0x298] sm:$0xff]  ;;  %v866_v32 = vld [vmem:[%s1566_s1 + $0x350] sm:$0xff]  ;;  %v861_v36 = vld [vmem:[%s1566_s1 + $0x328] sm:$0xff] }
  0x28   : > { %v867_v33 = vld [vmem:[%s1566_s1 + $0x358] sm:$0xff]  ;;  %v1125_v40 = vpack.c.bf16 %v861_v36, %v860_v35  ;;  %v844_v41 = vld [vmem:[%s1566_s1 + $0x2a0] sm:$0xff]  ;;  %v862_v43 = vld [vmem:[%s1566_s1 + $0x330] sm:$0xff] }
  0x29   : > { %1086 = vmatpush3.bf16.msra.mxu1 %v1085_v37  ;;  %321 = vmatmul.mubr.f32.vlgmr.msra.gmra.mrb[0].mxu0 %v248_v50  ;;  %v1123_v37 = vpack.c.bf16 %v843_v31, %v842_v28  ;;  %v1137_v38 = vpack.c.bf16 %v867_v33, %v866_v32  ;;  %v863_v44 = vld [vmem:[%s1566_s1 + $0x338] sm:$0xff]  ;;  %v869_v4 = vld [vmem:[%s1567_s2] ss:$0 sm:$0xff] }
  0x2a   : > { %1088 = vmatprep.subr.bf16.mxu1 %v1087_v42  ;;  %1104 = vmatpush3.bf16.msra.mxu0 %v1103_v52  ;;  %v845_v42 = vld [vmem:[%s1566_s1 + $0x2a8] sm:$0xff]  ;;  %v1129_v47 = vpack.c.bf16 %v863_v44, %v862_v43  ;;  %v847_v48 = vld [vmem:[%s1566_s1 + $0x2b8] sm:$0xff] }
  0x2b   : > { %1106 = vmatprep.subr.bf16.mxu0 %v1105_v56  ;;  %646 = vmatprep.mubr.f32.mxu0 %v576_v61  ;;  %v1127_v46 = vpack.c.bf16 %v845_v42, %v844_v41 }
  0x2d   : > { %1090 = vmatpush3.bf16.msra.mxu1 %v1089_v51 }
  0x2e   : > { %1092 = vmatprep.subr.bf16.mxu1 %v1091_v54  ;;  %1108 = vmatpush3.bf16.msra.mxu0 %v1107_v63 }
  0x2f   : > { %1110 = vmatprep.subr.bf16.mxu0 %v1109_v2 }
  0x31   : > { %1094 = vmatpush3.bf16.msra.mxu1 %v1093_v62 }
  0x32   : > { %1095 = vmatprep.subr.bf16.mxu1 %v1159_v3  ;;  %1112 = vmatpush3.bf16.msra.mxu0 %v1111_v10 }
  0x33   : > { %1114 = vmatprep.subr.bf16.mxu0 %v1113_v13 }
  0x34   : > { %463 = vmatmul.mubr.f32.vlgmr.msra.gmra.mrb[2].mxu1 %v1405_v39 }
  0x35   : > { %1097 = vmatpush3.bf16.msra.mxu1 %v1096_v9  ;;  %1011 = vmatprep.mubr.msk.f32.mxu1 %vm1160_vm0, %v1161_v8 }
  0x36   : > { %1098 = vmatprep.subr.bf16.mxu1 %v1159_v3  ;;  %1116 = vmatpush3.bf16.msra.mxu0 %v1115_v19 }
  0x37   : > { %1118 = vmatprep.subr.bf16.mxu0 %v1117_v21 }
  0x39   : > { %1100 = vmatpush3.bf16.msra.mxu1 %v1099_v18 }
  0x3a   : > { %1133 = vmatprep.subr.bf16.mxu1 %v1159_v3  ;;  %1120 = vmatpush3.bf16.msra.mxu0 %v1119_v27 }
  0x3b   : > { %1122 = vmatprep.subr.bf16.mxu0 %v1121_v30 }
  0x3c   : > { %1012 = vmatmul.mubr.msk.f32.vlgmr.msra.gmra.mrb[4].mxu1 %vm253_vm1, %v1275_v34 }
  0x3d   : > { %1135 = vmatpush3.bf16.msra.mxu1 %v1134_v29  ;;  %1022 = vmatprep.mubr.msk.f32.mxu1 %vm1160_vm0, %v1161_v8  ;;  %v575_v8 = vrot.slane %v1405_v39, 2 }
  0x3e   : > { %1136 = vmatprep.subr.bf16.mxu1 %v1159_v3  ;;  %1124 = vmatpush3.bf16.msra.mxu0 %v1123_v37  ;;  %v846_v3 = vld [vmem:[%s1566_s1 + $0x2b0] sm:$0xff] }
  0x3f   : > { %1126 = vmatprep.subr.bf16.mxu0 %v1125_v40  ;;  %v1131_v49 = vpack.c.bf16 %v847_v48, %v846_v3 }
  0x41   : > { %1138 = vmatpush3.bf16.msra.mxu1 %v1137_v38 }
  0x42   : > { %1128 = vmatpush3.bf16.msra.mxu0 %v1127_v46 }
  0x43   : > { %1130 = vmatprep.subr.bf16.mxu0 %v1129_v47 }
  0x44   : > { %1023 = vmatmul.mubr.msk.f32.vlgmr.msra.gmra.mrb[6].mxu1 %vm253_vm1, %v577_v45 }
  0x46   : > { %1132 = vmatpush3.bf16.msra.mxu0 %v1131_v49 }
  0x49   : > { %647 = vmatmul.mubr.f32.vlgmr.msra.gmra.mrb[2].mxu0 %v575_v8 }
  0xe7   : > { %v392_v34 = vpop.f32.mrb[0].mxu1 }
  0xe8   : > { %v1002_v50 = vpop.f32.mrb[1].mxu1 }
  0xfc   : > { %v904_v51 = vpop.f32.mrb[0].mxu0 }
  0xfd   : > { %v905_v52 = vpop.f32.mrb[1].mxu0 }
  0xfe   : > { %v906_v53 = vadd.f32 %v905_v52, %v904_v51 }
 0x100   : > { %v393_v54 = vadd.f32 %v906_v53, %v392_v34 }
 0x107   : > { %v944_v55 = vpop.f32.mrb[2].mxu1 }
 0x108   : > { %v945_v56 = vpop.f32.mrb[3].mxu1 }
 0x109   : > { %v946_v57 = vadd.f32 %v945_v56, %v944_v55 }
 0x10b   : > { %v465_v58 = vadd.f32 %v946_v57, %v393_v54 }
 0x10f   : > { %v534_v59 = vpop.f32.mrb[4].mxu1 }
 0x110   : > { %v535_v60 = vadd.f32 %v534_v59, %v465_v58  ;;  %v1013_v61 = vpop.f32.mrb[5].mxu1 }
 0x117   : > { %v718_v62 = vpop.f32.mrb[6].mxu1 }
 0x118   : > { %v1024_v63 = vpop.f32.mrb[7].mxu1 }
 0x11c   : > { %v984_v0 = vpop.f32.mrb[2].mxu0 }
 0x11d   : > { %v985_v39 = vpop.f32.mrb[3].mxu0 }
 0x11e   : > { %v986_v1 = vadd.f32 %v985_v39, %v984_v0 }
 0x120   : > { %v719_v2 = vadd.f32 %v986_v1, %v718_v62 }
 0x122   : > { %v722_v5 = vadd.f32 %v719_v2, %v535_v60 }
 0x124   : > { %v730_v6 = vadd.f32 %v869_v4, %v722_v5 }
 0x126   : > { %v731_v7 = vmax.f32 %v730_v6, 0.0 }
 0x128   : > { %733 = vst.msk [vmem:[%s168_s17] sm:$0xf] %vm732_vm2, %v731_v7 }
 0x129 PF: > { %s13_s12 = sadd.s32 1, %s1157_s12  }
 0x12a   : > { %p10_p4 = scmp.ge.s32.totalorder %s13_s12, 4  }
 0x12c   :  { %12 = sbr.rel (!%p10_p4) target bundleno = 1 (0x1), region = 64 }

// kernel: _lambda_.21
= control target key start
LH: loop header
LB: loop body
LE: loop exit
PB: predicated region body
PF: predicated region fallthrough
CT: control target
= control target key end

     0   :  { %s815_s12 = smov 0   ;;  %s1189_s0 = inlined_call_operand.vmem [shape: f32[2,1,10,240], index: 0, kind: input, shape index: {}]   ;;  %s1190_s1 = inlined_call_operand.vmem [shape: f32[3,240,64], index: 1, kind: input, shape index: {}]   ;;  %s1191_s2 = inlined_call_operand.vmem [shape: f32[1,64], index: 2, kind: input, shape index: {}]   ;;  %s1192_s3 = inlined_call_operand.vmem [shape: f32[2,8,64], index: 3, kind: output, shape index: {}]  }
   0x1 LB: > { %s567_s13 = sadd.s32 4294967295, %s792_s12   ;;  %p571_p0 = scmp.ge.s32.totalorder %s792_s12, 1  ;;  %s792_s12 = sphi %s815_s12, %s13_s12  }
   0x2   : > { %p137_p1 = scmp.lt.s32.totalorder %s792_s12, 3 }
   0x4   : > { %p138_p2 = pnand %p571_p0, %p137_p1 }
   0x5   : > { %v575_v0 = vld [vmem:[%s1190_s1 + $0xf0] sm:$0xff] (!%p138_p2)  ;;  %v576_v1 = vld [vmem:[%s1190_s1 + $0xf8] sm:$0xff] (!%p138_p2)  ;;  %v173_v2 = vld [vmem:[%s1190_s1] sm:$0xff] (!%p138_p2)  ;;  %v794_v3 = vmov (!%p138_p2), 0.0|0.0   ;;  %p160_p3 = scmp.lt.s32.totalorder (!%p138_p2), %s567_s13, 1  ;;  %vm246_vm0 = vcmask (!%p138_p2), 916480  }
   0x6   : > { %141 = sbr.rel (%p138_p2) target bundleno = 346 (0x15a), region = 32  ;;  %642 = vmatprep.subr.bf16.mxu0 (!%p138_p2), %v794_v3  ;;  %v643_v4 = vpack.c.bf16 (!%p138_p2), %v576_v1, %v575_v0  ;;  %687 = vmatprep.subr.bf16.mxu1 (!%p138_p2), %v794_v3  ;;  %v174_v5 = vld [vmem:[%s1190_s1 + $0x8] sm:$0xff] (!%p138_p2)  ;;  %v577_v6 = vld [vmem:[%s1190_s1 + $0x100] sm:$0xff] (!%p138_p2)  ;;  %v175_v9 = vld [vmem:[%s1190_s1 + $0x10] sm:$0xff] (!%p138_p2)  ;;  %vm238_vm1 = vcmask (!%p138_p2), 1046528   ;;  %vm422_vm2 = vcmask (!%p138_p2), 1045504  }
   0x7   : > { %v578_v7 = vld [vmem:[%s1190_s1 + $0x108] sm:$0xff] (!%p138_p2)  ;;  %v688_v8 = vpack.c.bf16 (!%p138_p2), %v174_v5, %v173_v2  ;;  %v176_v10 = vld [vmem:[%s1190_s1 + $0x18] sm:$0xff] (!%p138_p2)  ;;  %v579_v13 = vld [vmem:[%s1190_s1 + $0x110] sm:$0xff] (!%p138_p2)  ;;  %vm512_vm3 = vcmask (!%p138_p2), 523264  }
   0x8   : > { %644 = vmatpush1.bf16.msra.mxu0 (!%p138_p2), %v643_v4  ;;  %v646_v11 = vpack.c.bf16 (!%p138_p2), %v578_v7, %v577_v6  ;;  %v691_v12 = vpack.c.bf16 (!%p138_p2), %v176_v10, %v175_v9  ;;  %v580_v14 = vld [vmem:[%s1190_s1 + $0x118] sm:$0xff] (!%p138_p2)  ;;  %v177_v15 = vld [vmem:[%s1190_s1 + $0x20] sm:$0xff] (!%p138_p2)  ;;  %v178_v16 = vld [vmem:[%s1190_s1 + $0x28] sm:$0xff] (!%p138_p2) }
   0x9   : > { %689 = vmatpush1.bf16.msra.mxu1 (!%p138_p2), %v688_v8  ;;  %645 = vmatprep.subr.bf16.mxu0 (!%p138_p2), %v794_v3  ;;  %v649_v17 = vpack.c.bf16 (!%p138_p2), %v580_v14, %v579_v13  ;;  %v694_v18 = vpack.c.bf16 (!%p138_p2), %v178_v16, %v177_v15  ;;  %v581_v19 = vld [vmem:[%s1190_s1 + $0x120] sm:$0xff] (!%p138_p2)  ;;  %v582_v20 = vld [vmem:[%s1190_s1 + $0x128] sm:$0xff] (!%p138_p2)  ;;  %v179_v21 = vld [vmem:[%s1190_s1 + $0x30] sm:$0xff] (!%p138_p2) }
   0xa   : > { %690 = vmatprep.subr.bf16.mxu1 (!%p138_p2), %v794_v3  ;;  %v180_v22 = vld [vmem:[%s1190_s1 + $0x38] sm:$0xff] (!%p138_p2)  ;;  %v652_v23 = vpack.c.bf16 (!%p138_p2), %v582_v20, %v581_v19  ;;  %v583_v25 = vld [vmem:[%s1190_s1 + $0x130] sm:$0xff] (!%p138_p2)  ;;  %v181_v27 = vld [vmem:[%s1190_s1 + $0x40] sm:$0xff] (!%p138_p2) }
   0xb   : > { %v697_v24 = vpack.c.bf16 (!%p138_p2), %v180_v22, %v179_v21  ;;  %v584_v26 = vld [vmem:[%s1190_s1 + $0x138] sm:$0xff] (!%p138_p2)  ;;  %v182_v28 = vld [vmem:[%s1190_s1 + $0x48] sm:$0xff] (!%p138_p2)  ;;  %v585_v31 = vld [vmem:[%s1190_s1 + $0x140] sm:$0xff] (!%p138_p2) }
   0xc   : > { %647 = vmatpush1.bf16.msra.mxu0 (!%p138_p2), %v646_v11  ;;  %v655_v29 = vpack.c.bf16 (!%p138_p2), %v584_v26, %v583_v25  ;;  %v700_v30 = vpack.c.bf16 (!%p138_p2), %v182_v28, %v181_v27  ;;  %v586_v32 = vld [vmem:[%s1190_s1 + $0x148] sm:$0xff] (!%p138_p2)  ;;  %v183_v33 = vld [vmem:[%s1190_s1 + $0x50] sm:$0xff] (!%p138_p2)  ;;  %v184_v34 = vld [vmem:[%s1190_s1 + $0x58] sm:$0xff] (!%p138_p2) }
   0xd   : > { %692 = vmatpush1.bf16.msra.mxu1 %v691_v12  ;;  %648 = vmatprep.subr.bf16.mxu0 %v794_v3  ;;  %s1194_s13 = smov (!%p160_p3, %s567_s13), 1  ;;  %v658_v35 = vpack.c.bf16 %v586_v32, %v585_v31  ;;  %v587_v36 = vld [vmem:[%s1190_s1 + $0x150] sm:$0xff]  ;;  %v703_v37 = vpack.c.bf16 %v184_v34, %v183_v33  ;;  %v588_v38 = vld [vmem:[%s1190_s1 + $0x158] sm:$0xff]  ;;  %v185_v41 = vld [vmem:[%s1190_s1 + $0x60] sm:$0xff] }
   0xe   : > { %693 = vmatprep.subr.bf16.mxu1 %v794_v3  ;;  %s641_s29 = sshll.u32 %s1194_s13, 5  ;;  %v186_v42 = vld [vmem:[%s1190_s1 + $0x68] sm:$0xff]  ;;  %v661_v45 = vpack.c.bf16 %v588_v38, %v587_v36  ;;  %v589_v48 = vld [vmem:[%s1190_s1 + $0x160] sm:$0xff]  ;;  %v187_v50 = vld [vmem:[%s1190_s1 + $0x70] sm:$0xff]  ;;  %s574_s27 = sshll.u32 %s1194_s13, 3 }
   0xf   : > { %s915_s15 = scalar_lea.vmem %s1189_s0, %s641_s29  ;;  %v706_v47 = vpack.c.bf16 %v186_v42, %v185_v41  ;;  %v590_v49 = vld [vmem:[%s1190_s1 + $0x168] sm:$0xff]  ;;  %v188_v51 = vld [vmem:[%s1190_s1 + $0x78] sm:$0xff]  ;;  %v591_v54 = vld [vmem:[%s1190_s1 + $0x170] sm:$0xff]  ;;  %s168_s30 = scalar_lea.vmem %s1192_s3, %s574_s27 }
  0x10   : > { %650 = vmatpush1.bf16.msra.mxu0 %v649_v17  ;;  %v925_v39 = vld [vmem:[%s915_s15 + $0x8] sm:$0xff]  ;;  %v928_v40 = vld [vmem:[%s915_s15 + $0x18] sm:$0x3]  ;;  %v664_v52 = vpack.c.bf16 %v590_v49, %v589_v48  ;;  %v709_v53 = vpack.c.bf16 %v188_v51, %v187_v50  ;;  %v189_v56 = vld [vmem:[%s1190_s1 + $0x80] sm:$0xff] }
  0x11   : > { %695 = vmatpush1.bf16.msra.mxu1 %v694_v18  ;;  %651 = vmatprep.subr.bf16.mxu0 %v794_v3  ;;  %v242_v43 = vrot.slane %v925_v39, 1  ;;  %v243_v44 = vrot.slane %v928_v40, 1  ;;  %v592_v55 = vld [vmem:[%s1190_s1 + $0x178] sm:$0xff]  ;;  %v190_v57 = vld [vmem:[%s1190_s1 + $0x88] sm:$0xff]  ;;  %v593_v60 = vld [vmem:[%s1190_s1 + $0x180] sm:$0xff]  ;;  %v427_v41 = vrot.slane %v928_v40, 2 }
  0x12   : > { %696 = vmatprep.subr.bf16.mxu1 %v794_v3  ;;  %606 = vmatprep.mubr.msk.f32.mxu1 %vm246_vm0, %v925_v39  ;;  %v667_v58 = vpack.c.bf16 %v592_v55, %v591_v54  ;;  %v712_v59 = vpack.c.bf16 %v190_v57, %v189_v56  ;;  %v594_v61 = vld [vmem:[%s1190_s1 + $0x188] sm:$0xff]  ;;  %v191_v62 = vld [vmem:[%s1190_s1 + $0x90] sm:$0xff]  ;;  %v192_v63 = vld [vmem:[%s1190_s1 + $0x98] sm:$0xff]  ;;  %v426_v42 = vrot.slane %v925_v39, 2 }
  0x13   : > { %v244_v46 = vsel %vm238_vm1, %v242_v43, %v243_v44  ;;  %v670_v0 = vpack.c.bf16 %v594_v61, %v593_v60  ;;  %v715_v1 = vpack.c.bf16 %v192_v63, %v191_v62  ;;  %v595_v2 = vld [vmem:[%s1190_s1 + $0x190] sm:$0xff]  ;;  %v596_v4 = vld [vmem:[%s1190_s1 + $0x198] sm:$0xff]  ;;  %v193_v5 = vld [vmem:[%s1190_s1 + $0xa0] sm:$0xff] }
  0x14   : > { %653 = vmatpush1.bf16.msra.mxu0 %v652_v23  ;;  %605 = vmatprep.mubr.msk.f32.mxu0 %vm246_vm0, %v244_v46  ;;  %v194_v6 = vld [vmem:[%s1190_s1 + $0xa8] sm:$0xff]  ;;  %v673_v7 = vpack.c.bf16 %v596_v4, %v595_v2  ;;  %v597_v9 = vld [vmem:[%s1190_s1 + $0x1a0] sm:$0xff]  ;;  %v195_v11 = vld [vmem:[%s1190_s1 + $0xb0] sm:$0xff]  ;;  %v428_v40 = vsel %vm422_vm2, %v426_v42, %v427_v41 }
  0x15   : > { %698 = vmatpush1.bf16.msra.mxu1 %v697_v24  ;;  %654 = vmatprep.subr.bf16.mxu0 %v794_v3  ;;  %v718_v8 = vpack.c.bf16 %v194_v6, %v193_v5  ;;  %v598_v10 = vld [vmem:[%s1190_s1 + $0x1a8] sm:$0xff]  ;;  %v196_v12 = vld [vmem:[%s1190_s1 + $0xb8] sm:$0xff]  ;;  %v599_v15 = vld [vmem:[%s1190_s1 + $0x1b0] sm:$0xff] }
  0x16   : > { %699 = vmatprep.subr.bf16.mxu1 %v794_v3  ;;  %v676_v13 = vpack.c.bf16 %v598_v10, %v597_v9  ;;  %v721_v14 = vpack.c.bf16 %v196_v12, %v195_v11  ;;  %v600_v16 = vld [vmem:[%s1190_s1 + $0x1b8] sm:$0xff]  ;;  %v197_v17 = vld [vmem:[%s1190_s1 + $0xc0] sm:$0xff]  ;;  %v198_v18 = vld [vmem:[%s1190_s1 + $0xc8] sm:$0xff] }
  0x17   : > { %v679_v19 = vpack.c.bf16 %v600_v16, %v599_v15  ;;  %v724_v20 = vpack.c.bf16 %v198_v18, %v197_v17  ;;  %v601_v21 = vld [vmem:[%s1190_s1 + $0x1c0] sm:$0xff]  ;;  %v602_v22 = vld [vmem:[%s1190_s1 + $0x1c8] sm:$0xff]  ;;  %v199_v23 = vld [vmem:[%s1190_s1 + $0xd0] sm:$0xff] }
  0x18   : > { %656 = vmatpush1.bf16.msra.mxu0 %v655_v29  ;;  %v200_v24 = vld [vmem:[%s1190_s1 + $0xd8] sm:$0xff]  ;;  %v682_v25 = vpack.c.bf16 %v602_v22, %v601_v21  ;;  %v603_v26 = vld [vmem:[%s1190_s1 + $0x1d0] sm:$0xff]  ;;  %v1049_v29 = vld [vmem:[%s915_s15] sm:$0xff] }
  0x19   : > { %701 = vmatpush1.bf16.msra.mxu1 %v700_v30  ;;  %657 = vmatprep.subr.bf16.mxu0 %v794_v3  ;;  %v727_v27 = vpack.c.bf16 %v200_v24, %v199_v23  ;;  %v604_v28 = vld [vmem:[%s1190_s1 + $0x1d8] sm:$0xff]  ;;  %v1052_v30 = vld [vmem:[%s915_s15 + $0x10] sm:$0x3]  ;;  %v201_v31 = vld [vmem:[%s1190_s1 + $0xe0] sm:$0xff]  ;;  %v239_v34 = vrot.slane %v1049_v29, 1  ;;  %v423_v23 = vrot.slane %v1049_v29, 2 }
  0x1a   : > { %702 = vmatprep.subr.bf16.mxu1 %v794_v3  ;;  %v202_v32 = vld [vmem:[%s1190_s1 + $0xe8] sm:$0xff]  ;;  %v685_v33 = vpack.c.bf16 %v604_v28, %v603_v26  ;;  %v610_v46 = vld [vmem:[%s1190_s1 + $0x1f8] sm:$0xff]  ;;  %v613_v50 = vld [vmem:[%s1190_s1 + $0x210] sm:$0xff]  ;;  %v424_v24 = vrot.slane %v1052_v30, 2 }
  0x1b   : > { %v730_v36 = vpack.c.bf16 %v202_v32, %v201_v31  ;;  %v608_v38 = vld [vmem:[%s1190_s1 + $0x1e8] sm:$0xff]  ;;  %v614_v51 = vld [vmem:[%s1190_s1 + $0x218] sm:$0xff]  ;;  %v617_v56 = vld [vmem:[%s1190_s1 + $0x230] sm:$0xff] }
  0x1c   : > { %659 = vmatpush1.bf16.msra.mxu0 %v658_v35  ;;  %v240_v35 = vrot.slane %v1052_v30, 1  ;;  %v612_v48 = vld [vmem:[%s1190_s1 + $0x208] sm:$0xff]  ;;  %v618_v57 = vld [vmem:[%s1190_s1 + $0x238] sm:$0xff]  ;;  %v621_v62 = vld [vmem:[%s1190_s1 + $0x250] sm:$0xff] }
  0x1d   : > { %704 = vmatpush1.bf16.msra.mxu1 %v703_v37  ;;  %660 = vmatprep.subr.bf16.mxu0 %v794_v3  ;;  %v607_v37 = vld [vmem:[%s1190_s1 + $0x1e0] sm:$0xff]  ;;  %v616_v54 = vld [vmem:[%s1190_s1 + $0x228] sm:$0xff]  ;;  %v622_v63 = vld [vmem:[%s1190_s1 + $0x258] sm:$0xff] }
  0x1e   : > { %705 = vmatprep.subr.bf16.mxu1 %v794_v3  ;;  %v241_v43 = vsel %vm238_vm1, %v239_v34, %v240_v35  ;;  %v733_v44 = vpack.c.bf16 %v608_v38, %v607_v37  ;;  %v620_v60 = vld [vmem:[%s1190_s1 + $0x248] sm:$0xff]  ;;  %v625_v5 = vld [vmem:[%s1190_s1 + $0x270] sm:$0xff]  ;;  %v626_v6 = vld [vmem:[%s1190_s1 + $0x278] sm:$0xff] }
  0x1f   : > { %v624_v2 = vld [vmem:[%s1190_s1 + $0x268] sm:$0xff]  ;;  %v629_v11 = vld [vmem:[%s1190_s1 + $0x290] sm:$0xff]  ;;  %v630_v12 = vld [vmem:[%s1190_s1 + $0x298] sm:$0xff] }
  0x20   : > { %662 = vmatpush1.bf16.msra.mxu0 %v661_v45  ;;  %v609_v45 = vld [vmem:[%s1190_s1 + $0x1f0] sm:$0xff]  ;;  %v628_v9 = vld [vmem:[%s1190_s1 + $0x288] sm:$0xff]  ;;  %v634_v18 = vld [vmem:[%s1190_s1 + $0x2b8] sm:$0xff] }
  0x21   : > { %707 = vmatpush1.bf16.msra.mxu1 %v706_v47  ;;  %663 = vmatprep.subr.bf16.mxu0 %v794_v3  ;;  %v736_v39 = vpack.c.bf16 %v610_v46, %v609_v45  ;;  %v611_v47 = vld [vmem:[%s1190_s1 + $0x200] sm:$0xff]  ;;  %v632_v15 = vld [vmem:[%s1190_s1 + $0x2a8] sm:$0xff]  ;;  %v633_v17 = vld [vmem:[%s1190_s1 + $0x2b0] sm:$0xff] }
  0x22   : > { %708 = vmatprep.subr.bf16.mxu1 %v794_v3  ;;  %v739_v49 = vpack.c.bf16 %v612_v48, %v611_v47  ;;  %v636_v21 = vld [vmem:[%s1190_s1 + $0x2c8] sm:$0xff]  ;;  %v638_v34 = vld [vmem:[%s1191_s2] ss:$0 sm:$0xff] }
  0x24   : > { %665 = vmatpush1.bf16.msra.mxu0 %v664_v52  ;;  %v742_v52 = vpack.c.bf16 %v614_v51, %v613_v50 }
  0x25   : > { %710 = vmatpush1.bf16.msra.mxu1 %v709_v53  ;;  %666 = vmatprep.subr.bf16.mxu0 %v794_v3  ;;  %v615_v53 = vld [vmem:[%s1190_s1 + $0x220] sm:$0xff] }
  0x26   : > { %711 = vmatprep.subr.bf16.mxu1 %v794_v3  ;;  %v745_v55 = vpack.c.bf16 %v616_v54, %v615_v53 }
  0x28   : > { %668 = vmatpush1.bf16.msra.mxu0 %v667_v58  ;;  %v748_v58 = vpack.c.bf16 %v618_v57, %v617_v56 }
  0x29   : > { %713 = vmatpush1.bf16.msra.mxu1 %v712_v59  ;;  %669 = vmatprep.subr.bf16.mxu0 %v794_v3  ;;  %v619_v59 = vld [vmem:[%s1190_s1 + $0x240] sm:$0xff] }
  0x2a   : > { %714 = vmatprep.subr.bf16.mxu1 %v794_v3  ;;  %v751_v61 = vpack.c.bf16 %v620_v60, %v619_v59 }
  0x2c   : > { %671 = vmatpush1.bf16.msra.mxu0 %v670_v0  ;;  %v754_v0 = vpack.c.bf16 %v622_v63, %v621_v62 }
  0x2d   : > { %716 = vmatpush1.bf16.msra.mxu1 %v715_v1  ;;  %672 = vmatprep.subr.bf16.mxu0 %v794_v3  ;;  %v623_v1 = vld [vmem:[%s1190_s1 + $0x260] sm:$0xff] }
  0x2e   : > { %717 = vmatprep.subr.bf16.mxu1 %v794_v3  ;;  %v757_v4 = vpack.c.bf16 %v624_v2, %v623_v1 }
  0x30   : > { %674 = vmatpush1.bf16.msra.mxu0 %v673_v7  ;;  %v760_v7 = vpack.c.bf16 %v626_v6, %v625_v5 }
  0x31   : > { %719 = vmatpush1.bf16.msra.mxu1 %v718_v8  ;;  %675 = vmatprep.subr.bf16.mxu0 %v794_v3  ;;  %v627_v8 = vld [vmem:[%s1190_s1 + $0x280] sm:$0xff] }
  0x32   : > { %720 = vmatprep.subr.bf16.mxu1 %v794_v3  ;;  %v763_v10 = vpack.c.bf16 %v628_v9, %v627_v8 }
  0x34   : > { %677 = vmatpush1.bf16.msra.mxu0 %v676_v13  ;;  %v766_v13 = vpack.c.bf16 %v630_v12, %v629_v11 }
  0x35   : > { %722 = vmatpush1.bf16.msra.mxu1 %v721_v14  ;;  %678 = vmatprep.subr.bf16.mxu0 %v794_v3  ;;  %v631_v14 = vld [vmem:[%s1190_s1 + $0x2a0] sm:$0xff] }
  0x36   : > { %723 = vmatprep.subr.bf16.mxu1 %v794_v3  ;;  %v769_v16 = vpack.c.bf16 %v632_v15, %v631_v14 }
  0x38   : > { %680 = vmatpush1.bf16.msra.mxu0 %v679_v19  ;;  %v772_v19 = vpack.c.bf16 %v634_v18, %v633_v17 }
  0x39   : > { %725 = vmatpush1.bf16.msra.mxu1 %v724_v20  ;;  %681 = vmatprep.subr.bf16.mxu0 %v794_v3  ;;  %v635_v20 = vld [vmem:[%s1190_s1 + $0x2c0] sm:$0xff] }
  0x3a   : > { %726 = vmatprep.subr.bf16.mxu1 %v794_v3  ;;  %v775_v22 = vpack.c.bf16 %v636_v21, %v635_v20 }
  0x3c   : > { %683 = vmatpush1.bf16.msra.mxu0 %v682_v25  ;;  %v425_v25 = vsel %vm422_vm2, %v423_v23, %v424_v24 }
  0x3d   : > { %728 = vmatpush1.bf16.msra.mxu1 %v727_v27  ;;  %684 = vmatprep.subr.bf16.mxu0 %v794_v3 }
  0x3e   : > { %729 = vmatprep.subr.bf16.mxu1 %v794_v3 }
  0x40   : > { %686 = vmatpush1.bf16.msra.mxu0 %v685_v33 }
  0x41   : > { %731 = vmatpush1.bf16.msra.mxu1 %v730_v36  ;;  %732 = vmatprep.subr.bf16.mxu0 %v794_v3 }
  0x43   : > { %314 = vmatmul.mubr.f32.vlgmr.msra.gmra.mrb[0].mxu0 %v241_v43 }
  0x44   : > { %386 = vmatmul.mubr.f32.vlgmr.msra.gmra.mrb[0].mxu1 %v1049_v29  ;;  %734 = vmatpush1.bf16.msra.mxu0 %v733_v44 }
  0x45   : > { %735 = vmatprep.subr.bf16.mxu0 %v794_v3  ;;  %637 = vmatprep.mubr.msk.f32.mxu0 %vm246_vm0, %v428_v40 }
  0x48   : > { %737 = vmatpush1.bf16.msra.mxu0 %v736_v39 }
  0x49   : > { %738 = vmatprep.subr.bf16.mxu0 %v794_v3 }
  0x4c   : > { %740 = vmatpush1.bf16.msra.mxu0 %v739_v49 }
  0x4d   : > { %741 = vmatprep.subr.bf16.mxu0 %v794_v3 }
  0x50   : > { %743 = vmatpush1.bf16.msra.mxu0 %v742_v52 }
  0x51   : > { %744 = vmatprep.subr.bf16.mxu0 %v794_v3 }
  0x54   : > { %746 = vmatpush1.bf16.msra.mxu0 %v745_v55 }
  0x55   : > { %747 = vmatprep.subr.bf16.mxu0 %v794_v3 }
  0x58   : > { %749 = vmatpush1.bf16.msra.mxu0 %v748_v58 }
  0x59   : > { %750 = vmatprep.subr.bf16.mxu0 %v794_v3 }
  0x5c   : > { %752 = vmatpush1.bf16.msra.mxu0 %v751_v61 }
  0x5d   : > { %753 = vmatprep.subr.bf16.mxu0 %v794_v3 }
  0x60   : > { %755 = vmatpush1.bf16.msra.mxu0 %v754_v0 }
  0x61   : > { %756 = vmatprep.subr.bf16.mxu0 %v794_v3 }
  0x64   : > { %758 = vmatpush1.bf16.msra.mxu0 %v757_v4 }
  0x65   : > { %759 = vmatprep.subr.bf16.mxu0 %v794_v3 }
  0x68   : > { %761 = vmatpush1.bf16.msra.mxu0 %v760_v7 }
  0x69   : > { %762 = vmatprep.subr.bf16.mxu0 %v794_v3 }
  0x6c   : > { %764 = vmatpush1.bf16.msra.mxu0 %v763_v10 }
  0x6d   : > { %765 = vmatprep.subr.bf16.mxu0 %v794_v3 }
  0x70   : > { %767 = vmatpush1.bf16.msra.mxu0 %v766_v13 }
  0x71   : > { %768 = vmatprep.subr.bf16.mxu0 %v794_v3 }
  0x74   : > { %770 = vmatpush1.bf16.msra.mxu0 %v769_v16 }
  0x75   : > { %771 = vmatprep.subr.bf16.mxu0 %v794_v3 }
  0x78   : > { %773 = vmatpush1.bf16.msra.mxu0 %v772_v19 }
  0x79   : > { %774 = vmatprep.subr.bf16.mxu0 %v794_v3 }
  0x7c   : > { %776 = vmatpush1.bf16.msra.mxu0 %v775_v22 }
  0x7f   : > { %497 = vmatmul.mubr.f32.vlgmr.msra.gmra.mrb[2].mxu0 %v425_v25 }
 0x116   : > { %v315_v26 = vpop.f32.mrb[0].mxu0 }
 0x117   : > { %v317_v27 = vpop.f32.mrb[1].mxu0  ;;  %v387_v28 = vpop.f32.mrb[0].mxu1 }
 0x118   : > { %v388_v31 = vadd.f32 %v387_v28, %v315_v26  ;;  %v389_v32 = vpop.f32.mrb[1].mxu1 }
 0x152   : > { %v498_v33 = vpop.f32.mrb[2].mxu0 }
 0x153   : > { %v502_v29 = vadd.f32 %v498_v33, %v388_v31  ;;  %v500_v35 = vpop.f32.mrb[3].mxu0 }
 0x155   : > { %v510_v30 = vadd.f32 %v638_v34, %v502_v29 }
 0x157   : > { %v511_v3 = vmax.f32 %v510_v30, 0.0 }
 0x159   : > { %513 = vst.msk [vmem:[%s168_s30] sm:$0xff] %vm512_vm3, %v511_v3 }
 0x15a PF: > { %s13_s12 = sadd.s32 1, %s792_s12  }
 0x15b   : > { %p10_p4 = scmp.ge.s32.totalorder %s13_s12, 4  }
 0x15d   :  { %12 = sbr.rel (!%p10_p4) target bundleno = 1 (0x1), region = 64 }

// kernel: _lambda_.22
= control target key start
LH: loop header
LB: loop body
LE: loop exit
PB: predicated region body
PF: predicated region fallthrough
CT: control target
= control target key end

     0   :  { %s719_s12 = smov 0   ;;  %s857_s0 = inlined_call_operand.vmem [shape: f32[2,1,10,80], index: 0, kind: input, shape index: {}]   ;;  %s858_s1 = inlined_call_operand.vmem [shape: f32[3,80,64], index: 1, kind: input, shape index: {}]   ;;  %s859_s2 = inlined_call_operand.vmem [shape: f32[1,64], index: 2, kind: input, shape index: {}]   ;;  %s860_s3 = inlined_call_operand.vmem [shape: f32[2,8,64], index: 3, kind: output, shape index: {}]  }
   0x1 LB: > { %s495_s13 = sadd.s32 4294967295, %s694_s12   ;;  %p499_p0 = scmp.ge.s32.totalorder %s694_s12, 1  ;;  %s694_s12 = sphi %s719_s12, %s13_s12  }
   0x2   : > { %p137_p1 = scmp.lt.s32.totalorder %s694_s12, 3 }
   0x4   : > { %p138_p2 = pnand %p499_p0, %p137_p1 }
   0x5   : > { %v503_v0 = vld [vmem:[%s858_s1 + $0x50] sm:$0xff] (!%p138_p2)  ;;  %v504_v1 = vld [vmem:[%s858_s1 + $0x58] sm:$0xff] (!%p138_p2)  ;;  %v171_v2 = vld [vmem:[%s858_s1] sm:$0xff] (!%p138_p2)  ;;  %v696_v3 = vmov (!%p138_p2), 0.0|0.0   ;;  %p160_p3 = scmp.lt.s32.totalorder (!%p138_p2), %s495_s13, 1  ;;  %vm697_vm0 = vmmov (!%p138_p2), 0  }
   0x6   : > { %141 = sbr.rel (%p138_p2) target bundleno = 266 (0x10a), region = 32  ;;  %632 = vmatprep.subr.bf16.mxu0 (!%p138_p2), %v696_v3  ;;  %v633_v4 = vpack.c.bf16 (!%p138_p2), %v504_v1, %v503_v0  ;;  %647 = vmatprep.subr.bf16.mxu1 (!%p138_p2), %v696_v3  ;;  %v172_v5 = vld [vmem:[%s858_s1 + $0x8] sm:$0xff] (!%p138_p2)  ;;  %v505_v6 = vld [vmem:[%s858_s1 + $0x60] sm:$0xff] (!%p138_p2)  ;;  %v173_v9 = vld [vmem:[%s858_s1 + $0x10] sm:$0xff] (!%p138_p2)  ;;  %v698_v11 = vmov (!%p138_p2), 0.0   ;;  %vm194_vm1 = vcmask (!%p138_p2), 1046528  }
   0x7   : > { %v506_v7 = vld [vmem:[%s858_s1 + $0x68] sm:$0xff] (!%p138_p2)  ;;  %v648_v8 = vpack.c.bf16 (!%p138_p2), %v172_v5, %v171_v2  ;;  %v174_v10 = vld [vmem:[%s858_s1 + $0x18] sm:$0xff] (!%p138_p2)  ;;  %583 = vmatprep.mubr.msk.f32.mxu0 (!%p138_p2), %vm697_vm0, %v698_v11  ;;  %606 = vmatprep.mubr.msk.f32.mxu1 (!%p138_p2), %vm697_vm0, %v698_v11  ;;  %v507_v14 = vld [vmem:[%s858_s1 + $0x70] sm:$0xff] (!%p138_p2)  ;;  %vm198_vm2 = vcmask (!%p138_p2), 654336   ;;  %vm354_vm3 = vcmask (!%p138_p2), 1045504   ;;  %vm440_vm4 = vcmask (!%p138_p2), 523264  }
   0x8   : > { %634 = vmatpush3.bf16.msra.mxu0 (!%p138_p2), %v633_v4  ;;  %v636_v12 = vpack.c.bf16 (!%p138_p2), %v506_v7, %v505_v6  ;;  %v651_v13 = vpack.c.bf16 (!%p138_p2), %v174_v10, %v173_v9  ;;  %v508_v15 = vld [vmem:[%s858_s1 + $0x78] sm:$0xff] (!%p138_p2)  ;;  %v175_v16 = vld [vmem:[%s858_s1 + $0x20] sm:$0xff] (!%p138_p2)  ;;  %v176_v17 = vld [vmem:[%s858_s1 + $0x28] sm:$0xff] (!%p138_p2) }
   0x9   : > { %649 = vmatpush3.bf16.msra.mxu1 (!%p138_p2), %v648_v8  ;;  %635 = vmatprep.subr.bf16.mxu0 (!%p138_p2), %v696_v3  ;;  %v639_v18 = vpack.c.bf16 (!%p138_p2), %v508_v15, %v507_v14  ;;  %v654_v19 = vpack.c.bf16 (!%p138_p2), %v176_v17, %v175_v16  ;;  %v509_v20 = vld [vmem:[%s858_s1 + $0x80] sm:$0xff] (!%p138_p2)  ;;  %v510_v21 = vld [vmem:[%s858_s1 + $0x88] sm:$0xff] (!%p138_p2)  ;;  %v177_v22 = vld [vmem:[%s858_s1 + $0x30] sm:$0xff] (!%p138_p2) }
   0xa   : > { %650 = vmatprep.subr.bf16.mxu1 (!%p138_p2), %v696_v3  ;;  %v178_v23 = vld [vmem:[%s858_s1 + $0x38] sm:$0xff] (!%p138_p2)  ;;  %v642_v24 = vpack.c.bf16 (!%p138_p2), %v510_v21, %v509_v20  ;;  %v511_v25 = vld [vmem:[%s858_s1 + $0x90] sm:$0xff] (!%p138_p2)  ;;  %v179_v30 = vld [vmem:[%s858_s1 + $0x40] sm:$0xff] (!%p138_p2) }
   0xb   : > { %v657_v26 = vpack.c.bf16 (!%p138_p2), %v178_v23, %v177_v22  ;;  %v512_v27 = vld [vmem:[%s858_s1 + $0x98] sm:$0xff] (!%p138_p2)  ;;  %v180_v31 = vld [vmem:[%s858_s1 + $0x48] sm:$0xff] (!%p138_p2)  ;;  %v515_v36 = vld [vmem:[%s858_s1 + $0xa0] sm:$0xff] (!%p138_p2) }
   0xc   : > { %637 = vmatpush3.bf16.msra.mxu0 (!%p138_p2), %v636_v12  ;;  %v645_v32 = vpack.c.bf16 (!%p138_p2), %v512_v27, %v511_v25  ;;  %v660_v35 = vpack.c.bf16 (!%p138_p2), %v180_v31, %v179_v30  ;;  %v516_v37 = vld [vmem:[%s858_s1 + $0xa8] sm:$0xff] (!%p138_p2)  ;;  %v517_v40 = vld [vmem:[%s858_s1 + $0xb0] sm:$0xff] (!%p138_p2)  ;;  %v518_v41 = vld [vmem:[%s858_s1 + $0xb8] sm:$0xff] (!%p138_p2) }
   0xd   : > { %s862_s13 = smov (!%p160_p3, %s495_s13), 1  ;;  %652 = vmatpush3.bf16.msra.mxu1 %v651_v13  ;;  %638 = vmatprep.subr.bf16.mxu0 %v696_v3  ;;  %v663_v39 = vpack.c.bf16 %v516_v37, %v515_v36  ;;  %v666_v42 = vpack.c.bf16 %v518_v41, %v517_v40  ;;  %v519_v43 = vld [vmem:[%s858_s1 + $0xc0] sm:$0xff]  ;;  %v520_v44 = vld [vmem:[%s858_s1 + $0xc8] sm:$0xff]  ;;  %v521_v46 = vld [vmem:[%s858_s1 + $0xd0] sm:$0xff] }
   0xe   : > { %s529_s11 = sshll.u32 %s862_s13, 4  ;;  %653 = vmatprep.subr.bf16.mxu1 %v696_v3  ;;  %v669_v45 = vpack.c.bf16 %v520_v44, %v519_v43  ;;  %v522_v47 = vld [vmem:[%s858_s1 + $0xd8] sm:$0xff]  ;;  %v523_v49 = vld [vmem:[%s858_s1 + $0xe0] sm:$0xff]  ;;  %v524_v50 = vld [vmem:[%s858_s1 + $0xe8] sm:$0xff]  ;;  %s502_s30 = sshll.u32 %s862_s13, 3 }
   0xf   : > { %s164_s24 = scalar_lea.vmem %s857_s0, %s529_s11  ;;  %v672_v48 = vpack.c.bf16 %v522_v47, %v521_v46  ;;  %v675_v52 = vpack.c.bf16 %v524_v50, %v523_v49  ;;  %v526_v61 = vld [vmem:[%s859_s2] ss:$0 sm:$0xff]  ;;  %s168_s6 = scalar_lea.vmem %s860_s3, %s502_s30 }
  0x10   : > { %640 = vmatpush3.bf16.msra.mxu0 %v639_v18  ;;  %v169_v28 = vld [vmem:[%s164_s24] sm:$0xff]  ;;  %v170_v29 = vld [vmem:[%s164_s24 + $0x8] sm:$0x3] }
  0x11   : > { %655 = vmatpush3.bf16.msra.mxu1 %v654_v19  ;;  %641 = vmatprep.subr.bf16.mxu0 %v696_v3  ;;  %v195_v33 = vrot.slane %v169_v28, 1  ;;  %v196_v34 = vrot.slane %v170_v29, 1  ;;  %v356_v51 = vrot.slane %v170_v29, 2  ;;  %v355_v53 = vrot.slane %v169_v28, 2 }
  0x12   : > { %656 = vmatprep.subr.bf16.mxu1 %v696_v3 }
  0x13   : > { %v197_v38 = vsel %vm194_vm1, %v195_v33, %v196_v34  ;;  %v357_v54 = vsel %vm354_vm3, %v355_v53, %v356_v51 }
  0x14   : > { %643 = vmatpush3.bf16.msra.mxu0 %v642_v24 }
  0x15   : > { %658 = vmatpush3.bf16.msra.mxu1 %v657_v26  ;;  %644 = vmatprep.subr.bf16.mxu0 %v696_v3 }
  0x16   : > { %659 = vmatprep.subr.bf16.mxu1 %v696_v3 }
  0x18   : > { %646 = vmatpush3.bf16.msra.mxu0 %v645_v32 }
  0x19   : > { %661 = vmatpush3.bf16.msra.mxu1 %v660_v35  ;;  %662 = vmatprep.subr.bf16.mxu0 %v696_v3 }
  0x1b   : > { %584 = vmatmul.mubr.msk.f32.vlgmr.msra.gmra.mrb[0].mxu0 %vm198_vm2, %v197_v38 }
  0x1c   : > { %607 = vmatmul.mubr.msk.f32.vlgmr.msra.gmra.mrb[0].mxu1 %vm198_vm2, %v169_v28  ;;  %664 = vmatpush3.bf16.msra.mxu0 %v663_v39 }
  0x1d   : > { %665 = vmatprep.subr.bf16.mxu0 %v696_v3  ;;  %629 = vmatprep.mubr.msk.f32.mxu0 %vm697_vm0, %v698_v11 }
  0x20   : > { %667 = vmatpush3.bf16.msra.mxu0 %v666_v42 }
  0x21   : > { %668 = vmatprep.subr.bf16.mxu0 %v696_v3 }
  0x24   : > { %670 = vmatpush3.bf16.msra.mxu0 %v669_v45 }
  0x25   : > { %671 = vmatprep.subr.bf16.mxu0 %v696_v3 }
  0x28   : > { %673 = vmatpush3.bf16.msra.mxu0 %v672_v48 }
  0x29   : > { %674 = vmatprep.subr.bf16.mxu0 %v696_v3 }
  0x2c   : > { %676 = vmatpush3.bf16.msra.mxu0 %v675_v52 }
  0x2f   : > { %630 = vmatmul.mubr.msk.f32.vlgmr.msra.gmra.mrb[2].mxu0 %vm198_vm2, %v357_v54 }
  0xee   : > { %v267_v55 = vpop.f32.mrb[0].mxu0 }
  0xef   : > { %v585_v56 = vpop.f32.mrb[1].mxu0  ;;  %v339_v57 = vpop.f32.mrb[0].mxu1 }
  0xf0   : > { %v340_v58 = vadd.f32 %v339_v57, %v267_v55  ;;  %v608_v59 = vpop.f32.mrb[1].mxu1 }
 0x102   : > { %v426_v60 = vpop.f32.mrb[2].mxu0 }
 0x103   : > { %v430_v62 = vadd.f32 %v426_v60, %v340_v58  ;;  %v631_v63 = vpop.f32.mrb[3].mxu0 }
 0x105   : > { %v438_v0 = vadd.f32 %v526_v61, %v430_v62 }
 0x107   : > { %v439_v1 = vmax.f32 %v438_v0, 0.0 }
 0x109   : > { %441 = vst.msk [vmem:[%s168_s6] sm:$0xff] %vm440_vm4, %v439_v1 }
 0x10a PF: > { %s13_s12 = sadd.s32 1, %s694_s12  }
 0x10b   : > { %p10_p4 = scmp.ge.s32.totalorder %s13_s12, 4  }
 0x10d   :  { %12 = sbr.rel (!%p10_p4) target bundleno = 1 (0x1), region = 64 }

// kernel: _lambda_.17
= control target key start
LH: loop header
LB: loop body
LE: loop exit
PB: predicated region body
PF: predicated region fallthrough
CT: control target
= control target key end

     0   :  { %s7744_s6 = smov 1   ;;  %s7745_s10 = smov 2   ;;  %s8579_s0 = inlined_call_operand.smem [shape: u32[35], index: -1, kind: input, shape index: {}] }
   0x1   :  { %s7790_s5 = sld [smem:[%s8579_s0]]   ;;  %s7746_s14 = smov 3  }
   0x2   :  { %s7795_s9 = sld [smem:[%s8579_s0 + %s7744_s6]]   ;;  %s7747_s18 = smov 4  }
   0x3   :  { %s7800_s13 = sld [smem:[%s8579_s0 + %s7745_s10]]   ;;  %s7748_s22 = smov 5  }
   0x4   :  { %s7805_s17 = sld [smem:[%s8579_s0 + %s7746_s14]]   ;;  %s7749_s26 = smov 6  }
   0x5   :  { %s7810_s21 = sld [smem:[%s8579_s0 + %s7747_s18]]   ;;  %s7750_s30 = smov 7  }
   0x6   :  { %s7815_s25 = sld [smem:[%s8579_s0 + %s7748_s22]]   ;;  %s7751_s4 = smov 8  }
   0x7   :  { %8593 = sst [smem:[#allocation2_spill]] %s7790_s5  ;;  %s7752_s10 = smov 9  }
   0x8   :  { %8594 = sst [smem:[#allocation3_spill]] %s7795_s9  ;;  %s7753_s15 = smov 10  }
   0x9   :  { %s7820_s29 = sld [smem:[%s8579_s0 + %s7749_s26]]   ;;  %s7754_s20 = smov 11  }
   0xa   :  { %s7825_s3 = sld [smem:[%s8579_s0 + %s7750_s30]]   ;;  %s7755_s26 = smov 12  }
   0xb   :  { %s7830_s8 = sld [smem:[%s8579_s0 + %s7751_s4]]   ;;  %s7756_s1 = smov 13  }
   0xc   :  { %s7835_s14 = sld [smem:[%s8579_s0 + %s7752_s10]]   ;;  %s7757_s7 = smov 14  }
   0xd   :  { %s7840_s19 = sld [smem:[%s8579_s0 + %s7753_s15]]   ;;  %s7758_s15 = smov 15  }
   0xe   :  { %s7845_s24 = sld [smem:[%s8579_s0 + %s7754_s20]]   ;;  %s7759_s22 = smov 16  }
   0xf   :  { %s7850_s30 = sld [smem:[%s8579_s0 + %s7755_s26]]   ;;  %s7760_s28 = smov 17  }
  0x10   :  { %8595 = sst [smem:[#allocation4_spill]] %s7825_s3 }
  0x11   :  { %s7855_s6 = sld [smem:[%s8579_s0 + %s7756_s1]]  }
  0x12   :  { %s7860_s12 = sld [smem:[%s8579_s0 + %s7757_s7]]   ;;  %s7761_s7 = smov 18  }
  0x13   :  { %s7865_s20 = sld [smem:[%s8579_s0 + %s7758_s15]]   ;;  %s7762_s15 = smov 19  }
  0x14   :  { %s7870_s27 = sld [smem:[%s8579_s0 + %s7759_s22]]   ;;  %s7763_s22 = smov 20  }
  0x15   :  { %s7875_s4 = sld [smem:[%s8579_s0 + %s7760_s28]]   ;;  %s7764_s28 = smov 21  }
  0x16   :  { %s7880_s9 = sld [smem:[%s8579_s0 + %s7761_s7]]   ;;  %s7765_s7 = smov 22  }
  0x19   :  { %8596 = sst [smem:[#allocation5_spill]] %s7865_s20 }
  0x1a   :  { %8597 = sst [smem:[#allocation6_spill]] %s7870_s27 }
  0x1b   :  { %8598 = sst [smem:[#allocation7_spill]] %s7875_s4 }
  0x1c   :  { %8599 = sst [smem:[#allocation8_spill]] %s7880_s9 }
  0x1d   :  { %s7885_s20 = sld [smem:[%s8579_s0 + %s7762_s15]]   ;;  %s7766_s15 = smov 23  }
  0x1e   :  { %s7890_s27 = sld [smem:[%s8579_s0 + %s7763_s22]]   ;;  %s7767_s22 = smov 24  }
  0x1f   :  { %s7895_s4 = sld [smem:[%s8579_s0 + %s7764_s28]]   ;;  %s7768_s28 = smov 25  }
  0x20   :  { %s7900_s9 = sld [smem:[%s8579_s0 + %s7765_s7]]   ;;  %s7769_s7 = smov 26  }
  0x23   :  { %8600 = sst [smem:[#allocation9_spill]] %s7885_s20 }
  0x24   :  { %8601 = sst [smem:[#allocation10_spill]] %s7890_s27 }
  0x25   :  { %8602 = sst [smem:[#allocation11_spill]] %s7895_s4 }
  0x26   :  { %8603 = sst [smem:[#allocation12_spill]] %s7900_s9 }
  0x27   :  { %s7905_s20 = sld [smem:[%s8579_s0 + %s7766_s15]]   ;;  %s7770_s15 = smov 27  }
  0x28   :  { %s7910_s27 = sld [smem:[%s8579_s0 + %s7767_s22]]   ;;  %s7771_s22 = smov 28  }
  0x29   :  { %s7915_s4 = sld [smem:[%s8579_s0 + %s7768_s28]]   ;;  %s7772_s28 = smov 29  }
  0x2a   :  { %s7920_s9 = sld [smem:[%s8579_s0 + %s7769_s7]]   ;;  %s7773_s7 = smov 30  }
  0x2d   :  { %8604 = sst [smem:[#allocation13_spill]] %s7905_s20 }
  0x2e   :  { %8605 = sst [smem:[#allocation14_spill]] %s7910_s27 }
  0x2f   :  { %8606 = sst [smem:[#allocation15_spill]] %s7915_s4 }
  0x30   :  { %8607 = sst [smem:[#allocation16_spill]] %s7920_s9 }
  0x31   :  { %s7925_s20 = sld [smem:[%s8579_s0 + %s7770_s15]]   ;;  %s7774_s15 = smov 31  }
  0x32   :  { %s7930_s27 = sld [smem:[%s8579_s0 + %s7771_s22]]   ;;  %s7775_s22 = smov 32  }
  0x33   :  { %s7935_s4 = sld [smem:[%s8579_s0 + %s7772_s28]]   ;;  %s7776_s28 = smov 33  }
  0x34   :  { %s7940_s9 = sld [smem:[%s8579_s0 + %s7773_s7]]   ;;  %s7777_s7 = smov 34  }
  0x37   :  { %8608 = sst [smem:[#allocation17_spill]] %s7925_s20 }
  0x38   :  { %8609 = sst [smem:[#allocation18_spill]] %s7930_s27 }
  0x39   :  { %8610 = sst [smem:[#allocation19_spill]] %s7935_s4 }
  0x3a   :  { %8611 = sst [smem:[#allocation20_spill]] %s7940_s9 }
  0x3b   :  { %s7945_s20 = sld [smem:[%s8579_s0 + %s7774_s15]]   ;;  %s7962_s15 = smov 0  }
  0x3c   :  { %s7950_s27 = sld [smem:[%s8579_s0 + %s7775_s22]]  }
  0x3d   :  { %s7955_s4 = sld [smem:[%s8579_s0 + %s7776_s28]]  }
  0x3e   :  { %s7960_s9 = sld [smem:[%s8579_s0 + %s7777_s7]]  }
  0x3f LB: > { %s8612_s3 = sld [smem:[#allocation4_spill]]  ;;  %s6395_s16 = sadd.s32 4294967295, %s7742_s15   ;;  %s7742_s15 = sphi %s7962_s15, %s80_s15  }
  0x40   : > { %p6399_p0 = scmp.ge.s32.totalorder %s7742_s15, 1  ;;  %p958_p1 = scmp.lt.s32.totalorder %s7742_s15, 3 }
  0x42   : > { %p959_p2 = pnand %p6399_p0, %p958_p1 }
  0x43   : > { %v1065_v0 = vld [vmem:[%s7800_s13] sm:$0xff] (!%p959_p2)  ;;  %v1066_v1 = vld [vmem:[%s7800_s13 + $0x8] sm:$0xff] (!%p959_p2)  ;;  %v1067_v2 = vld [vmem:[%s7800_s13 + $0x10] sm:$0xff] (!%p959_p2)  ;;  %s8613_s5 = sld [smem:[#allocation2_spill]] (!%p959_p2)  ;;  %v7778_v3 = vmov (!%p959_p2), 0.0|0.0   ;;  %vm7779_vm0 = vmmov (!%p959_p2), 0  }
  0x44   : > { %962 = sbr.rel (%p959_p2) target bundleno = 11919 (0x2e8f), region = 152  ;;  %7420 = vmatprep.subr.bf16.mxu0 (!%p959_p2), %v7778_v3  ;;  %v7421_v4 = vpack.c.bf16 (!%p959_p2), %v1066_v1, %v1065_v0  ;;  %v1068_v5 = vld [vmem:[%s7800_s13 + $0x18] sm:$0xff] (!%p959_p2)  ;;  %v7780_v6 = vmov (!%p959_p2), 0.0   ;;  %p1049_p3 = scmp.lt.s32.totalorder (!%p959_p2), %s6395_s16, 1  ;;  %7426 = vmatprep.subr.bf16.mxu1 (!%p959_p2), %v7778_v3  ;;  %vm1076_vm1 = vcmask (!%p959_p2), 261120   ;;  %vm1154_vm2 = vcmask (!%p959_p2), 257024  }
  0x45   : > { %6903 = vmatprep.mubr.msk.f32.mxu0 (!%p959_p2), %vm7779_vm0, %v7780_v6  ;;  %6914 = vmatprep.mubr.msk.f32.mxu1 (!%p959_p2), %vm7779_vm0, %v7780_v6  ;;  %v7424_v7 = vpack.c.bf16 (!%p959_p2), %v1068_v5, %v1067_v2  ;;  %v6403_v9 = vld [vmem:[%s7805_s17] ss:$0 sm:$0xff] (!%p959_p2)  ;;  %v1184_v22 = vld [vmem:[%s8612_s3 + $0x8] sm:$0xff] (!%p959_p2)  ;;  %v1185_v27 = vld [vmem:[%s8612_s3 + $0x10] sm:$0xff] (!%p959_p2)  ;;  %vm1429_vm3 = vcmask (!%p959_p2), 64512   ;;  %vm1523_vm4 = vcmask (!%p959_p2), 1043456  }
  0x46   : > { %7422 = vmatpush3.bf16.msra.mxu0 (!%p959_p2), %v7421_v4  ;;  %v1150_v11 = vld [vmem:[%s7810_s21] sm:$0xf] (!%p959_p2)  ;;  %v1268_v25 = vld [vmem:[%s7835_s14 + $0x8] sm:$0xff] (!%p959_p2)  ;;  %v1186_v28 = vld [vmem:[%s8612_s3 + $0x18] sm:$0xff] (!%p959_p2)  ;;  %vm1507_vm5 = vcmask (!%p959_p2), 27648   ;;  %vm1519_vm6 = vcmask (!%p959_p2), 31744  }
  0x47   : > { %7423 = vmatprep.subr.bf16.mxu0 (!%p959_p2), %v7778_v3  ;;  %v1183_v21 = vld [vmem:[%s8612_s3] sm:$0xff] (!%p959_p2)  ;;  %v7430_v29 = vpack.c.bf16 (!%p959_p2), %v1186_v28, %v1185_v27  ;;  %v1269_v30 = vld [vmem:[%s7835_s14 + $0x10] sm:$0xff] (!%p959_p2)  ;;  %v1270_v31 = vld [vmem:[%s7835_s14 + $0x18] sm:$0xff] (!%p959_p2)  ;;  %s8614_s22 = sld [smem:[#allocation7_spill]] (!%p959_p2)  ;;  %s8615_s23 = sld [smem:[#allocation5_spill]] (!%p959_p2)  ;;  %vm3283_vm7 = vcmask (!%p959_p2), 523264  }
  0x48   : > { %v7427_v23 = vpack.c.bf16 (!%p959_p2), %v1184_v22, %v1183_v21  ;;  %v1267_v24 = vld [vmem:[%s7835_s14] sm:$0xff] (!%p959_p2)  ;;  %v7436_v32 = vpack.c.bf16 (!%p959_p2), %v1270_v31, %v1269_v30  ;;  %v1349_v40 = vld [vmem:[%s7845_s24 + $0x8] sm:$0xff] (!%p959_p2)  ;;  %v1350_v45 = vld [vmem:[%s7845_s24 + $0x10] sm:$0xff] (!%p959_p2)  ;;  %s8616_s26 = sld [smem:[#allocation6_spill]] (!%p959_p2)  ;;  %s8617_s28 = sld [smem:[#allocation9_spill]] (!%p959_p2)  ;;  %vm6184_vm8 = vcmask (!%p959_p2), 253952  }
  0x49   : > { %v7433_v26 = vpack.c.bf16 (!%p959_p2), %v1268_v25, %v1267_v24  ;;  %v6405_v37 = vld [vmem:[%s7815_s25] ss:$0 sm:$0xff] (!%p959_p2)  ;;  %v1351_v46 = vld [vmem:[%s7845_s24 + $0x18] sm:$0xff] (!%p959_p2)  ;;  %v6418_v52 = vld [vmem:[%s8612_s3 + $0x28] sm:$0xff] (!%p959_p2)  ;;  %s8618_s1 = sld [smem:[#allocation8_spill]] (!%p959_p2)  ;;  %s8619_s2 = sld [smem:[#allocation10_spill]] (!%p959_p2) }
  0x4a   : > { %7425 = vmatpush3.bf16.msra.mxu0 (!%p959_p2), %v7424_v7  ;;  %7428 = vmatpush3.bf16.msra.mxu1 (!%p959_p2), %v7427_v23  ;;  %v1348_v39 = vld [vmem:[%s7845_s24] sm:$0xff] (!%p959_p2)  ;;  %v7442_v47 = vpack.c.bf16 (!%p959_p2), %v1351_v46, %v1350_v45  ;;  %v6419_v59 = vld [vmem:[%s8612_s3 + $0x30] sm:$0xff] (!%p959_p2)  ;;  %v6420_v60 = vld [vmem:[%s8612_s3 + $0x38] sm:$0xff] (!%p959_p2)  ;;  %s8620_s7 = sld [smem:[#allocation13_spill]] (!%p959_p2)  ;;  %s8621_s10 = sld [smem:[#allocation3_spill]] (!%p959_p2) }
  0x4b   : > { %s8632_s16 = smov (!%p1049_p3, %s6395_s16), 1  ;;  %7432 = vmatprep.subr.bf16.mxu0 %v7778_v3  ;;  %7429 = vmatprep.subr.bf16.mxu1 %v7778_v3  ;;  %v6406_v41 = vld [vmem:[%s7820_s29] ss:$0 sm:$0xff]  ;;  %v7439_v43 = vpack.c.bf16 %v1349_v40, %v1348_v39  ;;  %v7448_v62 = vpack.c.bf16 %v6420_v60, %v6419_v59  ;;  %v6432_v1 = vld [vmem:[%s7845_s24 + $0x28] sm:$0xff]  ;;  %v6433_v7 = vld [vmem:[%s7845_s24 + $0x30] sm:$0xff]  ;;  %s8622_s11 = sld [smem:[#allocation15_spill]] }
  0x4c   : > { %s7984_s0 = sshll.u32 %s8632_s16, 2  ;;  %v6409_v48 = vld [vmem:[%s7840_s19] ss:$0 sm:$0xff]  ;;  %v6426_v30 = vld [vmem:[%s7835_s14 + $0x30] sm:$0xff]  ;;  %v6427_v31 = vld [vmem:[%s7835_s14 + $0x38] sm:$0xff] }
  0x4d   : > { %s1052_s18 = scalar_lea.vmem %s8613_s5, %s7984_s0  ;;  %v6417_v51 = vld [vmem:[%s8612_s3 + $0x20] sm:$0xff]  ;;  %v6453_v59 = vld [vmem:[%s7835_s14 + $0x48] sm:$0xff]  ;;  %s8628_s5 = sld [smem:[#allocation14_spill]] }
  0x4e   : > { %v1064_v8 = vld [vmem:[%s1052_s18] sm:$0xf]  ;;  %7431 = vmatpush3.bf16.msra.mxu1 %v7430_v29  ;;  %v7445_v57 = vpack.c.bf16 %v6418_v52, %v6417_v51  ;;  %s8623_s18 = sld [smem:[#allocation17_spill]] }
  0x4f   : > { %6904 = vmatmul.mubr.msk.f32.vlgmr.msra.gmra.mrb[0].mxu0 %vm1076_vm1, %v1064_v8  ;;  %7438 = vmatprep.subr.bf16.mxu1 %v7778_v3  ;;  %v6407_v53 = vld [vmem:[%s7830_s8] ss:$0 sm:$0xff]  ;;  %v6434_v8 = vld [vmem:[%s7845_s24 + $0x38] sm:$0xff]  ;;  %v6436_v40 = vld [vmem:[%s7850_s30 + $0x1] ss:$0 sm:$0xff] }
  0x50   : > { %6925 = vmatprep.mubr.msk.f32.mxu0 %vm7779_vm0, %v7780_v6  ;;  %7434 = vmatpush3.bf16.msra.mxu0 %v7433_v26  ;;  %v6411_v61 = vld [vmem:[%s7850_s30] ss:$0 sm:$0xff]  ;;  %v6425_v26 = vld [vmem:[%s7835_s14 + $0x28] sm:$0xff] }
  0x51   : > { %7435 = vmatprep.subr.bf16.mxu0 %v7778_v3  ;;  %v6431_v0 = vld [vmem:[%s7845_s24 + $0x20] sm:$0xff] }
  0x52   : > { %v7457_v5 = vpack.c.bf16 %v6432_v1, %v6431_v0  ;;  %v6424_v25 = vld [vmem:[%s7835_s14 + $0x20] sm:$0xff]  ;;  %v6446_v1 = vld [vmem:[%s8612_s3 + $0x48] sm:$0xff] }
  0x53   : > { %v7451_v28 = vpack.c.bf16 %v6425_v26, %v6424_v25  ;;  %v6445_v0 = vld [vmem:[%s8612_s3 + $0x40] sm:$0xff] }
  0x54   : > { %7437 = vmatpush3.bf16.msra.mxu0 %v7436_v32  ;;  %v7454_v32 = vpack.c.bf16 %v6427_v31, %v6426_v30  ;;  %v6450_v26 = vld [vmem:[%s7830_s8 + $0x2] ss:$0 sm:$0xff] }
  0x55   : > { %6939 = vmatprep.subr.mxu0 %v7780_v6  ;;  %v6464_v30 = vld [vmem:[%s7850_s30 + $0x2] ss:$0 sm:$0xff] }
 0x122   : > { %v1146_v10 = vpop.f32.mrb[0].mxu0 }
 0x123   : > { %v1147_v12 = vadd.f32 %v6403_v9, %v1146_v10  ;;  %v6905_v13 = vpop.f32.mrb[1].mxu0  ;;  %v7460_v9 = vpack.c.bf16 %v6434_v8, %v6433_v7 }
 0x125   : > { %v7994_v14 = vadd.f32 %v1150_v11, %v1147_v12 }
 0x127   : > { %v1155_v15 = vsel %vm1154_vm2, %v7994_v14, 0.0 }
 0x128   : > { %1156 = vadd.xlane.f32.xlu0 %v1155_v15 }
 0x1b5   : > { %v1157_v16 = vpop.xlane.xlu0 %1156 }
 0x1b6   : > { %v1159_v17 = vmul.f32 0.03125, %v1157_v16 }
 0x1b8   : > { %v1160_v18 = vsub.f32 %v7994_v14, %v1159_v17 }
 0x1ba   : > { %v1161_v19 = vmul.f32 %v1160_v18, %v1160_v18 }
 0x1bc   : > { %v1162_v20 = vsel %vm1154_vm2, %v1161_v19, 0.0 }
 0x1bd   : > { %1163 = vadd.xlane.f32.xlu0 %v1162_v20 }
 0x24a   : > { %v1164_v33 = vpop.xlane.xlu0 %1163 }
 0x24b   : > { %v1165_v34 = vmul.f32 0.03125, %v1164_v33 }
 0x24d   : > { %v1166_v35 = vadd.f32 1e-06, %v1165_v34 }
 0x24f   : > { %7682 = vrsqrt.f32 %v1166_v35  ;;  %v6429_v35 = vld [vmem:[%s7840_s19 + $0x1] ss:$0 sm:$0xff] }
 0x259   : > { %v7683_v36 = vpop.eup %7682 }
 0x25a   : > { %v1168_v38 = vmul.f32 %v7683_v36, %v1160_v18 }
 0x25c   : > { %v1175_v42 = vmul.f32 %v6405_v37, %v1168_v38  ;;  %v6422_v37 = vld [vmem:[%s7830_s8 + $0x1] ss:$0 sm:$0xff] }
 0x25e   : > { %v8016_v44 = vadd.f32 %v6406_v41, %v1175_v42 }
 0x260   : > { %6915 = vmatmul.mubr.msk.f32.vlgmr.msra.gmra.mrb[0].mxu1 %vm1076_vm1, %v8016_v44  ;;  %6926 = vmatmul.mubr.msk.f32.vlgmr.msra.gmra.mrb[2].mxu0 %vm1076_vm1, %v8016_v44 }
 0x261   : > { %7440 = vmatpush3.bf16.msra.mxu1 %v7439_v43  ;;  %6936 = vmatprep.mubr.msk.f32.mxu1 %vm7779_vm0, %v7780_v6 }
 0x262   : > { %7441 = vmatprep.subr.bf16.mxu1 %v7778_v3  ;;  %6941 = vmatprep.mubr.msk.f32.mxu0 %vm7779_vm0, %v7780_v6 }
 0x265   : > { %7443 = vmatpush3.bf16.msra.mxu1 %v7442_v47 }
 0x266   : > { %6944 = vmatprep.subr.mxu1 %v7780_v6 }
 0x268   : > { %6937 = vmatmul.mubr.msk.f32.vlgmr.msra.gmra.mrb[2].mxu1 %vm1076_vm1, %v8016_v44 }
 0x269   : > { %6946 = vmatprep.mubr.msk.f32.mxu1 %vm7779_vm0, %v7780_v6 }
 0x333   : > { %v1263_v49 = vpop.f32.mrb[0].mxu1  ;;  %v1344_v50 = vpop.f32.mrb[2].mxu0 }
 0x334   : > { %v1345_v54 = vadd.f32 %v6409_v48, %v1344_v50  ;;  %v6916_v55 = vpop.f32.mrb[1].mxu1  ;;  %v6927_v56 = vpop.f32.mrb[3].mxu0  ;;  %v1264_v58 = vadd.f32 %v6407_v53, %v1263_v49  ;;  %v6442_v53 = vld [vmem:[%s7855_s6 + $0x8] sm:$0xff] }
 0x336   : > { %6940 = vmatpush3.xpose.msk.msra.mxu0 %vm1429_vm3, %v1345_v54 }
 0x337   : > { %7444 = vmatprep.subr.bf16.mxu0 %v7778_v3 }
 0x339   : > { %6942 = vmatmul.mubr.msk.f32.vlgmr.msra.gmra.mrb[4].mxu0 %vm1429_vm3, %v1264_v58  ;;  %v6452_v58 = vld [vmem:[%s7835_s14 + $0x40] sm:$0xff] }
 0x33a   : > { %7446 = vmatpush3.bf16.msra.mxu0 %v7445_v57  ;;  %6957 = vmatprep.mubr.msk.f32.mxu0 %vm7779_vm0, %v7780_v6  ;;  %v1597_v57 = vld [vmem:[%s7855_s6] sm:$0xff]  ;;  %v7469_v60 = vpack.c.bf16 %v6453_v59, %v6452_v58  ;;  %v6489_v58 = vld [vmem:[%s7845_s24 + $0x78] sm:$0xff] }
 0x33b   : > { %v1425_v63 = vpop.f32.mrb[2].mxu1  ;;  %7447 = vmatprep.subr.bf16.mxu0 %v7778_v3 }
 0x33c   : > { %v1426_v2 = vadd.f32 %v6411_v61, %v1425_v63  ;;  %v6938_v4 = vpop.f32.mrb[3].mxu1  ;;  %v6454_v61 = vld [vmem:[%s7835_s14 + $0x50] sm:$0xff] }
 0x33d   : > { %v6447_v4 = vld [vmem:[%s8612_s3 + $0x50] sm:$0xff] }
 0x33e   : > { %6945 = vmatpush3.msk.msra.mxu1 %vm1523_vm4, %v1426_v2  ;;  %7449 = vmatpush3.bf16.msra.mxu0 %v7448_v62  ;;  %v6455_v62 = vld [vmem:[%s7835_s14 + $0x58] sm:$0xff]  ;;  %v7463_v2 = vpack.c.bf16 %v6446_v1, %v6445_v0 }
 0x33f   : > { %7456 = vmatprep.subr.bf16.mxu0 %v7778_v3  ;;  %7450 = vmatprep.subr.bf16.mxu1 %v7778_v3  ;;  %v7472_v63 = vpack.c.bf16 %v6455_v62, %v6454_v61  ;;  %v6480_v61 = vld [vmem:[%s7835_s14 + $0x68] sm:$0xff]  ;;  %v6482_v0 = vld [vmem:[%s7835_s14 + $0x78] sm:$0xff] }
 0x341   : > { %6958 = vmatmul.mubr.msk.f32.vlgmr.msra.gmra.mrb[6].mxu0 %vm1076_vm1, %v8016_v44 }
 0x342   : > { %7458 = vmatpush3.bf16.msra.mxu0 %v7457_v5  ;;  %6979 = vmatprep.mubr.msk.f32.mxu0 %vm7779_vm0, %v7780_v6  ;;  %v6448_v5 = vld [vmem:[%s8612_s3 + $0x58] sm:$0xff] }
 0x343   : > { %7459 = vmatprep.subr.bf16.mxu0 %v7778_v3 }
 0x346   : > { %7461 = vmatpush3.bf16.msra.mxu0 %v7460_v9  ;;  %v7466_v9 = vpack.c.bf16 %v6448_v5, %v6447_v4 }
 0x347   : > { %6992 = vmatprep.subr.mxu0 %v7780_v6 }
 0x349   : > { %6980 = vmatmul.mubr.msk.f32.vlgmr.msra.gmra.mrb[8].mxu0 %vm1076_vm1, %v8016_v44 }
 0x34a   : > { %6994 = vmatprep.mubr.msk.f32.mxu0 %vm7779_vm0, %v7780_v6  ;;  %6993 = vmatpush3.msra.mxu0 %v6442_v53 }
 0x34b   : > { %7462 = vmatprep.subr.bf16.mxu0 %v7778_v3 }
 0x40c   : > { %v1502_v10 = vpop.f32.mrb[4].mxu0 }
 0x40d   : > { %v1506_v11 = vmul.f32 0.35355338, %v1502_v10  ;;  %v6943_v12 = vpop.f32.mrb[5].mxu0  ;;  %v6459_v10 = vld [vmem:[%s7845_s24 + $0x40] sm:$0xff] }
 0x40f   : > { %v1508_v13 = vsel %vm1507_vm5, %v1506_v11, -inf }
 0x410   : > { %1509 = vmax.xlane.f32.xlu1 %v1508_v13 }
 0x414   : > { %v1677_v15 = vpop.f32.mrb[6].mxu0 }
 0x415   : > { %v6959_v16 = vpop.f32.mrb[7].mxu0  ;;  %v1678_v41 = vadd.f32 %v6422_v37, %v1677_v15 }
 0x416   : > { %v6461_v16 = vld [vmem:[%s7845_s24 + $0x50] sm:$0xff] }
 0x41c   : > { %v1843_v17 = vpop.f32.mrb[8].mxu0 }
 0x41d   : > { %v6981_v18 = vpop.f32.mrb[9].mxu0  ;;  %v1844_v42 = vadd.f32 %v6436_v40, %v1843_v17  ;;  %v6462_v17 = vld [vmem:[%s7845_s24 + $0x58] sm:$0xff] }
 0x41e   : > { %v6457_v18 = vld [vmem:[%s7840_s19 + $0x2] ss:$0 sm:$0xff] }
 0x49d   : > { %v1510_v19 = vpop.xlane.xlu1 %1509 }
 0x49e   : > { %v1511_v20 = vsub.f32 %v1506_v11, %v1510_v19  ;;  %v6460_v11 = vld [vmem:[%s7845_s24 + $0x48] sm:$0xff]  ;;  %v7478_v19 = vpack.c.bf16 %v6462_v17, %v6461_v16  ;;  %v6477_v16 = vld [vmem:[%s7830_s8 + $0x3] ss:$0 sm:$0xff] }
 0x49f   : > { %v7475_v15 = vpack.c.bf16 %v6460_v11, %v6459_v10 }
 0x4a0   : > { %v1512_v21 = vmul.f32 1.442695, %v1511_v20 }
 0x4a2   : > { %7684 = vpow2.f32 %v1512_v21 }
 0x4ac   : > { %v7685_v22 = vpop.eup %7684 }
 0x4ad   : > { %v1514_v23 = vsel %vm1507_vm5, %v7685_v22, 0.0 }
 0x4ae   : > { %1515 = vadd.xlane.f32.xlu1 %v1514_v23 }
 0x53b   : > { %v1516_v24 = vpop.xlane.xlu1 %1515 }
 0x53c   : > { %7686 = vrcp.f32 %v1516_v24 }
 0x546   : > { %v7687_v27 = vpop.eup %7686 }
 0x547   : > { %v1518_v29 = vmul.f32 %v7687_v27, %v7685_v22 }
 0x549   : > { %6947 = vmatmul.mubr.msk.f32.vlgmr.msra.gmra.mrb[4].mxu1 %vm1519_vm6, %v1518_v29 }
 0x54a   : > { %7452 = vmatpush3.bf16.msra.mxu1 %v7451_v28  ;;  %6968 = vmatprep.mubr.msk.f32.mxu1 %vm7779_vm0, %v7780_v6 }
 0x54b   : > { %7453 = vmatprep.subr.bf16.mxu1 %v7778_v3 }
 0x54e   : > { %7455 = vmatpush3.bf16.msra.mxu1 %v7454_v32 }
 0x54f   : > { %6982 = vmatprep.subr.mxu1 %v7780_v6 }
 0x551   : > { %6969 = vmatmul.mubr.msk.f32.vlgmr.msra.gmra.mrb[6].mxu1 %vm1076_vm1, %v8016_v44 }
 0x552   : > { %6984 = vmatprep.mubr.msk.f32.mxu1 %vm7779_vm0, %v7780_v6 }
 0x61c   : > { %v1593_v33 = vpop.f32.mrb[4].mxu1 }
 0x61d   : > { %v6948_v34 = vpop.f32.mrb[5].mxu1 }
 0x624   : > { %v1760_v36 = vpop.f32.mrb[6].mxu1 }
 0x625   : > { %v1761_v38 = vadd.f32 %v6429_v35, %v1760_v36  ;;  %v6970_v39 = vpop.f32.mrb[7].mxu1 }
 0x627   : > { %6983 = vmatpush3.xpose.msk.msra.mxu1 %vm1429_vm3, %v1761_v38 }
 0x628   : > { %6987 = vmatprep.subr.mxu1 %v7780_v6 }
 0x62a   : > { %6985 = vmatmul.mubr.msk.f32.vlgmr.msra.gmra.mrb[8].mxu1 %vm1429_vm3, %v1678_v41 }
 0x62b   : > { %6988 = vmatpush3.msk.msra.mxu1 %vm1523_vm4, %v1844_v42  ;;  %6989 = vmatprep.mubr.msk.f32.mxu1 %vm7779_vm0, %v7780_v6 }
 0x62c   : > { %6997 = vmatprep.subr.mxu1 %v7780_v6 }
 0x6fd   : > { %v1919_v43 = vpop.f32.mrb[8].mxu1 }
 0x6fe   : > { %v1923_v45 = vmul.f32 0.35355338, %v1919_v43  ;;  %v6986_v46 = vpop.f32.mrb[9].mxu1  ;;  %v6470_v43 = vld [vmem:[%s7855_s6 + $0x10] sm:$0xff] }
 0x6ff   : > { %v6472_v46 = vld [vmem:[%s8612_s3 + $0x60] sm:$0xff] }
 0x700   : > { %v1924_v47 = vsel %vm1507_vm5, %v1923_v45, -inf }
 0x701   : > { %1925 = vmax.xlane.f32.xlu0 %v1924_v47  ;;  %v6473_v47 = vld [vmem:[%s8612_s3 + $0x68] sm:$0xff] }
 0x78e   : > { %v1926_v48 = vpop.xlane.xlu0 %1925 }
 0x78f   : > { %v1927_v49 = vsub.f32 %v1923_v45, %v1926_v48 }
 0x791   : > { %v1928_v50 = vmul.f32 1.442695, %v1927_v49  ;;  %v7481_v49 = vpack.c.bf16 %v6473_v47, %v6472_v46 }
 0x793   : > { %7688 = vpow2.f32 %v1928_v50 }
 0x79d   : > { %v7689_v51 = vpop.eup %7688 }
 0x79e   : > { %v1930_v52 = vsel %vm1507_vm5, %v7689_v51, 0.0 }
 0x79f   : > { %1931 = vadd.xlane.f32.xlu1 %v1930_v52  ;;  %v6475_v52 = vld [vmem:[%s8612_s3 + $0x78] sm:$0xff] }
 0x82c   : > { %v1932_v54 = vpop.xlane.xlu1 %1931 }
 0x82d   : > { %7690 = vrcp.f32 %v1932_v54  ;;  %v6486_v54 = vld [vmem:[%s7845_s24 + $0x60] sm:$0xff] }
 0x837   : > { %v7691_v55 = vpop.eup %7690 }
 0x838   : > { %v1934_v56 = vmul.f32 %v7691_v55, %v7689_v51  ;;  %v6474_v51 = vld [vmem:[%s8612_s3 + $0x70] sm:$0xff]  ;;  %v6487_v55 = vld [vmem:[%s7845_s24 + $0x68] sm:$0xff] }
 0x839   : > { %v7484_v53 = vpack.c.bf16 %v6475_v52, %v6474_v51  ;;  %v3177_v51 = vld [vmem:[%s8614_s22 + $0x10] sm:$0xff]  ;;  %v3178_v52 = vld [vmem:[%s8614_s22 + $0x18] sm:$0xff] }
 0x83a   : > { %6990 = vmatmul.mubr.msk.f32.vlgmr.msra.gmra.mrb[10].mxu1 %vm1519_vm6, %v1934_v56  ;;  %v7493_v56 = vpack.c.bf16 %v6487_v55, %v6486_v54 }
 0x83b   : > { %6998 = vmatpush3.msra.mxu1 %v1597_v57  ;;  %6999 = vmatprep.mubr.msk.f32.mxu1 %vm7779_vm0, %v7780_v6  ;;  %v6488_v57 = vld [vmem:[%s7845_s24 + $0x70] sm:$0xff] }
 0x83c   : > { %7468 = vmatprep.subr.bf16.mxu1 %v7778_v3  ;;  %v7496_v59 = vpack.c.bf16 %v6489_v58, %v6488_v57  ;;  %v6500_v58 = vld [vmem:[%s8615_s23] ss:$0 sm:$0xff] }
 0x83e   : > { %7000 = vmatmul.mubr.msk.f32.vlgmr.msra.gmra.mrb[12].mxu1 %vm1429_vm3, %v1593_v33 }
 0x83f   : > { %7470 = vmatpush3.bf16.msra.mxu1 %v7469_v60  ;;  %7021 = vmatprep.mubr.msk.f32.mxu1 %vm7779_vm0, %v7780_v6  ;;  %v6479_v60 = vld [vmem:[%s7835_s14 + $0x60] sm:$0xff] }
 0x840   : > { %7471 = vmatprep.subr.bf16.mxu1 %v7778_v3  ;;  %v7487_v62 = vpack.c.bf16 %v6480_v61, %v6479_v60  ;;  %v6501_v60 = vld [vmem:[%s8616_s26] ss:$0 sm:$0xff] }
 0x843   : > { %7473 = vmatpush3.bf16.msra.mxu1 %v7472_v63  ;;  %v6481_v63 = vld [vmem:[%s7835_s14 + $0x70] sm:$0xff] }
 0x844   : > { %7035 = vmatprep.subr.mxu1 %v7780_v6  ;;  %v7490_v4 = vpack.c.bf16 %v6482_v0, %v6481_v63  ;;  %v3268_v63 = vld [vmem:[%s8617_s28] sm:$0xff]  ;;  %v3269_v0 = vld [vmem:[%s8617_s28 + $0x8] sm:$0xff] }
 0x846   : > { %7022 = vmatmul.mubr.msk.f32.vlgmr.msra.gmra.mrb[14].mxu1 %vm1076_vm1, %v8016_v44 }
 0x847   : > { %7037 = vmatprep.mubr.msk.f32.mxu1 %vm7779_vm0, %v7780_v6 }
 0x90d   : > { %v2007_v7 = vpop.f32.mrb[10].mxu1 }
 0x90e   : > { %v6991_v8 = vpop.f32.mrb[11].mxu1  ;;  %6995 = vmatmul.mubr.msk.f32.vlgmr.msra.gmra.mrb[10].mxu0 %vm1429_vm3, %v2007_v7 }
 0x90f   : > { %7464 = vmatpush3.bf16.msra.mxu0 %v7463_v2  ;;  %7010 = vmatprep.mubr.msk.f32.mxu0 %vm7779_vm0, %v7780_v6 }
 0x910   : > { %7465 = vmatprep.subr.bf16.mxu0 %v7778_v3 }
 0x911   : > { %v2155_v12 = vpop.f32.mrb[12].mxu1 }
 0x912   : > { %v7001_v13 = vpop.f32.mrb[13].mxu1 }
 0x913   : > { %7467 = vmatpush3.bf16.msra.mxu0 %v7466_v9  ;;  %v6484_v13 = vld [vmem:[%s7840_s19 + $0x3] ss:$0 sm:$0xff] }
 0x914   : > { %7474 = vmatprep.subr.bf16.mxu0 %v7778_v3 }
 0x916   : > { %7011 = vmatmul.mubr.msk.f32.vlgmr.msra.gmra.mrb[12].mxu0 %vm1076_vm1, %v8016_v44 }
 0x917   : > { %7476 = vmatpush3.bf16.msra.mxu0 %v7475_v15  ;;  %7032 = vmatprep.mubr.msk.f32.mxu0 %vm7779_vm0, %v7780_v6 }
 0x918   : > { %7477 = vmatprep.subr.bf16.mxu0 %v7778_v3 }
 0x919   : > { %v2321_v20 = vpop.f32.mrb[14].mxu1 }
 0x91a   : > { %v2322_v21 = vadd.f32 %v6457_v18, %v2321_v20  ;;  %v7023_v22 = vpop.f32.mrb[15].mxu1 }
 0x91b   : > { %7479 = vmatpush3.bf16.msra.mxu0 %v7478_v19  ;;  %v6491_v19 = vld [vmem:[%s7850_s30 + $0x3] ss:$0 sm:$0xff] }
 0x91c   : > { %7036 = vmatpush3.xpose.msk.msra.mxu1 %vm1429_vm3, %v2322_v21  ;;  %7045 = vmatprep.subr.mxu0 %v7780_v6 }
 0x91d   : > { %7040 = vmatprep.subr.mxu1 %v7780_v6 }
 0x91e   : > { %7033 = vmatmul.mubr.msk.f32.vlgmr.msra.gmra.mrb[14].mxu0 %vm1076_vm1, %v8016_v44 }
 0x91f   : > { %7047 = vmatprep.mubr.msk.f32.mxu0 %vm7779_vm0, %v7780_v6  ;;  %7046 = vmatpush3.msra.mxu0 %v6470_v43 }
 0x920   : > { %7486 = vmatprep.subr.bf16.mxu0 %v7778_v3 }
 0x9e1   : > { %v2082_v23 = vpop.f32.mrb[10].mxu0 }
 0x9e2   : > { %v8137_v24 = vadd.f32 %v2155_v12, %v2082_v23  ;;  %v6996_v25 = vpop.f32.mrb[11].mxu0 }
 0x9e9   : > { %v2238_v27 = vpop.f32.mrb[12].mxu0 }
 0x9ea   : > { %v2239_v28 = vadd.f32 %v6450_v26, %v2238_v27  ;;  %v7012_v29 = vpop.f32.mrb[13].mxu0 }
 0x9ec   : > { %7038 = vmatmul.mubr.msk.f32.vlgmr.msra.gmra.mrb[16].mxu1 %vm1429_vm3, %v2239_v28 }
 0x9ed   : > { %7042 = vmatprep.mubr.msk.f32.mxu1 %vm7779_vm0, %v7780_v6 }
 0x9f1   : > { %v2404_v31 = vpop.f32.mrb[14].mxu0 }
 0x9f2   : > { %v2405_v32 = vadd.f32 %v6464_v30, %v2404_v31  ;;  %v7034_v33 = vpop.f32.mrb[15].mxu0  ;;  %v6497_v30 = vld [vmem:[%s7855_s6 + $0x18] sm:$0xff] }
 0x9f4   : > { %7041 = vmatpush3.msk.msra.mxu1 %vm1523_vm4, %v2405_v32 }
 0x9f5   : > { %7480 = vmatprep.subr.bf16.mxu1 %v7778_v3 }
 0xabf   : > { %v2480_v34 = vpop.f32.mrb[16].mxu1 }
 0xac0   : > { %v2484_v35 = vmul.f32 0.35355338, %v2480_v34  ;;  %v7039_v36 = vpop.f32.mrb[17].mxu1 }
 0xac2   : > { %v2485_v37 = vsel %vm1507_vm5, %v2484_v35, -inf }
 0xac3   : > { %2486 = vmax.xlane.f32.xlu0 %v2485_v37 }
 0xb50   : > { %v2487_v38 = vpop.xlane.xlu0 %2486 }
 0xb51   : > { %v2488_v39 = vsub.f32 %v2484_v35, %v2487_v38 }
 0xb53   : > { %v2489_v40 = vmul.f32 1.442695, %v2488_v39  ;;  %v6499_v39 = vld [vmem:[%s7860_s12] ss:$0 sm:$0xff] }
 0xb55   : > { %7692 = vpow2.f32 %v2489_v40 }
 0xb5f   : > { %v7693_v41 = vpop.eup %7692 }
 0xb60   : > { %v2491_v42 = vsel %vm1507_vm5, %v7693_v41, 0.0 }
 0xb61   : > { %2492 = vadd.xlane.f32.xlu1 %v2491_v42 }
 0xbee   : > { %v2493_v45 = vpop.xlane.xlu1 %2492 }
 0xbef   : > { %7694 = vrcp.f32 %v2493_v45 }
 0xbf9   : > { %v7695_v48 = vpop.eup %7694 }
 0xbfa   : > { %v2495_v50 = vmul.f32 %v7695_v48, %v7693_v41 }
 0xbfc   : > { %7043 = vmatmul.mubr.msk.f32.vlgmr.msra.gmra.mrb[18].mxu1 %vm1519_vm6, %v2495_v50  ;;  %v3176_v50 = vld [vmem:[%s8614_s22 + $0x8] sm:$0xff] }
 0xbfd   : > { %7482 = vmatpush3.bf16.msra.mxu1 %v7481_v49  ;;  %7058 = vmatprep.mubr.msk.f32.mxu1 %vm7779_vm0, %v7780_v6  ;;  %v3175_v49 = vld [vmem:[%s8614_s22] sm:$0xff] }
 0xbfe   : > { %7483 = vmatprep.subr.bf16.mxu1 %v7778_v3 }
 0xc01   : > { %7485 = vmatpush3.bf16.msra.mxu1 %v7484_v53  ;;  %v7502_v53 = vpack.c.bf16 %v3178_v52, %v3177_v51 }
 0xc02   : > { %7492 = vmatprep.subr.bf16.mxu1 %v7778_v3 }
 0xc04   : > { %7059 = vmatmul.mubr.msk.f32.vlgmr.msra.gmra.mrb[20].mxu1 %vm1076_vm1, %v8016_v44 }
 0xc05   : > { %7494 = vmatpush3.bf16.msra.mxu1 %v7493_v56  ;;  %7080 = vmatprep.mubr.msk.f32.mxu1 %vm7779_vm0, %v7780_v6 }
 0xc06   : > { %7495 = vmatprep.subr.bf16.mxu1 %v7778_v3 }
 0xc09   : > { %7497 = vmatpush3.bf16.msra.mxu1 %v7496_v59 }
 0xc0a   : > { %7093 = vmatprep.subr.mxu1 %v7780_v6 }
 0xc0c   : > { %7081 = vmatmul.mubr.msk.f32.vlgmr.msra.gmra.mrb[22].mxu1 %vm1076_vm1, %v8016_v44 }
 0xc0d   : > { %7095 = vmatprep.mubr.msk.f32.mxu1 %vm7779_vm0, %v7780_v6  ;;  %7094 = vmatpush3.msra.mxu1 %v6497_v30 }
 0xc0e   : > { %7504 = vmatprep.subr.bf16.mxu1 %v7778_v3 }
 0xccf   : > { %v2568_v1 = vpop.f32.mrb[18].mxu1 }
 0xcd0   : > { %v7044_v2 = vpop.f32.mrb[19].mxu1  ;;  %7048 = vmatmul.mubr.msk.f32.vlgmr.msra.gmra.mrb[16].mxu0 %vm1429_vm3, %v2568_v1  ;;  %v7505_v1 = vpack.c.bf16 %v3269_v0, %v3268_v63  ;;  %v6529_v0 = vld [vmem:[%s7850_s30 + $0x4] ss:$0 sm:$0xff] }
 0xcd1   : > { %7488 = vmatpush3.bf16.msra.mxu0 %v7487_v62  ;;  %7069 = vmatprep.mubr.msk.f32.mxu0 %vm7779_vm0, %v7780_v6  ;;  %v3270_v2 = vld [vmem:[%s8617_s28 + $0x10] sm:$0xff] }
 0xcd2   : > { %7489 = vmatprep.subr.bf16.mxu0 %v7778_v3 }
 0xcd5   : > { %7491 = vmatpush3.bf16.msra.mxu0 %v7490_v4  ;;  %v3271_v4 = vld [vmem:[%s8617_s28 + $0x18] sm:$0xff] }
 0xcd6   : > { %7083 = vmatprep.subr.mxu0 %v7780_v6 }
 0xcd7   : > { %v2727_v5 = vpop.f32.mrb[20].mxu1 }
 0xcd8   : > { %v7060_v7 = vpop.f32.mrb[21].mxu1  ;;  %7070 = vmatmul.mubr.msk.f32.vlgmr.msra.gmra.mrb[18].mxu0 %vm1076_vm1, %v8016_v44  ;;  %v2728_v20 = vadd.f32 %v6477_v16, %v2727_v5  ;;  %v7508_v5 = vpack.c.bf16 %v3271_v4, %v3270_v2 }
 0xcd9   : > { %7085 = vmatprep.mubr.msk.f32.mxu0 %vm7779_vm0, %v7780_v6  ;;  %v3272_v7 = vld [vmem:[%s8617_s28 + $0x20] sm:$0xff] }
 0xcdf   : > { %v2893_v8 = vpop.f32.mrb[22].mxu1 }
 0xce0   : > { %v7082_v9 = vpop.f32.mrb[23].mxu1  ;;  %v2894_v44 = vadd.f32 %v6491_v19, %v2893_v8  ;;  %v3273_v8 = vld [vmem:[%s8617_s28 + $0x28] sm:$0xff] }
 0xce1   : > { %v7511_v9 = vpack.c.bf16 %v3273_v8, %v3272_v7  ;;  %v6522_v8 = vld [vmem:[%s7840_s19 + $0x4] ss:$0 sm:$0xff] }
 0xda3   : > { %v2643_v10 = vpop.f32.mrb[16].mxu0 }
 0xda4   : > { %v2647_v11 = vadd.f32 %v2643_v10, %v8137_v24  ;;  %v7049_v12 = vpop.f32.mrb[17].mxu0  ;;  %v3274_v10 = vld [vmem:[%s8617_s28 + $0x30] sm:$0xff] }
 0xdab   : > { %v2810_v15 = vpop.f32.mrb[18].mxu0 }
 0xdac   : > { %v2811_v17 = vadd.f32 %v6484_v13, %v2810_v15  ;;  %v7071_v18 = vpop.f32.mrb[19].mxu0  ;;  %v6502_v13 = vld [vmem:[%s8618_s1] ss:$0 sm:$0xff] }
 0xdae   : > { %7084 = vmatpush3.xpose.msk.msra.mxu0 %vm1429_vm3, %v2811_v17 }
 0xdaf   : > { %7088 = vmatprep.subr.mxu0 %v7780_v6 }
 0xdb1   : > { %7086 = vmatmul.mubr.msk.f32.vlgmr.msra.gmra.mrb[20].mxu0 %vm1429_vm3, %v2728_v20 }
 0xdb2   : > { %7089 = vmatpush3.msk.msra.mxu0 %vm1523_vm4, %v2894_v44  ;;  %7090 = vmatprep.mubr.msk.f32.mxu0 %vm7779_vm0, %v7780_v6 }
 0xdb3   : > { %7498 = vmatprep.subr.bf16.mxu0 %v7778_v3 }
 0xe84   : > { %v2969_v21 = vpop.f32.mrb[20].mxu0 }
 0xe85   : > { %v2973_v22 = vmul.f32 0.35355338, %v2969_v21  ;;  %v7087_v23 = vpop.f32.mrb[21].mxu0 }
 0xe87   : > { %v2974_v24 = vsel %vm1507_vm5, %v2973_v22, -inf }
 0xe88   : > { %2975 = vmax.xlane.f32.xlu0 %v2974_v24 }
 0xf15   : > { %v2976_v25 = vpop.xlane.xlu0 %2975 }
 0xf16   : > { %v2977_v26 = vsub.f32 %v2973_v22, %v2976_v25 }
 0xf18   : > { %v2978_v27 = vmul.f32 1.442695, %v2977_v26  ;;  %v6504_v26 = vld [vmem:[%s8619_s2] ss:$0 sm:$0xff] }
 0xf1a   : > { %7696 = vpow2.f32 %v2978_v27 }
 0xf24   : > { %v7697_v28 = vpop.eup %7696 }
 0xf25   : > { %v2980_v29 = vsel %vm1507_vm5, %v7697_v28, 0.0 }
 0xf26   : > { %2981 = vadd.xlane.f32.xlu1 %v2980_v29 }
 0xfb3   : > { %v2982_v31 = vpop.xlane.xlu1 %2981 }
 0xfb4   : > { %7698 = vrcp.f32 %v2982_v31 }
 0xfbe   : > { %v7699_v32 = vpop.eup %7698 }
 0xfbf   : > { %v2984_v33 = vmul.f32 %v7699_v32, %v7697_v28 }
 0xfc1   : > { %7091 = vmatmul.mubr.msk.f32.vlgmr.msra.gmra.mrb[22].mxu0 %vm1519_vm6, %v2984_v33 }
 0xfc2   : > { %7106 = vmatprep.mubr.msk.f32.mxu0 %vm7779_vm0, %v7780_v6 }
0x1094   : > { %v3057_v34 = vpop.f32.mrb[22].mxu0 }
0x1095   : > { %v7092_v35 = vpop.f32.mrb[23].mxu0  ;;  %7096 = vmatmul.mubr.msk.f32.vlgmr.msra.gmra.mrb[24].mxu1 %vm1429_vm3, %v3057_v34 }
0x1096   : > { %7125 = vmatprep.mubr.msk.f32.mxu1 %vm7779_vm0, %v7780_v6  ;;  %7506 = vmatpush3.bf16.msra.mxu1 %v7505_v1 }
0x1097   : > { %7507 = vmatprep.subr.bf16.mxu1 %v7778_v3 }
0x109a   : > { %7509 = vmatpush3.bf16.msra.mxu1 %v7508_v5 }
0x109b   : > { %7510 = vmatprep.subr.bf16.mxu1 %v7778_v3 }
0x109e   : > { %7512 = vmatpush3.bf16.msra.mxu1 %v7511_v9 }
0x109f   : > { %7513 = vmatprep.subr.bf16.mxu1 %v7778_v3 }
0x1168   : > { %v3132_v36 = vpop.f32.mrb[24].mxu1 }
0x1169   : > { %v3136_v37 = vadd.f32 %v3132_v36, %v2647_v11  ;;  %v7097_v38 = vpop.f32.mrb[25].mxu1  ;;  %v3275_v11 = vld [vmem:[%s8617_s28 + $0x38] sm:$0xff] }
0x116a   : > { %v7514_v12 = vpack.c.bf16 %v3275_v11, %v3274_v10  ;;  %v6511_v38 = vld [vmem:[%s8612_s3 + $0x88] sm:$0xff]  ;;  %v6536_v10 = vld [vmem:[%s8612_s3 + $0xa0] sm:$0xff] }
0x116b   : > { %v3137_v40 = vadd.f32 %v3136_v37, %v7994_v14  ;;  %v7499_v14 = vpack.c.bf16 %v3176_v50, %v3175_v49  ;;  %v6510_v37 = vld [vmem:[%s8612_s3 + $0x80] sm:$0xff]  ;;  %v6537_v11 = vld [vmem:[%s8612_s3 + $0xa8] sm:$0xff] }
0x116c   : > { %7515 = vmatpush3.bf16.msra.mxu1 %v7514_v12  ;;  %v6515_v12 = vld [vmem:[%s7830_s8 + $0x4] ss:$0 sm:$0xff] }
0x116d   : > { %v8209_v41 = vadd.f32 %v6499_v39, %v3137_v40  ;;  %7500 = vmatpush3.bf16.msra.mxu0 %v7499_v14  ;;  %7528 = vmatprep.subr.bf16.mxu1 %v7778_v3  ;;  %v7517_v39 = vpack.c.bf16 %v6511_v38, %v6510_v37  ;;  %v6524_v40 = vld [vmem:[%s7845_s24 + $0x80] sm:$0xff] }
0x116e   : > { %7501 = vmatprep.subr.bf16.mxu0 %v7778_v3 }
0x116f   : > { %v3148_v42 = vsel %vm1154_vm2, %v8209_v41, 0.0 }
0x1170   : > { %3149 = vadd.xlane.f32.xlu0 %v3148_v42 }
0x1171   : > { %7503 = vmatpush3.bf16.msra.mxu0 %v7502_v53  ;;  %v6508_v53 = vld [vmem:[%s7815_s25 + $0x1] ss:$0 sm:$0xff] }
0x1172   : > { %7516 = vmatprep.subr.bf16.mxu0 %v7778_v3 }
0x11fd   : > { %v3150_v43 = vpop.xlane.xlu0 %3149 }
0x11fe   : > { %v3151_v45 = vmul.f32 0.03125, %v3150_v43  ;;  %v6512_v43 = vld [vmem:[%s8612_s3 + $0x90] sm:$0xff] }
0x1200   : > { %v3152_v46 = vsub.f32 %v8209_v41, %v3151_v45  ;;  %v6513_v45 = vld [vmem:[%s8612_s3 + $0x98] sm:$0xff] }
0x1202   : > { %v3153_v47 = vmul.f32 %v3152_v46, %v3152_v46 }
0x1204   : > { %v3154_v48 = vsel %vm1154_vm2, %v3153_v47, 0.0  ;;  %v6526_v47 = vld [vmem:[%s7845_s24 + $0x90] sm:$0xff] }
0x1205   : > { %3155 = vadd.xlane.f32.xlu1 %v3154_v48  ;;  %v6527_v48 = vld [vmem:[%s7845_s24 + $0x98] sm:$0xff] }
0x1206   : > { %v7532_v49 = vpack.c.bf16 %v6527_v48, %v6526_v47  ;;  %v6545_v47 = vld [vmem:[%s7835_s14 + $0xb0] sm:$0xff]  ;;  %v6546_v48 = vld [vmem:[%s7835_s14 + $0xb8] sm:$0xff] }
0x1292   : > { %v3156_v54 = vpop.xlane.xlu1 %3155 }
0x1293   : > { %v3157_v55 = vmul.f32 0.03125, %v3156_v54 }
0x1295   : > { %v3158_v56 = vadd.f32 1e-06, %v3157_v55  ;;  %v6517_v55 = vld [vmem:[%s7835_s14 + $0x80] sm:$0xff] }
0x1297   : > { %7700 = vrsqrt.f32 %v3158_v56  ;;  %v6518_v56 = vld [vmem:[%s7835_s14 + $0x88] sm:$0xff] }
0x12a1   : > { %v7701_v57 = vpop.eup %7700 }
0x12a2   : > { %v3160_v59 = vmul.f32 %v7701_v57, %v3152_v46  ;;  %v7520_v46 = vpack.c.bf16 %v6513_v45, %v6512_v43  ;;  %v6509_v57 = vld [vmem:[%s7820_s29 + $0x1] ss:$0 sm:$0xff] }
0x12a4   : > { %v3167_v61 = vmul.f32 %v6500_v58, %v3160_v59  ;;  %v7523_v59 = vpack.c.bf16 %v6518_v56, %v6517_v55  ;;  %v6555_v56 = vld [vmem:[%s7850_s30 + $0x5] ss:$0 sm:$0xff] }
0x12a6   : > { %v3174_v62 = vadd.f32 %v6501_v60, %v3167_v61  ;;  %v6519_v61 = vld [vmem:[%s7835_s14 + $0x90] sm:$0xff] }
0x12a8   : > { %7107 = vmatmul.mubr.msk.f32.vlgmr.msra.gmra.mrb[24].mxu0 %vm1076_vm1, %v3174_v62  ;;  %v6520_v62 = vld [vmem:[%s7835_s14 + $0x98] sm:$0xff] }
0x12a9   : > { %7136 = vmatprep.mubr.msk.f32.mxu0 %vm7779_vm0, %v7780_v6  ;;  %7518 = vmatpush3.bf16.msra.mxu0 %v7517_v39  ;;  %v7526_v63 = vpack.c.bf16 %v6520_v62, %v6519_v61 }
0x12aa   : > { %7519 = vmatprep.subr.bf16.mxu0 %v7778_v3 }
0x12ad   : > { %7521 = vmatpush3.bf16.msra.mxu0 %v7520_v46 }
0x12ae   : > { %7522 = vmatprep.subr.bf16.mxu0 %v7778_v3 }
0x137b   : > { %v3255_v15 = vpop.f32.mrb[24].mxu0 }
0x137c   : > { %v3256_v16 = vadd.f32 %v6502_v13, %v3255_v15  ;;  %v7108_v17 = vpop.f32.mrb[25].mxu0 }
0x137e   : > { %v3259_v18 = vmul.f32 %v3256_v16, %v3256_v16 }
0x1380   : > { %v3260_v19 = vmul.f32 %v3259_v18, %v3256_v16  ;;  %v6538_v18 = vld [vmem:[%s8612_s3 + $0xb0] sm:$0xff] }
0x1382   : > { %v3261_v20 = vmul.f32 0.044715, %v3260_v19  ;;  %v6539_v19 = vld [vmem:[%s8612_s3 + $0xb8] sm:$0xff] }
0x1384   : > { %v3262_v44 = vadd.f32 %v3261_v20, %v3256_v16  ;;  %v7538_v20 = vpack.c.bf16 %v6539_v19, %v6538_v18  ;;  %v6564_v19 = vld [vmem:[%s8612_s3 + $0xc0] sm:$0xff] }
0x1386   : > { %v3263_v21 = vmul.f32 0.7978846, %v3262_v44  ;;  %v6550_v44 = vld [vmem:[%s7845_s24 + $0xa0] sm:$0xff] }
0x1388   : > { %7702 = vtanh.f32 %v3263_v21  ;;  %v6551_v21 = vld [vmem:[%s7845_s24 + $0xa8] sm:$0xff] }
0x1392   : > { %v7703_v22 = vpop.eup %7702 }
0x1393   : > { %v3265_v23 = vadd.f32 1.0, %v7703_v22  ;;  %v7547_v22 = vpack.c.bf16 %v6551_v21, %v6550_v44  ;;  %v6566_v21 = vld [vmem:[%s8612_s3 + $0xd0] sm:$0xff] }
0x1395   : > { %v3266_v24 = vmul.f32 0.5, %v3265_v23  ;;  %v6552_v23 = vld [vmem:[%s7845_s24 + $0xb0] sm:$0xff] }
0x1397   : > { %v3267_v25 = vmul.f32 %v3266_v24, %v3256_v16  ;;  %v7535_v16 = vpack.c.bf16 %v6537_v11, %v6536_v10  ;;  %v6553_v24 = vld [vmem:[%s7845_s24 + $0xb8] sm:$0xff]  ;;  %v6535_v11 = vld [vmem:[%s7855_s6 + $0x20] sm:$0xff] }
0x1399   : > { %7126 = vmatmul.mubr.msk.f32.vlgmr.msra.gmra.mrb[26].mxu1 %vm3283_vm7, %v3267_v25  ;;  %v7550_v25 = vpack.c.bf16 %v6553_v24, %v6552_v23 }
0x139a   : > { %7158 = vmatprep.mubr.msk.f32.mxu1 %vm7779_vm0, %v7780_v6 }
0x146c   : > { %v3353_v27 = vpop.f32.mrb[26].mxu1 }
0x146d   : > { %v3354_v28 = vadd.f32 %v6504_v26, %v3353_v27  ;;  %v7127_v29 = vpop.f32.mrb[27].mxu1 }
0x146f   : > { %v8244_v30 = vadd.f32 %v3354_v28, %v8209_v41  ;;  %v6525_v41 = vld [vmem:[%s7845_s24 + $0x88] sm:$0xff] }
0x1470   : > { %v7529_v42 = vpack.c.bf16 %v6525_v41, %v6524_v40  ;;  %v6543_v41 = vld [vmem:[%s7835_s14 + $0xa0] sm:$0xff] }
0x1471   : > { %v3362_v31 = vsel %vm1154_vm2, %v8244_v30, 0.0 }
0x1472   : > { %3363 = vadd.xlane.f32.xlu0 %v3362_v31  ;;  %7530 = vmatpush3.bf16.msra.mxu1 %v7529_v42  ;;  %v6544_v42 = vld [vmem:[%s7835_s14 + $0xa8] sm:$0xff] }
0x1473   : > { %7531 = vmatprep.subr.bf16.mxu1 %v7778_v3  ;;  %v7541_v45 = vpack.c.bf16 %v6544_v42, %v6543_v41  ;;  %v6569_v42 = vld [vmem:[%s7830_s8 + $0x6] ss:$0 sm:$0xff] }
0x1476   : > { %7533 = vmatpush3.bf16.msra.mxu1 %v7532_v49  ;;  %v7544_v49 = vpack.c.bf16 %v6546_v48, %v6545_v47  ;;  %v6583_v47 = vld [vmem:[%s7850_s30 + $0x6] ss:$0 sm:$0xff] }
0x1477   : > { %7166 = vmatprep.subr.mxu1 %v7780_v6 }
0x14ff   : > { %v3364_v32 = vpop.xlane.xlu0 %3363 }
0x1500   : > { %v3365_v33 = vmul.f32 0.03125, %v3364_v32 }
0x1502   : > { %v3366_v34 = vsub.f32 %v8244_v30, %v3365_v33 }
0x1504   : > { %v3367_v35 = vmul.f32 %v3366_v34, %v3366_v34 }
0x1506   : > { %v3368_v36 = vsel %vm1154_vm2, %v3367_v35, 0.0 }
0x1507   : > { %3369 = vadd.xlane.f32.xlu1 %v3368_v36 }
0x1594   : > { %v3370_v50 = vpop.xlane.xlu1 %3369 }
0x1595   : > { %v3371_v14 = vmul.f32 0.03125, %v3370_v50 }
0x1597   : > { %v3372_v51 = vadd.f32 1e-06, %v3371_v14 }
0x1599   : > { %7704 = vrsqrt.f32 %v3372_v51  ;;  %v6548_v51 = vld [vmem:[%s7840_s19 + $0x5] ss:$0 sm:$0xff] }
0x15a3   : > { %v7705_v52 = vpop.eup %7704 }
0x15a4   : > { %v3374_v54 = vmul.f32 %v7705_v52, %v3366_v34 }
0x15a6   : > { %v3381_v58 = vmul.f32 %v6508_v53, %v3374_v54  ;;  %v6541_v53 = vld [vmem:[%s7830_s8 + $0x5] ss:$0 sm:$0xff] }
0x15a8   : > { %v8266_v60 = vadd.f32 %v6509_v57, %v3381_v58 }
0x15aa   : > { %7137 = vmatmul.mubr.msk.f32.vlgmr.msra.gmra.mrb[26].mxu0 %vm1076_vm1, %v8266_v60  ;;  %7159 = vmatmul.mubr.msk.f32.vlgmr.msra.gmra.mrb[28].mxu1 %vm1076_vm1, %v8266_v60 }
0x15ab   : > { %7524 = vmatpush3.bf16.msra.mxu0 %v7523_v59  ;;  %7147 = vmatprep.mubr.msk.f32.mxu0 %vm7779_vm0, %v7780_v6 }
0x15ac   : > { %7525 = vmatprep.subr.bf16.mxu0 %v7778_v3  ;;  %7168 = vmatprep.mubr.msk.f32.mxu1 %vm7779_vm0, %v7780_v6 }
0x15af   : > { %7527 = vmatpush3.bf16.msra.mxu0 %v7526_v63 }
0x15b0   : > { %7161 = vmatprep.subr.mxu0 %v7780_v6 }
0x15b2   : > { %7148 = vmatmul.mubr.msk.f32.vlgmr.msra.gmra.mrb[28].mxu0 %vm1076_vm1, %v8266_v60 }
0x15b3   : > { %7163 = vmatprep.mubr.msk.f32.mxu0 %vm7779_vm0, %v7780_v6 }
0x167d   : > { %v3471_v1 = vpop.f32.mrb[26].mxu0  ;;  %v3637_v2 = vpop.f32.mrb[28].mxu1 }
0x167e   : > { %v3638_v4 = vadd.f32 %v6529_v0, %v3637_v2  ;;  %v7138_v5 = vpop.f32.mrb[27].mxu0  ;;  %v7160_v7 = vpop.f32.mrb[29].mxu1  ;;  %v3472_v17 = vadd.f32 %v6515_v12, %v3471_v1  ;;  %v6571_v12 = vld [vmem:[%s7835_s14 + $0xc0] sm:$0xff] }
0x167f   : > { %v6561_v7 = vld [vmem:[%s7855_s6 + $0x28] sm:$0xff] }
0x1680   : > { %7167 = vmatpush3.msk.msra.mxu1 %vm1523_vm4, %v3638_v4 }
0x1681   : > { %7540 = vmatprep.subr.bf16.mxu1 %v7778_v3 }
0x1685   : > { %v3554_v9 = vpop.f32.mrb[28].mxu0 }
0x1686   : > { %v3555_v13 = vadd.f32 %v6522_v8, %v3554_v9  ;;  %v7149_v15 = vpop.f32.mrb[29].mxu0 }
0x1688   : > { %7162 = vmatpush3.xpose.msk.msra.mxu0 %vm1429_vm3, %v3555_v13  ;;  %v6572_v13 = vld [vmem:[%s7835_s14 + $0xc8] sm:$0xff] }
0x1689   : > { %7534 = vmatprep.subr.bf16.mxu0 %v7778_v3  ;;  %v7559_v15 = vpack.c.bf16 %v6572_v13, %v6571_v12  ;;  %v6608_v12 = vld [vmem:[%s7845_s24 + $0xf8] sm:$0xff] }
0x168b   : > { %7164 = vmatmul.mubr.msk.f32.vlgmr.msra.gmra.mrb[30].mxu0 %vm1429_vm3, %v3472_v17  ;;  %v6574_v17 = vld [vmem:[%s7835_s14 + $0xd8] sm:$0xff] }
0x168c   : > { %7536 = vmatpush3.bf16.msra.mxu0 %v7535_v16  ;;  %7179 = vmatprep.mubr.msk.f32.mxu0 %vm7779_vm0, %v7780_v6  ;;  %v6573_v16 = vld [vmem:[%s7835_s14 + $0xd0] sm:$0xff] }
0x168d   : > { %7537 = vmatprep.subr.bf16.mxu0 %v7778_v3  ;;  %v7562_v18 = vpack.c.bf16 %v6574_v17, %v6573_v16  ;;  %v6599_v16 = vld [vmem:[%s7835_s14 + $0xe8] sm:$0xff] }
0x1690   : > { %7539 = vmatpush3.bf16.msra.mxu0 %v7538_v20  ;;  %v6565_v20 = vld [vmem:[%s8612_s3 + $0xc8] sm:$0xff] }
0x1691   : > { %7546 = vmatprep.subr.bf16.mxu0 %v7778_v3  ;;  %v7553_v44 = vpack.c.bf16 %v6565_v20, %v6564_v19  ;;  %v6601_v19 = vld [vmem:[%s7835_s14 + $0xf8] sm:$0xff] }
0x1693   : > { %7180 = vmatmul.mubr.msk.f32.vlgmr.msra.gmra.mrb[32].mxu0 %vm1076_vm1, %v8266_v60 }
0x1694   : > { %7548 = vmatpush3.bf16.msra.mxu0 %v7547_v22  ;;  %7201 = vmatprep.mubr.msk.f32.mxu0 %vm7779_vm0, %v7780_v6  ;;  %v6567_v22 = vld [vmem:[%s8612_s3 + $0xd8] sm:$0xff] }
0x1695   : > { %7549 = vmatprep.subr.bf16.mxu0 %v7778_v3 }
0x1698   : > { %7551 = vmatpush3.bf16.msra.mxu0 %v7550_v25  ;;  %v7556_v25 = vpack.c.bf16 %v6567_v22, %v6566_v21 }
0x1699   : > { %7214 = vmatprep.subr.mxu0 %v7780_v6 }
0x169b   : > { %7202 = vmatmul.mubr.msk.f32.vlgmr.msra.gmra.mrb[34].mxu0 %vm1076_vm1, %v8266_v60 }
0x169c   : > { %7216 = vmatprep.mubr.msk.f32.mxu0 %vm7779_vm0, %v7780_v6  ;;  %7215 = vmatpush3.msra.mxu0 %v6561_v7 }
0x169d   : > { %7552 = vmatprep.subr.bf16.mxu0 %v7778_v3 }
0x175e   : > { %v3713_v26 = vpop.f32.mrb[30].mxu0 }
0x175f   : > { %v3717_v27 = vmul.f32 0.35355338, %v3713_v26  ;;  %v7165_v28 = vpop.f32.mrb[31].mxu0  ;;  %v6578_v26 = vld [vmem:[%s7845_s24 + $0xc0] sm:$0xff] }
0x1761   : > { %v3718_v29 = vsel %vm1507_vm5, %v3717_v27, -inf }
0x1762   : > { %3719 = vmax.xlane.f32.xlu0 %v3718_v29 }
0x1766   : > { %v3886_v31 = vpop.f32.mrb[32].mxu0 }
0x1767   : > { %v7181_v32 = vpop.f32.mrb[33].mxu0  ;;  %v3887_v57 = vadd.f32 %v6541_v53, %v3886_v31 }
0x1768   : > { %v6580_v32 = vld [vmem:[%s7845_s24 + $0xd0] sm:$0xff] }
0x176e   : > { %v4052_v33 = vpop.f32.mrb[34].mxu0 }
0x176f   : > { %v7203_v34 = vpop.f32.mrb[35].mxu0  ;;  %v4053_v58 = vadd.f32 %v6555_v56, %v4052_v33  ;;  %v6581_v33 = vld [vmem:[%s7845_s24 + $0xd8] sm:$0xff] }
0x1770   : > { %v6576_v34 = vld [vmem:[%s7840_s19 + $0x6] ss:$0 sm:$0xff] }
0x17ef   : > { %v3720_v35 = vpop.xlane.xlu0 %3719 }
0x17f0   : > { %v3721_v36 = vsub.f32 %v3717_v27, %v3720_v35  ;;  %v6579_v27 = vld [vmem:[%s7845_s24 + $0xc8] sm:$0xff]  ;;  %v7568_v35 = vpack.c.bf16 %v6581_v33, %v6580_v32  ;;  %v6596_v32 = vld [vmem:[%s7830_s8 + $0x7] ss:$0 sm:$0xff] }
0x17f1   : > { %v7565_v31 = vpack.c.bf16 %v6579_v27, %v6578_v26 }
0x17f2   : > { %v3722_v37 = vmul.f32 1.442695, %v3721_v36 }
0x17f4   : > { %7706 = vpow2.f32 %v3722_v37 }
0x17fe   : > { %v7707_v38 = vpop.eup %7706 }
0x17ff   : > { %v3724_v39 = vsel %vm1507_vm5, %v7707_v38, 0.0 }
0x1800   : > { %3725 = vadd.xlane.f32.xlu1 %v3724_v39 }
0x188d   : > { %v3726_v40 = vpop.xlane.xlu1 %3725 }
0x188e   : > { %7708 = vrcp.f32 %v3726_v40 }
0x1898   : > { %v7709_v43 = vpop.eup %7708 }
0x1899   : > { %v3728_v46 = vmul.f32 %v7709_v43, %v7707_v38 }
0x189b   : > { %7169 = vmatmul.mubr.msk.f32.vlgmr.msra.gmra.mrb[30].mxu1 %vm1519_vm6, %v3728_v46 }
0x189c   : > { %7542 = vmatpush3.bf16.msra.mxu1 %v7541_v45  ;;  %7190 = vmatprep.mubr.msk.f32.mxu1 %vm7779_vm0, %v7780_v6 }
0x189d   : > { %7543 = vmatprep.subr.bf16.mxu1 %v7778_v3 }
0x18a0   : > { %7545 = vmatpush3.bf16.msra.mxu1 %v7544_v49 }
0x18a1   : > { %7204 = vmatprep.subr.mxu1 %v7780_v6 }
0x18a3   : > { %7191 = vmatmul.mubr.msk.f32.vlgmr.msra.gmra.mrb[32].mxu1 %vm1076_vm1, %v8266_v60 }
0x18a4   : > { %7206 = vmatprep.mubr.msk.f32.mxu1 %vm7779_vm0, %v7780_v6 }
0x196e   : > { %v3801_v50 = vpop.f32.mrb[30].mxu1 }
0x196f   : > { %v7170_v14 = vpop.f32.mrb[31].mxu1 }
0x1976   : > { %v3969_v52 = vpop.f32.mrb[32].mxu1 }
0x1977   : > { %v3970_v54 = vadd.f32 %v6548_v51, %v3969_v52  ;;  %v7192_v55 = vpop.f32.mrb[33].mxu1 }
0x1979   : > { %7205 = vmatpush3.xpose.msk.msra.mxu1 %vm1429_vm3, %v3970_v54 }
0x197a   : > { %7209 = vmatprep.subr.mxu1 %v7780_v6 }
0x197c   : > { %7207 = vmatmul.mubr.msk.f32.vlgmr.msra.gmra.mrb[34].mxu1 %vm1429_vm3, %v3887_v57 }
0x197d   : > { %7210 = vmatpush3.msk.msra.mxu1 %vm1523_vm4, %v4053_v58  ;;  %7211 = vmatprep.mubr.msk.f32.mxu1 %vm7779_vm0, %v7780_v6 }
0x197e   : > { %7219 = vmatprep.subr.mxu1 %v7780_v6 }
0x1a4f   : > { %v4128_v59 = vpop.f32.mrb[34].mxu1 }
0x1a50   : > { %v4132_v61 = vmul.f32 0.35355338, %v4128_v59  ;;  %v7208_v62 = vpop.f32.mrb[35].mxu1  ;;  %v6589_v59 = vld [vmem:[%s7855_s6 + $0x30] sm:$0xff] }
0x1a51   : > { %v6591_v62 = vld [vmem:[%s8612_s3 + $0xe0] sm:$0xff] }
0x1a52   : > { %v4133_v63 = vsel %vm1507_vm5, %v4132_v61, -inf }
0x1a53   : > { %4134 = vmax.xlane.f32.xlu0 %v4133_v63  ;;  %v6592_v63 = vld [vmem:[%s8612_s3 + $0xe8] sm:$0xff] }
0x1ae0   : > { %v4135_v0 = vpop.xlane.xlu0 %4134 }
0x1ae1   : > { %v4136_v1 = vsub.f32 %v4132_v61, %v4135_v0 }
0x1ae3   : > { %v4137_v2 = vmul.f32 1.442695, %v4136_v1  ;;  %v7571_v1 = vpack.c.bf16 %v6592_v63, %v6591_v62 }
0x1ae5   : > { %7710 = vpow2.f32 %v4137_v2 }
0x1aef   : > { %v7711_v4 = vpop.eup %7710 }
0x1af0   : > { %v4139_v5 = vsel %vm1507_vm5, %v7711_v4, 0.0 }
0x1af1   : > { %4140 = vadd.xlane.f32.xlu1 %v4139_v5  ;;  %v6594_v5 = vld [vmem:[%s8612_s3 + $0xf8] sm:$0xff] }
0x1b7e   : > { %v4141_v8 = vpop.xlane.xlu1 %4140 }
0x1b7f   : > { %7712 = vrcp.f32 %v4141_v8  ;;  %v6605_v8 = vld [vmem:[%s7845_s24 + $0xe0] sm:$0xff] }
0x1b89   : > { %v7713_v9 = vpop.eup %7712 }
0x1b8a   : > { %v4143_v10 = vmul.f32 %v7713_v9, %v7711_v4  ;;  %v6593_v4 = vld [vmem:[%s8612_s3 + $0xf0] sm:$0xff]  ;;  %v6606_v9 = vld [vmem:[%s7845_s24 + $0xe8] sm:$0xff]  ;;  %s8627_s3 = sld [smem:[#allocation18_spill]] }
0x1b8b   : > { %v7574_v7 = vpack.c.bf16 %v6594_v5, %v6593_v4  ;;  %v6626_v4 = vld [vmem:[%s8614_s22 + $0x30] sm:$0xff]  ;;  %v6627_v5 = vld [vmem:[%s8614_s22 + $0x38] sm:$0xff] }
0x1b8c   : > { %7212 = vmatmul.mubr.msk.f32.vlgmr.msra.gmra.mrb[36].mxu1 %vm1519_vm6, %v4143_v10  ;;  %v7583_v10 = vpack.c.bf16 %v6606_v9, %v6605_v8 }
0x1b8d   : > { %7220 = vmatpush3.msra.mxu1 %v6535_v11  ;;  %7221 = vmatprep.mubr.msk.f32.mxu1 %vm7779_vm0, %v7780_v6  ;;  %v6607_v11 = vld [vmem:[%s7845_s24 + $0xf0] sm:$0xff] }
0x1b8e   : > { %7558 = vmatprep.subr.bf16.mxu1 %v7778_v3  ;;  %v7586_v13 = vpack.c.bf16 %v6608_v12, %v6607_v11  ;;  %v6622_v12 = vld [vmem:[%s8615_s23 + $0x1] ss:$0 sm:$0xff] }
0x1b90   : > { %7222 = vmatmul.mubr.msk.f32.vlgmr.msra.gmra.mrb[38].mxu1 %vm1429_vm3, %v3801_v50 }
0x1b91   : > { %7560 = vmatpush3.bf16.msra.mxu1 %v7559_v15  ;;  %7243 = vmatprep.mubr.msk.f32.mxu1 %vm7779_vm0, %v7780_v6  ;;  %v6598_v15 = vld [vmem:[%s7835_s14 + $0xe0] sm:$0xff] }
0x1b92   : > { %7561 = vmatprep.subr.bf16.mxu1 %v7778_v3  ;;  %v7577_v17 = vpack.c.bf16 %v6599_v16, %v6598_v15  ;;  %v6623_v15 = vld [vmem:[%s8616_s26 + $0x1] ss:$0 sm:$0xff] }
0x1b95   : > { %7563 = vmatpush3.bf16.msra.mxu1 %v7562_v18  ;;  %v6600_v18 = vld [vmem:[%s7835_s14 + $0xf0] sm:$0xff] }
0x1b96   : > { %7257 = vmatprep.subr.mxu1 %v7780_v6  ;;  %v7580_v21 = vpack.c.bf16 %v6601_v19, %v6600_v18  ;;  %v6631_v18 = vld [vmem:[%s8617_s28 + $0x40] sm:$0xff]  ;;  %v6632_v19 = vld [vmem:[%s8617_s28 + $0x48] sm:$0xff] }
0x1b98   : > { %7244 = vmatmul.mubr.msk.f32.vlgmr.msra.gmra.mrb[40].mxu1 %vm1076_vm1, %v8266_v60 }
0x1b99   : > { %7259 = vmatprep.mubr.msk.f32.mxu1 %vm7779_vm0, %v7780_v6 }
0x1c5f   : > { %v4216_v23 = vpop.f32.mrb[36].mxu1 }
0x1c60   : > { %v7213_v24 = vpop.f32.mrb[37].mxu1  ;;  %7217 = vmatmul.mubr.msk.f32.vlgmr.msra.gmra.mrb[36].mxu0 %vm1429_vm3, %v4216_v23 }
0x1c61   : > { %7554 = vmatpush3.bf16.msra.mxu0 %v7553_v44  ;;  %7232 = vmatprep.mubr.msk.f32.mxu0 %vm7779_vm0, %v7780_v6 }
0x1c62   : > { %7555 = vmatprep.subr.bf16.mxu0 %v7778_v3 }
0x1c63   : > { %v4364_v28 = vpop.f32.mrb[38].mxu1 }
0x1c64   : > { %v7223_v29 = vpop.f32.mrb[39].mxu1 }
0x1c65   : > { %7557 = vmatpush3.bf16.msra.mxu0 %v7556_v25  ;;  %v6603_v29 = vld [vmem:[%s7840_s19 + $0x7] ss:$0 sm:$0xff] }
0x1c66   : > { %7564 = vmatprep.subr.bf16.mxu0 %v7778_v3 }
0x1c68   : > { %7233 = vmatmul.mubr.msk.f32.vlgmr.msra.gmra.mrb[38].mxu0 %vm1076_vm1, %v8266_v60 }
0x1c69   : > { %7566 = vmatpush3.bf16.msra.mxu0 %v7565_v31  ;;  %7254 = vmatprep.mubr.msk.f32.mxu0 %vm7779_vm0, %v7780_v6 }
0x1c6a   : > { %7567 = vmatprep.subr.bf16.mxu0 %v7778_v3 }
0x1c6b   : > { %v4530_v36 = vpop.f32.mrb[40].mxu1 }
0x1c6c   : > { %v4531_v37 = vadd.f32 %v6576_v34, %v4530_v36  ;;  %v7245_v38 = vpop.f32.mrb[41].mxu1 }
0x1c6d   : > { %7569 = vmatpush3.bf16.msra.mxu0 %v7568_v35  ;;  %v6610_v35 = vld [vmem:[%s7850_s30 + $0x7] ss:$0 sm:$0xff] }
0x1c6e   : > { %7258 = vmatpush3.xpose.msk.msra.mxu1 %vm1429_vm3, %v4531_v37  ;;  %7267 = vmatprep.subr.mxu0 %v7780_v6 }
0x1c6f   : > { %7262 = vmatprep.subr.mxu1 %v7780_v6 }
0x1c70   : > { %7255 = vmatmul.mubr.msk.f32.vlgmr.msra.gmra.mrb[40].mxu0 %vm1076_vm1, %v8266_v60 }
0x1c71   : > { %7269 = vmatprep.mubr.msk.f32.mxu0 %vm7779_vm0, %v7780_v6  ;;  %7268 = vmatpush3.msra.mxu0 %v6589_v59 }
0x1c72   : > { %7576 = vmatprep.subr.bf16.mxu0 %v7778_v3 }
0x1d33   : > { %v4291_v39 = vpop.f32.mrb[36].mxu0 }
0x1d34   : > { %v8387_v40 = vadd.f32 %v4364_v28, %v4291_v39  ;;  %v7218_v41 = vpop.f32.mrb[37].mxu0 }
0x1d3b   : > { %v4447_v43 = vpop.f32.mrb[38].mxu0 }
0x1d3c   : > { %v4448_v45 = vadd.f32 %v6569_v42, %v4447_v43  ;;  %v7234_v46 = vpop.f32.mrb[39].mxu0 }
0x1d3e   : > { %7260 = vmatmul.mubr.msk.f32.vlgmr.msra.gmra.mrb[42].mxu1 %vm1429_vm3, %v4448_v45 }
0x1d3f   : > { %7264 = vmatprep.mubr.msk.f32.mxu1 %vm7779_vm0, %v7780_v6 }
0x1d43   : > { %v4613_v48 = vpop.f32.mrb[40].mxu0 }
0x1d44   : > { %v4614_v49 = vadd.f32 %v6583_v47, %v4613_v48  ;;  %v7256_v50 = vpop.f32.mrb[41].mxu0  ;;  %v6616_v47 = vld [vmem:[%s7855_s6 + $0x38] sm:$0xff] }
0x1d46   : > { %7263 = vmatpush3.msk.msra.mxu1 %vm1523_vm4, %v4614_v49 }
0x1d47   : > { %7570 = vmatprep.subr.bf16.mxu1 %v7778_v3 }
0x1e11   : > { %v4689_v14 = vpop.f32.mrb[42].mxu1 }
0x1e12   : > { %v4693_v51 = vmul.f32 0.35355338, %v4689_v14  ;;  %v7261_v52 = vpop.f32.mrb[43].mxu1 }
0x1e14   : > { %v4694_v53 = vsel %vm1507_vm5, %v4693_v51, -inf }
0x1e15   : > { %4695 = vmax.xlane.f32.xlu0 %v4694_v53 }
0x1ea2   : > { %v4696_v54 = vpop.xlane.xlu0 %4695 }
0x1ea3   : > { %v4697_v55 = vsub.f32 %v4693_v51, %v4696_v54 }
0x1ea5   : > { %v4698_v56 = vmul.f32 1.442695, %v4697_v55  ;;  %v6619_v55 = vld [vmem:[%s7860_s12 + $0x1] ss:$0 sm:$0xff] }
0x1ea7   : > { %7714 = vpow2.f32 %v4698_v56 }
0x1eb1   : > { %v7715_v57 = vpop.eup %7714 }
0x1eb2   : > { %v4700_v58 = vsel %vm1507_vm5, %v7715_v57, 0.0 }
0x1eb3   : > { %4701 = vadd.xlane.f32.xlu1 %v4700_v58 }
0x1f40   : > { %v4702_v61 = vpop.xlane.xlu1 %4701 }
0x1f41   : > { %7716 = vrcp.f32 %v4702_v61 }
0x1f4b   : > { %v7717_v0 = vpop.eup %7716 }
0x1f4c   : > { %v4704_v2 = vmul.f32 %v7717_v0, %v7715_v57 }
0x1f4e   : > { %7265 = vmatmul.mubr.msk.f32.vlgmr.msra.gmra.mrb[44].mxu1 %vm1519_vm6, %v4704_v2  ;;  %v6625_v2 = vld [vmem:[%s8614_s22 + $0x28] sm:$0xff] }
0x1f4f   : > { %7572 = vmatpush3.bf16.msra.mxu1 %v7571_v1  ;;  %7280 = vmatprep.mubr.msk.f32.mxu1 %vm7779_vm0, %v7780_v6  ;;  %v6624_v1 = vld [vmem:[%s8614_s22 + $0x20] sm:$0xff] }
0x1f50   : > { %7573 = vmatprep.subr.bf16.mxu1 %v7778_v3 }
0x1f53   : > { %7575 = vmatpush3.bf16.msra.mxu1 %v7574_v7  ;;  %v7592_v7 = vpack.c.bf16 %v6627_v5, %v6626_v4  ;;  %v5690_v4 = vld [vmem:[%s8622_s11 + $0x18] sm:$0xff]  ;;  %v5773_v5 = vld [vmem:[%s8623_s18 + $0x10] sm:$0xff] }
0x1f54   : > { %7582 = vmatprep.subr.bf16.mxu1 %v7778_v3 }
0x1f56   : > { %7281 = vmatmul.mubr.msk.f32.vlgmr.msra.gmra.mrb[46].mxu1 %vm1076_vm1, %v8266_v60 }
0x1f57   : > { %7584 = vmatpush3.bf16.msra.mxu1 %v7583_v10  ;;  %7302 = vmatprep.mubr.msk.f32.mxu1 %vm7779_vm0, %v7780_v6 }
0x1f58   : > { %7585 = vmatprep.subr.bf16.mxu1 %v7778_v3 }
0x1f5b   : > { %7587 = vmatpush3.bf16.msra.mxu1 %v7586_v13 }
0x1f5c   : > { %7315 = vmatprep.subr.mxu1 %v7780_v6 }
0x1f5e   : > { %7303 = vmatmul.mubr.msk.f32.vlgmr.msra.gmra.mrb[48].mxu1 %vm1076_vm1, %v8266_v60 }
0x1f5f   : > { %7317 = vmatprep.mubr.msk.f32.mxu1 %vm7779_vm0, %v7780_v6  ;;  %7316 = vmatpush3.msra.mxu1 %v6616_v47 }
0x1f60   : > { %7594 = vmatprep.subr.bf16.mxu1 %v7778_v3 }
0x2021   : > { %v4777_v20 = vpop.f32.mrb[44].mxu1 }
0x2022   : > { %v7266_v44 = vpop.f32.mrb[45].mxu1  ;;  %7270 = vmatmul.mubr.msk.f32.vlgmr.msra.gmra.mrb[42].mxu0 %vm1429_vm3, %v4777_v20  ;;  %v7595_v20 = vpack.c.bf16 %v6632_v19, %v6631_v18 }
0x2023   : > { %7578 = vmatpush3.bf16.msra.mxu0 %v7577_v17  ;;  %7291 = vmatprep.mubr.msk.f32.mxu0 %vm7779_vm0, %v7780_v6  ;;  %v6633_v44 = vld [vmem:[%s8617_s28 + $0x50] sm:$0xff] }
0x2024   : > { %7579 = vmatprep.subr.bf16.mxu0 %v7778_v3 }
0x2027   : > { %7581 = vmatpush3.bf16.msra.mxu0 %v7580_v21  ;;  %v6634_v21 = vld [vmem:[%s8617_s28 + $0x58] sm:$0xff] }
0x2028   : > { %7305 = vmatprep.subr.mxu0 %v7780_v6 }
0x2029   : > { %v4936_v22 = vpop.f32.mrb[46].mxu1 }
0x202a   : > { %v7282_v23 = vpop.f32.mrb[47].mxu1  ;;  %7292 = vmatmul.mubr.msk.f32.vlgmr.msra.gmra.mrb[44].mxu0 %vm1076_vm1, %v8266_v60  ;;  %v4937_v36 = vadd.f32 %v6596_v32, %v4936_v22  ;;  %v7598_v22 = vpack.c.bf16 %v6634_v21, %v6633_v44 }
0x202b   : > { %7307 = vmatprep.mubr.msk.f32.mxu0 %vm7779_vm0, %v7780_v6  ;;  %v6635_v23 = vld [vmem:[%s8617_s28 + $0x60] sm:$0xff] }
0x2031   : > { %v5102_v24 = vpop.f32.mrb[48].mxu1 }
0x2032   : > { %v7304_v25 = vpop.f32.mrb[49].mxu1  ;;  %v5103_v60 = vadd.f32 %v6610_v35, %v5102_v24  ;;  %v6636_v24 = vld [vmem:[%s8617_s28 + $0x68] sm:$0xff] }
0x2033   : > { %v7601_v25 = vpack.c.bf16 %v6636_v24, %v6635_v23 }
0x20f5   : > { %v4852_v26 = vpop.f32.mrb[42].mxu0 }
0x20f6   : > { %v4856_v27 = vadd.f32 %v4852_v26, %v8387_v40  ;;  %v7271_v28 = vpop.f32.mrb[43].mxu0  ;;  %v6637_v26 = vld [vmem:[%s8617_s28 + $0x70] sm:$0xff] }
0x20fd   : > { %v5019_v31 = vpop.f32.mrb[44].mxu0 }
0x20fe   : > { %v5020_v33 = vadd.f32 %v6603_v29, %v5019_v31  ;;  %v7293_v34 = vpop.f32.mrb[45].mxu0  ;;  %v6629_v29 = vld [vmem:[%s8618_s1 + $0x1] ss:$0 sm:$0xff]  ;;  %s1056_s1 = scalar_lea.vmem %s8621_s10, %s7984_s0  ;;  %s8624_s10 = sld [smem:[#allocation11_spill]] }
0x2100   : > { %7306 = vmatpush3.xpose.msk.msra.mxu0 %vm1429_vm3, %v5020_v33 }
0x2101   : > { %7310 = vmatprep.subr.mxu0 %v7780_v6 }
0x2103   : > { %7308 = vmatmul.mubr.msk.f32.vlgmr.msra.gmra.mrb[46].mxu0 %vm1429_vm3, %v4937_v36 }
0x2104   : > { %7311 = vmatpush3.msk.msra.mxu0 %vm1523_vm4, %v5103_v60  ;;  %7312 = vmatprep.mubr.msk.f32.mxu0 %vm7779_vm0, %v7780_v6 }
0x2105   : > { %7588 = vmatprep.subr.bf16.mxu0 %v7778_v3 }
0x21d6   : > { %v5178_v37 = vpop.f32.mrb[46].mxu0 }
0x21d7   : > { %v5182_v38 = vmul.f32 0.35355338, %v5178_v37  ;;  %v7309_v39 = vpop.f32.mrb[47].mxu0 }
0x21d9   : > { %v5183_v40 = vsel %vm1507_vm5, %v5182_v38, -inf }
0x21da   : > { %5184 = vmax.xlane.f32.xlu0 %v5183_v40 }
0x2267   : > { %v5185_v41 = vpop.xlane.xlu0 %5184 }
0x2268   : > { %v5186_v42 = vsub.f32 %v5182_v38, %v5185_v41 }
0x226a   : > { %v5187_v43 = vmul.f32 1.442695, %v5186_v42  ;;  %v6640_v42 = vld [vmem:[%s8619_s2 + $0x1] ss:$0 sm:$0xff]  ;;  %s8626_s2 = sld [smem:[#allocation16_spill]] }
0x226c   : > { %7718 = vpow2.f32 %v5187_v43 }
0x2270   : > { %v6646_v21 = vld [vmem:[%s8626_s2] ss:$0 sm:$0xff]  ;;  %s1060_s2 = scalar_lea.vmem %s7955_s4, %s7984_s0 }
0x2276   : > { %v7719_v45 = vpop.eup %7718 }
0x2277   : > { %v5189_v46 = vsel %vm1507_vm5, %v7719_v45, 0.0 }
0x2278   : > { %5190 = vadd.xlane.f32.xlu1 %v5189_v46 }
0x2305   : > { %v5191_v48 = vpop.xlane.xlu1 %5190 }
0x2306   : > { %7720 = vrcp.f32 %v5191_v48 }
0x2310   : > { %v7721_v49 = vpop.eup %7720 }
0x2311   : > { %v5193_v50 = vmul.f32 %v7721_v49, %v7719_v45 }
0x2313   : > { %7313 = vmatmul.mubr.msk.f32.vlgmr.msra.gmra.mrb[48].mxu0 %vm1519_vm6, %v5193_v50 }
0x2314   : > { %7328 = vmatprep.mubr.msk.f32.mxu0 %vm7779_vm0, %v7780_v6 }
0x23e6   : > { %v5266_v14 = vpop.f32.mrb[48].mxu0 }
0x23e7   : > { %v7314_v51 = vpop.f32.mrb[49].mxu0  ;;  %7318 = vmatmul.mubr.msk.f32.vlgmr.msra.gmra.mrb[50].mxu1 %vm1429_vm3, %v5266_v14 }
0x23e8   : > { %7347 = vmatprep.mubr.msk.f32.mxu1 %vm7779_vm0, %v7780_v6  ;;  %7596 = vmatpush3.bf16.msra.mxu1 %v7595_v20 }
0x23e9   : > { %7597 = vmatprep.subr.bf16.mxu1 %v7778_v3 }
0x23ec   : > { %7599 = vmatpush3.bf16.msra.mxu1 %v7598_v22  ;;  %v6648_v22 = vld [vmem:[%s8627_s3] ss:$0 sm:$0xff]  ;;  %s1063_s3 = scalar_lea.vmem %s7960_s9, %s8632_s16 }
0x23ed   : > { %7600 = vmatprep.subr.bf16.mxu1 %v7778_v3 }
0x23f0   : > { %7602 = vmatpush3.bf16.msra.mxu1 %v7601_v25  ;;  %v6644_v25 = vld [vmem:[%s8628_s5] ss:$0 sm:$0xff]  ;;  %s8630_s5 = sld [smem:[#allocation20_spill]] }
0x23f1   : > { %7603 = vmatprep.subr.bf16.mxu1 %v7778_v3 }
0x24ba   : > { %v5341_v52 = vpop.f32.mrb[50].mxu1 }
0x24bb   : > { %v5345_v53 = vadd.f32 %v5341_v52, %v4856_v27  ;;  %v7319_v54 = vpop.f32.mrb[51].mxu1  ;;  %v6638_v27 = vld [vmem:[%s8617_s28 + $0x78] sm:$0xff] }
0x24bc   : > { %v7604_v28 = vpack.c.bf16 %v6638_v27, %v6637_v26  ;;  %v5604_v54 = vld [vmem:[%s8620_s7 + $0x8] sm:$0xff] }
0x24bd   : > { %v5346_v56 = vadd.f32 %v5345_v53, %v8244_v30  ;;  %v7589_v30 = vpack.c.bf16 %v6625_v2, %v6624_v1  ;;  %v5603_v53 = vld [vmem:[%s8620_s7] sm:$0xff]  ;;  %v5772_v1 = vld [vmem:[%s8623_s18 + $0x8] sm:$0xff] }
0x24be   : > { %7605 = vmatpush3.bf16.msra.mxu1 %v7604_v28 }
0x24bf   : > { %v8459_v57 = vadd.f32 %v6619_v55, %v5346_v56  ;;  %7590 = vmatpush3.bf16.msra.mxu0 %v7589_v30  ;;  %7618 = vmatprep.subr.bf16.mxu1 %v7778_v3  ;;  %v7607_v55 = vpack.c.bf16 %v5604_v54, %v5603_v53  ;;  %v5605_v56 = vld [vmem:[%s8620_s7 + $0x10] sm:$0xff] }
0x24c0   : > { %7591 = vmatprep.subr.bf16.mxu0 %v7778_v3  ;;  %v5689_v30 = vld [vmem:[%s8622_s11 + $0x10] sm:$0xff] }
0x24c1   : > { %v5360_v58 = vsel %vm1154_vm2, %v8459_v57, 0.0 }
0x24c2   : > { %5361 = vadd.xlane.f32.xlu0 %v5360_v58 }
0x24c3   : > { %7593 = vmatpush3.bf16.msra.mxu0 %v7592_v7  ;;  %v7616_v7 = vpack.c.bf16 %v5690_v4, %v5689_v30 }
0x24c4   : > { %7606 = vmatprep.subr.bf16.mxu0 %v7778_v3 }
0x254f   : > { %v5362_v59 = vpop.xlane.xlu0 %5361 }
0x2550   : > { %v5363_v61 = vmul.f32 0.03125, %v5362_v59  ;;  %v5687_v59 = vld [vmem:[%s8622_s11] sm:$0xff] }
0x2552   : > { %v5364_v62 = vsub.f32 %v8459_v57, %v5363_v61  ;;  %v5688_v61 = vld [vmem:[%s8622_s11 + $0x8] sm:$0xff] }
0x2554   : > { %v5365_v63 = vmul.f32 %v5364_v62, %v5364_v62 }
0x2556   : > { %v5366_v0 = vsel %vm1154_vm2, %v5365_v63, 0.0  ;;  %v8507_v63 = vld [vmem:[%s1056_s1] sm:$0xf]  ;;  %s8625_s1 = sld [smem:[#allocation12_spill]] }
0x2557   : > { %5367 = vadd.xlane.f32.xlu1 %v5366_v0  ;;  %v7613_v0 = vpack.c.bf16 %v5688_v61, %v5687_v59  ;;  %v6186_v59 = vld [vmem:[%s7945_s20] sm:$0xff]  ;;  %v6187_v61 = vld [vmem:[%s7945_s20 + $0x8] sm:$0xff] }
0x25e4   : > { %v5368_v8 = vpop.xlane.xlu1 %5367 }
0x25e5   : > { %v5369_v9 = vmul.f32 0.03125, %v5368_v8  ;;  %v5774_v8 = vld [vmem:[%s8623_s18 + $0x18] sm:$0xff] }
0x25e7   : > { %v5370_v10 = vadd.f32 1e-06, %v5369_v9  ;;  %v7622_v9 = vpack.c.bf16 %v5774_v8, %v5773_v5  ;;  %v6660_v8 = vld [vmem:[%s7950_s27] ss:$0 sm:$0xff] }
0x25e9   : > { %7722 = vrsqrt.f32 %v5370_v10 }
0x25f3   : > { %v7723_v11 = vpop.eup %7722 }
0x25f4   : > { %v5372_v13 = vmul.f32 %v7723_v11, %v5364_v62  ;;  %v5771_v62 = vld [vmem:[%s8623_s18] sm:$0xff] }
0x25f5   : > { %v7619_v2 = vpack.c.bf16 %v5772_v1, %v5771_v62  ;;  %v7631_v62 = vpack.c.bf16 %v6187_v61, %v6186_v59  ;;  %v6188_v1 = vld [vmem:[%s7945_s20 + $0x10] sm:$0xff] }
0x25f6   : > { %v5379_v16 = vmul.f32 %v6622_v12, %v5372_v13 }
0x25f8   : > { %v5386_v17 = vadd.f32 %v6623_v15, %v5379_v16  ;;  %v6642_v15 = vld [vmem:[%s8624_s10] ss:$0 sm:$0xff]  ;;  %s8629_s10 = sld [smem:[#allocation19_spill]] }
0x25fa   : > { %7329 = vmatmul.mubr.msk.f32.vlgmr.msra.gmra.mrb[50].mxu0 %vm1076_vm1, %v5386_v17  ;;  %v6643_v17 = vld [vmem:[%s8625_s1] ss:$0 sm:$0xff] }
0x25fb   : > { %7358 = vmatprep.mubr.msk.f32.mxu0 %vm7779_vm0, %v7780_v6  ;;  %7608 = vmatpush3.bf16.msra.mxu0 %v7607_v55 }
0x25fc   : > { %7609 = vmatprep.subr.bf16.mxu0 %v7778_v3 }
0x26cd   : > { %v5469_v31 = vpop.f32.mrb[50].mxu0 }
0x26ce   : > { %v5470_v32 = vadd.f32 %v6629_v29, %v5469_v31  ;;  %v7330_v33 = vpop.f32.mrb[51].mxu0 }
0x26d0   : > { %v5473_v34 = vmul.f32 %v5470_v32, %v5470_v32 }
0x26d2   : > { %v5474_v35 = vmul.f32 %v5473_v34, %v5470_v32 }
0x26d4   : > { %v5475_v36 = vmul.f32 0.044715, %v5474_v35 }
0x26d6   : > { %v5476_v60 = vadd.f32 %v5475_v36, %v5470_v32 }
0x26d8   : > { %v5477_v37 = vmul.f32 0.7978846, %v5476_v60 }
0x26da   : > { %7724 = vtanh.f32 %v5477_v37 }
0x26e4   : > { %v7725_v38 = vpop.eup %7724 }
0x26e5   : > { %v5479_v39 = vadd.f32 1.0, %v7725_v38 }
0x26e7   : > { %v5480_v40 = vmul.f32 0.5, %v5479_v39 }
0x26e9   : > { %v5481_v41 = vmul.f32 %v5480_v40, %v5470_v32  ;;  %v6016_v40 = vld [vmem:[%s8629_s10] sm:$0xff] }
0x26eb   : > { %7348 = vmatmul.mubr.msk.f32.vlgmr.msra.gmra.mrb[52].mxu1 %vm3283_vm7, %v5481_v41  ;;  %v6017_v41 = vld [vmem:[%s8629_s10 + $0x8] sm:$0xff] }
0x26ec   : > { %7380 = vmatprep.mubr.msk.f32.mxu1 %vm7779_vm0, %v7780_v6  ;;  %7620 = vmatpush3.bf16.msra.mxu1 %v7619_v2  ;;  %v6189_v2 = vld [vmem:[%s7945_s20 + $0x18] sm:$0xff] }
0x26ed   : > { %7621 = vmatprep.subr.bf16.mxu1 %v7778_v3  ;;  %v7634_v30 = vpack.c.bf16 %v6189_v2, %v6188_v1 }
0x26f0   : > { %7623 = vmatpush3.bf16.msra.mxu1 %v7622_v9 }
0x26f1   : > { %7388 = vmatprep.subr.mxu1 %v7780_v6 }
0x27be   : > { %v5568_v43 = vpop.f32.mrb[52].mxu1 }
0x27bf   : > { %v5569_v45 = vadd.f32 %v6640_v42, %v5568_v43  ;;  %v7349_v46 = vpop.f32.mrb[53].mxu1  ;;  %v6018_v42 = vld [vmem:[%s8629_s10 + $0x10] sm:$0xff]  ;;  %v7625_v43 = vpack.c.bf16 %v6017_v41, %v6016_v40 }
0x27c1   : > { %v5572_v47 = vadd.f32 %v5569_v45, %v8459_v57  ;;  %v5606_v57 = vld [vmem:[%s8620_s7 + $0x18] sm:$0xff] }
0x27c2   : > { %v7610_v58 = vpack.c.bf16 %v5606_v57, %v5605_v56  ;;  %v6019_v45 = vld [vmem:[%s8629_s10 + $0x18] sm:$0xff] }
0x27c3   : > { %v5575_v48 = vsel %vm1154_vm2, %v5572_v47, 0.0  ;;  %v7628_v46 = vpack.c.bf16 %v6019_v45, %v6018_v42 }
0x27c4   : > { %5576 = vadd.xlane.f32.xlu0 %v5575_v48  ;;  %7611 = vmatpush3.bf16.msra.mxu0 %v7610_v58 }
0x27c5   : > { %7612 = vmatprep.subr.bf16.mxu0 %v7778_v3 }
0x27c7   : > { %7359 = vmatmul.mubr.msk.f32.vlgmr.msra.gmra.mrb[52].mxu0 %vm1076_vm1, %v8507_v63 }
0x27c8   : > { %7614 = vmatpush3.bf16.msra.mxu0 %v7613_v0  ;;  %7369 = vmatprep.mubr.msk.f32.mxu0 %vm7779_vm0, %v7780_v6 }
0x27c9   : > { %7615 = vmatprep.subr.bf16.mxu0 %v7778_v3 }
0x27cc   : > { %7617 = vmatpush3.bf16.msra.mxu0 %v7616_v7 }
0x27cd   : > { %7383 = vmatprep.subr.mxu0 %v7780_v6 }
0x2851   : > { %v5577_v49 = vpop.xlane.xlu0 %5576 }
0x2852   : > { %v5578_v50 = vmul.f32 0.03125, %v5577_v49 }
0x2854   : > { %v5579_v14 = vsub.f32 %v5572_v47, %v5578_v50 }
0x2856   : > { %v5580_v51 = vmul.f32 %v5579_v14, %v5579_v14 }
0x2858   : > { %v5581_v52 = vsel %vm1154_vm2, %v5580_v51, 0.0 }
0x2859   : > { %5582 = vadd.xlane.f32.xlu1 %v5581_v52  ;;  %v6655_v52 = vld [vmem:[%s8630_s5] ss:$0 sm:$0xff] }
0x289a   : > { %v5683_v20 = vpop.f32.mrb[52].mxu0 }
0x289b   : > { %v7360_v44 = vpop.f32.mrb[53].mxu0  ;;  %v5684_v31 = vadd.f32 %v6644_v25, %v5683_v20 }
0x28e6   : > { %v5583_v10 = vpop.xlane.xlu1 %5582 }
0x28e7   : > { %v5584_v11 = vmul.f32 0.03125, %v5583_v10 }
0x28e9   : > { %v5585_v12 = vadd.f32 1e-06, %v5584_v11 }
0x28eb   : > { %7726 = vrsqrt.f32 %v5585_v12 }
0x28f5   : > { %v7727_v13 = vpop.eup %7726 }
0x28f6   : > { %v5587_v16 = vmul.f32 %v7727_v13, %v5579_v14 }
0x28f8   : > { %v5594_v18 = vmul.f32 %v6642_v15, %v5587_v16 }
0x28fa   : > { %v8524_v19 = vadd.f32 %v6643_v17, %v5594_v18 }
0x28fc   : > { %7370 = vmatmul.mubr.msk.f32.vlgmr.msra.gmra.mrb[54].mxu0 %vm1076_vm1, %v8524_v19  ;;  %7381 = vmatmul.mubr.msk.f32.vlgmr.msra.gmra.mrb[54].mxu1 %vm1076_vm1, %v8524_v19 }
0x28fd   : > { %7385 = vmatprep.mubr.msk.f32.mxu0 %vm7779_vm0, %v7780_v6  ;;  %7390 = vmatprep.mubr.msk.f32.mxu1 %vm7779_vm0, %v7780_v6 }
0x29cf   : > { %v5767_v23 = vpop.f32.mrb[54].mxu0  ;;  %v5848_v24 = vpop.f32.mrb[54].mxu1 }
0x29d0   : > { %v5768_v26 = vadd.f32 %v6646_v21, %v5767_v23  ;;  %v5849_v27 = vadd.f32 %v6648_v22, %v5848_v24  ;;  %v7371_v28 = vpop.f32.mrb[55].mxu0  ;;  %v7382_v29 = vpop.f32.mrb[55].mxu1 }
0x29d2   : > { %7384 = vmatpush3.xpose.msk.msra.mxu0 %vm1076_vm1, %v5768_v26  ;;  %7389 = vmatpush3.msk.msra.mxu1 %vm1523_vm4, %v5849_v27 }
0x29d3   : > { %7624 = vmatprep.subr.bf16.mxu0 %v7778_v3  ;;  %7404 = vmatprep.subr.mxu1 %v7780_v6 }
0x29d5   : > { %7386 = vmatmul.mubr.msk.f32.vlgmr.msra.gmra.mrb[56].mxu0 %vm1076_vm1, %v5684_v31 }
0x29d6   : > { %7401 = vmatprep.mubr.msk.f32.mxu0 %vm7779_vm0, %v7780_v6  ;;  %7626 = vmatpush3.bf16.msra.mxu0 %v7625_v43 }
0x29d7   : > { %7627 = vmatprep.subr.bf16.mxu0 %v7778_v3 }
0x29da   : > { %7629 = vmatpush3.bf16.msra.mxu0 %v7628_v46 }
0x2aa8   : > { %v5924_v32 = vpop.f32.mrb[56].mxu0 }
0x2aa9   : > { %v5928_v33 = vmul.f32 0.17677669, %v5924_v32  ;;  %v7387_v34 = vpop.f32.mrb[57].mxu0 }
0x2aab   : > { %v5929_v35 = vsel %vm1507_vm5, %v5928_v33, -inf }
0x2aac   : > { %5930 = vmax.xlane.f32.xlu0 %v5929_v35 }
0x2b39   : > { %v5931_v36 = vpop.xlane.xlu0 %5930 }
0x2b3a   : > { %v5932_v60 = vsub.f32 %v5928_v33, %v5931_v36 }
0x2b3c   : > { %v5933_v37 = vmul.f32 1.442695, %v5932_v60 }
0x2b3e   : > { %7728 = vpow2.f32 %v5933_v37 }
0x2b48   : > { %v7729_v38 = vpop.eup %7728 }
0x2b49   : > { %v5935_v39 = vsel %vm1507_vm5, %v7729_v38, 0.0 }
0x2b4a   : > { %5936 = vadd.xlane.f32.xlu1 %v5935_v39 }
0x2bd7   : > { %v5937_v47 = vpop.xlane.xlu1 %5936 }
0x2bd8   : > { %7730 = vrcp.f32 %v5937_v47 }
0x2be2   : > { %v7731_v48 = vpop.eup %7730 }
0x2be3   : > { %v5939_v49 = vmul.f32 %v7731_v48, %v7729_v38 }
0x2be5   : > { %7391 = vmatmul.mubr.msk.f32.vlgmr.msra.gmra.mrb[56].mxu1 %vm1519_vm6, %v5939_v49 }
0x2be6   : > { %7406 = vmatprep.mubr.msk.f32.mxu1 %vm7779_vm0, %v7780_v6 }
0x2cb8   : > { %v6012_v50 = vpop.f32.mrb[56].mxu1 }
0x2cb9   : > { %v7392_v14 = vpop.f32.mrb[57].mxu1  ;;  %7402 = vmatmul.mubr.msk.f32.vlgmr.msra.gmra.mrb[58].mxu0 %vm1076_vm1, %v6012_v50 }
0x2d8c   : > { %v6089_v51 = vpop.f32.mrb[58].mxu0 }
0x2d8d   : > { %v6093_v53 = vadd.f32 %v6089_v51, %v8507_v63  ;;  %v7403_v54 = vpop.f32.mrb[59].mxu0  ;;  %v7781_v63 = vmov 0.25  }
0x2d8f   : > { %v6101_v55 = vadd.f32 %v6655_v52, %v6093_v53 }
0x2d91   : > { %v6656_v56 = vmul.f32 -1.442695, %v6101_v55 }
0x2d93   : > { %7732 = vpow2.f32 %v6656_v56 }
0x2d9d   : > { %v7733_v57 = vpop.eup %7732 }
0x2d9e   : > { %v6105_v58 = vadd.f32 1.0, %v7733_v57 }
0x2da0   : > { %7734 = vrcp.f32 %v6105_v58 }
0x2daa   : > { %v7735_v0 = vpop.eup %7734 }
0x2dab   : > { %7405 = vmatpush3.msk.msra.mxu1 %vm1523_vm4, %v7735_v0 }
0x2dac   : > { %7630 = vmatprep.subr.bf16.mxu1 %v7778_v3  ;;  %7407 = vmatmul.mubr.msk.f32.vlgmr.msra.gmra.mrb[58].mxu1 %vm1519_vm6, %v7781_v63 }
0x2dad   : > { %7632 = vmatpush3.bf16.msra.mxu1 %v7631_v62  ;;  %7417 = vmatprep.mubr.msk.f32.mxu1 %vm7779_vm0, %v7780_v6 }
0x2dae   : > { %7633 = vmatprep.subr.bf16.mxu1 %v7778_v3 }
0x2db1   : > { %7635 = vmatpush3.bf16.msra.mxu1 %v7634_v30 }
0x2db4   : > { %7418 = vmatmul.mubr.msk.f32.vlgmr.msra.gmra.mrb[60].mxu1 %vm1076_vm1, %v8524_v19 }
0x2e7f   : > { %v6180_v4 = vpop.f32.mrb[58].mxu1 }
0x2e80   : > { %6185 = vst.msk [vmem:[%s1063_s3] sm:$0x1] %vm6184_vm8, %v6180_v4  ;;  %v7408_v5 = vpop.f32.mrb[59].mxu1 }
0x2e87   : > { %v6256_v7 = vpop.f32.mrb[60].mxu1 }
0x2e88   : > { %v6260_v9 = vadd.f32 %v6256_v7, %v8524_v19  ;;  %v7419_v10 = vpop.f32.mrb[61].mxu1 }
0x2e8a   : > { %v6268_v11 = vadd.f32 %v6660_v8, %v6260_v9 }
0x2e8c   : > { %v6269_v12 = vmax.f32 %v6268_v11, 0.0 }
0x2e8e   : > { %6270 = vst.msk [vmem:[%s1060_s2] sm:$0xf] %vm1154_vm2, %v6269_v12 }
0x2e8f PF: > { %s80_s15 = sadd.s32 1, %s7742_s15  }
0x2e90   : > { %p77_p4 = scmp.ge.s32.totalorder %s80_s15, 4  }
0x2e92   :  { %79 = sbr.rel (!%p77_p4) target bundleno = 63 (0x3f), region = 289 }

// kernel: _lambda_.23
= control target key start
LH: loop header
LB: loop body
LE: loop exit
PB: predicated region body
PF: predicated region fallthrough
CT: control target
= control target key end

     0   :  { %s830_s12 = smov 0   ;;  %s1163_s0 = inlined_call_operand.vmem [shape: f32[2,1,18,180], index: 0, kind: input, shape index: {}]   ;;  %s1164_s1 = inlined_call_operand.vmem [shape: f32[3,180,64], index: 1, kind: input, shape index: {}]   ;;  %s1165_s2 = inlined_call_operand.vmem [shape: f32[1,64], index: 2, kind: input, shape index: {}]   ;;  %s1166_s3 = inlined_call_operand.vmem [shape: f32[2,16,64], index: 3, kind: output, shape index: {}]  }
   0x1 LB: > { %s599_s13 = sadd.s32 4294967295, %s806_s12   ;;  %p603_p0 = scmp.ge.s32.totalorder %s806_s12, 1  ;;  %s806_s12 = sphi %s830_s12, %s13_s12  }
   0x2   : > { %p137_p1 = scmp.lt.s32.totalorder %s806_s12, 3 }
   0x4   : > { %p138_p2 = pnand %p603_p0, %p137_p1 }
   0x5   : > { %v607_v0 = vld [vmem:[%s1164_s1 + $0xb8] sm:$0xff] (!%p138_p2)  ;;  %v608_v1 = vld [vmem:[%s1164_s1 + $0xc0] sm:$0xff] (!%p138_p2)  ;;  %v808_v3 = vmov (!%p138_p2), 0.0|0.0   ;;  %v178_v5 = vld [vmem:[%s1164_s1 + $0x8] sm:$0xff] (!%p138_p2)  ;;  %p161_p3 = scmp.lt.s32.totalorder (!%p138_p2), %s599_s13, 1  ;;  %vm243_vm0 = vcmask (!%p138_p2), 424960  }
   0x6   : > { %141 = sbr.rel (%p138_p2) target bundleno = 320 (0x140), region = 32  ;;  %v177_v2 = vld [vmem:[%s1164_s1] sm:$0xff] (!%p138_p2)  ;;  %666 = vmatprep.subr.bf16.mxu0 (!%p138_p2), %v808_v3  ;;  %699 = vmatprep.subr.bf16.mxu1 (!%p138_p2), %v808_v3  ;;  %v667_v4 = vpack.c.bf16 (!%p138_p2), %v608_v1, %v607_v0  ;;  %v609_v6 = vld [vmem:[%s1164_s1 + $0xc8] sm:$0xff] (!%p138_p2)  ;;  %v610_v7 = vld [vmem:[%s1164_s1 + $0xd0] sm:$0xff] (!%p138_p2)  ;;  %vm230_vm1 = vcmask (!%p138_p2), 1046528   ;;  %vm248_vm2 = vcmask (!%p138_p2), 1043456  }
   0x7   : > { %v700_v8 = vpack.c.bf16 (!%p138_p2), %v178_v5, %v177_v2  ;;  %v179_v9 = vld [vmem:[%s1164_s1 + $0x10] sm:$0xff] (!%p138_p2)  ;;  %v180_v10 = vld [vmem:[%s1164_s1 + $0x18] sm:$0xff] (!%p138_p2)  ;;  %v670_v11 = vpack.c.bf16 (!%p138_p2), %v610_v7, %v609_v6  ;;  %v612_v14 = vld [vmem:[%s1164_s1 + $0xe0] sm:$0xff] (!%p138_p2)  ;;  %vm433_vm3 = vcmask (!%p138_p2), 1045504   ;;  %vm541_vm4 = vcmask (!%p138_p2), 523264  }
   0x8   : > { %668 = vmatpush1.bf16.msra.mxu0 (!%p138_p2), %v667_v4  ;;  %v703_v12 = vpack.c.bf16 (!%p138_p2), %v180_v10, %v179_v9  ;;  %v611_v13 = vld [vmem:[%s1164_s1 + $0xd8] sm:$0xff] (!%p138_p2)  ;;  %v181_v15 = vld [vmem:[%s1164_s1 + $0x20] sm:$0xff] (!%p138_p2)  ;;  %v182_v16 = vld [vmem:[%s1164_s1 + $0x28] sm:$0xff] (!%p138_p2) }
   0x9   : > { %701 = vmatpush1.bf16.msra.mxu1 (!%p138_p2), %v700_v8  ;;  %669 = vmatprep.subr.bf16.mxu0 (!%p138_p2), %v808_v3  ;;  %v673_v17 = vpack.c.bf16 (!%p138_p2), %v612_v14, %v611_v13  ;;  %v706_v18 = vpack.c.bf16 (!%p138_p2), %v182_v16, %v181_v15  ;;  %v613_v19 = vld [vmem:[%s1164_s1 + $0xe8] sm:$0xff] (!%p138_p2)  ;;  %v614_v20 = vld [vmem:[%s1164_s1 + $0xf0] sm:$0xff] (!%p138_p2)  ;;  %v184_v22 = vld [vmem:[%s1164_s1 + $0x38] sm:$0xff] (!%p138_p2) }
   0xa   : > { %702 = vmatprep.subr.bf16.mxu1 (!%p138_p2), %v808_v3  ;;  %v183_v21 = vld [vmem:[%s1164_s1 + $0x30] sm:$0xff] (!%p138_p2)  ;;  %v676_v23 = vpack.c.bf16 (!%p138_p2), %v614_v20, %v613_v19  ;;  %v615_v25 = vld [vmem:[%s1164_s1 + $0xf8] sm:$0xff] (!%p138_p2)  ;;  %v616_v26 = vld [vmem:[%s1164_s1 + $0x100] sm:$0xff] (!%p138_p2) }
   0xb   : > { %v709_v24 = vpack.c.bf16 (!%p138_p2), %v184_v22, %v183_v21  ;;  %v185_v27 = vld [vmem:[%s1164_s1 + $0x40] sm:$0xff] (!%p138_p2)  ;;  %v186_v28 = vld [vmem:[%s1164_s1 + $0x48] sm:$0xff] (!%p138_p2)  ;;  %v679_v29 = vpack.c.bf16 (!%p138_p2), %v616_v26, %v615_v25  ;;  %v618_v34 = vld [vmem:[%s1164_s1 + $0x110] sm:$0xff] (!%p138_p2) }
   0xc   : > { %671 = vmatpush1.bf16.msra.mxu0 (!%p138_p2), %v670_v11  ;;  %v712_v32 = vpack.c.bf16 (!%p138_p2), %v186_v28, %v185_v27  ;;  %v617_v33 = vld [vmem:[%s1164_s1 + $0x108] sm:$0xff] (!%p138_p2)  ;;  %v187_v37 = vld [vmem:[%s1164_s1 + $0x50] sm:$0xff] (!%p138_p2)  ;;  %v188_v38 = vld [vmem:[%s1164_s1 + $0x58] sm:$0xff] (!%p138_p2) }
   0xd   : > { %s1168_s13 = smov (!%p161_p3, %s599_s13), 1  ;;  %704 = vmatpush1.bf16.msra.mxu1 %v703_v12  ;;  %672 = vmatprep.subr.bf16.mxu0 %v808_v3  ;;  %v682_v40 = vpack.c.bf16 %v618_v34, %v617_v33  ;;  %v715_v41 = vpack.c.bf16 %v188_v38, %v187_v37  ;;  %v619_v42 = vld [vmem:[%s1164_s1 + $0x118] sm:$0xff]  ;;  %v620_v43 = vld [vmem:[%s1164_s1 + $0x120] sm:$0xff]  ;;  %v190_v45 = vld [vmem:[%s1164_s1 + $0x68] sm:$0xff] }
   0xe   : > { %s789_s17 = smul.u32 48, %s1168_s13  ;;  %705 = vmatprep.subr.bf16.mxu1 %v808_v3  ;;  %v189_v44 = vld [vmem:[%s1164_s1 + $0x60] sm:$0xff]  ;;  %v685_v46 = vpack.c.bf16 %v620_v43, %v619_v42  ;;  %v621_v48 = vld [vmem:[%s1164_s1 + $0x128] sm:$0xff]  ;;  %v622_v49 = vld [vmem:[%s1164_s1 + $0x130] sm:$0xff]  ;;  %s665_s8 = sshll.u32 %s1168_s13, 4 }
   0xf   : > { %v718_v47 = vpack.c.bf16 %v190_v45, %v189_v44  ;;  %v191_v50 = vld [vmem:[%s1164_s1 + $0x70] sm:$0xff]  ;;  %v192_v51 = vld [vmem:[%s1164_s1 + $0x78] sm:$0xff]  ;;  %v688_v52 = vpack.c.bf16 %v622_v49, %v621_v48  ;;  %v624_v55 = vld [vmem:[%s1164_s1 + $0x140] sm:$0xff]  ;;  %s170_s11 = scalar_lea.vmem %s1166_s3, %s665_s8 }
  0x10   : > { %674 = vmatpush1.bf16.msra.mxu0 %v673_v17  ;;  %s905_s28 = scalar_lea.vmem %s1163_s0, %s789_s17  ;;  %v721_v53 = vpack.c.bf16 %v192_v51, %v191_v50  ;;  %v623_v54 = vld [vmem:[%s1164_s1 + $0x138] sm:$0xff]  ;;  %v193_v56 = vld [vmem:[%s1164_s1 + $0x80] sm:$0xff]  ;;  %v194_v57 = vld [vmem:[%s1164_s1 + $0x88] sm:$0xff]  ;;  %v809_v17 = vmov 0.0  }
  0x11   : > { %707 = vmatpush1.bf16.msra.mxu1 %v706_v18  ;;  %675 = vmatprep.subr.bf16.mxu0 %v808_v3  ;;  %v915_v30 = vld [vmem:[%s905_s28 + $0x8] sm:$0xff]  ;;  %v918_v31 = vld [vmem:[%s905_s28 + $0x18] sm:$0xff]  ;;  %v691_v58 = vpack.c.bf16 %v624_v55, %v623_v54  ;;  %v724_v59 = vpack.c.bf16 %v194_v57, %v193_v56  ;;  %v626_v61 = vld [vmem:[%s1164_s1 + $0x150] sm:$0xff] }
  0x12   : > { %708 = vmatprep.subr.bf16.mxu1 %v808_v3  ;;  %v234_v35 = vrot.slane %v915_v30, 1  ;;  %v235_v36 = vrot.slane %v918_v31, 1  ;;  %634 = vmatprep.mubr.msk.f32.mxu1 %vm243_vm0, %v915_v30  ;;  %v625_v60 = vld [vmem:[%s1164_s1 + $0x148] sm:$0xff]  ;;  %v195_v62 = vld [vmem:[%s1164_s1 + $0x90] sm:$0xff]  ;;  %v196_v63 = vld [vmem:[%s1164_s1 + $0x98] sm:$0xff]  ;;  %v437_v27 = vrot.slane %v915_v30, 2 }
  0x13   : > { %v694_v0 = vpack.c.bf16 %v626_v61, %v625_v60  ;;  %v727_v1 = vpack.c.bf16 %v196_v63, %v195_v62  ;;  %v627_v2 = vld [vmem:[%s1164_s1 + $0x158] sm:$0xff]  ;;  %v628_v4 = vld [vmem:[%s1164_s1 + $0x160] sm:$0xff]  ;;  %v198_v6 = vld [vmem:[%s1164_s1 + $0xa8] sm:$0xff]  ;;  %v438_v28 = vrot.slane %v918_v31, 2 }
  0x14   : > { %677 = vmatpush1.bf16.msra.mxu0 %v676_v23  ;;  %v236_v39 = vsel %vm230_vm1, %v234_v35, %v235_v36  ;;  %v197_v5 = vld [vmem:[%s1164_s1 + $0xa0] sm:$0xff]  ;;  %v1016_v8 = vld [vmem:[%s905_s28 + $0x10] sm:$0xff]  ;;  %v697_v9 = vpack.c.bf16 %v628_v4, %v627_v2  ;;  %v176_v13 = vld [vmem:[%s905_s28 + $0x28] sm:$0x3] }
  0x15   : > { %710 = vmatpush1.bf16.msra.mxu1 %v709_v24  ;;  %678 = vmatprep.subr.bf16.mxu0 %v808_v3  ;;  %v1013_v7 = vld [vmem:[%s905_s28] sm:$0xff]  ;;  %v730_v10 = vpack.c.bf16 %v198_v6, %v197_v5  ;;  %v232_v12 = vrot.slane %v1016_v8, 1  ;;  %v636_v14 = vld [vmem:[%s1164_s1 + $0x170] sm:$0xff]  ;;  %v637_v15 = vld [vmem:[%s1164_s1 + $0x178] sm:$0xff]  ;;  %v239_v21 = vrot.slane %v176_v13, 1  ;;  %v442_v33 = vrot.slane %v176_v13, 2 }
  0x16   : > { %711 = vmatprep.subr.bf16.mxu1 %v808_v3  ;;  %631 = vmatprep.mubr.msk.f32.mxu0 %vm243_vm0, %v236_v39  ;;  %v231_v11 = vrot.slane %v1013_v7, 1  ;;  %v1030_v16 = vld [vmem:[%s905_s28 + $0x20] sm:$0x3]  ;;  %v629_v18 = vld [vmem:[%s1164_s1 + $0x168] sm:$0xf]  ;;  %v733_v22 = vpack.c.bf16 %v637_v15, %v636_v14  ;;  %v640_v34 = vld [vmem:[%s1164_s1 + $0x190] sm:$0xff]  ;;  %v439_v35 = vsel %vm433_vm3, %v437_v27, %v438_v28 }
  0x17   : > { %v199_v19 = vld [vmem:[%s1164_s1 + $0xb0] sm:$0xf]  ;;  %v237_v23 = vrot.slane %v1030_v16, 1  ;;  %v638_v24 = vld [vmem:[%s1164_s1 + $0x180] sm:$0xff]  ;;  %v639_v25 = vld [vmem:[%s1164_s1 + $0x188] sm:$0xff]  ;;  %v240_v26 = vsel %vm230_vm1, %v235_v36, %v239_v21  ;;  %v443_v37 = vsel %vm433_vm3, %v438_v28, %v442_v33  ;;  %v434_v61 = vrot.slane %v1013_v7, 2 }
  0x18   : > { %680 = vmatpush1.bf16.msra.mxu0 %v679_v29  ;;  %v233_v20 = vsel %vm230_vm1, %v231_v11, %v232_v12  ;;  %v736_v29 = vpack.c.bf16 %v639_v25, %v638_v24  ;;  %v641_v30 = vld [vmem:[%s1164_s1 + $0x198] sm:$0xff]  ;;  %v642_v38 = vld [vmem:[%s1164_s1 + $0x1a0] sm:$0xff]  ;;  %v647_v44 = vld [vmem:[%s1164_s1 + $0x1c8] sm:$0xff]  ;;  %v435_v62 = vrot.slane %v1016_v8, 2  ;;  %v440_v63 = vrot.slane %v1030_v16, 2 }
  0x19   : > { %713 = vmatpush1.bf16.msra.mxu1 %v712_v32  ;;  %681 = vmatprep.subr.bf16.mxu0 %v808_v3  ;;  %v238_v32 = vsel %vm230_vm1, %v232_v12, %v237_v23  ;;  %v739_v36 = vpack.c.bf16 %v641_v30, %v640_v34  ;;  %v646_v43 = vld [vmem:[%s1164_s1 + $0x1c0] sm:$0xff]  ;;  %v651_v50 = vld [vmem:[%s1164_s1 + $0x1e8] sm:$0xff] }
  0x1a   : > { %714 = vmatprep.subr.bf16.mxu1 %v808_v3  ;;  %v748_v45 = vpack.c.bf16 %v647_v44, %v646_v43  ;;  %v650_v49 = vld [vmem:[%s1164_s1 + $0x1e0] sm:$0xff]  ;;  %v655_v56 = vld [vmem:[%s1164_s1 + $0x208] sm:$0xff] }
  0x1b   : > { %v754_v51 = vpack.c.bf16 %v651_v50, %v650_v49  ;;  %v654_v55 = vld [vmem:[%s1164_s1 + $0x200] sm:$0xff] }
  0x1c   : > { %683 = vmatpush1.bf16.msra.mxu0 %v682_v40  ;;  %v644_v40 = vld [vmem:[%s1164_s1 + $0x1b0] sm:$0xff]  ;;  %v760_v57 = vpack.c.bf16 %v655_v56, %v654_v55  ;;  %v662_v14 = vld [vmem:[%s1165_s2] ss:$0 sm:$0xff] }
  0x1d   : > { %716 = vmatpush1.bf16.msra.mxu1 %v715_v41  ;;  %684 = vmatprep.subr.bf16.mxu0 %v808_v3  ;;  %v645_v41 = vld [vmem:[%s1164_s1 + $0x1b8] sm:$0xff] }
  0x1e   : > { %717 = vmatprep.subr.bf16.mxu1 %v808_v3  ;;  %v745_v42 = vpack.c.bf16 %v645_v41, %v644_v40 }
  0x20   : > { %686 = vmatpush1.bf16.msra.mxu0 %v685_v46  ;;  %v648_v46 = vld [vmem:[%s1164_s1 + $0x1d0] sm:$0xff] }
  0x21   : > { %719 = vmatpush1.bf16.msra.mxu1 %v718_v47  ;;  %687 = vmatprep.subr.bf16.mxu0 %v808_v3  ;;  %v649_v47 = vld [vmem:[%s1164_s1 + $0x1d8] sm:$0xff] }
  0x22   : > { %720 = vmatprep.subr.bf16.mxu1 %v808_v3  ;;  %v751_v48 = vpack.c.bf16 %v649_v47, %v648_v46 }
  0x24   : > { %689 = vmatpush1.bf16.msra.mxu0 %v688_v52  ;;  %v652_v52 = vld [vmem:[%s1164_s1 + $0x1f0] sm:$0xff] }
  0x25   : > { %722 = vmatpush1.bf16.msra.mxu1 %v721_v53  ;;  %690 = vmatprep.subr.bf16.mxu0 %v808_v3  ;;  %v653_v53 = vld [vmem:[%s1164_s1 + $0x1f8] sm:$0xff] }
  0x26   : > { %723 = vmatprep.subr.bf16.mxu1 %v808_v3  ;;  %v757_v54 = vpack.c.bf16 %v653_v53, %v652_v52 }
  0x28   : > { %692 = vmatpush1.bf16.msra.mxu0 %v691_v58  ;;  %v656_v58 = vld [vmem:[%s1164_s1 + $0x210] sm:$0xff] }
  0x29   : > { %725 = vmatpush1.bf16.msra.mxu1 %v724_v59  ;;  %693 = vmatprep.subr.bf16.mxu0 %v808_v3  ;;  %v657_v59 = vld [vmem:[%s1164_s1 + $0x218] sm:$0xff] }
  0x2a   : > { %726 = vmatprep.subr.bf16.mxu1 %v808_v3  ;;  %v763_v60 = vpack.c.bf16 %v657_v59, %v656_v58 }
  0x2c   : > { %695 = vmatpush1.bf16.msra.mxu0 %v694_v0  ;;  %v658_v0 = vld [vmem:[%s1164_s1 + $0x220] sm:$0xf] }
  0x2d   : > { %728 = vmatpush1.bf16.msra.mxu1 %v727_v1  ;;  %696 = vmatprep.subr.bf16.mxu0 %v808_v3  ;;  %v436_v1 = vsel %vm433_vm3, %v434_v61, %v435_v62 }
  0x2e   : > { %729 = vmatprep.subr.bf16.mxu1 %v808_v3 }
  0x30   : > { %698 = vmatpush1.bf16.msra.mxu0 %v697_v9 }
  0x31   : > { %731 = vmatpush1.bf16.msra.mxu1 %v730_v10  ;;  %296 = vmatprep.subr.mxu0 %v809_v17 }
  0x32   : > { %378 = vmatprep.subr.mxu1 %v809_v17 }
  0x34   : > { %630 = vmatpush1.msk.msra.mxu0 %vm248_vm2, %v629_v18 }
  0x35   : > { %633 = vmatpush1.msk.msra.mxu1 %vm248_vm2, %v199_v19  ;;  %317 = vmatmul.mubr.f32.vlgmr.msra.gmra.mrb[0].mxu0 %v233_v20 }
  0x36   : > { %399 = vmatmul.mubr.f32.vlgmr.msra.gmra.mrb[0].mxu1 %v1013_v7  ;;  %732 = vmatprep.subr.bf16.mxu0 %v808_v3 }
  0x37   : > { %765 = vmatprep.subr.bf16.mxu1 %v808_v3  ;;  %734 = vmatpush1.bf16.msra.mxu0 %v733_v22 }
  0x38   : > { %777 = vmatpush1.bf16.msra.mxu1 %v733_v22  ;;  %735 = vmatprep.subr.bf16.mxu0 %v808_v3 }
  0x39   : > { %766 = vmatprep.subr.bf16.mxu1 %v808_v3  ;;  %632 = vmatprep.mubr.msk.f32.mxu0 %vm243_vm0, %v240_v26 }
  0x3a   : > { %635 = vmatprep.mubr.msk.f32.mxu1 %vm243_vm0, %v918_v31  ;;  %322 = vmatmul.mubr.f32.gmra.mrb[2].mxu0 %v238_v32  ;;  %v643_v31 = vld [vmem:[%s1164_s1 + $0x1a8] sm:$0xff] }
  0x3b   : > { %737 = vmatpush1.bf16.msra.mxu0 %v736_v29  ;;  %404 = vmatmul.mubr.f32.gmra.mrb[2].mxu1 %v1016_v8  ;;  %v742_v39 = vpack.c.bf16 %v643_v31, %v642_v38 }
  0x3c   : > { %778 = vmatpush1.bf16.msra.mxu1 %v736_v29  ;;  %738 = vmatprep.subr.bf16.mxu0 %v808_v3 }
  0x3d   : > { %767 = vmatprep.subr.bf16.mxu1 %v808_v3  ;;  %660 = vmatprep.mubr.msk.f32.mxu0 %vm243_vm0, %v439_v35 }
  0x3e   : > { %661 = vmatprep.mubr.msk.f32.mxu1 %vm243_vm0, %v443_v37 }
  0x3f   : > { %740 = vmatpush1.bf16.msra.mxu0 %v739_v36 }
  0x40   : > { %779 = vmatpush1.bf16.msra.mxu1 %v739_v36  ;;  %741 = vmatprep.subr.bf16.mxu0 %v808_v3 }
  0x41   : > { %768 = vmatprep.subr.bf16.mxu1 %v808_v3 }
  0x43   : > { %743 = vmatpush1.bf16.msra.mxu0 %v742_v39 }
  0x44   : > { %780 = vmatpush1.bf16.msra.mxu1 %v742_v39  ;;  %744 = vmatprep.subr.bf16.mxu0 %v808_v3 }
  0x45   : > { %769 = vmatprep.subr.bf16.mxu1 %v808_v3 }
  0x47   : > { %746 = vmatpush1.bf16.msra.mxu0 %v745_v42 }
  0x48   : > { %781 = vmatpush1.bf16.msra.mxu1 %v745_v42  ;;  %747 = vmatprep.subr.bf16.mxu0 %v808_v3 }
  0x49   : > { %770 = vmatprep.subr.bf16.mxu1 %v808_v3 }
  0x4b   : > { %749 = vmatpush1.bf16.msra.mxu0 %v748_v45 }
  0x4c   : > { %782 = vmatpush1.bf16.msra.mxu1 %v748_v45  ;;  %750 = vmatprep.subr.bf16.mxu0 %v808_v3 }
  0x4d   : > { %771 = vmatprep.subr.bf16.mxu1 %v808_v3 }
  0x4f   : > { %752 = vmatpush1.bf16.msra.mxu0 %v751_v48 }
  0x50   : > { %783 = vmatpush1.bf16.msra.mxu1 %v751_v48  ;;  %753 = vmatprep.subr.bf16.mxu0 %v808_v3 }
  0x51   : > { %772 = vmatprep.subr.bf16.mxu1 %v808_v3 }
  0x53   : > { %755 = vmatpush1.bf16.msra.mxu0 %v754_v51 }
  0x54   : > { %784 = vmatpush1.bf16.msra.mxu1 %v754_v51  ;;  %756 = vmatprep.subr.bf16.mxu0 %v808_v3 }
  0x55   : > { %773 = vmatprep.subr.bf16.mxu1 %v808_v3 }
  0x57   : > { %758 = vmatpush1.bf16.msra.mxu0 %v757_v54 }
  0x58   : > { %785 = vmatpush1.bf16.msra.mxu1 %v757_v54  ;;  %759 = vmatprep.subr.bf16.mxu0 %v808_v3 }
  0x59   : > { %774 = vmatprep.subr.bf16.mxu1 %v808_v3 }
  0x5b   : > { %761 = vmatpush1.bf16.msra.mxu0 %v760_v57 }
  0x5c   : > { %786 = vmatpush1.bf16.msra.mxu1 %v760_v57  ;;  %762 = vmatprep.subr.bf16.mxu0 %v808_v3 }
  0x5d   : > { %775 = vmatprep.subr.bf16.mxu1 %v808_v3  ;;  %v441_v3 = vsel %vm433_vm3, %v435_v62, %v440_v63 }
  0x5f   : > { %764 = vmatpush1.bf16.msra.mxu0 %v763_v60 }
  0x60   : > { %787 = vmatpush1.bf16.msra.mxu1 %v763_v60  ;;  %497 = vmatprep.subr.mxu0 %v809_v17 }
  0x61   : > { %776 = vmatprep.subr.mxu1 %v809_v17 }
  0x63   : > { %659 = vmatpush1.msk.msra.mxu0 %vm248_vm2, %v658_v0 }
  0x64   : > { %788 = vmatpush1.msk.msra.mxu1 %vm248_vm2, %v658_v0  ;;  %518 = vmatmul.mubr.f32.vlgmr.msra.gmra.mrb[4].mxu0 %v436_v1 }
  0x65   : > { %523 = vmatmul.mubr.f32.vlgmr.msra.gmra.mrb[4].mxu1 %v441_v3 }
 0x108   : > { %v318_v2 = vpop.f32.mrb[0].mxu0 }
 0x109   : > { %v400_v4 = vpop.f32.mrb[0].mxu1  ;;  %v320_v5 = vpop.f32.mrb[1].mxu0 }
 0x10a   : > { %v401_v6 = vadd.f32 %v400_v4, %v318_v2  ;;  %v402_v7 = vpop.f32.mrb[1].mxu1 }
 0x10d   : > { %v323_v8 = vpop.f32.mrb[2].mxu0 }
 0x10e   : > { %v405_v9 = vpop.f32.mrb[2].mxu1  ;;  %v325_v10 = vpop.f32.mrb[3].mxu0 }
 0x10f   : > { %v406_v11 = vadd.f32 %v405_v9, %v323_v8  ;;  %v407_v12 = vpop.f32.mrb[3].mxu1 }
 0x137   : > { %v519_v13 = vpop.f32.mrb[4].mxu0 }
 0x138   : > { %v528_v15 = vadd.f32 %v519_v13, %v401_v6  ;;  %v524_v16 = vpop.f32.mrb[4].mxu1  ;;  %v521_v17 = vpop.f32.mrb[5].mxu0 }
 0x139   : > { %v529_v18 = vadd.f32 %v524_v16, %v406_v11  ;;  %v526_v19 = vpop.f32.mrb[5].mxu1 }
 0x13a   : > { %v537_v20 = vadd.f32 %v662_v14, %v528_v15 }
 0x13b   : > { %v538_v21 = vadd.f32 %v662_v14, %v529_v18 }
 0x13c   : > { %v539_v22 = vmax.f32 %v537_v20, 0.0 }
 0x13d   : > { %v540_v23 = vmax.f32 %v538_v21, 0.0 }
 0x13e   : > { %542 = vst.msk [vmem:[%s170_s11] sm:$0xff] %vm541_vm4, %v539_v22 }
 0x13f   : > { %543 = vst.msk [vmem:[%s170_s11 + $0x8] sm:$0xff] %vm541_vm4, %v540_v23 }
 0x140 PF: > { %s13_s12 = sadd.s32 1, %s806_s12  }
 0x141   : > { %p10_p4 = scmp.ge.s32.totalorder %s13_s12, 4  }
 0x143   :  { %12 = sbr.rel (!%p10_p4) target bundleno = 1 (0x1), region = 64 }

// kernel: _lambda_.24
= control target key start
LH: loop header
LB: loop body
LE: loop exit
PB: predicated region body
PF: predicated region fallthrough
CT: control target
= control target key end

     0   :  { %s748_s12 = smov 0   ;;  %s863_s0 = inlined_call_operand.vmem [shape: f32[2,1,18,72], index: 0, kind: input, shape index: {}]   ;;  %s864_s1 = inlined_call_operand.vmem [shape: f32[3,72,64], index: 1, kind: input, shape index: {}]   ;;  %s865_s2 = inlined_call_operand.vmem [shape: f32[1,64], index: 2, kind: input, shape index: {}]   ;;  %s866_s3 = inlined_call_operand.vmem [shape: f32[2,16,64], index: 3, kind: output, shape index: {}]  }
   0x1 LB: > { %s527_s13 = sadd.s32 4294967295, %s726_s12   ;;  %p531_p0 = scmp.ge.s32.totalorder %s726_s12, 1  ;;  %s726_s12 = sphi %s748_s12, %s13_s12  }
   0x2   : > { %p137_p1 = scmp.lt.s32.totalorder %s726_s12, 3 }
   0x4   : > { %p138_p2 = pnand %p531_p0, %p137_p1 }
   0x5   : > { %v174_v0 = vld [vmem:[%s864_s1] sm:$0xff] (!%p138_p2)  ;;  %v175_v1 = vld [vmem:[%s864_s1 + $0x8] sm:$0xff] (!%p138_p2)  ;;  %v176_v2 = vld [vmem:[%s864_s1 + $0x10] sm:$0xff] (!%p138_p2)  ;;  %p161_p3 = scmp.lt.s32.totalorder (!%p138_p2), %s527_s13, 1  ;;  %vm202_vm0 = vcmask (!%p138_p2), 588800   ;;  %vm196_vm1 = vcmask (!%p138_p2), 1046528  }
   0x6   : > { %141 = sbr.rel (%p138_p2) target bundleno = 264 (0x108), region = 32  ;;  %v675_v3 = vpack.c.bf16 (!%p138_p2), %v175_v1, %v174_v0  ;;  %v177_v4 = vld [vmem:[%s864_s1 + $0x18] sm:$0xff] (!%p138_p2)  ;;  %v178_v6 = vld [vmem:[%s864_s1 + $0x20] sm:$0xff] (!%p138_p2)  ;;  %v179_v7 = vld [vmem:[%s864_s1 + $0x28] sm:$0xff] (!%p138_p2)  ;;  %vm371_vm2 = vcmask (!%p138_p2), 1045504   ;;  %vm469_vm3 = vcmask (!%p138_p2), 523264  }
   0x7   : > { %v679_v5 = vpack.c.bf16 (!%p138_p2), %v177_v4, %v176_v2  ;;  %v535_v8 = vld [vmem:[%s864_s1 + $0x48] sm:$0xff] (!%p138_p2)  ;;  %v536_v9 = vld [vmem:[%s864_s1 + $0x50] sm:$0xff] (!%p138_p2)  ;;  %v537_v11 = vld [vmem:[%s864_s1 + $0x58] sm:$0xff] (!%p138_p2)  ;;  %v683_v13 = vpack.c.bf16 (!%p138_p2), %v179_v7, %v178_v6 }
   0x8   : > { %676 = vmatprep.subr.bf16.mxu0 (!%p138_p2), %v675_v3  ;;  %v659_v10 = vpack.c.bf16 (!%p138_p2), %v536_v9, %v535_v8  ;;  %v538_v12 = vld [vmem:[%s864_s1 + $0x60] sm:$0xff] (!%p138_p2)  ;;  %v539_v15 = vld [vmem:[%s864_s1 + $0x68] sm:$0xff] (!%p138_p2)  ;;  %v180_v16 = vld [vmem:[%s864_s1 + $0x30] sm:$0xff] (!%p138_p2) }
   0x9   : > { %678 = vmatpush3.bf16.msra.mxu0 (!%p138_p2), %v675_v3  ;;  %v663_v14 = vpack.c.bf16 (!%p138_p2), %v538_v12, %v537_v11  ;;  %v181_v17 = vld [vmem:[%s864_s1 + $0x38] sm:$0xff] (!%p138_p2)  ;;  %v540_v18 = vld [vmem:[%s864_s1 + $0x70] sm:$0xff] (!%p138_p2)  ;;  %v542_v25 = vld [vmem:[%s864_s1 + $0x80] sm:$0xff] (!%p138_p2) }
   0xa   : > { %680 = vmatprep.subr.bf16.mxu0 (!%p138_p2), %v679_v5  ;;  %660 = vmatprep.subr.bf16.mxu1 (!%p138_p2), %v659_v10  ;;  %v667_v22 = vpack.c.bf16 (!%p138_p2), %v540_v18, %v539_v15  ;;  %v687_v23 = vpack.c.bf16 (!%p138_p2), %v181_v17, %v180_v16  ;;  %v541_v24 = vld [vmem:[%s864_s1 + $0x78] sm:$0xff] (!%p138_p2)  ;;  %v182_v29 = vld [vmem:[%s864_s1 + $0x40] sm:$0xff] (!%p138_p2)  ;;  %v548_v31 = vld [vmem:[%s864_s1 + $0x90] sm:$0xff] (!%p138_p2) }
   0xb   : > { %662 = vmatpush3.bf16.msra.mxu1 (!%p138_p2), %v659_v10  ;;  %v671_v28 = vpack.c.bf16 (!%p138_p2), %v542_v25, %v541_v24  ;;  %v549_v32 = vld [vmem:[%s864_s1 + $0x98] sm:$0xff] (!%p138_p2)  ;;  %v550_v35 = vld [vmem:[%s864_s1 + $0xa0] sm:$0xff] (!%p138_p2)  ;;  %v551_v36 = vld [vmem:[%s864_s1 + $0xa8] sm:$0xff] (!%p138_p2) }
   0xc   : > { %664 = vmatprep.subr.bf16.mxu1 (!%p138_p2), %v663_v14  ;;  %v691_v38 = vpack.c.bf16 (!%p138_p2), %v549_v32, %v548_v31  ;;  %v543_v39 = vld [vmem:[%s864_s1 + $0x88] sm:$0xff] (!%p138_p2)  ;;  %v695_v40 = vpack.c.bf16 (!%p138_p2), %v551_v36, %v550_v35  ;;  %v552_v42 = vld [vmem:[%s864_s1 + $0xb0] sm:$0xff] (!%p138_p2)  ;;  %v553_v43 = vld [vmem:[%s864_s1 + $0xb8] sm:$0xff] (!%p138_p2) }
   0xd   : > { %s868_s13 = smov (!%p161_p3, %s527_s13), 1  ;;  %682 = vmatpush3.bf16.msra.mxu0 %v679_v5  ;;  %v699_v45 = vpack.c.bf16 %v553_v43, %v552_v42  ;;  %v554_v46 = vld [vmem:[%s864_s1 + $0xc0] sm:$0xff]  ;;  %v555_v47 = vld [vmem:[%s864_s1 + $0xc8] sm:$0xff]  ;;  %v556_v50 = vld [vmem:[%s864_s1 + $0xd0] sm:$0xff] }
   0xe   : > { %s711_s30 = smul.u32 24, %s868_s13  ;;  %684 = vmatprep.subr.bf16.mxu0 %v683_v13  ;;  %v703_v48 = vpack.c.bf16 %v555_v47, %v554_v46  ;;  %v559_v55 = vld [vmem:[%s865_s2] ss:$0 sm:$0xff]  ;;  %s562_s24 = sshll.u32 %s868_s13, 4 }
   0xf   : > { %666 = vmatpush3.bf16.msra.mxu1 %v663_v14  ;;  %s170_s27 = scalar_lea.vmem %s866_s3, %s562_s24 }
  0x10   : > { %s165_s18 = scalar_lea.vmem %s863_s0, %s711_s30  ;;  %668 = vmatprep.subr.bf16.mxu1 %v667_v22 }
  0x11   : > { %v171_v19 = vld [vmem:[%s165_s18] sm:$0xff]  ;;  %v172_v21 = vld [vmem:[%s165_s18 + $0x8] sm:$0xff]  ;;  %686 = vmatpush3.bf16.msra.mxu0 %v683_v13  ;;  %v173_v30 = vld [vmem:[%s165_s18 + $0x10] sm:$0x3] }
  0x12   : > { %v197_v20 = vrot.slane %v171_v19, 1  ;;  %635 = vmatprep.mubr.msk.f32.mxu0 %vm202_vm0, %v171_v19  ;;  %v198_v26 = vrot.slane %v172_v21, 1  ;;  %688 = vmatprep.subr.bf16.mxu0 %v687_v23  ;;  %v372_v33 = vrot.slane %v171_v19, 2  ;;  %v373_v34 = vrot.slane %v172_v21, 2 }
  0x13   : > { %670 = vmatpush3.bf16.msra.mxu1 %v667_v22  ;;  %v200_v37 = vrot.slane %v173_v30, 1  ;;  %v375_v49 = vrot.slane %v173_v30, 2 }
  0x14   : > { %v199_v27 = vsel %vm196_vm1, %v197_v20, %v198_v26  ;;  %672 = vmatprep.subr.bf16.mxu1 %v671_v28  ;;  %v374_v41 = vsel %vm371_vm2, %v372_v33, %v373_v34 }
  0x15   : > { %614 = vmatprep.mubr.msk.f32.mxu1 %vm202_vm0, %v199_v27  ;;  %690 = vmatpush3.bf16.msra.mxu0 %v687_v23  ;;  %v201_v44 = vsel %vm196_vm1, %v198_v26, %v200_v37  ;;  %v376_v51 = vsel %vm371_vm2, %v373_v34, %v375_v49 }
  0x16   : > { %633 = vmatprep.subr.mxu0 %v182_v29 }
  0x17   : > { %674 = vmatpush3.bf16.msra.mxu1 %v671_v28 }
  0x18   : > { %612 = vmatprep.subr.mxu1 %v543_v39 }
  0x19   : > { %634 = vmatpush3.msra.mxu0 %v182_v29 }
  0x1a   : > { %692 = vmatprep.subr.bf16.mxu0 %v691_v38  ;;  %636 = vmatmul.mubr.msk.f32.vlgmr.msra.gmra.mrb[0].mxu0 %vm202_vm0, %v172_v21 }
  0x1b   : > { %694 = vmatpush3.bf16.msra.mxu0 %v691_v38  ;;  %656 = vmatprep.mubr.msk.f32.mxu0 %vm202_vm0, %v374_v41 }
  0x1c   : > { %696 = vmatprep.subr.bf16.mxu0 %v695_v40  ;;  %613 = vmatpush3.msra.mxu1 %v543_v39 }
  0x1d   : > { %615 = vmatmul.mubr.msk.f32.vlgmr.msra.gmra.mrb[0].mxu1 %vm202_vm0, %v201_v44 }
  0x1f   : > { %698 = vmatpush3.bf16.msra.mxu0 %v695_v40 }
  0x20   : > { %700 = vmatprep.subr.bf16.mxu0 %v699_v45 }
  0x23   : > { %702 = vmatpush3.bf16.msra.mxu0 %v699_v45 }
  0x24   : > { %704 = vmatprep.subr.bf16.mxu0 %v703_v48 }
  0x27   : > { %706 = vmatpush3.bf16.msra.mxu0 %v703_v48 }
  0x28   : > { %654 = vmatprep.subr.mxu0 %v556_v50 }
  0x2b   : > { %655 = vmatpush3.msra.mxu0 %v556_v50 }
  0x2c   : > { %657 = vmatmul.mubr.msk.f32.vlgmr.msra.gmra.mrb[0].mxu0 %vm202_vm0, %v376_v51 }
  0xf0   : > { %v616_v52 = vpop.f32.mrb[0].mxu1 }
  0xf1   : > { %v273_v53 = vpop.f32.mrb[1].mxu1 }
  0xff   : > { %v658_v54 = vpop.f32.mrb[0].mxu0 }
 0x100   : > { %v707_v56 = vadd.f32 %v658_v54, %v616_v52  ;;  %v447_v57 = vpop.f32.mrb[1].mxu0 }
 0x101   : > { %v708_v58 = vadd.f32 %v447_v57, %v273_v53 }
 0x102   : > { %v466_v59 = vadd.f32 %v707_v56, %v559_v55 }
 0x103   : > { %v465_v60 = vadd.f32 %v708_v58, %v559_v55 }
 0x104   : > { %v468_v61 = vmax.f32 %v466_v59, 0.0 }
 0x105   : > { %v467_v62 = vmax.f32 %v465_v60, 0.0 }
 0x106   : > { %471 = vst.msk [vmem:[%s170_s27 + $0x8] sm:$0xff] %vm469_vm3, %v468_v61 }
 0x107   : > { %470 = vst.msk [vmem:[%s170_s27] sm:$0xff] %vm469_vm3, %v467_v62 }
 0x108 PF: > { %s13_s12 = sadd.s32 1, %s726_s12  }
 0x109   : > { %p10_p4 = scmp.ge.s32.totalorder %s13_s12, 4  }
 0x10b   :  { %12 = sbr.rel (!%p10_p4) target bundleno = 1 (0x1), region = 64 }

// kernel: _lambda_.25
= control target key start
LH: loop header
LB: loop body
LE: loop exit
PB: predicated region body
PF: predicated region fallthrough
CT: control target
= control target key end

     0   :  { %s834_s12 = smov 0   ;;  %s1143_s0 = inlined_call_operand.vmem [shape: f32[2,1,34,136], index: 0, kind: input, shape index: {}]   ;;  %s1144_s1 = inlined_call_operand.vmem [shape: f32[3,136,64], index: 1, kind: input, shape index: {}]   ;;  %s1145_s2 = inlined_call_operand.vmem [shape: f32[1,64], index: 2, kind: input, shape index: {}]   ;;  %s1146_s3 = inlined_call_operand.vmem [shape: f32[2,32,64], index: 3, kind: output, shape index: {}]  }
   0x1 LB: > { %s645_s13 = sadd.s32 4294967295, %s810_s12   ;;  %p649_p0 = scmp.ge.s32.totalorder %s810_s12, 1  ;;  %s810_s12 = sphi %s834_s12, %s13_s12  }
   0x2   : > { %p137_p1 = scmp.lt.s32.totalorder %s810_s12, 3 }
   0x4   : > { %p138_p2 = pnand %p649_p0, %p137_p1 }
   0x5   : > { %v653_v0 = vld [vmem:[%s1144_s1 + $0x88] sm:$0xff] (!%p138_p2)  ;;  %v654_v1 = vld [vmem:[%s1144_s1 + $0x90] sm:$0xff] (!%p138_p2)  ;;  %v181_v2 = vld [vmem:[%s1144_s1] sm:$0xff] (!%p138_p2)  ;;  %p161_p3 = scmp.lt.s32.totalorder (!%p138_p2), %s645_s13, 1  ;;  %v812_v3 = vmov (!%p138_p2), 0.0|0.0   ;;  %vm249_vm0 = vcmask (!%p138_p2), 64512  }
   0x6   : > { %141 = sbr.rel (%p138_p2) target bundleno = 298 (0x12a), region = 32  ;;  %703 = vmatprep.subr.bf16.mxu0 (!%p138_p2), %v812_v3  ;;  %727 = vmatprep.subr.bf16.mxu1 (!%p138_p2), %v812_v3  ;;  %v704_v4 = vpack.c.bf16 (!%p138_p2), %v654_v1, %v653_v0  ;;  %v182_v5 = vld [vmem:[%s1144_s1 + $0x8] sm:$0xff] (!%p138_p2)  ;;  %v655_v6 = vld [vmem:[%s1144_s1 + $0x98] sm:$0xff] (!%p138_p2)  ;;  %v656_v7 = vld [vmem:[%s1144_s1 + $0xa0] sm:$0xff] (!%p138_p2)  ;;  %vm226_vm1 = vcmask (!%p138_p2), 1046528   ;;  %v813_v62 = vmov (!%p138_p2), 0.0  }
   0x7   : > { %v728_v8 = vpack.c.bf16 (!%p138_p2), %v182_v5, %v181_v2  ;;  %v183_v9 = vld [vmem:[%s1144_s1 + $0x10] sm:$0xff] (!%p138_p2)  ;;  %v184_v10 = vld [vmem:[%s1144_s1 + $0x18] sm:$0xff] (!%p138_p2)  ;;  %v707_v11 = vpack.c.bf16 (!%p138_p2), %v656_v7, %v655_v6  ;;  %v657_v13 = vld [vmem:[%s1144_s1 + $0xa8] sm:$0xff] (!%p138_p2)  ;;  %vm454_vm2 = vcmask (!%p138_p2), 1045504   ;;  %vm585_vm3 = vcmask (!%p138_p2), 523264  }
   0x8   : > { %705 = vmatpush1.bf16.msra.mxu0 (!%p138_p2), %v704_v4  ;;  %v731_v12 = vpack.c.bf16 (!%p138_p2), %v184_v10, %v183_v9  ;;  %v658_v14 = vld [vmem:[%s1144_s1 + $0xb0] sm:$0xff] (!%p138_p2)  ;;  %v185_v15 = vld [vmem:[%s1144_s1 + $0x20] sm:$0xff] (!%p138_p2)  ;;  %v186_v16 = vld [vmem:[%s1144_s1 + $0x28] sm:$0xff] (!%p138_p2) }
   0x9   : > { %729 = vmatpush1.bf16.msra.mxu1 (!%p138_p2), %v728_v8  ;;  %706 = vmatprep.subr.bf16.mxu0 (!%p138_p2), %v812_v3  ;;  %v710_v17 = vpack.c.bf16 (!%p138_p2), %v658_v14, %v657_v13  ;;  %v734_v18 = vpack.c.bf16 (!%p138_p2), %v186_v16, %v185_v15  ;;  %v659_v19 = vld [vmem:[%s1144_s1 + $0xb8] sm:$0xff] (!%p138_p2)  ;;  %v660_v20 = vld [vmem:[%s1144_s1 + $0xc0] sm:$0xff] (!%p138_p2)  ;;  %v187_v21 = vld [vmem:[%s1144_s1 + $0x30] sm:$0xff] (!%p138_p2) }
   0xa   : > { %730 = vmatprep.subr.bf16.mxu1 (!%p138_p2), %v812_v3  ;;  %v188_v22 = vld [vmem:[%s1144_s1 + $0x38] sm:$0xff] (!%p138_p2)  ;;  %v713_v23 = vpack.c.bf16 (!%p138_p2), %v660_v20, %v659_v19  ;;  %v661_v27 = vld [vmem:[%s1144_s1 + $0xc8] sm:$0xff] (!%p138_p2)  ;;  %v662_v28 = vld [vmem:[%s1144_s1 + $0xd0] sm:$0xff] (!%p138_p2) }
   0xb   : > { %v737_v26 = vpack.c.bf16 (!%p138_p2), %v188_v22, %v187_v21  ;;  %v189_v31 = vld [vmem:[%s1144_s1 + $0x40] sm:$0xff] (!%p138_p2)  ;;  %v190_v32 = vld [vmem:[%s1144_s1 + $0x48] sm:$0xff] (!%p138_p2)  ;;  %v716_v34 = vpack.c.bf16 (!%p138_p2), %v662_v28, %v661_v27  ;;  %v663_v36 = vld [vmem:[%s1144_s1 + $0xd8] sm:$0xff] (!%p138_p2) }
   0xc   : > { %708 = vmatpush1.bf16.msra.mxu0 (!%p138_p2), %v707_v11  ;;  %v740_v35 = vpack.c.bf16 (!%p138_p2), %v190_v32, %v189_v31  ;;  %v664_v37 = vld [vmem:[%s1144_s1 + $0xe0] sm:$0xff] (!%p138_p2)  ;;  %v191_v38 = vld [vmem:[%s1144_s1 + $0x50] sm:$0xff] (!%p138_p2)  ;;  %v192_v39 = vld [vmem:[%s1144_s1 + $0x58] sm:$0xff] (!%p138_p2) }
   0xd   : > { %s1148_s13 = smov (!%p161_p3, %s645_s13), 1  ;;  %732 = vmatpush1.bf16.msra.mxu1 %v731_v12  ;;  %709 = vmatprep.subr.bf16.mxu0 %v812_v3  ;;  %v719_v40 = vpack.c.bf16 %v664_v37, %v663_v36  ;;  %v743_v41 = vpack.c.bf16 %v192_v39, %v191_v38  ;;  %v665_v42 = vld [vmem:[%s1144_s1 + $0xe8] sm:$0xff]  ;;  %v666_v43 = vld [vmem:[%s1144_s1 + $0xf0] sm:$0xff]  ;;  %v193_v44 = vld [vmem:[%s1144_s1 + $0x60] sm:$0xff] }
   0xe   : > { %s793_s7 = smul.u32 80, %s1148_s13  ;;  %733 = vmatprep.subr.bf16.mxu1 %v812_v3  ;;  %v194_v45 = vld [vmem:[%s1144_s1 + $0x68] sm:$0xff]  ;;  %v722_v46 = vpack.c.bf16 %v666_v43, %v665_v42  ;;  %v667_v48 = vld [vmem:[%s1144_s1 + $0xf8] sm:$0xff]  ;;  %v668_v49 = vld [vmem:[%s1144_s1 + $0x100] sm:$0xff]  ;;  %s702_s22 = sshll.u32 %s1148_s13, 5 }
   0xf   : > { %v746_v47 = vpack.c.bf16 %v194_v45, %v193_v44  ;;  %v195_v50 = vld [vmem:[%s1144_s1 + $0x70] sm:$0xff]  ;;  %v196_v51 = vld [vmem:[%s1144_s1 + $0x78] sm:$0xff]  ;;  %v725_v54 = vpack.c.bf16 %v668_v49, %v667_v48  ;;  %v669_v63 = vld [vmem:[%s1144_s1 + $0x108] sm:$0xff]  ;;  %s170_s26 = scalar_lea.vmem %s1146_s3, %s702_s22 }
  0x10   : > { %s895_s20 = scalar_lea.vmem %s1143_s0, %s793_s7  ;;  %711 = vmatpush1.bf16.msra.mxu0 %v710_v17  ;;  %v749_v55 = vpack.c.bf16 %v196_v51, %v195_v50  ;;  %v678_v59 = vld [vmem:[%s1144_s1 + $0x110] sm:$0xff]  ;;  %v679_v60 = vld [vmem:[%s1144_s1 + $0x118] sm:$0xff]  ;;  %v197_v0 = vld [vmem:[%s1144_s1 + $0x80] sm:$0xff] }
  0x11   : > { %v905_v24 = vld [vmem:[%s895_s20 + $0x8] sm:$0xff]  ;;  %v908_v25 = vld [vmem:[%s895_s20 + $0x18] sm:$0xff]  ;;  %735 = vmatpush1.bf16.msra.mxu1 %v734_v18  ;;  %712 = vmatprep.subr.bf16.mxu0 %v812_v3  ;;  %v975_v52 = vld [vmem:[%s895_s20] sm:$0xff]  ;;  %v752_v4 = vpack.c.bf16 %v679_v60, %v678_v59 }
  0x12   : > { %v230_v29 = vrot.slane %v905_v24, 1  ;;  %v231_v30 = vrot.slane %v908_v25, 1  ;;  %736 = vmatprep.subr.bf16.mxu1 %v812_v3  ;;  %674 = vmatprep.mubr.msk.f32.mxu1 %vm249_vm0, %v905_v24  ;;  %v978_v53 = vld [vmem:[%s895_s20 + $0x10] sm:$0xff]  ;;  %v227_v56 = vrot.slane %v975_v52, 1  ;;  %v985_v58 = vld [vmem:[%s895_s20 + $0x28] sm:$0xff]  ;;  %v994_v61 = vld [vmem:[%s895_s20 + $0x20] sm:$0xff] }
  0x13   : > { %v228_v57 = vrot.slane %v978_v53, 1  ;;  %v235_v2 = vrot.slane %v985_v58, 1  ;;  %v233_v5 = vrot.slane %v994_v61, 1  ;;  %v1008_v6 = vld [vmem:[%s895_s20 + $0x38] sm:$0xff]  ;;  %v680_v7 = vld [vmem:[%s1144_s1 + $0x120] sm:$0xff]  ;;  %v681_v8 = vld [vmem:[%s1144_s1 + $0x128] sm:$0xff] }
  0x14   : > { %v232_v33 = vsel %vm226_vm1, %v230_v29, %v231_v30  ;;  %714 = vmatpush1.bf16.msra.mxu0 %v713_v23  ;;  %v1017_v9 = vld [vmem:[%s895_s20 + $0x30] sm:$0xff]  ;;  %v239_v11 = vrot.slane %v1008_v6, 1  ;;  %v755_v12 = vpack.c.bf16 %v681_v8, %v680_v7  ;;  %v1029_v15 = vld [vmem:[%s895_s20 + $0x48] sm:$0x3]  ;;  %v683_v17 = vld [vmem:[%s1144_s1 + $0x138] sm:$0xff]  ;;  %v458_v29 = vrot.slane %v905_v24, 2 }
  0x15   : > { %670 = vmatprep.mubr.msk.f32.mxu0 %vm249_vm0, %v232_v33  ;;  %738 = vmatpush1.bf16.msra.mxu1 %v737_v26  ;;  %v229_v1 = vsel %vm226_vm1, %v227_v56, %v228_v57  ;;  %v236_v10 = vsel %vm226_vm1, %v231_v30, %v235_v2  ;;  %v234_v13 = vsel %vm226_vm1, %v228_v57, %v233_v5  ;;  %v237_v14 = vrot.slane %v1017_v9, 1  ;;  %v682_v16 = vld [vmem:[%s1144_s1 + $0x130] sm:$0xff]  ;;  %v1039_v18 = vld [vmem:[%s895_s20 + $0x40] sm:$0x3]  ;;  %v685_v27 = vld [vmem:[%s1144_s1 + $0x148] sm:$0xff] }
  0x16   : > { %715 = vmatprep.subr.bf16.mxu0 %v812_v3  ;;  %739 = vmatprep.subr.bf16.mxu1 %v812_v3  ;;  %v240_v19 = vsel %vm226_vm1, %v235_v2, %v239_v11  ;;  %v243_v20 = vrot.slane %v1029_v15, 1  ;;  %v758_v21 = vpack.c.bf16 %v683_v17, %v682_v16  ;;  %v241_v23 = vrot.slane %v1039_v18, 1  ;;  %v684_v26 = vld [vmem:[%s1144_s1 + $0x140] sm:$0xff]  ;;  %v687_v24 = vld [vmem:[%s1144_s1 + $0x158] sm:$0xff]  ;;  %v689_v39 = vld [vmem:[%s1144_s1 + $0x168] sm:$0xff] }
  0x17   : > { %v238_v22 = vsel %vm226_vm1, %v233_v5, %v237_v14  ;;  %v459_v30 = vrot.slane %v908_v25, 2  ;;  %v761_v31 = vpack.c.bf16 %v685_v27, %v684_v26  ;;  %v463_v33 = vrot.slane %v985_v58, 2  ;;  %v688_v38 = vld [vmem:[%s1144_s1 + $0x160] sm:$0xff]  ;;  %v691_v42 = vld [vmem:[%s1144_s1 + $0x178] sm:$0xff]  ;;  %v693_v45 = vld [vmem:[%s1144_s1 + $0x188] sm:$0xff] }
  0x18   : > { %717 = vmatpush1.bf16.msra.mxu0 %v716_v34  ;;  %v244_v28 = vsel %vm226_vm1, %v239_v11, %v243_v20  ;;  %v242_v32 = vsel %vm226_vm1, %v237_v14, %v241_v23  ;;  %v467_v34 = vrot.slane %v1008_v6, 2  ;;  %v692_v44 = vld [vmem:[%s1144_s1 + $0x180] sm:$0xff]  ;;  %v456_v48 = vrot.slane %v978_v53, 2 }
  0x19   : > { %741 = vmatpush1.bf16.msra.mxu1 %v740_v35  ;;  %718 = vmatprep.subr.bf16.mxu0 %v812_v3  ;;  %v686_v35 = vld [vmem:[%s1144_s1 + $0x150] sm:$0xff]  ;;  %v461_v49 = vrot.slane %v994_v61, 2  ;;  %v465_v50 = vrot.slane %v1017_v9, 2  ;;  %v471_v51 = vrot.slane %v1029_v15, 2  ;;  %v699_v17 = vld [vmem:[%s1145_s2] ss:$0 sm:$0xff] }
  0x1a   : > { %742 = vmatprep.subr.bf16.mxu1 %v812_v3  ;;  %v764_v36 = vpack.c.bf16 %v687_v24, %v686_v35  ;;  %v468_v37 = vsel %vm454_vm2, %v463_v33, %v467_v34 }
  0x1b   : > { %v472_v56 = vsel %vm454_vm2, %v467_v34, %v471_v51  ;;  %v462_v57 = vsel %vm454_vm2, %v456_v48, %v461_v49 }
  0x1c   : > { %720 = vmatpush1.bf16.msra.mxu0 %v719_v40  ;;  %v767_v40 = vpack.c.bf16 %v689_v39, %v688_v38 }
  0x1d   : > { %744 = vmatpush1.bf16.msra.mxu1 %v743_v41  ;;  %721 = vmatprep.subr.bf16.mxu0 %v812_v3  ;;  %v690_v41 = vld [vmem:[%s1144_s1 + $0x170] sm:$0xff] }
  0x1e   : > { %745 = vmatprep.subr.bf16.mxu1 %v812_v3  ;;  %v770_v43 = vpack.c.bf16 %v691_v42, %v690_v41 }
  0x20   : > { %723 = vmatpush1.bf16.msra.mxu0 %v722_v46  ;;  %v773_v46 = vpack.c.bf16 %v693_v45, %v692_v44 }
  0x21   : > { %747 = vmatpush1.bf16.msra.mxu1 %v746_v47  ;;  %724 = vmatprep.subr.bf16.mxu0 %v812_v3  ;;  %v455_v47 = vrot.slane %v975_v52, 2 }
  0x22   : > { %748 = vmatprep.subr.bf16.mxu1 %v812_v3 }
  0x24   : > { %726 = vmatpush1.bf16.msra.mxu0 %v725_v54  ;;  %v694_v54 = vld [vmem:[%s1144_s1 + $0x190] sm:$0xff] }
  0x25   : > { %750 = vmatpush1.bf16.msra.mxu1 %v749_v55  ;;  %290 = vmatprep.subr.mxu0 %v813_v62  ;;  %v469_v55 = vrot.slane %v1039_v18, 2 }
  0x26   : > { %383 = vmatprep.subr.mxu1 %v813_v62 }
  0x28   : > { %291 = vmatpush1.msra.mxu0 %v669_v63 }
  0x29   : > { %384 = vmatpush1.msra.mxu1 %v197_v0  ;;  %323 = vmatmul.mubr.f32.vlgmr.msra.gmra.mrb[0].mxu0 %v229_v1 }
  0x2a   : > { %416 = vmatmul.mubr.f32.vlgmr.msra.gmra.mrb[0].mxu1 %v975_v52  ;;  %751 = vmatprep.subr.bf16.mxu0 %v812_v3  ;;  %v466_v52 = vsel %vm454_vm2, %v461_v49, %v465_v50 }
  0x2b   : > { %775 = vmatprep.subr.bf16.mxu1 %v812_v3  ;;  %753 = vmatpush1.bf16.msra.mxu0 %v752_v4 }
  0x2c   : > { %784 = vmatpush1.bf16.msra.mxu1 %v752_v4  ;;  %754 = vmatprep.subr.bf16.mxu0 %v812_v3 }
  0x2d   : > { %776 = vmatprep.subr.bf16.mxu1 %v812_v3  ;;  %671 = vmatprep.mubr.msk.f32.mxu0 %vm249_vm0, %v236_v10 }
  0x2e   : > { %675 = vmatprep.mubr.msk.f32.mxu1 %vm249_vm0, %v908_v25  ;;  %328 = vmatmul.mubr.f32.gmra.mrb[2].mxu0 %v234_v13  ;;  %v460_v25 = vsel %vm454_vm2, %v458_v29, %v459_v30 }
  0x2f   : > { %756 = vmatpush1.bf16.msra.mxu0 %v755_v12  ;;  %421 = vmatmul.mubr.f32.gmra.mrb[2].mxu1 %v978_v53  ;;  %v464_v53 = vsel %vm454_vm2, %v459_v30, %v463_v33 }
  0x30   : > { %785 = vmatpush1.bf16.msra.mxu1 %v755_v12  ;;  %757 = vmatprep.subr.bf16.mxu0 %v812_v3 }
  0x31   : > { %777 = vmatprep.subr.bf16.mxu1 %v812_v3  ;;  %672 = vmatprep.mubr.msk.f32.mxu0 %vm249_vm0, %v240_v19 }
  0x32   : > { %676 = vmatprep.mubr.msk.f32.mxu1 %vm249_vm0, %v985_v58  ;;  %333 = vmatmul.mubr.f32.gmra.mrb[4].mxu0 %v238_v22  ;;  %v470_v58 = vsel %vm454_vm2, %v465_v50, %v469_v55 }
  0x33   : > { %759 = vmatpush1.bf16.msra.mxu0 %v758_v21  ;;  %426 = vmatmul.mubr.f32.gmra.mrb[4].mxu1 %v994_v61 }
  0x34   : > { %786 = vmatpush1.bf16.msra.mxu1 %v758_v21  ;;  %760 = vmatprep.subr.bf16.mxu0 %v812_v3 }
  0x35   : > { %778 = vmatprep.subr.bf16.mxu1 %v812_v3  ;;  %673 = vmatprep.mubr.msk.f32.mxu0 %vm249_vm0, %v244_v28 }
  0x36   : > { %677 = vmatprep.mubr.msk.f32.mxu1 %vm249_vm0, %v1008_v6  ;;  %338 = vmatmul.mubr.f32.gmra.mrb[6].mxu0 %v242_v32 }
  0x37   : > { %762 = vmatpush1.bf16.msra.mxu0 %v761_v31  ;;  %431 = vmatmul.mubr.f32.gmra.mrb[6].mxu1 %v1017_v9 }
  0x38   : > { %787 = vmatpush1.bf16.msra.mxu1 %v761_v31  ;;  %763 = vmatprep.subr.bf16.mxu0 %v812_v3 }
  0x39   : > { %779 = vmatprep.subr.bf16.mxu1 %v812_v3  ;;  %695 = vmatprep.mubr.msk.f32.mxu0 %vm249_vm0, %v460_v25 }
  0x3a   : > { %697 = vmatprep.mubr.msk.f32.mxu1 %vm249_vm0, %v468_v37 }
  0x3b   : > { %765 = vmatpush1.bf16.msra.mxu0 %v764_v36 }
  0x3c   : > { %788 = vmatpush1.bf16.msra.mxu1 %v764_v36  ;;  %766 = vmatprep.subr.bf16.mxu0 %v812_v3 }
  0x3d   : > { %780 = vmatprep.subr.bf16.mxu1 %v812_v3 }
  0x3f   : > { %768 = vmatpush1.bf16.msra.mxu0 %v767_v40 }
  0x40   : > { %789 = vmatpush1.bf16.msra.mxu1 %v767_v40  ;;  %769 = vmatprep.subr.bf16.mxu0 %v812_v3 }
  0x41   : > { %781 = vmatprep.subr.bf16.mxu1 %v812_v3 }
  0x43   : > { %771 = vmatpush1.bf16.msra.mxu0 %v770_v43 }
  0x44   : > { %790 = vmatpush1.bf16.msra.mxu1 %v770_v43  ;;  %772 = vmatprep.subr.bf16.mxu0 %v812_v3 }
  0x45   : > { %782 = vmatprep.subr.bf16.mxu1 %v812_v3  ;;  %v457_v3 = vsel %vm454_vm2, %v455_v47, %v456_v48 }
  0x47   : > { %774 = vmatpush1.bf16.msra.mxu0 %v773_v46 }
  0x48   : > { %791 = vmatpush1.bf16.msra.mxu1 %v773_v46  ;;  %517 = vmatprep.subr.mxu0 %v813_v62 }
  0x49   : > { %783 = vmatprep.subr.mxu1 %v813_v62 }
  0x4b   : > { %518 = vmatpush1.msra.mxu0 %v694_v54 }
  0x4c   : > { %792 = vmatpush1.msra.mxu1 %v694_v54  ;;  %550 = vmatmul.mubr.f32.vlgmr.msra.gmra.mrb[8].mxu0 %v457_v3 }
  0x4d   : > { %560 = vmatmul.mubr.f32.vlgmr.msra.gmra.mrb[8].mxu1 %v466_v52  ;;  %696 = vmatprep.mubr.msk.f32.mxu0 %vm249_vm0, %v464_v53 }
  0x4e   : > { %698 = vmatprep.mubr.msk.f32.mxu1 %vm249_vm0, %v472_v56 }
  0x50   : > { %555 = vmatmul.mubr.f32.gmra.mrb[10].mxu0 %v462_v57 }
  0x51   : > { %565 = vmatmul.mubr.f32.gmra.mrb[10].mxu1 %v470_v58 }
  0xfc   : > { %v324_v59 = vpop.f32.mrb[0].mxu0 }
  0xfd   : > { %v417_v60 = vpop.f32.mrb[0].mxu1  ;;  %v326_v61 = vpop.f32.mrb[1].mxu0 }
  0xfe   : > { %v418_v62 = vadd.f32 %v417_v60, %v324_v59  ;;  %v419_v63 = vpop.f32.mrb[1].mxu1 }
 0x101   : > { %v329_v0 = vpop.f32.mrb[2].mxu0 }
 0x102   : > { %v422_v1 = vpop.f32.mrb[2].mxu1  ;;  %v331_v2 = vpop.f32.mrb[3].mxu0 }
 0x103   : > { %v423_v4 = vadd.f32 %v422_v1, %v329_v0  ;;  %v424_v5 = vpop.f32.mrb[3].mxu1 }
 0x105   : > { %v334_v6 = vpop.f32.mrb[4].mxu0 }
 0x106   : > { %v427_v7 = vpop.f32.mrb[4].mxu1  ;;  %v336_v8 = vpop.f32.mrb[5].mxu0 }
 0x107   : > { %v428_v9 = vadd.f32 %v427_v7, %v334_v6  ;;  %v429_v10 = vpop.f32.mrb[5].mxu1 }
 0x109   : > { %v339_v11 = vpop.f32.mrb[6].mxu0 }
 0x10a   : > { %v432_v12 = vpop.f32.mrb[6].mxu1  ;;  %v341_v13 = vpop.f32.mrb[7].mxu0 }
 0x10b   : > { %v433_v14 = vadd.f32 %v432_v12, %v339_v11  ;;  %v434_v15 = vpop.f32.mrb[7].mxu1 }
 0x11f   : > { %v551_v16 = vpop.f32.mrb[8].mxu0 }
 0x120   : > { %v570_v18 = vadd.f32 %v551_v16, %v418_v62  ;;  %v561_v19 = vpop.f32.mrb[8].mxu1  ;;  %v553_v20 = vpop.f32.mrb[9].mxu0 }
 0x121   : > { %v572_v21 = vadd.f32 %v561_v19, %v428_v9  ;;  %v563_v22 = vpop.f32.mrb[9].mxu1 }
 0x122   : > { %v581_v23 = vadd.f32 %v699_v17, %v570_v18 }
 0x123   : > { %v583_v26 = vadd.f32 %v699_v17, %v572_v21  ;;  %v556_v27 = vpop.f32.mrb[10].mxu0 }
 0x124   : > { %586 = vst.msk [vmem:[%s170_s26] sm:$0xff] %vm585_vm3, %v581_v23  ;;  %v571_v28 = vadd.f32 %v556_v27, %v423_v4  ;;  %v566_v29 = vpop.f32.mrb[10].mxu1  ;;  %v558_v30 = vpop.f32.mrb[11].mxu0 }
 0x125   : > { %588 = vst.msk [vmem:[%s170_s26 + $0x10] sm:$0xff] %vm585_vm3, %v583_v26  ;;  %v573_v31 = vadd.f32 %v566_v29, %v433_v14  ;;  %v568_v32 = vpop.f32.mrb[11].mxu1 }
 0x126   : > { %v582_v33 = vadd.f32 %v699_v17, %v571_v28 }
 0x127   : > { %v584_v34 = vadd.f32 %v699_v17, %v573_v31 }
 0x128   : > { %587 = vst.msk [vmem:[%s170_s26 + $0x8] sm:$0xff] %vm585_vm3, %v582_v33 }
 0x129   : > { %589 = vst.msk [vmem:[%s170_s26 + $0x18] sm:$0xff] %vm585_vm3, %v584_v34 }
 0x12a PF: > { %s13_s12 = sadd.s32 1, %s810_s12  }
 0x12b   : > { %p10_p4 = scmp.ge.s32.totalorder %s13_s12, 4  }
 0x12d   :  { %12 = sbr.rel (!%p10_p4) target bundleno = 1 (0x1), region = 64 }

</bundles_post_ra>
